<compile_context>
chip_gen: v5e
topology: v5e:2x2
jax: 0.10.0
libtpu: 0.0.40
codegen_flags: <defaults>
</compile_context>

<pallas_src>
import functools

import numpy as np
import jax
import jax.numpy as jnp
from jax import lax
from jax.experimental import pallas as pl
from jax.experimental.pallas import tpu as pltpu

_LANES = 128                      # all channel / feature / class dims padded to this
_TAPS = tuple((oy, ox) for oy in (-1, 0, 1) for ox in (-1, 0, 1))


# ------------------------------ in-kernel helpers ------------------------------ #

def _conv3x3_accum(x_f32, w_ref, H, W):
    """3x3 'same' conv on one image.

    x_f32: (H*W, Cin) f32, rows in row-major (i*W + j) order, channels in lanes.
    w_ref: (9, Cin, Cout) bf16 VMEM ref (tap-major, PyTorch cross-correlation order).
    Returns (H*W, Cout) f32 accumulator.
    """
    R, cin = x_f32.shape
    cout = w_ref.shape[-1]
    shift_bits = W.bit_length() - 1            # W is a power of two
    ridx = lax.broadcasted_iota(jnp.int32, (R, cin), 0)
    ii = jnp.right_shift(ridx, shift_bits)     # row index i = r // W
    jj = jnp.bitwise_and(ridx, W - 1)          # col index j = r %  W

    acc = jnp.zeros((R, cout), jnp.float32)
    for t, (oy, ox) in enumerate(_TAPS):
        s = oy * W + ox
        # shifted[r] = x[r + s] (wrapped rows are masked out below).
        shifted = x_f32 if s == 0 else pltpu.roll(x_f32, shift=(-s) % R, axis=0)
        valid = (ii + oy >= 0) & (ii + oy < H) & (jj + ox >= 0) & (jj + ox < W)
        tap = jnp.where(valid, shifted, 0.0).astype(jnp.bfloat16)
        acc = acc + jnp.dot(tap, w_ref[t], preferred_element_type=jnp.float32)
    return acc


def _maxpool_sel(s_ref, a_f32):
    """2x2/stride-2 max pool via 4 selection matmuls (exact row gather on the MXU).

    s_ref: (4, R_out, R_in) bf16 selection matrices; a_f32: (R_in, C) f32.
    Returns (R_out, C) f32.
    """
    a_bf = a_f32.astype(jnp.bfloat16)
    p = jnp.dot(s_ref[0], a_bf, preferred_element_type=jnp.float32)
    for ab in range(1, 4):
        p = jnp.maximum(p, jnp.dot(s_ref[ab], a_bf, preferred_element_type=jnp.float32))
    return p


# --------------------------------- kernels ------------------------------------ #

def _backbone_kernel(x_ref, w1_ref, b1_ref, w2_ref, b2_ref, s1_ref, s2_ref, o_ref, *, hw):
    """Fused conv1+ReLU -> pool -> conv2+ReLU -> pool for ONE image (grid over batch)."""
    H = W = hw
    x = x_ref[...].astype(jnp.float32)                                   # (H*W, Cin)

    a1 = jnp.maximum(_conv3x3_accum(x, w1_ref, H, W) + b1_ref[...], 0.0)  # (H*W, 128)
    p1 = _maxpool_sel(s1_ref, a1)                                         # (H/2*W/2, 128)

    a2 = jnp.maximum(_conv3x3_accum(p1, w2_ref, H // 2, W // 2) + b2_ref[...], 0.0)
    p2 = _maxpool_sel(s2_ref, a2)                                         # (H/4*W/4, 128)

    o_ref[...] = p2.astype(o_ref.dtype)


def _head_kernel(f_ref, wfc_ref, bfc_ref, wclf_ref, bclf_ref, feat_ref, out_ref):
    """Fused fc+bias+ReLU -> classifier Linear (padded-lane layout)."""
    h = jnp.dot(f_ref[...], wfc_ref[...], preferred_element_type=jnp.float32) + bfc_ref[...]
    h = jnp.maximum(h, 0.0)
    feat_ref[...] = h
    logits = jnp.dot(h.astype(jnp.bfloat16), wclf_ref[...],
                     preferred_element_type=jnp.float32) + bclf_ref[...]
    out_ref[...] = logits


# ------------------------------- call wrappers --------------------------------- #

def _backbone_call(x2d, params, *, batch, hw):
    P = _LANES
    hw2, hw4 = hw // 2, hw // 4
    r_in, r_mid, r_out = hw * hw, hw2 * hw2, hw4 * hw4
    cin = x2d.shape[1]
    kernel = functools.partial(_backbone_kernel, hw=hw)
    return pl.pallas_call(
        kernel,
        out_shape=jax.ShapeDtypeStruct((batch * r_out, P), jnp.bfloat16),
        grid=(batch,),
        in_specs=[
            pl.BlockSpec((r_in, cin), lambda n: (n, 0)),
            pl.BlockSpec((9, cin, P), lambda n: (0, 0, 0)),
            pl.BlockSpec((1, P), lambda n: (0, 0)),
            pl.BlockSpec((9, P, P), lambda n: (0, 0, 0)),
            pl.BlockSpec((1, P), lambda n: (0, 0)),
            pl.BlockSpec((4, r_mid, r_in), lambda n: (0, 0, 0)),
            pl.BlockSpec((4, r_out, r_mid), lambda n: (0, 0, 0)),
        ],
        out_specs=pl.BlockSpec((r_out, P), lambda n: (n, 0)),
        compiler_params=pltpu.CompilerParams(dimension_semantics=("parallel",)),
    )(x2d, params["w1"], params["b1"], params["w2"], params["b2"],
      params["s1"], params["s2"])


def _head_call(feats2d, params):
    P = _LANES
    B, K = feats2d.shape
    return pl.pallas_call(
        _head_kernel,
        out_shape=(jax.ShapeDtypeStruct((B, P), jnp.float32),
                   jax.ShapeDtypeStruct((B, P), jnp.float32)),
        grid=(1,),
        in_specs=[
            pl.BlockSpec((B, K), lambda i: (0, 0)),
            pl.BlockSpec((K, P), lambda i: (0, 0)),
            pl.BlockSpec((1, P), lambda i: (0, 0)),
            pl.BlockSpec((P, P), lambda i: (0, 0)),
            pl.BlockSpec((1, P), lambda i: (0, 0)),
        ],
        out_specs=[pl.BlockSpec((B, P), lambda i: (0, 0)),
                   pl.BlockSpec((B, P), lambda i: (0, 0))],
    )(feats2d, params["wfc"], params["bfc"], params["wclf"], params["bclf"])


# --------------------------------- parameters ---------------------------------- #

def _pool_select_mats(hi, wi):
    """(4, (hi/2)*(wi/2), hi*wi) one-hot selection matrices for the 4 taps of a 2x2 pool."""
    ho, wo = hi // 2, wi // 2
    s = np.zeros((4, ho * wo, hi * wi), np.float32)
    for a in range(2):
        for b in range(2):
            for pi in range(ho):
                for pj in range(wo):
                    s[a * 2 + b, pi * wo + pj, (2 * pi + a) * wi + (2 * pj + b)] = 1.0
    return jnp.asarray(s, jnp.bfloat16)


def init_params(key, in_ch=4, n_class=31, feat_dim=32, hw=16):
    """Pre-padded / pre-transposed bf16 weights (lane dims padded to 128) + fixed pool selectors."""
    c1, c2 = 8, 16
    P = _LANES
    hw2, hw4 = hw // 2, hw // 4
    ks = jax.random.split(key, 4)

    conv1 = jax.random.normal(ks[0], (c1, in_ch, 3, 3), jnp.float32) * 0.05
    conv2 = jax.random.normal(ks[1], (c2, c1, 3, 3), jnp.float32) * 0.05
    fc = jax.random.normal(ks[2], (hw4 * hw4, c2, feat_dim), jnp.float32) * 0.05
    clf = jax.random.normal(ks[3], (n_class, feat_dim), jnp.float32) * 0.005

    w1 = jnp.zeros((9, in_ch, P), jnp.float32).at[:, :, :c1].set(
        jnp.transpose(conv1, (2, 3, 1, 0)).reshape(9, in_ch, c1))
    w2 = jnp.zeros((9, P, P), jnp.float32).at[:, :c1, :c2].set(
        jnp.transpose(conv2, (2, 3, 1, 0)).reshape(9, c1, c2))
    wfc = jnp.zeros((hw4 * hw4, P, P), jnp.float32).at[:, :c2, :feat_dim].set(fc)
    wfc = wfc.reshape(hw4 * hw4 * P, P)
    # classifier_layer: weight.data.normal_(0, 0.005); bias.data.fill_(0.1); logits = x @ W.T + b
    wclf = jnp.zeros((P, P), jnp.float32).at[:feat_dim, :n_class].set(clf.T)

    return {
        "w1": w1.astype(jnp.bfloat16), "b1": jnp.zeros((1, P), jnp.float32),
        "w2": w2.astype(jnp.bfloat16), "b2": jnp.zeros((1, P), jnp.float32),
        "wfc": wfc.astype(jnp.bfloat16), "bfc": jnp.zeros((1, P), jnp.float32),
        "wclf": wclf.astype(jnp.bfloat16),
        "bclf": jnp.zeros((1, P), jnp.float32).at[0, :n_class].set(0.1),
        "s1": _pool_select_mats(hw, hw),
        "s2": _pool_select_mats(hw2, hw2),
    }


# --------------------------------- the Network --------------------------------- #

def _forward_padded(x_nchw, params):
    N, C, H, W = x_nchw.shape
    assert H == W
    # NCHW -> (N*H*W, C): rows = spatial, channels in lanes (layout plumbing only, tiny).
    x2d = jnp.transpose(x_nchw, (0, 2, 3, 1)).reshape(N * H * W, C).astype(jnp.bfloat16)
    pooled = _backbone_call(x2d, params, batch=N, hw=H)            # (N*(H/4)^2, 128) bf16
    feats_flat = pooled.reshape(N, (H // 4) * (W // 4) * _LANES)   # per-image flatten (wrapper reshape)
    return _head_call(feats_flat, params)                          # ((N,128) feat, (N,128) logits)


def get_features(x_nchw, params, *, feat_dim=32):
    feat_pad, _ = _forward_padded(x_nchw, params)
    return feat_pad[:, :feat_dim]


def network_forward(x_nchw, params, *, n_class=31):
    _, logits_pad = _forward_padded(x_nchw, params)
    return logits_pad[:, :n_class]


if __name__ == "__main__":
    key = jax.random.PRNGKey(0)
    k_param, k_x = jax.random.split(key)

    # Small shapes consistent with the module's NCHW conv input.
    x = jax.random.normal(k_x, (2, 4, 16, 16), jnp.float32)
    params = init_params(k_param, in_ch=4, n_class=31, feat_dim=32, hw=16)

    out = jax.jit(network_forward)(x, params)
    out = jax.block_until_ready(out)

    assert out.shape == (2, 31), out.shape
    assert out.dtype == jnp.float32
    assert bool(jnp.all(jnp.isfinite(out)))
    print("KERNEL_OK")
</pallas_src>

<mosaic_0001>
module attributes {stable_mosaic.version = 11 : i64} {
  func.func @_backbone_kernel(%arg0: i32, %arg1: memref<256x4xbf16, #tpu.memory_space<vmem>>, %arg2: memref<9x4x128xbf16, #tpu.memory_space<vmem>>, %arg3: memref<1x128xf32, #tpu.memory_space<vmem>>, %arg4: memref<9x128x128xbf16, #tpu.memory_space<vmem>>, %arg5: memref<1x128xf32, #tpu.memory_space<vmem>>, %arg6: memref<4x64x256xbf16, #tpu.memory_space<vmem>>, %arg7: memref<4x16x64xbf16, #tpu.memory_space<vmem>>, %arg8: memref<16x128xbf16, #tpu.memory_space<vmem>>) attributes {dimension_semantics = [#tpu.dimension_semantics<parallel>], iteration_bounds = array<i64: 2>, scalar_prefetch = 0 : i64, scratch_operands = 0 : i64, tpu.core_type = #tpu.core_type<tc>, window_params = [{transform_indices = @transform_0, window_bounds = array<i64: 256, 4>}, {pipeline_mode = #tpu.pipeline_mode<synchronous>, transform_indices = @transform_1, window_bounds = array<i64: 9, 4, 128>}, {pipeline_mode = #tpu.pipeline_mode<synchronous>, transform_indices = @transform_2, window_bounds = array<i64: 1, 128>}, {pipeline_mode = #tpu.pipeline_mode<synchronous>, transform_indices = @transform_3, window_bounds = array<i64: 9, 128, 128>}, {pipeline_mode = #tpu.pipeline_mode<synchronous>, transform_indices = @transform_4, window_bounds = array<i64: 1, 128>}, {pipeline_mode = #tpu.pipeline_mode<synchronous>, transform_indices = @transform_5, window_bounds = array<i64: 4, 64, 256>}, {pipeline_mode = #tpu.pipeline_mode<synchronous>, transform_indices = @transform_6, window_bounds = array<i64: 4, 16, 64>}, {transform_indices = @transform_7, window_bounds = array<i64: 16, 128>}]} {
    %c0 = arith.constant 0 : index
    %c0_0 = arith.constant 0 : index
    %0 = vector.load %arg1[%c0, %c0_0] : memref<256x4xbf16, #tpu.memory_space<vmem>>, vector<256x4xbf16>
    %1 = arith.extf %0 : vector<256x4xbf16> to vector<256x4xf32>
    %2 = tpu.iota {dimensions = array<i32: 0>} : vector<256x4xi32>
    %c4_i32 = arith.constant 4 : i32
    %3 = vector.broadcast %c4_i32 : i32 to vector<256x4xi32>
    %4 = arith.shrsi %2, %3 : vector<256x4xi32>
    %c15_i32 = arith.constant 15 : i32
    %5 = vector.broadcast %c15_i32 : i32 to vector<256x4xi32>
    %6 = arith.andi %2, %5 : vector<256x4xi32>
    %cst = arith.constant 0.000000e+00 : f32
    %7 = vector.broadcast %cst : f32 to vector<256x128xf32>
    %c17_i32 = arith.constant 17 : i32
    %8 = tpu.dynamic_rotate %1 by %c17_i32 dim 0 : vector<256x4xf32>, i32 -> vector<256x4xf32>
    %c-1_i32 = arith.constant -1 : i32
    %9 = vector.broadcast %c-1_i32 : i32 to vector<256x4xi32>
    %10 = arith.addi %4, %9 : vector<256x4xi32>
    %c0_i32 = arith.constant 0 : i32
    %11 = vector.broadcast %c0_i32 : i32 to vector<256x4xi32>
    %12 = arith.cmpi sge, %10, %11 : vector<256x4xi32>
    %c-1_i32_1 = arith.constant -1 : i32
    %13 = vector.broadcast %c-1_i32_1 : i32 to vector<256x4xi32>
    %14 = arith.addi %4, %13 : vector<256x4xi32>
    %c16_i32 = arith.constant 16 : i32
    %15 = vector.broadcast %c16_i32 : i32 to vector<256x4xi32>
    %16 = arith.cmpi slt, %14, %15 : vector<256x4xi32>
    %17 = arith.andi %12, %16 : vector<256x4xi1>
    %c-1_i32_2 = arith.constant -1 : i32
    %18 = vector.broadcast %c-1_i32_2 : i32 to vector<256x4xi32>
    %19 = arith.addi %6, %18 : vector<256x4xi32>
    %c0_i32_3 = arith.constant 0 : i32
    %20 = vector.broadcast %c0_i32_3 : i32 to vector<256x4xi32>
    %21 = arith.cmpi sge, %19, %20 : vector<256x4xi32>
    %22 = arith.andi %17, %21 : vector<256x4xi1>
    %c-1_i32_4 = arith.constant -1 : i32
    %23 = vector.broadcast %c-1_i32_4 : i32 to vector<256x4xi32>
    %24 = arith.addi %6, %23 : vector<256x4xi32>
    %c16_i32_5 = arith.constant 16 : i32
    %25 = vector.broadcast %c16_i32_5 : i32 to vector<256x4xi32>
    %26 = arith.cmpi slt, %24, %25 : vector<256x4xi32>
    %27 = arith.andi %22, %26 : vector<256x4xi1>
    %cst_6 = arith.constant 0.000000e+00 : f32
    %28 = vector.broadcast %cst_6 : f32 to vector<256x4xf32>
    %29 = arith.select %27, %8, %28 : vector<256x4xi1>, vector<256x4xf32>
    %30 = arith.truncf %29 : vector<256x4xf32> to vector<256x4xbf16>
    %c0_7 = arith.constant 0 : index
    %c0_8 = arith.constant 0 : index
    %c0_9 = arith.constant 0 : index
    %31 = vector.load %arg2[%c0_7, %c0_8, %c0_9] : memref<9x4x128xbf16, #tpu.memory_space<vmem>>, vector<1x4x128xbf16>
    %32 = vector.shape_cast %31 : vector<1x4x128xbf16> to vector<4x128xbf16>
    %cst_10 = arith.constant dense<0.000000e+00> : vector<256x128xf32>
    %33 = tpu.matmul %30, %32, %cst_10 {dimension_numbers = #tpu.dot_dimension_numbers<[1], [0], [0], [1], [0, 0, 1, 1], [], []>} : vector<256x4xbf16>, vector<4x128xbf16>, vector<256x128xf32> -> vector<256x128xf32>
    %34 = arith.addf %7, %33 : vector<256x128xf32>
    %c16_i32_11 = arith.constant 16 : i32
    %35 = tpu.dynamic_rotate %1 by %c16_i32_11 dim 0 : vector<256x4xf32>, i32 -> vector<256x4xf32>
    %c-1_i32_12 = arith.constant -1 : i32
    %36 = vector.broadcast %c-1_i32_12 : i32 to vector<256x4xi32>
    %37 = arith.addi %4, %36 : vector<256x4xi32>
    %c0_i32_13 = arith.constant 0 : i32
    %38 = vector.broadcast %c0_i32_13 : i32 to vector<256x4xi32>
    %39 = arith.cmpi sge, %37, %38 : vector<256x4xi32>
    %c-1_i32_14 = arith.constant -1 : i32
    %40 = vector.broadcast %c-1_i32_14 : i32 to vector<256x4xi32>
    %41 = arith.addi %4, %40 : vector<256x4xi32>
    %c16_i32_15 = arith.constant 16 : i32
    %42 = vector.broadcast %c16_i32_15 : i32 to vector<256x4xi32>
    %43 = arith.cmpi slt, %41, %42 : vector<256x4xi32>
    %44 = arith.andi %39, %43 : vector<256x4xi1>
    %c0_i32_16 = arith.constant 0 : i32
    %45 = vector.broadcast %c0_i32_16 : i32 to vector<256x4xi32>
    %46 = arith.addi %6, %45 : vector<256x4xi32>
    %c0_i32_17 = arith.constant 0 : i32
    %47 = vector.broadcast %c0_i32_17 : i32 to vector<256x4xi32>
    %48 = arith.cmpi sge, %46, %47 : vector<256x4xi32>
    %49 = arith.andi %44, %48 : vector<256x4xi1>
    %c0_i32_18 = arith.constant 0 : i32
    %50 = vector.broadcast %c0_i32_18 : i32 to vector<256x4xi32>
    %51 = arith.addi %6, %50 : vector<256x4xi32>
    %c16_i32_19 = arith.constant 16 : i32
    %52 = vector.broadcast %c16_i32_19 : i32 to vector<256x4xi32>
    %53 = arith.cmpi slt, %51, %52 : vector<256x4xi32>
    %54 = arith.andi %49, %53 : vector<256x4xi1>
    %cst_20 = arith.constant 0.000000e+00 : f32
    %55 = vector.broadcast %cst_20 : f32 to vector<256x4xf32>
    %56 = arith.select %54, %35, %55 : vector<256x4xi1>, vector<256x4xf32>
    %57 = arith.truncf %56 : vector<256x4xf32> to vector<256x4xbf16>
    %c1 = arith.constant 1 : index
    %c0_21 = arith.constant 0 : index
    %c0_22 = arith.constant 0 : index
    %58 = vector.load %arg2[%c1, %c0_21, %c0_22] : memref<9x4x128xbf16, #tpu.memory_space<vmem>>, vector<1x4x128xbf16>
    %59 = vector.shape_cast %58 : vector<1x4x128xbf16> to vector<4x128xbf16>
    %cst_23 = arith.constant dense<0.000000e+00> : vector<256x128xf32>
    %60 = tpu.matmul %57, %59, %cst_23 {dimension_numbers = #tpu.dot_dimension_numbers<[1], [0], [0], [1], [0, 0, 1, 1], [], []>} : vector<256x4xbf16>, vector<4x128xbf16>, vector<256x128xf32> -> vector<256x128xf32>
    %61 = arith.addf %34, %60 : vector<256x128xf32>
    %c15_i32_24 = arith.constant 15 : i32
    %62 = tpu.dynamic_rotate %1 by %c15_i32_24 dim 0 : vector<256x4xf32>, i32 -> vector<256x4xf32>
    %c-1_i32_25 = arith.constant -1 : i32
    %63 = vector.broadcast %c-1_i32_25 : i32 to vector<256x4xi32>
    %64 = arith.addi %4, %63 : vector<256x4xi32>
    %c0_i32_26 = arith.constant 0 : i32
    %65 = vector.broadcast %c0_i32_26 : i32 to vector<256x4xi32>
    %66 = arith.cmpi sge, %64, %65 : vector<256x4xi32>
    %c-1_i32_27 = arith.constant -1 : i32
    %67 = vector.broadcast %c-1_i32_27 : i32 to vector<256x4xi32>
    %68 = arith.addi %4, %67 : vector<256x4xi32>
    %c16_i32_28 = arith.constant 16 : i32
    %69 = vector.broadcast %c16_i32_28 : i32 to vector<256x4xi32>
    %70 = arith.cmpi slt, %68, %69 : vector<256x4xi32>
    %71 = arith.andi %66, %70 : vector<256x4xi1>
    %c1_i32 = arith.constant 1 : i32
    %72 = vector.broadcast %c1_i32 : i32 to vector<256x4xi32>
    %73 = arith.addi %6, %72 : vector<256x4xi32>
    %c0_i32_29 = arith.constant 0 : i32
    %74 = vector.broadcast %c0_i32_29 : i32 to vector<256x4xi32>
    %75 = arith.cmpi sge, %73, %74 : vector<256x4xi32>
    %76 = arith.andi %71, %75 : vector<256x4xi1>
    %c1_i32_30 = arith.constant 1 : i32
    %77 = vector.broadcast %c1_i32_30 : i32 to vector<256x4xi32>
    %78 = arith.addi %6, %77 : vector<256x4xi32>
    %c16_i32_31 = arith.constant 16 : i32
    %79 = vector.broadcast %c16_i32_31 : i32 to vector<256x4xi32>
    %80 = arith.cmpi slt, %78, %79 : vector<256x4xi32>
    %81 = arith.andi %76, %80 : vector<256x4xi1>
    %cst_32 = arith.constant 0.000000e+00 : f32
    %82 = vector.broadcast %cst_32 : f32 to vector<256x4xf32>
    %83 = arith.select %81, %62, %82 : vector<256x4xi1>, vector<256x4xf32>
    %84 = arith.truncf %83 : vector<256x4xf32> to vector<256x4xbf16>
    %c2 = arith.constant 2 : index
    %c0_33 = arith.constant 0 : index
    %c0_34 = arith.constant 0 : index
    %85 = vector.load %arg2[%c2, %c0_33, %c0_34] : memref<9x4x128xbf16, #tpu.memory_space<vmem>>, vector<1x4x128xbf16>
    %86 = vector.shape_cast %85 : vector<1x4x128xbf16> to vector<4x128xbf16>
    %cst_35 = arith.constant dense<0.000000e+00> : vector<256x128xf32>
    %87 = tpu.matmul %84, %86, %cst_35 {dimension_numbers = #tpu.dot_dimension_numbers<[1], [0], [0], [1], [0, 0, 1, 1], [], []>} : vector<256x4xbf16>, vector<4x128xbf16>, vector<256x128xf32> -> vector<256x128xf32>
    %88 = arith.addf %61, %87 : vector<256x128xf32>
    %c1_i32_36 = arith.constant 1 : i32
    %89 = tpu.dynamic_rotate %1 by %c1_i32_36 dim 0 : vector<256x4xf32>, i32 -> vector<256x4xf32>
    %c0_i32_37 = arith.constant 0 : i32
    %90 = vector.broadcast %c0_i32_37 : i32 to vector<256x4xi32>
    %91 = arith.addi %4, %90 : vector<256x4xi32>
    %c0_i32_38 = arith.constant 0 : i32
    %92 = vector.broadcast %c0_i32_38 : i32 to vector<256x4xi32>
    %93 = arith.cmpi sge, %91, %92 : vector<256x4xi32>
    %c0_i32_39 = arith.constant 0 : i32
    %94 = vector.broadcast %c0_i32_39 : i32 to vector<256x4xi32>
    %95 = arith.addi %4, %94 : vector<256x4xi32>
    %c16_i32_40 = arith.constant 16 : i32
    %96 = vector.broadcast %c16_i32_40 : i32 to vector<256x4xi32>
    %97 = arith.cmpi slt, %95, %96 : vector<256x4xi32>
    %98 = arith.andi %93, %97 : vector<256x4xi1>
    %c-1_i32_41 = arith.constant -1 : i32
    %99 = vector.broadcast %c-1_i32_41 : i32 to vector<256x4xi32>
    %100 = arith.addi %6, %99 : vector<256x4xi32>
    %c0_i32_42 = arith.constant 0 : i32
    %101 = vector.broadcast %c0_i32_42 : i32 to vector<256x4xi32>
    %102 = arith.cmpi sge, %100, %101 : vector<256x4xi32>
    %103 = arith.andi %98, %102 : vector<256x4xi1>
    %c-1_i32_43 = arith.constant -1 : i32
    %104 = vector.broadcast %c-1_i32_43 : i32 to vector<256x4xi32>
    %105 = arith.addi %6, %104 : vector<256x4xi32>
    %c16_i32_44 = arith.constant 16 : i32
    %106 = vector.broadcast %c16_i32_44 : i32 to vector<256x4xi32>
    %107 = arith.cmpi slt, %105, %106 : vector<256x4xi32>
    %108 = arith.andi %103, %107 : vector<256x4xi1>
    %cst_45 = arith.constant 0.000000e+00 : f32
    %109 = vector.broadcast %cst_45 : f32 to vector<256x4xf32>
    %110 = arith.select %108, %89, %109 : vector<256x4xi1>, vector<256x4xf32>
    %111 = arith.truncf %110 : vector<256x4xf32> to vector<256x4xbf16>
    %c3 = arith.constant 3 : index
    %c0_46 = arith.constant 0 : index
    %c0_47 = arith.constant 0 : index
    %112 = vector.load %arg2[%c3, %c0_46, %c0_47] : memref<9x4x128xbf16, #tpu.memory_space<vmem>>, vector<1x4x128xbf16>
    %113 = vector.shape_cast %112 : vector<1x4x128xbf16> to vector<4x128xbf16>
    %cst_48 = arith.constant dense<0.000000e+00> : vector<256x128xf32>
    %114 = tpu.matmul %111, %113, %cst_48 {dimension_numbers = #tpu.dot_dimension_numbers<[1], [0], [0], [1], [0, 0, 1, 1], [], []>} : vector<256x4xbf16>, vector<4x128xbf16>, vector<256x128xf32> -> vector<256x128xf32>
    %115 = arith.addf %88, %114 : vector<256x128xf32>
    %c0_i32_49 = arith.constant 0 : i32
    %116 = vector.broadcast %c0_i32_49 : i32 to vector<256x4xi32>
    %117 = arith.addi %4, %116 : vector<256x4xi32>
    %c0_i32_50 = arith.constant 0 : i32
    %118 = vector.broadcast %c0_i32_50 : i32 to vector<256x4xi32>
    %119 = arith.cmpi sge, %117, %118 : vector<256x4xi32>
    %c0_i32_51 = arith.constant 0 : i32
    %120 = vector.broadcast %c0_i32_51 : i32 to vector<256x4xi32>
    %121 = arith.addi %4, %120 : vector<256x4xi32>
    %c16_i32_52 = arith.constant 16 : i32
    %122 = vector.broadcast %c16_i32_52 : i32 to vector<256x4xi32>
    %123 = arith.cmpi slt, %121, %122 : vector<256x4xi32>
    %124 = arith.andi %119, %123 : vector<256x4xi1>
    %c0_i32_53 = arith.constant 0 : i32
    %125 = vector.broadcast %c0_i32_53 : i32 to vector<256x4xi32>
    %126 = arith.addi %6, %125 : vector<256x4xi32>
    %c0_i32_54 = arith.constant 0 : i32
    %127 = vector.broadcast %c0_i32_54 : i32 to vector<256x4xi32>
    %128 = arith.cmpi sge, %126, %127 : vector<256x4xi32>
    %129 = arith.andi %124, %128 : vector<256x4xi1>
    %c0_i32_55 = arith.constant 0 : i32
    %130 = vector.broadcast %c0_i32_55 : i32 to vector<256x4xi32>
    %131 = arith.addi %6, %130 : vector<256x4xi32>
    %c16_i32_56 = arith.constant 16 : i32
    %132 = vector.broadcast %c16_i32_56 : i32 to vector<256x4xi32>
    %133 = arith.cmpi slt, %131, %132 : vector<256x4xi32>
    %134 = arith.andi %129, %133 : vector<256x4xi1>
    %cst_57 = arith.constant 0.000000e+00 : f32
    %135 = vector.broadcast %cst_57 : f32 to vector<256x4xf32>
    %136 = arith.select %134, %1, %135 : vector<256x4xi1>, vector<256x4xf32>
    %137 = arith.truncf %136 : vector<256x4xf32> to vector<256x4xbf16>
    %c4 = arith.constant 4 : index
    %c0_58 = arith.constant 0 : index
    %c0_59 = arith.constant 0 : index
    %138 = vector.load %arg2[%c4, %c0_58, %c0_59] : memref<9x4x128xbf16, #tpu.memory_space<vmem>>, vector<1x4x128xbf16>
    %139 = vector.shape_cast %138 : vector<1x4x128xbf16> to vector<4x128xbf16>
    %cst_60 = arith.constant dense<0.000000e+00> : vector<256x128xf32>
    %140 = tpu.matmul %137, %139, %cst_60 {dimension_numbers = #tpu.dot_dimension_numbers<[1], [0], [0], [1], [0, 0, 1, 1], [], []>} : vector<256x4xbf16>, vector<4x128xbf16>, vector<256x128xf32> -> vector<256x128xf32>
    %141 = arith.addf %115, %140 : vector<256x128xf32>
    %c255_i32 = arith.constant 255 : i32
    %142 = tpu.dynamic_rotate %1 by %c255_i32 dim 0 : vector<256x4xf32>, i32 -> vector<256x4xf32>
    %c0_i32_61 = arith.constant 0 : i32
    %143 = vector.broadcast %c0_i32_61 : i32 to vector<256x4xi32>
    %144 = arith.addi %4, %143 : vector<256x4xi32>
    %c0_i32_62 = arith.constant 0 : i32
    %145 = vector.broadcast %c0_i32_62 : i32 to vector<256x4xi32>
    %146 = arith.cmpi sge, %144, %145 : vector<256x4xi32>
    %c0_i32_63 = arith.constant 0 : i32
    %147 = vector.broadcast %c0_i32_63 : i32 to vector<256x4xi32>
    %148 = arith.addi %4, %147 : vector<256x4xi32>
    %c16_i32_64 = arith.constant 16 : i32
    %149 = vector.broadcast %c16_i32_64 : i32 to vector<256x4xi32>
    %150 = arith.cmpi slt, %148, %149 : vector<256x4xi32>
    %151 = arith.andi %146, %150 : vector<256x4xi1>
    %c1_i32_65 = arith.constant 1 : i32
    %152 = vector.broadcast %c1_i32_65 : i32 to vector<256x4xi32>
    %153 = arith.addi %6, %152 : vector<256x4xi32>
    %c0_i32_66 = arith.constant 0 : i32
    %154 = vector.broadcast %c0_i32_66 : i32 to vector<256x4xi32>
    %155 = arith.cmpi sge, %153, %154 : vector<256x4xi32>
    %156 = arith.andi %151, %155 : vector<256x4xi1>
    %c1_i32_67 = arith.constant 1 : i32
    %157 = vector.broadcast %c1_i32_67 : i32 to vector<256x4xi32>
    %158 = arith.addi %6, %157 : vector<256x4xi32>
    %c16_i32_68 = arith.constant 16 : i32
    %159 = vector.broadcast %c16_i32_68 : i32 to vector<256x4xi32>
    %160 = arith.cmpi slt, %158, %159 : vector<256x4xi32>
    %161 = arith.andi %156, %160 : vector<256x4xi1>
    %cst_69 = arith.constant 0.000000e+00 : f32
    %162 = vector.broadcast %cst_69 : f32 to vector<256x4xf32>
    %163 = arith.select %161, %142, %162 : vector<256x4xi1>, vector<256x4xf32>
    %164 = arith.truncf %163 : vector<256x4xf32> to vector<256x4xbf16>
    %c5 = arith.constant 5 : index
    %c0_70 = arith.constant 0 : index
    %c0_71 = arith.constant 0 : index
    %165 = vector.load %arg2[%c5, %c0_70, %c0_71] : memref<9x4x128xbf16, #tpu.memory_space<vmem>>, vector<1x4x128xbf16>
    %166 = vector.shape_cast %165 : vector<1x4x128xbf16> to vector<4x128xbf16>
    %cst_72 = arith.constant dense<0.000000e+00> : vector<256x128xf32>
    %167 = tpu.matmul %164, %166, %cst_72 {dimension_numbers = #tpu.dot_dimension_numbers<[1], [0], [0], [1], [0, 0, 1, 1], [], []>} : vector<256x4xbf16>, vector<4x128xbf16>, vector<256x128xf32> -> vector<256x128xf32>
    %168 = arith.addf %141, %167 : vector<256x128xf32>
    %c241_i32 = arith.constant 241 : i32
    %169 = tpu.dynamic_rotate %1 by %c241_i32 dim 0 : vector<256x4xf32>, i32 -> vector<256x4xf32>
    %c1_i32_73 = arith.constant 1 : i32
    %170 = vector.broadcast %c1_i32_73 : i32 to vector<256x4xi32>
    %171 = arith.addi %4, %170 : vector<256x4xi32>
    %c0_i32_74 = arith.constant 0 : i32
    %172 = vector.broadcast %c0_i32_74 : i32 to vector<256x4xi32>
    %173 = arith.cmpi sge, %171, %172 : vector<256x4xi32>
    %c1_i32_75 = arith.constant 1 : i32
    %174 = vector.broadcast %c1_i32_75 : i32 to vector<256x4xi32>
    %175 = arith.addi %4, %174 : vector<256x4xi32>
    %c16_i32_76 = arith.constant 16 : i32
    %176 = vector.broadcast %c16_i32_76 : i32 to vector<256x4xi32>
    %177 = arith.cmpi slt, %175, %176 : vector<256x4xi32>
    %178 = arith.andi %173, %177 : vector<256x4xi1>
    %c-1_i32_77 = arith.constant -1 : i32
    %179 = vector.broadcast %c-1_i32_77 : i32 to vector<256x4xi32>
    %180 = arith.addi %6, %179 : vector<256x4xi32>
    %c0_i32_78 = arith.constant 0 : i32
    %181 = vector.broadcast %c0_i32_78 : i32 to vector<256x4xi32>
    %182 = arith.cmpi sge, %180, %181 : vector<256x4xi32>
    %183 = arith.andi %178, %182 : vector<256x4xi1>
    %c-1_i32_79 = arith.constant -1 : i32
    %184 = vector.broadcast %c-1_i32_79 : i32 to vector<256x4xi32>
    %185 = arith.addi %6, %184 : vector<256x4xi32>
    %c16_i32_80 = arith.constant 16 : i32
    %186 = vector.broadcast %c16_i32_80 : i32 to vector<256x4xi32>
    %187 = arith.cmpi slt, %185, %186 : vector<256x4xi32>
    %188 = arith.andi %183, %187 : vector<256x4xi1>
    %cst_81 = arith.constant 0.000000e+00 : f32
    %189 = vector.broadcast %cst_81 : f32 to vector<256x4xf32>
    %190 = arith.select %188, %169, %189 : vector<256x4xi1>, vector<256x4xf32>
    %191 = arith.truncf %190 : vector<256x4xf32> to vector<256x4xbf16>
    %c6 = arith.constant 6 : index
    %c0_82 = arith.constant 0 : index
    %c0_83 = arith.constant 0 : index
    %192 = vector.load %arg2[%c6, %c0_82, %c0_83] : memref<9x4x128xbf16, #tpu.memory_space<vmem>>, vector<1x4x128xbf16>
    %193 = vector.shape_cast %192 : vector<1x4x128xbf16> to vector<4x128xbf16>
    %cst_84 = arith.constant dense<0.000000e+00> : vector<256x128xf32>
    %194 = tpu.matmul %191, %193, %cst_84 {dimension_numbers = #tpu.dot_dimension_numbers<[1], [0], [0], [1], [0, 0, 1, 1], [], []>} : vector<256x4xbf16>, vector<4x128xbf16>, vector<256x128xf32> -> vector<256x128xf32>
    %195 = arith.addf %168, %194 : vector<256x128xf32>
    %c240_i32 = arith.constant 240 : i32
    %196 = tpu.dynamic_rotate %1 by %c240_i32 dim 0 : vector<256x4xf32>, i32 -> vector<256x4xf32>
    %c1_i32_85 = arith.constant 1 : i32
    %197 = vector.broadcast %c1_i32_85 : i32 to vector<256x4xi32>
    %198 = arith.addi %4, %197 : vector<256x4xi32>
    %c0_i32_86 = arith.constant 0 : i32
    %199 = vector.broadcast %c0_i32_86 : i32 to vector<256x4xi32>
    %200 = arith.cmpi sge, %198, %199 : vector<256x4xi32>
    %c1_i32_87 = arith.constant 1 : i32
    %201 = vector.broadcast %c1_i32_87 : i32 to vector<256x4xi32>
    %202 = arith.addi %4, %201 : vector<256x4xi32>
    %c16_i32_88 = arith.constant 16 : i32
    %203 = vector.broadcast %c16_i32_88 : i32 to vector<256x4xi32>
    %204 = arith.cmpi slt, %202, %203 : vector<256x4xi32>
    %205 = arith.andi %200, %204 : vector<256x4xi1>
    %c0_i32_89 = arith.constant 0 : i32
    %206 = vector.broadcast %c0_i32_89 : i32 to vector<256x4xi32>
    %207 = arith.addi %6, %206 : vector<256x4xi32>
    %c0_i32_90 = arith.constant 0 : i32
    %208 = vector.broadcast %c0_i32_90 : i32 to vector<256x4xi32>
    %209 = arith.cmpi sge, %207, %208 : vector<256x4xi32>
    %210 = arith.andi %205, %209 : vector<256x4xi1>
    %c0_i32_91 = arith.constant 0 : i32
    %211 = vector.broadcast %c0_i32_91 : i32 to vector<256x4xi32>
    %212 = arith.addi %6, %211 : vector<256x4xi32>
    %c16_i32_92 = arith.constant 16 : i32
    %213 = vector.broadcast %c16_i32_92 : i32 to vector<256x4xi32>
    %214 = arith.cmpi slt, %212, %213 : vector<256x4xi32>
    %215 = arith.andi %210, %214 : vector<256x4xi1>
    %cst_93 = arith.constant 0.000000e+00 : f32
    %216 = vector.broadcast %cst_93 : f32 to vector<256x4xf32>
    %217 = arith.select %215, %196, %216 : vector<256x4xi1>, vector<256x4xf32>
    %218 = arith.truncf %217 : vector<256x4xf32> to vector<256x4xbf16>
    %c7 = arith.constant 7 : index
    %c0_94 = arith.constant 0 : index
    %c0_95 = arith.constant 0 : index
    %219 = vector.load %arg2[%c7, %c0_94, %c0_95] : memref<9x4x128xbf16, #tpu.memory_space<vmem>>, vector<1x4x128xbf16>
    %220 = vector.shape_cast %219 : vector<1x4x128xbf16> to vector<4x128xbf16>
    %cst_96 = arith.constant dense<0.000000e+00> : vector<256x128xf32>
    %221 = tpu.matmul %218, %220, %cst_96 {dimension_numbers = #tpu.dot_dimension_numbers<[1], [0], [0], [1], [0, 0, 1, 1], [], []>} : vector<256x4xbf16>, vector<4x128xbf16>, vector<256x128xf32> -> vector<256x128xf32>
    %222 = arith.addf %195, %221 : vector<256x128xf32>
    %c239_i32 = arith.constant 239 : i32
    %223 = tpu.dynamic_rotate %1 by %c239_i32 dim 0 : vector<256x4xf32>, i32 -> vector<256x4xf32>
    %c1_i32_97 = arith.constant 1 : i32
    %224 = vector.broadcast %c1_i32_97 : i32 to vector<256x4xi32>
    %225 = arith.addi %4, %224 : vector<256x4xi32>
    %c0_i32_98 = arith.constant 0 : i32
    %226 = vector.broadcast %c0_i32_98 : i32 to vector<256x4xi32>
    %227 = arith.cmpi sge, %225, %226 : vector<256x4xi32>
    %c1_i32_99 = arith.constant 1 : i32
    %228 = vector.broadcast %c1_i32_99 : i32 to vector<256x4xi32>
    %229 = arith.addi %4, %228 : vector<256x4xi32>
    %c16_i32_100 = arith.constant 16 : i32
    %230 = vector.broadcast %c16_i32_100 : i32 to vector<256x4xi32>
    %231 = arith.cmpi slt, %229, %230 : vector<256x4xi32>
    %232 = arith.andi %227, %231 : vector<256x4xi1>
    %c1_i32_101 = arith.constant 1 : i32
    %233 = vector.broadcast %c1_i32_101 : i32 to vector<256x4xi32>
    %234 = arith.addi %6, %233 : vector<256x4xi32>
    %c0_i32_102 = arith.constant 0 : i32
    %235 = vector.broadcast %c0_i32_102 : i32 to vector<256x4xi32>
    %236 = arith.cmpi sge, %234, %235 : vector<256x4xi32>
    %237 = arith.andi %232, %236 : vector<256x4xi1>
    %c1_i32_103 = arith.constant 1 : i32
    %238 = vector.broadcast %c1_i32_103 : i32 to vector<256x4xi32>
    %239 = arith.addi %6, %238 : vector<256x4xi32>
    %c16_i32_104 = arith.constant 16 : i32
    %240 = vector.broadcast %c16_i32_104 : i32 to vector<256x4xi32>
    %241 = arith.cmpi slt, %239, %240 : vector<256x4xi32>
    %242 = arith.andi %237, %241 : vector<256x4xi1>
    %cst_105 = arith.constant 0.000000e+00 : f32
    %243 = vector.broadcast %cst_105 : f32 to vector<256x4xf32>
    %244 = arith.select %242, %223, %243 : vector<256x4xi1>, vector<256x4xf32>
    %245 = arith.truncf %244 : vector<256x4xf32> to vector<256x4xbf16>
    %c8 = arith.constant 8 : index
    %c0_106 = arith.constant 0 : index
    %c0_107 = arith.constant 0 : index
    %246 = vector.load %arg2[%c8, %c0_106, %c0_107] : memref<9x4x128xbf16, #tpu.memory_space<vmem>>, vector<1x4x128xbf16>
    %247 = vector.shape_cast %246 : vector<1x4x128xbf16> to vector<4x128xbf16>
    %cst_108 = arith.constant dense<0.000000e+00> : vector<256x128xf32>
    %248 = tpu.matmul %245, %247, %cst_108 {dimension_numbers = #tpu.dot_dimension_numbers<[1], [0], [0], [1], [0, 0, 1, 1], [], []>} : vector<256x4xbf16>, vector<4x128xbf16>, vector<256x128xf32> -> vector<256x128xf32>
    %249 = arith.addf %222, %248 : vector<256x128xf32>
    %c0_109 = arith.constant 0 : index
    %c0_110 = arith.constant 0 : index
    %250 = vector.load %arg3[%c0_109, %c0_110] : memref<1x128xf32, #tpu.memory_space<vmem>>, vector<1x128xf32>
    %251 = vector.broadcast %250 : vector<1x128xf32> to vector<256x128xf32>
    %252 = arith.addf %249, %251 : vector<256x128xf32>
    %cst_111 = arith.constant 0.000000e+00 : f32
    %253 = vector.broadcast %cst_111 : f32 to vector<256x128xf32>
    %254 = arith.maximumf %252, %253 : vector<256x128xf32>
    %255 = arith.truncf %254 : vector<256x128xf32> to vector<256x128xbf16>
    %c0_112 = arith.constant 0 : index
    %c0_113 = arith.constant 0 : index
    %c0_114 = arith.constant 0 : index
    %256 = vector.load %arg6[%c0_112, %c0_113, %c0_114] : memref<4x64x256xbf16, #tpu.memory_space<vmem>>, vector<1x64x256xbf16>
    %257 = vector.shape_cast %256 : vector<1x64x256xbf16> to vector<64x256xbf16>
    %cst_115 = arith.constant dense<0.000000e+00> : vector<64x128xf32>
    %258 = tpu.matmul %257, %255, %cst_115 {dimension_numbers = #tpu.dot_dimension_numbers<[1], [0], [0], [1], [0, 0, 1, 1], [], []>} : vector<64x256xbf16>, vector<256x128xbf16>, vector<64x128xf32> -> vector<64x128xf32>
    %c1_116 = arith.constant 1 : index
    %c0_117 = arith.constant 0 : index
    %c0_118 = arith.constant 0 : index
    %259 = vector.load %arg6[%c1_116, %c0_117, %c0_118] : memref<4x64x256xbf16, #tpu.memory_space<vmem>>, vector<1x64x256xbf16>
    %260 = vector.shape_cast %259 : vector<1x64x256xbf16> to vector<64x256xbf16>
    %cst_119 = arith.constant dense<0.000000e+00> : vector<64x128xf32>
    %261 = tpu.matmul %260, %255, %cst_119 {dimension_numbers = #tpu.dot_dimension_numbers<[1], [0], [0], [1], [0, 0, 1, 1], [], []>} : vector<64x256xbf16>, vector<256x128xbf16>, vector<64x128xf32> -> vector<64x128xf32>
    %262 = arith.maximumf %258, %261 : vector<64x128xf32>
    %c2_120 = arith.constant 2 : index
    %c0_121 = arith.constant 0 : index
    %c0_122 = arith.constant 0 : index
    %263 = vector.load %arg6[%c2_120, %c0_121, %c0_122] : memref<4x64x256xbf16, #tpu.memory_space<vmem>>, vector<1x64x256xbf16>
    %264 = vector.shape_cast %263 : vector<1x64x256xbf16> to vector<64x256xbf16>
    %cst_123 = arith.constant dense<0.000000e+00> : vector<64x128xf32>
    %265 = tpu.matmul %264, %255, %cst_123 {dimension_numbers = #tpu.dot_dimension_numbers<[1], [0], [0], [1], [0, 0, 1, 1], [], []>} : vector<64x256xbf16>, vector<256x128xbf16>, vector<64x128xf32> -> vector<64x128xf32>
    %266 = arith.maximumf %262, %265 : vector<64x128xf32>
    %c3_124 = arith.constant 3 : index
    %c0_125 = arith.constant 0 : index
    %c0_126 = arith.constant 0 : index
    %267 = vector.load %arg6[%c3_124, %c0_125, %c0_126] : memref<4x64x256xbf16, #tpu.memory_space<vmem>>, vector<1x64x256xbf16>
    %268 = vector.shape_cast %267 : vector<1x64x256xbf16> to vector<64x256xbf16>
    %cst_127 = arith.constant dense<0.000000e+00> : vector<64x128xf32>
    %269 = tpu.matmul %268, %255, %cst_127 {dimension_numbers = #tpu.dot_dimension_numbers<[1], [0], [0], [1], [0, 0, 1, 1], [], []>} : vector<64x256xbf16>, vector<256x128xbf16>, vector<64x128xf32> -> vector<64x128xf32>
    %270 = arith.maximumf %266, %269 : vector<64x128xf32>
    %271 = tpu.iota {dimensions = array<i32: 0>} : vector<64x128xi32>
    %c3_i32 = arith.constant 3 : i32
    %272 = vector.broadcast %c3_i32 : i32 to vector<64x128xi32>
    %273 = arith.shrsi %271, %272 : vector<64x128xi32>
    %c7_i32 = arith.constant 7 : i32
    %274 = vector.broadcast %c7_i32 : i32 to vector<64x128xi32>
    %275 = arith.andi %271, %274 : vector<64x128xi32>
    %cst_128 = arith.constant 0.000000e+00 : f32
    %276 = vector.broadcast %cst_128 : f32 to vector<64x128xf32>
    %c9_i32 = arith.constant 9 : i32
    %277 = tpu.dynamic_rotate %270 by %c9_i32 dim 0 : vector<64x128xf32>, i32 -> vector<64x128xf32>
    %c-1_i32_129 = arith.constant -1 : i32
    %278 = vector.broadcast %c-1_i32_129 : i32 to vector<64x128xi32>
    %279 = arith.addi %273, %278 : vector<64x128xi32>
    %c0_i32_130 = arith.constant 0 : i32
    %280 = vector.broadcast %c0_i32_130 : i32 to vector<64x128xi32>
    %281 = arith.cmpi sge, %279, %280 : vector<64x128xi32>
    %c-1_i32_131 = arith.constant -1 : i32
    %282 = vector.broadcast %c-1_i32_131 : i32 to vector<64x128xi32>
    %283 = arith.addi %273, %282 : vector<64x128xi32>
    %c8_i32 = arith.constant 8 : i32
    %284 = vector.broadcast %c8_i32 : i32 to vector<64x128xi32>
    %285 = arith.cmpi slt, %283, %284 : vector<64x128xi32>
    %286 = arith.andi %281, %285 : vector<64x128xi1>
    %c-1_i32_132 = arith.constant -1 : i32
    %287 = vector.broadcast %c-1_i32_132 : i32 to vector<64x128xi32>
    %288 = arith.addi %275, %287 : vector<64x128xi32>
    %c0_i32_133 = arith.constant 0 : i32
    %289 = vector.broadcast %c0_i32_133 : i32 to vector<64x128xi32>
    %290 = arith.cmpi sge, %288, %289 : vector<64x128xi32>
    %291 = arith.andi %286, %290 : vector<64x128xi1>
    %c-1_i32_134 = arith.constant -1 : i32
    %292 = vector.broadcast %c-1_i32_134 : i32 to vector<64x128xi32>
    %293 = arith.addi %275, %292 : vector<64x128xi32>
    %c8_i32_135 = arith.constant 8 : i32
    %294 = vector.broadcast %c8_i32_135 : i32 to vector<64x128xi32>
    %295 = arith.cmpi slt, %293, %294 : vector<64x128xi32>
    %296 = arith.andi %291, %295 : vector<64x128xi1>
    %cst_136 = arith.constant 0.000000e+00 : f32
    %297 = vector.broadcast %cst_136 : f32 to vector<64x128xf32>
    %298 = arith.select %296, %277, %297 : vector<64x128xi1>, vector<64x128xf32>
    %299 = arith.truncf %298 : vector<64x128xf32> to vector<64x128xbf16>
    %c0_137 = arith.constant 0 : index
    %c0_138 = arith.constant 0 : index
    %c0_139 = arith.constant 0 : index
    %300 = vector.load %arg4[%c0_137, %c0_138, %c0_139] : memref<9x128x128xbf16, #tpu.memory_space<vmem>>, vector<1x128x128xbf16>
    %301 = vector.shape_cast %300 : vector<1x128x128xbf16> to vector<128x128xbf16>
    %cst_140 = arith.constant dense<0.000000e+00> : vector<64x128xf32>
    %302 = tpu.matmul %299, %301, %cst_140 {dimension_numbers = #tpu.dot_dimension_numbers<[1], [0], [0], [1], [0, 0, 1, 1], [], []>} : vector<64x128xbf16>, vector<128x128xbf16>, vector<64x128xf32> -> vector<64x128xf32>
    %303 = arith.addf %276, %302 : vector<64x128xf32>
    %c8_i32_141 = arith.constant 8 : i32
    %304 = tpu.dynamic_rotate %270 by %c8_i32_141 dim 0 : vector<64x128xf32>, i32 -> vector<64x128xf32>
    %c-1_i32_142 = arith.constant -1 : i32
    %305 = vector.broadcast %c-1_i32_142 : i32 to vector<64x128xi32>
    %306 = arith.addi %273, %305 : vector<64x128xi32>
    %c0_i32_143 = arith.constant 0 : i32
    %307 = vector.broadcast %c0_i32_143 : i32 to vector<64x128xi32>
    %308 = arith.cmpi sge, %306, %307 : vector<64x128xi32>
    %c-1_i32_144 = arith.constant -1 : i32
    %309 = vector.broadcast %c-1_i32_144 : i32 to vector<64x128xi32>
    %310 = arith.addi %273, %309 : vector<64x128xi32>
    %c8_i32_145 = arith.constant 8 : i32
    %311 = vector.broadcast %c8_i32_145 : i32 to vector<64x128xi32>
    %312 = arith.cmpi slt, %310, %311 : vector<64x128xi32>
    %313 = arith.andi %308, %312 : vector<64x128xi1>
    %c0_i32_146 = arith.constant 0 : i32
    %314 = vector.broadcast %c0_i32_146 : i32 to vector<64x128xi32>
    %315 = arith.addi %275, %314 : vector<64x128xi32>
    %c0_i32_147 = arith.constant 0 : i32
    %316 = vector.broadcast %c0_i32_147 : i32 to vector<64x128xi32>
    %317 = arith.cmpi sge, %315, %316 : vector<64x128xi32>
    %318 = arith.andi %313, %317 : vector<64x128xi1>
    %c0_i32_148 = arith.constant 0 : i32
    %319 = vector.broadcast %c0_i32_148 : i32 to vector<64x128xi32>
    %320 = arith.addi %275, %319 : vector<64x128xi32>
    %c8_i32_149 = arith.constant 8 : i32
    %321 = vector.broadcast %c8_i32_149 : i32 to vector<64x128xi32>
    %322 = arith.cmpi slt, %320, %321 : vector<64x128xi32>
    %323 = arith.andi %318, %322 : vector<64x128xi1>
    %cst_150 = arith.constant 0.000000e+00 : f32
    %324 = vector.broadcast %cst_150 : f32 to vector<64x128xf32>
    %325 = arith.select %323, %304, %324 : vector<64x128xi1>, vector<64x128xf32>
    %326 = arith.truncf %325 : vector<64x128xf32> to vector<64x128xbf16>
    %c1_151 = arith.constant 1 : index
    %c0_152 = arith.constant 0 : index
    %c0_153 = arith.constant 0 : index
    %327 = vector.load %arg4[%c1_151, %c0_152, %c0_153] : memref<9x128x128xbf16, #tpu.memory_space<vmem>>, vector<1x128x128xbf16>
    %328 = vector.shape_cast %327 : vector<1x128x128xbf16> to vector<128x128xbf16>
    %cst_154 = arith.constant dense<0.000000e+00> : vector<64x128xf32>
    %329 = tpu.matmul %326, %328, %cst_154 {dimension_numbers = #tpu.dot_dimension_numbers<[1], [0], [0], [1], [0, 0, 1, 1], [], []>} : vector<64x128xbf16>, vector<128x128xbf16>, vector<64x128xf32> -> vector<64x128xf32>
    %330 = arith.addf %303, %329 : vector<64x128xf32>
    %c7_i32_155 = arith.constant 7 : i32
    %331 = tpu.dynamic_rotate %270 by %c7_i32_155 dim 0 : vector<64x128xf32>, i32 -> vector<64x128xf32>
    %c-1_i32_156 = arith.constant -1 : i32
    %332 = vector.broadcast %c-1_i32_156 : i32 to vector<64x128xi32>
    %333 = arith.addi %273, %332 : vector<64x128xi32>
    %c0_i32_157 = arith.constant 0 : i32
    %334 = vector.broadcast %c0_i32_157 : i32 to vector<64x128xi32>
    %335 = arith.cmpi sge, %333, %334 : vector<64x128xi32>
    %c-1_i32_158 = arith.constant -1 : i32
    %336 = vector.broadcast %c-1_i32_158 : i32 to vector<64x128xi32>
    %337 = arith.addi %273, %336 : vector<64x128xi32>
    %c8_i32_159 = arith.constant 8 : i32
    %338 = vector.broadcast %c8_i32_159 : i32 to vector<64x128xi32>
    %339 = arith.cmpi slt, %337, %338 : vector<64x128xi32>
    %340 = arith.andi %335, %339 : vector<64x128xi1>
    %c1_i32_160 = arith.constant 1 : i32
    %341 = vector.broadcast %c1_i32_160 : i32 to vector<64x128xi32>
    %342 = arith.addi %275, %341 : vector<64x128xi32>
    %c0_i32_161 = arith.constant 0 : i32
    %343 = vector.broadcast %c0_i32_161 : i32 to vector<64x128xi32>
    %344 = arith.cmpi sge, %342, %343 : vector<64x128xi32>
    %345 = arith.andi %340, %344 : vector<64x128xi1>
    %c1_i32_162 = arith.constant 1 : i32
    %346 = vector.broadcast %c1_i32_162 : i32 to vector<64x128xi32>
    %347 = arith.addi %275, %346 : vector<64x128xi32>
    %c8_i32_163 = arith.constant 8 : i32
    %348 = vector.broadcast %c8_i32_163 : i32 to vector<64x128xi32>
    %349 = arith.cmpi slt, %347, %348 : vector<64x128xi32>
    %350 = arith.andi %345, %349 : vector<64x128xi1>
    %cst_164 = arith.constant 0.000000e+00 : f32
    %351 = vector.broadcast %cst_164 : f32 to vector<64x128xf32>
    %352 = arith.select %350, %331, %351 : vector<64x128xi1>, vector<64x128xf32>
    %353 = arith.truncf %352 : vector<64x128xf32> to vector<64x128xbf16>
    %c2_165 = arith.constant 2 : index
    %c0_166 = arith.constant 0 : index
    %c0_167 = arith.constant 0 : index
    %354 = vector.load %arg4[%c2_165, %c0_166, %c0_167] : memref<9x128x128xbf16, #tpu.memory_space<vmem>>, vector<1x128x128xbf16>
    %355 = vector.shape_cast %354 : vector<1x128x128xbf16> to vector<128x128xbf16>
    %cst_168 = arith.constant dense<0.000000e+00> : vector<64x128xf32>
    %356 = tpu.matmul %353, %355, %cst_168 {dimension_numbers = #tpu.dot_dimension_numbers<[1], [0], [0], [1], [0, 0, 1, 1], [], []>} : vector<64x128xbf16>, vector<128x128xbf16>, vector<64x128xf32> -> vector<64x128xf32>
    %357 = arith.addf %330, %356 : vector<64x128xf32>
    %c1_i32_169 = arith.constant 1 : i32
    %358 = tpu.dynamic_rotate %270 by %c1_i32_169 dim 0 : vector<64x128xf32>, i32 -> vector<64x128xf32>
    %c0_i32_170 = arith.constant 0 : i32
    %359 = vector.broadcast %c0_i32_170 : i32 to vector<64x128xi32>
    %360 = arith.addi %273, %359 : vector<64x128xi32>
    %c0_i32_171 = arith.constant 0 : i32
    %361 = vector.broadcast %c0_i32_171 : i32 to vector<64x128xi32>
    %362 = arith.cmpi sge, %360, %361 : vector<64x128xi32>
    %c0_i32_172 = arith.constant 0 : i32
    %363 = vector.broadcast %c0_i32_172 : i32 to vector<64x128xi32>
    %364 = arith.addi %273, %363 : vector<64x128xi32>
    %c8_i32_173 = arith.constant 8 : i32
    %365 = vector.broadcast %c8_i32_173 : i32 to vector<64x128xi32>
    %366 = arith.cmpi slt, %364, %365 : vector<64x128xi32>
    %367 = arith.andi %362, %366 : vector<64x128xi1>
    %c-1_i32_174 = arith.constant -1 : i32
    %368 = vector.broadcast %c-1_i32_174 : i32 to vector<64x128xi32>
    %369 = arith.addi %275, %368 : vector<64x128xi32>
    %c0_i32_175 = arith.constant 0 : i32
    %370 = vector.broadcast %c0_i32_175 : i32 to vector<64x128xi32>
    %371 = arith.cmpi sge, %369, %370 : vector<64x128xi32>
    %372 = arith.andi %367, %371 : vector<64x128xi1>
    %c-1_i32_176 = arith.constant -1 : i32
    %373 = vector.broadcast %c-1_i32_176 : i32 to vector<64x128xi32>
    %374 = arith.addi %275, %373 : vector<64x128xi32>
    %c8_i32_177 = arith.constant 8 : i32
    %375 = vector.broadcast %c8_i32_177 : i32 to vector<64x128xi32>
    %376 = arith.cmpi slt, %374, %375 : vector<64x128xi32>
    %377 = arith.andi %372, %376 : vector<64x128xi1>
    %cst_178 = arith.constant 0.000000e+00 : f32
    %378 = vector.broadcast %cst_178 : f32 to vector<64x128xf32>
    %379 = arith.select %377, %358, %378 : vector<64x128xi1>, vector<64x128xf32>
    %380 = arith.truncf %379 : vector<64x128xf32> to vector<64x128xbf16>
    %c3_179 = arith.constant 3 : index
    %c0_180 = arith.constant 0 : index
    %c0_181 = arith.constant 0 : index
    %381 = vector.load %arg4[%c3_179, %c0_180, %c0_181] : memref<9x128x128xbf16, #tpu.memory_space<vmem>>, vector<1x128x128xbf16>
    %382 = vector.shape_cast %381 : vector<1x128x128xbf16> to vector<128x128xbf16>
    %cst_182 = arith.constant dense<0.000000e+00> : vector<64x128xf32>
    %383 = tpu.matmul %380, %382, %cst_182 {dimension_numbers = #tpu.dot_dimension_numbers<[1], [0], [0], [1], [0, 0, 1, 1], [], []>} : vector<64x128xbf16>, vector<128x128xbf16>, vector<64x128xf32> -> vector<64x128xf32>
    %384 = arith.addf %357, %383 : vector<64x128xf32>
    %c0_i32_183 = arith.constant 0 : i32
    %385 = vector.broadcast %c0_i32_183 : i32 to vector<64x128xi32>
    %386 = arith.addi %273, %385 : vector<64x128xi32>
    %c0_i32_184 = arith.constant 0 : i32
    %387 = vector.broadcast %c0_i32_184 : i32 to vector<64x128xi32>
    %388 = arith.cmpi sge, %386, %387 : vector<64x128xi32>
    %c0_i32_185 = arith.constant 0 : i32
    %389 = vector.broadcast %c0_i32_185 : i32 to vector<64x128xi32>
    %390 = arith.addi %273, %389 : vector<64x128xi32>
    %c8_i32_186 = arith.constant 8 : i32
    %391 = vector.broadcast %c8_i32_186 : i32 to vector<64x128xi32>
    %392 = arith.cmpi slt, %390, %391 : vector<64x128xi32>
    %393 = arith.andi %388, %392 : vector<64x128xi1>
    %c0_i32_187 = arith.constant 0 : i32
    %394 = vector.broadcast %c0_i32_187 : i32 to vector<64x128xi32>
    %395 = arith.addi %275, %394 : vector<64x128xi32>
    %c0_i32_188 = arith.constant 0 : i32
    %396 = vector.broadcast %c0_i32_188 : i32 to vector<64x128xi32>
    %397 = arith.cmpi sge, %395, %396 : vector<64x128xi32>
    %398 = arith.andi %393, %397 : vector<64x128xi1>
    %c0_i32_189 = arith.constant 0 : i32
    %399 = vector.broadcast %c0_i32_189 : i32 to vector<64x128xi32>
    %400 = arith.addi %275, %399 : vector<64x128xi32>
    %c8_i32_190 = arith.constant 8 : i32
    %401 = vector.broadcast %c8_i32_190 : i32 to vector<64x128xi32>
    %402 = arith.cmpi slt, %400, %401 : vector<64x128xi32>
    %403 = arith.andi %398, %402 : vector<64x128xi1>
    %cst_191 = arith.constant 0.000000e+00 : f32
    %404 = vector.broadcast %cst_191 : f32 to vector<64x128xf32>
    %405 = arith.select %403, %270, %404 : vector<64x128xi1>, vector<64x128xf32>
    %406 = arith.truncf %405 : vector<64x128xf32> to vector<64x128xbf16>
    %c4_192 = arith.constant 4 : index
    %c0_193 = arith.constant 0 : index
    %c0_194 = arith.constant 0 : index
    %407 = vector.load %arg4[%c4_192, %c0_193, %c0_194] : memref<9x128x128xbf16, #tpu.memory_space<vmem>>, vector<1x128x128xbf16>
    %408 = vector.shape_cast %407 : vector<1x128x128xbf16> to vector<128x128xbf16>
    %cst_195 = arith.constant dense<0.000000e+00> : vector<64x128xf32>
    %409 = tpu.matmul %406, %408, %cst_195 {dimension_numbers = #tpu.dot_dimension_numbers<[1], [0], [0], [1], [0, 0, 1, 1], [], []>} : vector<64x128xbf16>, vector<128x128xbf16>, vector<64x128xf32> -> vector<64x128xf32>
    %410 = arith.addf %384, %409 : vector<64x128xf32>
    %c63_i32 = arith.constant 63 : i32
    %411 = tpu.dynamic_rotate %270 by %c63_i32 dim 0 : vector<64x128xf32>, i32 -> vector<64x128xf32>
    %c0_i32_196 = arith.constant 0 : i32
    %412 = vector.broadcast %c0_i32_196 : i32 to vector<64x128xi32>
    %413 = arith.addi %273, %412 : vector<64x128xi32>
    %c0_i32_197 = arith.constant 0 : i32
    %414 = vector.broadcast %c0_i32_197 : i32 to vector<64x128xi32>
    %415 = arith.cmpi sge, %413, %414 : vector<64x128xi32>
    %c0_i32_198 = arith.constant 0 : i32
    %416 = vector.broadcast %c0_i32_198 : i32 to vector<64x128xi32>
    %417 = arith.addi %273, %416 : vector<64x128xi32>
    %c8_i32_199 = arith.constant 8 : i32
    %418 = vector.broadcast %c8_i32_199 : i32 to vector<64x128xi32>
    %419 = arith.cmpi slt, %417, %418 : vector<64x128xi32>
    %420 = arith.andi %415, %419 : vector<64x128xi1>
    %c1_i32_200 = arith.constant 1 : i32
    %421 = vector.broadcast %c1_i32_200 : i32 to vector<64x128xi32>
    %422 = arith.addi %275, %421 : vector<64x128xi32>
    %c0_i32_201 = arith.constant 0 : i32
    %423 = vector.broadcast %c0_i32_201 : i32 to vector<64x128xi32>
    %424 = arith.cmpi sge, %422, %423 : vector<64x128xi32>
    %425 = arith.andi %420, %424 : vector<64x128xi1>
    %c1_i32_202 = arith.constant 1 : i32
    %426 = vector.broadcast %c1_i32_202 : i32 to vector<64x128xi32>
    %427 = arith.addi %275, %426 : vector<64x128xi32>
    %c8_i32_203 = arith.constant 8 : i32
    %428 = vector.broadcast %c8_i32_203 : i32 to vector<64x128xi32>
    %429 = arith.cmpi slt, %427, %428 : vector<64x128xi32>
    %430 = arith.andi %425, %429 : vector<64x128xi1>
    %cst_204 = arith.constant 0.000000e+00 : f32
    %431 = vector.broadcast %cst_204 : f32 to vector<64x128xf32>
    %432 = arith.select %430, %411, %431 : vector<64x128xi1>, vector<64x128xf32>
    %433 = arith.truncf %432 : vector<64x128xf32> to vector<64x128xbf16>
    %c5_205 = arith.constant 5 : index
    %c0_206 = arith.constant 0 : index
    %c0_207 = arith.constant 0 : index
    %434 = vector.load %arg4[%c5_205, %c0_206, %c0_207] : memref<9x128x128xbf16, #tpu.memory_space<vmem>>, vector<1x128x128xbf16>
    %435 = vector.shape_cast %434 : vector<1x128x128xbf16> to vector<128x128xbf16>
    %cst_208 = arith.constant dense<0.000000e+00> : vector<64x128xf32>
    %436 = tpu.matmul %433, %435, %cst_208 {dimension_numbers = #tpu.dot_dimension_numbers<[1], [0], [0], [1], [0, 0, 1, 1], [], []>} : vector<64x128xbf16>, vector<128x128xbf16>, vector<64x128xf32> -> vector<64x128xf32>
    %437 = arith.addf %410, %436 : vector<64x128xf32>
    %c57_i32 = arith.constant 57 : i32
    %438 = tpu.dynamic_rotate %270 by %c57_i32 dim 0 : vector<64x128xf32>, i32 -> vector<64x128xf32>
    %c1_i32_209 = arith.constant 1 : i32
    %439 = vector.broadcast %c1_i32_209 : i32 to vector<64x128xi32>
    %440 = arith.addi %273, %439 : vector<64x128xi32>
    %c0_i32_210 = arith.constant 0 : i32
    %441 = vector.broadcast %c0_i32_210 : i32 to vector<64x128xi32>
    %442 = arith.cmpi sge, %440, %441 : vector<64x128xi32>
    %c1_i32_211 = arith.constant 1 : i32
    %443 = vector.broadcast %c1_i32_211 : i32 to vector<64x128xi32>
    %444 = arith.addi %273, %443 : vector<64x128xi32>
    %c8_i32_212 = arith.constant 8 : i32
    %445 = vector.broadcast %c8_i32_212 : i32 to vector<64x128xi32>
    %446 = arith.cmpi slt, %444, %445 : vector<64x128xi32>
    %447 = arith.andi %442, %446 : vector<64x128xi1>
    %c-1_i32_213 = arith.constant -1 : i32
    %448 = vector.broadcast %c-1_i32_213 : i32 to vector<64x128xi32>
    %449 = arith.addi %275, %448 : vector<64x128xi32>
    %c0_i32_214 = arith.constant 0 : i32
    %450 = vector.broadcast %c0_i32_214 : i32 to vector<64x128xi32>
    %451 = arith.cmpi sge, %449, %450 : vector<64x128xi32>
    %452 = arith.andi %447, %451 : vector<64x128xi1>
    %c-1_i32_215 = arith.constant -1 : i32
    %453 = vector.broadcast %c-1_i32_215 : i32 to vector<64x128xi32>
    %454 = arith.addi %275, %453 : vector<64x128xi32>
    %c8_i32_216 = arith.constant 8 : i32
    %455 = vector.broadcast %c8_i32_216 : i32 to vector<64x128xi32>
    %456 = arith.cmpi slt, %454, %455 : vector<64x128xi32>
    %457 = arith.andi %452, %456 : vector<64x128xi1>
    %cst_217 = arith.constant 0.000000e+00 : f32
    %458 = vector.broadcast %cst_217 : f32 to vector<64x128xf32>
    %459 = arith.select %457, %438, %458 : vector<64x128xi1>, vector<64x128xf32>
    %460 = arith.truncf %459 : vector<64x128xf32> to vector<64x128xbf16>
    %c6_218 = arith.constant 6 : index
    %c0_219 = arith.constant 0 : index
    %c0_220 = arith.constant 0 : index
    %461 = vector.load %arg4[%c6_218, %c0_219, %c0_220] : memref<9x128x128xbf16, #tpu.memory_space<vmem>>, vector<1x128x128xbf16>
    %462 = vector.shape_cast %461 : vector<1x128x128xbf16> to vector<128x128xbf16>
    %cst_221 = arith.constant dense<0.000000e+00> : vector<64x128xf32>
    %463 = tpu.matmul %460, %462, %cst_221 {dimension_numbers = #tpu.dot_dimension_numbers<[1], [0], [0], [1], [0, 0, 1, 1], [], []>} : vector<64x128xbf16>, vector<128x128xbf16>, vector<64x128xf32> -> vector<64x128xf32>
    %464 = arith.addf %437, %463 : vector<64x128xf32>
    %c56_i32 = arith.constant 56 : i32
    %465 = tpu.dynamic_rotate %270 by %c56_i32 dim 0 : vector<64x128xf32>, i32 -> vector<64x128xf32>
    %c1_i32_222 = arith.constant 1 : i32
    %466 = vector.broadcast %c1_i32_222 : i32 to vector<64x128xi32>
    %467 = arith.addi %273, %466 : vector<64x128xi32>
    %c0_i32_223 = arith.constant 0 : i32
    %468 = vector.broadcast %c0_i32_223 : i32 to vector<64x128xi32>
    %469 = arith.cmpi sge, %467, %468 : vector<64x128xi32>
    %c1_i32_224 = arith.constant 1 : i32
    %470 = vector.broadcast %c1_i32_224 : i32 to vector<64x128xi32>
    %471 = arith.addi %273, %470 : vector<64x128xi32>
    %c8_i32_225 = arith.constant 8 : i32
    %472 = vector.broadcast %c8_i32_225 : i32 to vector<64x128xi32>
    %473 = arith.cmpi slt, %471, %472 : vector<64x128xi32>
    %474 = arith.andi %469, %473 : vector<64x128xi1>
    %c0_i32_226 = arith.constant 0 : i32
    %475 = vector.broadcast %c0_i32_226 : i32 to vector<64x128xi32>
    %476 = arith.addi %275, %475 : vector<64x128xi32>
    %c0_i32_227 = arith.constant 0 : i32
    %477 = vector.broadcast %c0_i32_227 : i32 to vector<64x128xi32>
    %478 = arith.cmpi sge, %476, %477 : vector<64x128xi32>
    %479 = arith.andi %474, %478 : vector<64x128xi1>
    %c0_i32_228 = arith.constant 0 : i32
    %480 = vector.broadcast %c0_i32_228 : i32 to vector<64x128xi32>
    %481 = arith.addi %275, %480 : vector<64x128xi32>
    %c8_i32_229 = arith.constant 8 : i32
    %482 = vector.broadcast %c8_i32_229 : i32 to vector<64x128xi32>
    %483 = arith.cmpi slt, %481, %482 : vector<64x128xi32>
    %484 = arith.andi %479, %483 : vector<64x128xi1>
    %cst_230 = arith.constant 0.000000e+00 : f32
    %485 = vector.broadcast %cst_230 : f32 to vector<64x128xf32>
    %486 = arith.select %484, %465, %485 : vector<64x128xi1>, vector<64x128xf32>
    %487 = arith.truncf %486 : vector<64x128xf32> to vector<64x128xbf16>
    %c7_231 = arith.constant 7 : index
    %c0_232 = arith.constant 0 : index
    %c0_233 = arith.constant 0 : index
    %488 = vector.load %arg4[%c7_231, %c0_232, %c0_233] : memref<9x128x128xbf16, #tpu.memory_space<vmem>>, vector<1x128x128xbf16>
    %489 = vector.shape_cast %488 : vector<1x128x128xbf16> to vector<128x128xbf16>
    %cst_234 = arith.constant dense<0.000000e+00> : vector<64x128xf32>
    %490 = tpu.matmul %487, %489, %cst_234 {dimension_numbers = #tpu.dot_dimension_numbers<[1], [0], [0], [1], [0, 0, 1, 1], [], []>} : vector<64x128xbf16>, vector<128x128xbf16>, vector<64x128xf32> -> vector<64x128xf32>
    %491 = arith.addf %464, %490 : vector<64x128xf32>
    %c55_i32 = arith.constant 55 : i32
    %492 = tpu.dynamic_rotate %270 by %c55_i32 dim 0 : vector<64x128xf32>, i32 -> vector<64x128xf32>
    %c1_i32_235 = arith.constant 1 : i32
    %493 = vector.broadcast %c1_i32_235 : i32 to vector<64x128xi32>
    %494 = arith.addi %273, %493 : vector<64x128xi32>
    %c0_i32_236 = arith.constant 0 : i32
    %495 = vector.broadcast %c0_i32_236 : i32 to vector<64x128xi32>
    %496 = arith.cmpi sge, %494, %495 : vector<64x128xi32>
    %c1_i32_237 = arith.constant 1 : i32
    %497 = vector.broadcast %c1_i32_237 : i32 to vector<64x128xi32>
    %498 = arith.addi %273, %497 : vector<64x128xi32>
    %c8_i32_238 = arith.constant 8 : i32
    %499 = vector.broadcast %c8_i32_238 : i32 to vector<64x128xi32>
    %500 = arith.cmpi slt, %498, %499 : vector<64x128xi32>
    %501 = arith.andi %496, %500 : vector<64x128xi1>
    %c1_i32_239 = arith.constant 1 : i32
    %502 = vector.broadcast %c1_i32_239 : i32 to vector<64x128xi32>
    %503 = arith.addi %275, %502 : vector<64x128xi32>
    %c0_i32_240 = arith.constant 0 : i32
    %504 = vector.broadcast %c0_i32_240 : i32 to vector<64x128xi32>
    %505 = arith.cmpi sge, %503, %504 : vector<64x128xi32>
    %506 = arith.andi %501, %505 : vector<64x128xi1>
    %c1_i32_241 = arith.constant 1 : i32
    %507 = vector.broadcast %c1_i32_241 : i32 to vector<64x128xi32>
    %508 = arith.addi %275, %507 : vector<64x128xi32>
    %c8_i32_242 = arith.constant 8 : i32
    %509 = vector.broadcast %c8_i32_242 : i32 to vector<64x128xi32>
    %510 = arith.cmpi slt, %508, %509 : vector<64x128xi32>
    %511 = arith.andi %506, %510 : vector<64x128xi1>
    %cst_243 = arith.constant 0.000000e+00 : f32
    %512 = vector.broadcast %cst_243 : f32 to vector<64x128xf32>
    %513 = arith.select %511, %492, %512 : vector<64x128xi1>, vector<64x128xf32>
    %514 = arith.truncf %513 : vector<64x128xf32> to vector<64x128xbf16>
    %c8_244 = arith.constant 8 : index
    %c0_245 = arith.constant 0 : index
    %c0_246 = arith.constant 0 : index
    %515 = vector.load %arg4[%c8_244, %c0_245, %c0_246] : memref<9x128x128xbf16, #tpu.memory_space<vmem>>, vector<1x128x128xbf16>
    %516 = vector.shape_cast %515 : vector<1x128x128xbf16> to vector<128x128xbf16>
    %cst_247 = arith.constant dense<0.000000e+00> : vector<64x128xf32>
    %517 = tpu.matmul %514, %516, %cst_247 {dimension_numbers = #tpu.dot_dimension_numbers<[1], [0], [0], [1], [0, 0, 1, 1], [], []>} : vector<64x128xbf16>, vector<128x128xbf16>, vector<64x128xf32> -> vector<64x128xf32>
    %518 = arith.addf %491, %517 : vector<64x128xf32>
    %c0_248 = arith.constant 0 : index
    %c0_249 = arith.constant 0 : index
    %519 = vector.load %arg5[%c0_248, %c0_249] : memref<1x128xf32, #tpu.memory_space<vmem>>, vector<1x128xf32>
    %520 = vector.broadcast %519 : vector<1x128xf32> to vector<64x128xf32>
    %521 = arith.addf %518, %520 : vector<64x128xf32>
    %cst_250 = arith.constant 0.000000e+00 : f32
    %522 = vector.broadcast %cst_250 : f32 to vector<64x128xf32>
    %523 = arith.maximumf %521, %522 : vector<64x128xf32>
    %524 = arith.truncf %523 : vector<64x128xf32> to vector<64x128xbf16>
    %c0_251 = arith.constant 0 : index
    %c0_252 = arith.constant 0 : index
    %c0_253 = arith.constant 0 : index
    %525 = vector.load %arg7[%c0_251, %c0_252, %c0_253] : memref<4x16x64xbf16, #tpu.memory_space<vmem>>, vector<1x16x64xbf16>
    %526 = vector.shape_cast %525 : vector<1x16x64xbf16> to vector<16x64xbf16>
    %cst_254 = arith.constant dense<0.000000e+00> : vector<16x128xf32>
    %527 = tpu.matmul %526, %524, %cst_254 {dimension_numbers = #tpu.dot_dimension_numbers<[1], [0], [0], [1], [0, 0, 1, 1], [], []>} : vector<16x64xbf16>, vector<64x128xbf16>, vector<16x128xf32> -> vector<16x128xf32>
    %c1_255 = arith.constant 1 : index
    %c0_256 = arith.constant 0 : index
    %c0_257 = arith.constant 0 : index
    %528 = vector.load %arg7[%c1_255, %c0_256, %c0_257] : memref<4x16x64xbf16, #tpu.memory_space<vmem>>, vector<1x16x64xbf16>
    %529 = vector.shape_cast %528 : vector<1x16x64xbf16> to vector<16x64xbf16>
    %cst_258 = arith.constant dense<0.000000e+00> : vector<16x128xf32>
    %530 = tpu.matmul %529, %524, %cst_258 {dimension_numbers = #tpu.dot_dimension_numbers<[1], [0], [0], [1], [0, 0, 1, 1], [], []>} : vector<16x64xbf16>, vector<64x128xbf16>, vector<16x128xf32> -> vector<16x128xf32>
    %531 = arith.maximumf %527, %530 : vector<16x128xf32>
    %c2_259 = arith.constant 2 : index
    %c0_260 = arith.constant 0 : index
    %c0_261 = arith.constant 0 : index
    %532 = vector.load %arg7[%c2_259, %c0_260, %c0_261] : memref<4x16x64xbf16, #tpu.memory_space<vmem>>, vector<1x16x64xbf16>
    %533 = vector.shape_cast %532 : vector<1x16x64xbf16> to vector<16x64xbf16>
    %cst_262 = arith.constant dense<0.000000e+00> : vector<16x128xf32>
    %534 = tpu.matmul %533, %524, %cst_262 {dimension_numbers = #tpu.dot_dimension_numbers<[1], [0], [0], [1], [0, 0, 1, 1], [], []>} : vector<16x64xbf16>, vector<64x128xbf16>, vector<16x128xf32> -> vector<16x128xf32>
    %535 = arith.maximumf %531, %534 : vector<16x128xf32>
    %c3_263 = arith.constant 3 : index
    %c0_264 = arith.constant 0 : index
    %c0_265 = arith.constant 0 : index
    %536 = vector.load %arg7[%c3_263, %c0_264, %c0_265] : memref<4x16x64xbf16, #tpu.memory_space<vmem>>, vector<1x16x64xbf16>
    %537 = vector.shape_cast %536 : vector<1x16x64xbf16> to vector<16x64xbf16>
    %cst_266 = arith.constant dense<0.000000e+00> : vector<16x128xf32>
    %538 = tpu.matmul %537, %524, %cst_266 {dimension_numbers = #tpu.dot_dimension_numbers<[1], [0], [0], [1], [0, 0, 1, 1], [], []>} : vector<16x64xbf16>, vector<64x128xbf16>, vector<16x128xf32> -> vector<16x128xf32>
    %539 = arith.maximumf %535, %538 : vector<16x128xf32>
    %540 = arith.truncf %539 : vector<16x128xf32> to vector<16x128xbf16>
    %c0_267 = arith.constant 0 : index
    %c0_268 = arith.constant 0 : index
    %541 = vector.load %arg8[%c0_267, %c0_268] : memref<16x128xbf16, #tpu.memory_space<vmem>>, vector<16x128xbf16>
    tpu.vector_store %arg8[%c0_267, %c0_268], %540 {strides = array<i32>} : memref<16x128xbf16, #tpu.memory_space<vmem>>, vector<16x128xbf16>,
    return
  }
  func.func @transform_0(%arg0: i32) -> (i32, i32) {
    %c0_i32 = arith.constant 0 : i32
    %c0_i32_0 = arith.constant 0 : i32
    return %arg0, %c0_i32 : i32, i32
  }
  func.func @transform_1(%arg0: i32) -> (i32, i32, i32) {
    %c0_i32 = arith.constant 0 : i32
    %c0_i32_0 = arith.constant 0 : i32
    %c0_i32_1 = arith.constant 0 : i32
    %c0_i32_2 = arith.constant 0 : i32
    return %c0_i32, %c0_i32_0, %c0_i32_1 : i32, i32, i32
  }
  func.func @transform_2(%arg0: i32) -> (i32, i32) {
    %c0_i32 = arith.constant 0 : i32
    %c0_i32_0 = arith.constant 0 : i32
    %c0_i32_1 = arith.constant 0 : i32
    return %c0_i32, %c0_i32_0 : i32, i32
  }
  func.func @transform_3(%arg0: i32) -> (i32, i32, i32) {
    %c0_i32 = arith.constant 0 : i32
    %c0_i32_0 = arith.constant 0 : i32
    %c0_i32_1 = arith.constant 0 : i32
    %c0_i32_2 = arith.constant 0 : i32
    return %c0_i32, %c0_i32_0, %c0_i32_1 : i32, i32, i32
  }
  func.func @transform_4(%arg0: i32) -> (i32, i32) {
    %c0_i32 = arith.constant 0 : i32
    %c0_i32_0 = arith.constant 0 : i32
    %c0_i32_1 = arith.constant 0 : i32
    return %c0_i32, %c0_i32_0 : i32, i32
  }
  func.func @transform_5(%arg0: i32) -> (i32, i32, i32) {
    %c0_i32 = arith.constant 0 : i32
    %c0_i32_0 = arith.constant 0 : i32
    %c0_i32_1 = arith.constant 0 : i32
    %c0_i32_2 = arith.constant 0 : i32
    return %c0_i32, %c0_i32_0, %c0_i32_1 : i32, i32, i32
  }
  func.func @transform_6(%arg0: i32) -> (i32, i32, i32) {
    %c0_i32 = arith.constant 0 : i32
    %c0_i32_0 = arith.constant 0 : i32
    %c0_i32_1 = arith.constant 0 : i32
    %c0_i32_2 = arith.constant 0 : i32
    return %c0_i32, %c0_i32_0, %c0_i32_1 : i32, i32, i32
  }
  func.func @transform_7(%arg0: i32) -> (i32, i32) {
    %c0_i32 = arith.constant 0 : i32
    %c0_i32_0 = arith.constant 0 : i32
    return %arg0, %c0_i32 : i32, i32
  }
}

module attributes {stable_mosaic.version = 11 : i64} {
  func.func @_head_kernel(%arg0: i32, %arg1: memref<2x2048xbf16, #tpu.memory_space<vmem>>, %arg2: memref<2048x128xbf16, #tpu.memory_space<vmem>>, %arg3: memref<1x128xf32, #tpu.memory_space<vmem>>, %arg4: memref<128x128xbf16, #tpu.memory_space<vmem>>, %arg5: memref<1x128xf32, #tpu.memory_space<vmem>>, %arg6: memref<2x128xf32, #tpu.memory_space<vmem>>, %arg7: memref<2x128xf32, #tpu.memory_space<vmem>>) attributes {dimension_semantics = [#tpu.dimension_semantics<arbitrary>], iteration_bounds = array<i64: 1>, scalar_prefetch = 0 : i64, scratch_operands = 0 : i64, tpu.core_type = #tpu.core_type<tc>, window_params = [{pipeline_mode = #tpu.pipeline_mode<synchronous>, transform_indices = @transform_0, window_bounds = array<i64: 2, 2048>}, {pipeline_mode = #tpu.pipeline_mode<synchronous>, transform_indices = @transform_1, window_bounds = array<i64: 2048, 128>}, {pipeline_mode = #tpu.pipeline_mode<synchronous>, transform_indices = @transform_2, window_bounds = array<i64: 1, 128>}, {pipeline_mode = #tpu.pipeline_mode<synchronous>, transform_indices = @transform_3, window_bounds = array<i64: 128, 128>}, {pipeline_mode = #tpu.pipeline_mode<synchronous>, transform_indices = @transform_4, window_bounds = array<i64: 1, 128>}, {pipeline_mode = #tpu.pipeline_mode<synchronous>, transform_indices = @transform_5, window_bounds = array<i64: 2, 128>}, {pipeline_mode = #tpu.pipeline_mode<synchronous>, transform_indices = @transform_6, window_bounds = array<i64: 2, 128>}]} {
    %c0 = arith.constant 0 : index
    %c0_0 = arith.constant 0 : index
    %0 = vector.load %arg1[%c0, %c0_0] : memref<2x2048xbf16, #tpu.memory_space<vmem>>, vector<2x2048xbf16>
    %c0_1 = arith.constant 0 : index
    %c0_2 = arith.constant 0 : index
    %1 = vector.load %arg2[%c0_1, %c0_2] : memref<2048x128xbf16, #tpu.memory_space<vmem>>, vector<2048x128xbf16>
    %cst = arith.constant dense<0.000000e+00> : vector<2x128xf32>
    %2 = tpu.matmul %0, %1, %cst {dimension_numbers = #tpu.dot_dimension_numbers<[1], [0], [0], [1], [0, 0, 1, 1], [], []>} : vector<2x2048xbf16>, vector<2048x128xbf16>, vector<2x128xf32> -> vector<2x128xf32>
    %c0_3 = arith.constant 0 : index
    %c0_4 = arith.constant 0 : index
    %3 = vector.load %arg3[%c0_3, %c0_4] : memref<1x128xf32, #tpu.memory_space<vmem>>, vector<1x128xf32>
    %4 = vector.broadcast %3 : vector<1x128xf32> to vector<2x128xf32>
    %5 = arith.addf %2, %4 : vector<2x128xf32>
    %cst_5 = arith.constant 0.000000e+00 : f32
    %6 = vector.broadcast %cst_5 : f32 to vector<2x128xf32>
    %7 = arith.maximumf %5, %6 : vector<2x128xf32>
    %c0_6 = arith.constant 0 : index
    %c0_7 = arith.constant 0 : index
    %8 = vector.load %arg6[%c0_6, %c0_7] : memref<2x128xf32, #tpu.memory_space<vmem>>, vector<2x128xf32>
    tpu.vector_store %arg6[%c0_6, %c0_7], %7 {strides = array<i32>} : memref<2x128xf32, #tpu.memory_space<vmem>>, vector<2x128xf32>,
    %9 = arith.truncf %7 : vector<2x128xf32> to vector<2x128xbf16>
    %c0_8 = arith.constant 0 : index
    %c0_9 = arith.constant 0 : index
    %10 = vector.load %arg4[%c0_8, %c0_9] : memref<128x128xbf16, #tpu.memory_space<vmem>>, vector<128x128xbf16>
    %cst_10 = arith.constant dense<0.000000e+00> : vector<2x128xf32>
    %11 = tpu.matmul %9, %10, %cst_10 {dimension_numbers = #tpu.dot_dimension_numbers<[1], [0], [0], [1], [0, 0, 1, 1], [], []>} : vector<2x128xbf16>, vector<128x128xbf16>, vector<2x128xf32> -> vector<2x128xf32>
    %c0_11 = arith.constant 0 : index
    %c0_12 = arith.constant 0 : index
    %12 = vector.load %arg5[%c0_11, %c0_12] : memref<1x128xf32, #tpu.memory_space<vmem>>, vector<1x128xf32>
    %13 = vector.broadcast %12 : vector<1x128xf32> to vector<2x128xf32>
    %14 = arith.addf %11, %13 : vector<2x128xf32>
    %c0_13 = arith.constant 0 : index
    %c0_14 = arith.constant 0 : index
    %15 = vector.load %arg7[%c0_13, %c0_14] : memref<2x128xf32, #tpu.memory_space<vmem>>, vector<2x128xf32>
    tpu.vector_store %arg7[%c0_13, %c0_14], %14 {strides = array<i32>} : memref<2x128xf32, #tpu.memory_space<vmem>>, vector<2x128xf32>,
    return
  }
  func.func @transform_0(%arg0: i32) -> (i32, i32) {
    %c0_i32 = arith.constant 0 : i32
    %c0_i32_0 = arith.constant 0 : i32
    %c0_i32_1 = arith.constant 0 : i32
    return %c0_i32, %c0_i32_0 : i32, i32
  }
  func.func @transform_1(%arg0: i32) -> (i32, i32) {
    %c0_i32 = arith.constant 0 : i32
    %c0_i32_0 = arith.constant 0 : i32
    %c0_i32_1 = arith.constant 0 : i32
    return %c0_i32, %c0_i32_0 : i32, i32
  }
  func.func @transform_2(%arg0: i32) -> (i32, i32) {
    %c0_i32 = arith.constant 0 : i32
    %c0_i32_0 = arith.constant 0 : i32
    %c0_i32_1 = arith.constant 0 : i32
    return %c0_i32, %c0_i32_0 : i32, i32
  }
  func.func @transform_3(%arg0: i32) -> (i32, i32) {
    %c0_i32 = arith.constant 0 : i32
    %c0_i32_0 = arith.constant 0 : i32
    %c0_i32_1 = arith.constant 0 : i32
    return %c0_i32, %c0_i32_0 : i32, i32
  }
  func.func @transform_4(%arg0: i32) -> (i32, i32) {
    %c0_i32 = arith.constant 0 : i32
    %c0_i32_0 = arith.constant 0 : i32
    %c0_i32_1 = arith.constant 0 : i32
    return %c0_i32, %c0_i32_0 : i32, i32
  }
  func.func @transform_5(%arg0: i32) -> (i32, i32) {
    %c0_i32 = arith.constant 0 : i32
    %c0_i32_0 = arith.constant 0 : i32
    %c0_i32_1 = arith.constant 0 : i32
    return %c0_i32, %c0_i32_0 : i32, i32
  }
  func.func @transform_6(%arg0: i32) -> (i32, i32) {
    %c0_i32 = arith.constant 0 : i32
    %c0_i32_0 = arith.constant 0 : i32
    %c0_i32_1 = arith.constant 0 : i32
    return %c0_i32, %c0_i32_0 : i32, i32
  }
}

</mosaic_0001>

<bundles_post_ra>
// kernel: network_forward.3
= control target key start
LH: loop header
LB: loop body
LE: loop exit
PB: predicated region body
PF: predicated region fallthrough
CT: control target
= control target key end

     0   :  { %12 = vsyncpa [#allocation3], 0  ;;  %s2282_s0 = inlined_call_operand.vmem [shape: bf16[2,2048], index: 0, kind: input, shape index: {}]   ;;  %s2283_s1 = inlined_call_operand.hbm [shape: bf16[2048,128], index: 1, kind: input, shape index: {}]   ;;  %s2284_s2 = inlined_call_operand.vmem [shape: f32[1,128], index: 2, kind: input, shape index: {}]   ;;  %s2285_s3 = inlined_call_operand.vmem [shape: bf16[128,128], index: 3, kind: input, shape index: {}]   ;;  %s2286_s4 = inlined_call_operand.vmem [shape: f32[1,128], index: 4, kind: input, shape index: {}]   ;;  %s2287_s5 = inlined_call_operand.hbm [shape: f32[2,128], index: 5, kind: output, shape index: {0}]   ;;  %s2288_s6 = inlined_call_operand.hbm [shape: f32[2,128], index: 6, kind: output, shape index: {1}]  }
   0x1   :  { %13 = vsyncpa [#allocation4], 0 }
   0x2   :  { %14 = vsyncpa [#allocation7], 0  ;;  %s21_s23 = sshll.u32 %s2283_s1, 4  ;;  %s2197_s24 = smov [#allocation2]   ;;  %s22_s23 = int_to_ptr.hbm [resolvable:$true] %s21_s23 }
   0x3   :  { %s23_s25 = sshll.u32 %s2197_s24, 4  ;;  %s2198_s26 = smov 64   ;;  %s24_s25 = int_to_ptr.vmem [resolvable:$true] %s23_s25 }
   0x4   :  { %s2199_s27 = smov 4  }
   0x5   :  { %29 = dma.hbm_to_vmem [thread:$0]  %s22_s23, 16384, %s24_s25, [#allocation3], %s2198_s26, %s2198_s26, %s2199_s27  }
   0x6   :  { %2191 = dma.done.wait [#allocation3], 16384  }
   0x7   :  { %2192 = vsyncadd [#allocation3], 4294950912  ;;  %v1983_v0 = vld [vmem:[#allocation2 + $0x38] sm:$0xff]  ;;  %v1982_v4 = vld [vmem:[#allocation2 + $0x30] sm:$0xff]  ;;  %s1406_s26 = sshll.u32 %s2287_s5, 4  ;;  %s2201_s28 = smov [#allocation6]   ;;  %s1407_s26 = int_to_ptr.hbm [resolvable:$true] %s1406_s26 }
   0x8   :  { %v1991_v1 = vld [vmem:[#allocation2 + $0x78] sm:$0xff]  ;;  %1106 = vmatpush.bf16.msra.mxu0 %v1983_v0  ;;  %v1990_v5 = vld [vmem:[#allocation2 + $0x70] sm:$0xff]  ;;  %v1981_v8 = vld [vmem:[#allocation2 + $0x28] sm:$0xff]  ;;  %s1415_s29 = sshll.u32 %s2201_s28, 4  ;;  %s1417_s7 = sshll.u32 %s2288_s6, 4  ;;  %s1416_s29 = int_to_ptr.vmem [resolvable:$true] %s1415_s29  ;;  %s1418_s7 = int_to_ptr.hbm [resolvable:$true] %s1417_s7 }
   0x9   :  { %v1999_v2 = vld [vmem:[#allocation2 + $0xb8] sm:$0xff]  ;;  %1119 = vmatpush.bf16.msra.mxu1 %v1991_v1  ;;  %v1998_v6 = vld [vmem:[#allocation2 + $0xb0] sm:$0xff]  ;;  %v1989_v9 = vld [vmem:[#allocation2 + $0x68] sm:$0xff] }
   0xa   :  { %v2007_v3 = vld [vmem:[#allocation2 + $0xf8] sm:$0xff]  ;;  %1132 = vmatpush.bf16.msra.mxu2 %v1999_v2  ;;  %v2006_v7 = vld [vmem:[#allocation2 + $0xf0] sm:$0xff]  ;;  %v1997_v10 = vld [vmem:[#allocation2 + $0xa8] sm:$0xff] }
   0xb   :  { %1145 = vmatpush.bf16.msra.mxu3 %v2007_v3  ;;  %v2005_v11 = vld [vmem:[#allocation2 + $0xe8] sm:$0xff]  ;;  %v1980_v12 = vld [vmem:[#allocation2 + $0x20] sm:$0xff]  ;;  %v1979_v16 = vld [vmem:[#allocation2 + $0x18] sm:$0xff] }
   0xc   :  { %1107 = vmatpush.bf16.msra.mxu0 %v1982_v4  ;;  %v1988_v13 = vld [vmem:[#allocation2 + $0x60] sm:$0xff]  ;;  %v1987_v17 = vld [vmem:[#allocation2 + $0x58] sm:$0xff]  ;;  %v1978_v20 = vld [vmem:[#allocation2 + $0x10] sm:$0xff] }
   0xd   :  { %1120 = vmatpush.bf16.msra.mxu1 %v1990_v5  ;;  %v1996_v14 = vld [vmem:[#allocation2 + $0xa0] sm:$0xff]  ;;  %v1995_v18 = vld [vmem:[#allocation2 + $0x98] sm:$0xff]  ;;  %v1986_v21 = vld [vmem:[#allocation2 + $0x50] sm:$0xff] }
   0xe   :  { %1133 = vmatpush.bf16.msra.mxu2 %v1998_v6  ;;  %v2004_v15 = vld [vmem:[#allocation2 + $0xe0] sm:$0xff]  ;;  %v2003_v19 = vld [vmem:[#allocation2 + $0xd8] sm:$0xff]  ;;  %v1994_v23 = vld [vmem:[#allocation2 + $0x90] sm:$0xff] }
   0xf   :  { %1146 = vmatpush.bf16.msra.mxu3 %v2006_v7  ;;  %v40_v22 = vld [vmem:[%s2282_s0] sm:$0xff]  ;;  %v2002_v24 = vld [vmem:[#allocation2 + $0xd0] sm:$0xff]  ;;  %v1977_v25 = vld [vmem:[#allocation2 + $0x8] sm:$0xff] }
  0x10   :  { %1108 = vmatpush.bf16.msra.mxu0 %v1981_v8  ;;  %303 = vst [vmem:[#allocation1] ss:$9 sm:$0xff] %v40_v22  ;;  %v1985_v26 = vld [vmem:[#allocation2 + $0x48] sm:$0xff]  ;;  %v1976_v29 = vld [vmem:[#allocation2] sm:$0xff]  ;;  %v2015_v33 = vld [vmem:[#allocation2 + $0x138] sm:$0xff] }
  0x11   :  { %1121 = vmatpush.bf16.msra.mxu1 %v1989_v9  ;;  %v1993_v27 = vld [vmem:[#allocation2 + $0x88] sm:$0xff]  ;;  %v1984_v30 = vld [vmem:[#allocation2 + $0x40] sm:$0xff]  ;;  %v2023_v34 = vld [vmem:[#allocation2 + $0x178] sm:$0xff] }
  0x12   :  { %1134 = vmatpush.bf16.msra.mxu2 %v1997_v10  ;;  %v2001_v28 = vld [vmem:[#allocation2 + $0xc8] sm:$0xff]  ;;  %v1992_v31 = vld [vmem:[#allocation2 + $0x80] sm:$0xff]  ;;  %v2031_v35 = vld [vmem:[#allocation2 + $0x1b8] sm:$0xff] }
  0x13   :  { %1147 = vmatpush.bf16.msra.mxu3 %v2005_v11  ;;  %v2000_v32 = vld [vmem:[#allocation2 + $0xc0] sm:$0xff]  ;;  %v2039_v36 = vld [vmem:[#allocation2 + $0x1f8] sm:$0xff]  ;;  %v2014_v37 = vld [vmem:[#allocation2 + $0x130] sm:$0xff] }
  0x14   :  { %1109 = vmatpush.bf16.msra.mxu0 %v1980_v12  ;;  %v2022_v40 = vld [vmem:[#allocation2 + $0x170] sm:$0xff]  ;;  %v2013_v45 = vld [vmem:[#allocation2 + $0x128] sm:$0xff]  ;;  %v2012_v49 = vld [vmem:[#allocation2 + $0x120] sm:$0xff] }
  0x15   :  { %1122 = vmatpush.bf16.msra.mxu1 %v1988_v13  ;;  %v2030_v43 = vld [vmem:[#allocation2 + $0x1b0] sm:$0xff]  ;;  %v2021_v46 = vld [vmem:[#allocation2 + $0x168] sm:$0xff]  ;;  %v2020_v50 = vld [vmem:[#allocation2 + $0x160] sm:$0xff] }
  0x16   :  { %1135 = vmatpush.bf16.msra.mxu2 %v1996_v14  ;;  %v2038_v44 = vld [vmem:[#allocation2 + $0x1f0] sm:$0xff]  ;;  %v2029_v47 = vld [vmem:[#allocation2 + $0x1a8] sm:$0xff]  ;;  %v41_v52 = vld [vmem:[%s2282_s0 + $0x8] sm:$0xff] }
  0x17   :  { %1148 = vmatpush.bf16.msra.mxu3 %v2004_v15  ;;  %v306_v38 = vld [vmem:[#allocation1 + $0x12] sm:$0xff]  ;;  %v304_v39 = vld [vmem:[#allocation1] sm:$0xff]  ;;  %v305_v42 = vld [vmem:[#allocation1 + $0x9] sm:$0xff] }
  0x18   :  { %1110 = vmatpush.bf16.msra.mxu0 %v1979_v16  ;;  %v307_v41 = vld [vmem:[#allocation1 + $0x1b] sm:$0xff]  ;;  %v2037_v48 = vld [vmem:[#allocation2 + $0x1e8] sm:$0xff]  ;;  %v308_v53 = vld [vmem:[#allocation1 + $0x24] sm:$0xff] }
  0x19   :  { %1123 = vmatpush.bf16.msra.mxu1 %v1987_v17  ;;  %v310_v51 = vld [vmem:[#allocation1 + $0x36] sm:$0xff]  ;;  %v311_v54 = vld [vmem:[#allocation1 + $0x3f] sm:$0xff]  ;;  %v309_v55 = vld [vmem:[#allocation1 + $0x2d] sm:$0xff] }
  0x1a   :  { %1136 = vmatpush.bf16.msra.mxu2 %v1995_v18  ;;  %v2028_v56 = vld [vmem:[#allocation2 + $0x1a0] sm:$0xff]  ;;  %313 = vst [vmem:[#allocation1] ss:$9 sm:$0xff] %v41_v52  ;;  %v2011_v58 = vld [vmem:[#allocation2 + $0x118] sm:$0xff]  ;;  %v2010_v62 = vld [vmem:[#allocation2 + $0x110] sm:$0xff] }
  0x1b   :  { %1149 = vmatpush.bf16.msra.mxu3 %v2003_v19  ;;  %v2036_v57 = vld [vmem:[#allocation2 + $0x1e0] sm:$0xff]  ;;  %v2019_v59 = vld [vmem:[#allocation2 + $0x158] sm:$0xff]  ;;  %v2018_v63 = vld [vmem:[#allocation2 + $0x150] sm:$0xff] }
  0x1c   :  { %1111 = vmatpush.bf16.msra.mxu0 %v1978_v20  ;;  %v2027_v60 = vld [vmem:[#allocation2 + $0x198] sm:$0xff]  ;;  %v2026_v0 = vld [vmem:[#allocation2 + $0x190] sm:$0xff]  ;;  %v2009_v2 = vld [vmem:[#allocation2 + $0x108] sm:$0xff] }
  0x1d   :  { %1124 = vmatpush.bf16.msra.mxu1 %v1986_v21  ;;  %v2035_v61 = vld [vmem:[#allocation2 + $0x1d8] sm:$0xff]  ;;  %v2034_v1 = vld [vmem:[#allocation2 + $0x1d0] sm:$0xff]  ;;  %v2017_v3 = vld [vmem:[#allocation2 + $0x148] sm:$0xff] }
  0x1e   :  { %1137 = vmatpush.bf16.msra.mxu2 %v1994_v23  ;;  %v2025_v4 = vld [vmem:[#allocation2 + $0x188] sm:$0xff]  ;;  %v2008_v6 = vld [vmem:[#allocation2 + $0x100] sm:$0xff]  ;;  %v2047_v10 = vld [vmem:[#allocation2 + $0x238] sm:$0xff] }
  0x1f   :  { %1150 = vmatpush.bf16.msra.mxu3 %v2002_v24  ;;  %v2033_v5 = vld [vmem:[#allocation2 + $0x1c8] sm:$0xff]  ;;  %v2016_v7 = vld [vmem:[#allocation2 + $0x140] sm:$0xff]  ;;  %v2055_v11 = vld [vmem:[#allocation2 + $0x278] sm:$0xff] }
  0x20   :  { %1112 = vmatpush.bf16.msra.mxu0 %v1977_v25  ;;  %v2024_v8 = vld [vmem:[#allocation2 + $0x180] sm:$0xff]  ;;  %v2063_v12 = vld [vmem:[#allocation2 + $0x2b8] sm:$0xff]  ;;  %v2046_v14 = vld [vmem:[#allocation2 + $0x230] sm:$0xff] }
  0x21   :  { %1125 = vmatpush.bf16.msra.mxu1 %v1985_v26  ;;  %v2032_v9 = vld [vmem:[#allocation2 + $0x1c0] sm:$0xff]  ;;  %v2071_v13 = vld [vmem:[#allocation2 + $0x2f8] sm:$0xff]  ;;  %v2054_v15 = vld [vmem:[#allocation2 + $0x270] sm:$0xff] }
  0x22   :  { %1138 = vmatpush.bf16.msra.mxu2 %v1993_v27  ;;  %v2062_v16 = vld [vmem:[#allocation2 + $0x2b0] sm:$0xff]  ;;  %v2045_v18 = vld [vmem:[#allocation2 + $0x228] sm:$0xff]  ;;  %v2044_v22 = vld [vmem:[#allocation2 + $0x220] sm:$0xff] }
  0x23   :  { %1151 = vmatpush.bf16.msra.mxu3 %v2001_v28  ;;  %v2070_v17 = vld [vmem:[#allocation2 + $0x2f0] sm:$0xff]  ;;  %v2053_v19 = vld [vmem:[#allocation2 + $0x268] sm:$0xff]  ;;  %v2052_v23 = vld [vmem:[#allocation2 + $0x260] sm:$0xff] }
  0x24   :  { %1113 = vmatpush.bf16.msra.mxu0 %v1976_v29  ;;  %v2061_v20 = vld [vmem:[#allocation2 + $0x2a8] sm:$0xff]  ;;  %v2060_v24 = vld [vmem:[#allocation2 + $0x2a0] sm:$0xff]  ;;  %v2043_v26 = vld [vmem:[#allocation2 + $0x218] sm:$0xff] }
  0x25   :  { %1126 = vmatpush.bf16.msra.mxu1 %v1984_v30  ;;  %v2069_v21 = vld [vmem:[#allocation2 + $0x2e8] sm:$0xff]  ;;  %v2068_v25 = vld [vmem:[#allocation2 + $0x2e0] sm:$0xff]  ;;  %v2051_v27 = vld [vmem:[#allocation2 + $0x258] sm:$0xff] }
  0x26   :  { %1139 = vmatpush.bf16.msra.mxu2 %v1992_v31  ;;  %v2059_v28 = vld [vmem:[#allocation2 + $0x298] sm:$0xff]  ;;  %v2042_v30 = vld [vmem:[#allocation2 + $0x210] sm:$0xff] }
  0x27   :  { %1152 = vmatpush.bf16.msra.mxu3 %v2000_v32  ;;  %1114 = vmatmul.bf16.vlgmr.msra.gmra.mxu0 %v304_v39  ;;  %v2067_v29 = vld [vmem:[#allocation2 + $0x2d8] sm:$0xff]  ;;  %v2050_v31 = vld [vmem:[#allocation2 + $0x250] sm:$0xff]  ;;  %v2048_v39 = vld [vmem:[#allocation2 + $0x240] sm:$0xff] }
  0x28   :  { %1158 = vmatpush.bf16.msrb.mxu0 %v2015_v33  ;;  %1127 = vmatmul.bf16.vlgmr.msra.gmra.mxu1 %v305_v42  ;;  %v2058_v32 = vld [vmem:[#allocation2 + $0x290] sm:$0xff]  ;;  %v2079_v42 = vld [vmem:[#allocation2 + $0x338] sm:$0xff] }
  0x29   :  { %1171 = vmatpush.bf16.msrb.mxu1 %v2023_v34  ;;  %1140 = vmatmul.bf16.vlgmr.msra.gmra.mxu2 %v306_v38  ;;  %v2066_v33 = vld [vmem:[#allocation2 + $0x2d0] sm:$0xff]  ;;  %v2041_v34 = vld [vmem:[#allocation2 + $0x208] sm:$0xff]  ;;  %v2040_v38 = vld [vmem:[#allocation2 + $0x200] sm:$0xff] }
  0x2a   :  { %1184 = vmatpush.bf16.msrb.mxu2 %v2031_v35  ;;  %1153 = vmatmul.bf16.vlgmr.msra.gmra.mxu3 %v307_v41  ;;  %v2049_v35 = vld [vmem:[#allocation2 + $0x248] sm:$0xff]  ;;  %v2064_v41 = vld [vmem:[#allocation2 + $0x2c0] sm:$0xff]  ;;  %v2094_v52 = vld [vmem:[#allocation2 + $0x3b0] sm:$0xff] }
  0x2b   :  { %1197 = vmatpush.bf16.msrb.mxu3 %v2039_v36  ;;  %v2057_v36 = vld [vmem:[#allocation2 + $0x288] sm:$0xff] }
  0x2c   :  { %1159 = vmatpush.bf16.msrb.mxu0 %v2014_v37  ;;  %v2065_v37 = vld [vmem:[#allocation2 + $0x2c8] sm:$0xff] }
  0x2d   :  { %1172 = vmatpush.bf16.msrb.mxu1 %v2022_v40  ;;  %v2056_v40 = vld [vmem:[#allocation2 + $0x280] sm:$0xff] }
  0x2e   :  { %1185 = vmatpush.bf16.msrb.mxu2 %v2030_v43  ;;  %v2087_v43 = vld [vmem:[#allocation2 + $0x378] sm:$0xff] }
  0x2f   :  { %1198 = vmatpush.bf16.msrb.mxu3 %v2038_v44  ;;  %v2095_v44 = vld [vmem:[#allocation2 + $0x3b8] sm:$0xff] }
  0x30   :  { %1160 = vmatpush.bf16.msrb.mxu0 %v2013_v45  ;;  %v2103_v45 = vld [vmem:[#allocation2 + $0x3f8] sm:$0xff] }
  0x31   :  { %1173 = vmatpush.bf16.msrb.mxu1 %v2021_v46  ;;  %v314_v46 = vld [vmem:[#allocation1] sm:$0xff] }
  0x32   :  { %1186 = vmatpush.bf16.msrb.mxu2 %v2029_v47  ;;  %v316_v47 = vld [vmem:[#allocation1 + $0x12] sm:$0xff] }
  0x33   :  { %1199 = vmatpush.bf16.msrb.mxu3 %v2037_v48  ;;  %v315_v48 = vld [vmem:[#allocation1 + $0x9] sm:$0xff] }
  0x34   :  { %1161 = vmatpush.bf16.msrb.mxu0 %v2012_v49  ;;  %v317_v49 = vld [vmem:[#allocation1 + $0x1b] sm:$0xff] }
  0x35   :  { %1174 = vmatpush.bf16.msrb.mxu1 %v2020_v50  ;;  %v2078_v50 = vld [vmem:[#allocation2 + $0x330] sm:$0xff] }
  0x36   :  { %1187 = vmatpush.bf16.msrb.mxu2 %v2028_v56  ;;  %v2093_v56 = vld [vmem:[#allocation2 + $0x3a8] sm:$0xff] }
  0x37   :  { %1200 = vmatpush.bf16.msrb.mxu3 %v2036_v57  ;;  %v2101_v57 = vld [vmem:[#allocation2 + $0x3e8] sm:$0xff] }
  0x38   :  { %1162 = vmatpush.bf16.msrb.mxu0 %v2011_v58  ;;  %v2076_v58 = vld [vmem:[#allocation2 + $0x320] sm:$0xff] }
  0x39   :  { %1175 = vmatpush.bf16.msrb.mxu1 %v2019_v59  ;;  %v2084_v59 = vld [vmem:[#allocation2 + $0x360] sm:$0xff] }
  0x3a   :  { %1188 = vmatpush.bf16.msrb.mxu2 %v2027_v60  ;;  %v2092_v60 = vld [vmem:[#allocation2 + $0x3a0] sm:$0xff] }
  0x3b   :  { %1201 = vmatpush.bf16.msrb.mxu3 %v2035_v61  ;;  %v2100_v61 = vld [vmem:[#allocation2 + $0x3e0] sm:$0xff] }
  0x3c   :  { %1163 = vmatpush.bf16.msrb.mxu0 %v2010_v62  ;;  %v2075_v62 = vld [vmem:[#allocation2 + $0x318] sm:$0xff] }
  0x3d   :  { %1176 = vmatpush.bf16.msrb.mxu1 %v2018_v63  ;;  %v2083_v63 = vld [vmem:[#allocation2 + $0x358] sm:$0xff] }
  0x3e   :  { %1189 = vmatpush.bf16.msrb.mxu2 %v2026_v0  ;;  %v2091_v0 = vld [vmem:[#allocation2 + $0x398] sm:$0xff] }
  0x3f   :  { %1202 = vmatpush.bf16.msrb.mxu3 %v2034_v1  ;;  %v2099_v1 = vld [vmem:[#allocation2 + $0x3d8] sm:$0xff] }
  0x40   :  { %1164 = vmatpush.bf16.msrb.mxu0 %v2009_v2  ;;  %v2074_v2 = vld [vmem:[#allocation2 + $0x310] sm:$0xff] }
  0x41   :  { %1177 = vmatpush.bf16.msrb.mxu1 %v2017_v3  ;;  %v2082_v3 = vld [vmem:[#allocation2 + $0x350] sm:$0xff] }
  0x42   :  { %1190 = vmatpush.bf16.msrb.mxu2 %v2025_v4  ;;  %v2090_v4 = vld [vmem:[#allocation2 + $0x390] sm:$0xff] }
  0x43   :  { %1203 = vmatpush.bf16.msrb.mxu3 %v2033_v5  ;;  %v2098_v5 = vld [vmem:[#allocation2 + $0x3d0] sm:$0xff] }
  0x44   :  { %1165 = vmatpush.bf16.msrb.mxu0 %v2008_v6  ;;  %v2073_v6 = vld [vmem:[#allocation2 + $0x308] sm:$0xff] }
  0x45   :  { %1178 = vmatpush.bf16.msrb.mxu1 %v2016_v7  ;;  %v2081_v7 = vld [vmem:[#allocation2 + $0x348] sm:$0xff] }
  0x46   :  { %1191 = vmatpush.bf16.msrb.mxu2 %v2024_v8  ;;  %v2089_v8 = vld [vmem:[#allocation2 + $0x388] sm:$0xff] }
  0x47   :  { %1204 = vmatpush.bf16.msrb.mxu3 %v2032_v9  ;;  %1166 = vmatmul.bf16.vlgmr.msrb.gmra.mxu0 %v308_v53  ;;  %v2102_v53 = vld [vmem:[#allocation2 + $0x3f0] sm:$0xff]  ;;  %v2097_v9 = vld [vmem:[#allocation2 + $0x3c8] sm:$0xff] }
  0x48   :  { %1210 = vmatpush.bf16.msra.mxu0 %v2047_v10  ;;  %1179 = vmatmul.bf16.vlgmr.msrb.gmra.mxu1 %v309_v55  ;;  %v2085_v55 = vld [vmem:[#allocation2 + $0x368] sm:$0xff]  ;;  %v2072_v10 = vld [vmem:[#allocation2 + $0x300] sm:$0xff] }
  0x49   :  { %1223 = vmatpush.bf16.msra.mxu1 %v2055_v11  ;;  %1192 = vmatmul.bf16.vlgmr.msrb.gmra.mxu2 %v310_v51  ;;  %v2086_v51 = vld [vmem:[#allocation2 + $0x370] sm:$0xff]  ;;  %v2080_v11 = vld [vmem:[#allocation2 + $0x340] sm:$0xff] }
  0x4a   :  { %1236 = vmatpush.bf16.msra.mxu2 %v2063_v12  ;;  %1205 = vmatmul.bf16.vlgmr.msrb.gmra.mxu3 %v311_v54  ;;  %v2077_v54 = vld [vmem:[#allocation2 + $0x328] sm:$0xff]  ;;  %v2088_v12 = vld [vmem:[#allocation2 + $0x380] sm:$0xff] }
  0x4b   :  { %1249 = vmatpush.bf16.msra.mxu3 %v2071_v13  ;;  %v2096_v13 = vld [vmem:[#allocation2 + $0x3c0] sm:$0xff] }
  0x4c   :  { %1211 = vmatpush.bf16.msra.mxu0 %v2046_v14  ;;  %v318_v14 = vld [vmem:[#allocation1 + $0x24] sm:$0xff] }
  0x4d   :  { %1224 = vmatpush.bf16.msra.mxu1 %v2054_v15  ;;  %v319_v15 = vld [vmem:[#allocation1 + $0x2d] sm:$0xff] }
  0x4e   :  { %1237 = vmatpush.bf16.msra.mxu2 %v2062_v16  ;;  %v320_v16 = vld [vmem:[#allocation1 + $0x36] sm:$0xff] }
  0x4f   :  { %1250 = vmatpush.bf16.msra.mxu3 %v2070_v17  ;;  %v321_v17 = vld [vmem:[#allocation1 + $0x3f] sm:$0xff] }
  0x50   :  { %1212 = vmatpush.bf16.msra.mxu0 %v2045_v18  ;;  %v2117_v18 = vld [vmem:[%s2284_s2] ss:$0 sm:$0xff] }
  0x51   :  { %1225 = vmatpush.bf16.msra.mxu1 %v2053_v19 }
  0x52   :  { %1238 = vmatpush.bf16.msra.mxu2 %v2061_v20 }
  0x53   :  { %1251 = vmatpush.bf16.msra.mxu3 %v2069_v21 }
  0x54   :  { %1213 = vmatpush.bf16.msra.mxu0 %v2044_v22 }
  0x55   :  { %1226 = vmatpush.bf16.msra.mxu1 %v2052_v23 }
  0x56   :  { %1239 = vmatpush.bf16.msra.mxu2 %v2060_v24 }
  0x57   :  { %1252 = vmatpush.bf16.msra.mxu3 %v2068_v25 }
  0x58   :  { %1214 = vmatpush.bf16.msra.mxu0 %v2043_v26 }
  0x59   :  { %1227 = vmatpush.bf16.msra.mxu1 %v2051_v27 }
  0x5a   :  { %1240 = vmatpush.bf16.msra.mxu2 %v2059_v28 }
  0x5b   :  { %1253 = vmatpush.bf16.msra.mxu3 %v2067_v29 }
  0x5c   :  { %1215 = vmatpush.bf16.msra.mxu0 %v2042_v30 }
  0x5d   :  { %1228 = vmatpush.bf16.msra.mxu1 %v2050_v31 }
  0x5e   :  { %1241 = vmatpush.bf16.msra.mxu2 %v2058_v32 }
  0x5f   :  { %1254 = vmatpush.bf16.msra.mxu3 %v2066_v33 }
  0x60   :  { %1216 = vmatpush.bf16.msra.mxu0 %v2041_v34 }
  0x61   :  { %1229 = vmatpush.bf16.msra.mxu1 %v2049_v35  ;;  %v2111_v35 = vld [vmem:[%s2285_s3 + $0x38] sm:$0xff] }
  0x62   :  { %1242 = vmatpush.bf16.msra.mxu2 %v2057_v36 }
  0x63   :  { %1255 = vmatpush.bf16.msra.mxu3 %v2065_v37 }
  0x64   :  { %1217 = vmatpush.bf16.msra.mxu0 %v2040_v38  ;;  %v2110_v38 = vld [vmem:[%s2285_s3 + $0x30] sm:$0xff] }
  0x65   :  { %1230 = vmatpush.bf16.msra.mxu1 %v2048_v39  ;;  %v2109_v39 = vld [vmem:[%s2285_s3 + $0x28] sm:$0xff] }
  0x66   :  { %1243 = vmatpush.bf16.msra.mxu2 %v2056_v40 }
  0x67   :  { %1256 = vmatpush.bf16.msra.mxu3 %v2064_v41  ;;  %1218 = vmatmul.bf16.vlgmr.msra.gmra.mxu0 %v314_v46 }
  0x68   :  { %1262 = vmatpush.bf16.msrb.mxu0 %v2079_v42  ;;  %1231 = vmatmul.bf16.vlgmr.msra.gmra.mxu1 %v315_v48  ;;  %v2108_v42 = vld [vmem:[%s2285_s3 + $0x20] sm:$0xff] }
  0x69   :  { %1275 = vmatpush.bf16.msrb.mxu1 %v2087_v43  ;;  %1244 = vmatmul.bf16.vlgmr.msra.gmra.mxu2 %v316_v47  ;;  %v2107_v43 = vld [vmem:[%s2285_s3 + $0x18] sm:$0xff]  ;;  %v2105_v47 = vld [vmem:[%s2285_s3 + $0x8] sm:$0xff] }
  0x6a   :  { %1288 = vmatpush.bf16.msrb.mxu2 %v2095_v44  ;;  %1257 = vmatmul.bf16.vlgmr.msra.gmra.mxu3 %v317_v49 }
  0x6b   :  { %1301 = vmatpush.bf16.msrb.mxu3 %v2103_v45  ;;  %v2106_v45 = vld [vmem:[%s2285_s3 + $0x10] sm:$0xff] }
  0x6c   :  { %1263 = vmatpush.bf16.msrb.mxu0 %v2078_v50 }
  0x6d   :  { %1276 = vmatpush.bf16.msrb.mxu1 %v2086_v51 }
  0x6e   :  { %1289 = vmatpush.bf16.msrb.mxu2 %v2094_v52  ;;  %v2104_v52 = vld [vmem:[%s2285_s3] sm:$0xff]  ;;  %s2200_s3 = smov [#allocation5]  }
  0x6f   :  { %1302 = vmatpush.bf16.msrb.mxu3 %v2102_v53  ;;  %s1404_s23 = sshll.u32 %s2200_s3, 4  ;;  %s1405_s23 = int_to_ptr.vmem [resolvable:$true] %s1404_s23 }
  0x70   :  { %1264 = vmatpush.bf16.msrb.mxu0 %v2077_v54 }
  0x71   :  { %1277 = vmatpush.bf16.msrb.mxu1 %v2085_v55 }
  0x72   :  { %1290 = vmatpush.bf16.msrb.mxu2 %v2093_v56 }
  0x73   :  { %1303 = vmatpush.bf16.msrb.mxu3 %v2101_v57 }
  0x74   :  { %1265 = vmatpush.bf16.msrb.mxu0 %v2076_v58 }
  0x75   :  { %1278 = vmatpush.bf16.msrb.mxu1 %v2084_v59 }
  0x76   :  { %1291 = vmatpush.bf16.msrb.mxu2 %v2092_v60 }
  0x77   :  { %1304 = vmatpush.bf16.msrb.mxu3 %v2100_v61 }
  0x78   :  { %1266 = vmatpush.bf16.msrb.mxu0 %v2075_v62 }
  0x79   :  { %1279 = vmatpush.bf16.msrb.mxu1 %v2083_v63 }
  0x7a   :  { %1292 = vmatpush.bf16.msrb.mxu2 %v2091_v0 }
  0x7b   :  { %1305 = vmatpush.bf16.msrb.mxu3 %v2099_v1 }
  0x7c   :  { %1267 = vmatpush.bf16.msrb.mxu0 %v2074_v2 }
  0x7d   :  { %1280 = vmatpush.bf16.msrb.mxu1 %v2082_v3 }
  0x7e   :  { %1293 = vmatpush.bf16.msrb.mxu2 %v2090_v4 }
  0x7f   :  { %1306 = vmatpush.bf16.msrb.mxu3 %v2098_v5 }
  0x80   :  { %1268 = vmatpush.bf16.msrb.mxu0 %v2073_v6 }
  0x81   :  { %1281 = vmatpush.bf16.msrb.mxu1 %v2081_v7 }
  0x82   :  { %1294 = vmatpush.bf16.msrb.mxu2 %v2089_v8 }
  0x83   :  { %1307 = vmatpush.bf16.msrb.mxu3 %v2097_v9 }
  0x84   :  { %1269 = vmatpush.bf16.msrb.mxu0 %v2072_v10 }
  0x85   :  { %1282 = vmatpush.bf16.msrb.mxu1 %v2080_v11 }
  0x86   :  { %1295 = vmatpush.bf16.msrb.mxu2 %v2088_v12 }
  0x87   :  { %1308 = vmatpush.bf16.msrb.mxu3 %v2096_v13  ;;  %1270 = vmatmul.bf16.vlgmr.msrb.gmra.mxu0 %v318_v14  ;;  %v2118_v13 = vld [vmem:[%s2286_s4] ss:$0 sm:$0xff] }
  0x88   :  { %1283 = vmatmul.bf16.vlgmr.msrb.gmra.mxu1 %v319_v15  ;;  %1385 = vmatpush.bf16.msra.mxu0 %v2111_v35 }
  0x89   :  { %1296 = vmatmul.bf16.vlgmr.msrb.gmra.mxu2 %v320_v16 }
  0x8a   :  { %1309 = vmatmul.bf16.vlgmr.msrb.gmra.mxu3 %v321_v17 }
  0x8c   :  { %1386 = vmatpush.bf16.msra.mxu0 %v2110_v38 }
  0x90   :  { %1387 = vmatpush.bf16.msra.mxu0 %v2109_v39 }
  0x94   :  { %1388 = vmatpush.bf16.msra.mxu0 %v2108_v42 }
  0x98   :  { %1389 = vmatpush.bf16.msra.mxu0 %v2107_v43 }
  0x9c   :  { %1390 = vmatpush.bf16.msra.mxu0 %v2106_v45 }
  0xa0   :  { %1391 = vmatpush.bf16.msra.mxu0 %v2105_v47 }
  0xa4   :  { %v1115_v19 = vpop.f32.mrf.mxu0  ;;  %1392 = vmatpush.bf16.msra.mxu0 %v2104_v52 }
  0xa5   :  { %v1116_v20 = vadd.f32 %v2117_v18, %v1115_v19  ;;  %v1128_v21 = vpop.f32.mrf.mxu1 }
  0xa7   :  { %v1129_v22 = vadd.f32 %v1128_v21, %v1116_v20 }
  0xac   :  { %v1141_v23 = vpop.f32.mrf.mxu2  ;;  %v1117_v26 = vpop.f32.mrf.mxu0 }
  0xad   :  { %v1142_v24 = vadd.f32 %v1141_v23, %v1129_v22  ;;  %v1154_v25 = vpop.f32.mrf.mxu3  ;;  %v1130_v28 = vpop.f32.mrf.mxu1 }
  0xaf   :  { %v1155_v27 = vadd.f32 %v1154_v25, %v1142_v24 }
  0xb4   :  { %v1143_v29 = vpop.f32.mrf.mxu2 }
  0xb5   :  { %v1156_v30 = vpop.f32.mrf.mxu3 }
  0xc4   :  { %v1167_v31 = vpop.f32.mrf.mxu0 }
  0xc5   :  { %v1180_v32 = vpop.f32.mrf.mxu1  ;;  %v1168_v48 = vadd.f32 %v1167_v31, %v1155_v27 }
  0xc7   :  { %v1181_v53 = vadd.f32 %v1180_v32, %v1168_v48 }
  0xcc   :  { %v1193_v33 = vpop.f32.mrf.mxu2  ;;  %v1169_v36 = vpop.f32.mrf.mxu0 }
  0xcd   :  { %v1206_v34 = vpop.f32.mrf.mxu3  ;;  %v1182_v37 = vpop.f32.mrf.mxu1  ;;  %v1194_v55 = vadd.f32 %v1193_v33, %v1181_v53 }
  0xcf   :  { %v1207_v58 = vadd.f32 %v1206_v34, %v1194_v55 }
  0xd4   :  { %v1195_v40 = vpop.f32.mrf.mxu2 }
  0xd5   :  { %v1208_v41 = vpop.f32.mrf.mxu3 }
  0xe4   :  { %v1219_v44 = vpop.f32.mrf.mxu0 }
  0xe5   :  { %v1232_v46 = vpop.f32.mrf.mxu1  ;;  %v1220_v59 = vadd.f32 %v1219_v44, %v1207_v58 }
  0xe7   :  { %v1233_v60 = vadd.f32 %v1232_v46, %v1220_v59 }
  0xec   :  { %v1245_v49 = vpop.f32.mrf.mxu2  ;;  %v1221_v51 = vpop.f32.mrf.mxu0 }
  0xed   :  { %v1258_v50 = vpop.f32.mrf.mxu3  ;;  %v1234_v54 = vpop.f32.mrf.mxu1  ;;  %v1246_v61 = vadd.f32 %v1245_v49, %v1233_v60 }
  0xef   :  { %v1259_v62 = vadd.f32 %v1258_v50, %v1246_v61 }
  0xf4   :  { %v1247_v56 = vpop.f32.mrf.mxu2 }
  0xf5   :  { %v1260_v57 = vpop.f32.mrf.mxu3 }
 0x104   :  { %v1271_v63 = vpop.f32.mrf.mxu0 }
 0x105   :  { %v1284_v0 = vpop.f32.mrf.mxu1  ;;  %v1272_v1 = vadd.f32 %v1271_v63, %v1259_v62 }
 0x107   :  { %v1285_v2 = vadd.f32 %v1284_v0, %v1272_v1 }
 0x10c   :  { %v1297_v3 = vpop.f32.mrf.mxu2  ;;  %v1273_v6 = vpop.f32.mrf.mxu0 }
 0x10d   :  { %v1310_v4 = vpop.f32.mrf.mxu3  ;;  %v1298_v5 = vadd.f32 %v1297_v3, %v1285_v2  ;;  %v1286_v7 = vpop.f32.mrf.mxu1 }
 0x10f   :  { %v1311_v8 = vadd.f32 %v1310_v4, %v1298_v5 }
 0x111   :  { %v1314_v9 = vmax.f32 %v1311_v8, 0.0 }
 0x113   :  { %1315 = vst [vmem:[#allocation5] sm:$0x3] %v1314_v9  ;;  %v1316_v10 = vpack.c.bf16 %v1314_v9, %v1314_v9 }
 0x114   :  { %v1299_v11 = vpop.f32.mrf.mxu2  ;;  %1409 = dma.vmem_to_hbm [thread:$0]  %s1405_s23, 32, %s1407_s26, [#allocation4]  }
 0x115   :  { %v1312_v12 = vpop.f32.mrf.mxu3  ;;  %1393 = vmatmul.bf16.vlgmr.msra.gmra.mxu0 %v1316_v10 }
 0x192   :  { %v1394_v14 = vpop.f32.mrf.mxu0 }
 0x193   :  { %v1395_v15 = vadd.f32 %v2118_v13, %v1394_v14 }
 0x195   :  { %1398 = vst [vmem:[#allocation6] sm:$0x3] %v1395_v15 }
 0x196   :  { %1420 = dma.vmem_to_hbm [thread:$0]  %s1416_s29, 32, %s1418_s7, [#allocation7]  }
 0x19a   :  { %v1396_v16 = vpop.f32.mrf.mxu0 }
 0x19b   :  { %2193 = dma.done.wait [#allocation4], 32  }
 0x19c   :  { %2194 = vsyncadd [#allocation4], 4294967264 }
 0x19d   :  { %2195 = dma.done.wait [#allocation7], 32  }
 0x19e   :  { %2196 = vsyncadd [#allocation7], 4294967264 }
 0x19f   :  { %1429 = vsyncpa [#allocation3], 1 }
 0x1a0   :  { %1430 = vsyncpa [#allocation4], 1 }
 0x1a1   :  { %1431 = vsyncpa [#allocation7], 1 }

// kernel: network_forward.2
= control target key start
LH: loop header
LB: loop body
LE: loop exit
PB: predicated region body
PF: predicated region fallthrough
CT: control target
= control target key end

     0   :  { %12 = vsyncpa [#allocation3], 0  ;;  %s6841_s24 = smov 0   ;;  %s11551_s0 = inlined_call_operand.vmem [shape: bf16[512,4], index: 0, kind: input, shape index: {}]   ;;  %s11552_s1 = inlined_call_operand.vmem [shape: bf16[9,4,128], index: 1, kind: input, shape index: {}]   ;;  %s11553_s2 = inlined_call_operand.vmem [shape: f32[1,128], index: 2, kind: input, shape index: {}]   ;;  %s11554_s3 = inlined_call_operand.hbm [shape: bf16[9,128,128], index: 3, kind: input, shape index: {}]   ;;  %s11555_s4 = inlined_call_operand.vmem [shape: f32[1,128], index: 4, kind: input, shape index: {}]   ;;  %s11556_s5 = inlined_call_operand.vmem [shape: bf16[4,64,256], index: 5, kind: input, shape index: {}]   ;;  %s11557_s6 = inlined_call_operand.vmem [shape: bf16[4,16,64], index: 6, kind: input, shape index: {}]   ;;  %s11558_s7 = inlined_call_operand.vmem [shape: bf16[32,128], index: 7, kind: output, shape index: {}]  }
   0x1 LB: > { %s218_s27 = sshll.u32 %s11554_s3, 4  ;;  %s6850_s28 = sadd.s32 4294967295, %s6796_s24   ;;  %s6796_s24 = sphi %s6841_s24, %s18_s24   ;;  %s219_s27 = int_to_ptr.hbm [resolvable:$true] %s218_s27 }
   0x2   : > { %p5802_p0 = scmp.ge.s32.totalorder %s6796_s24, 1  ;;  %p201_p1 = scmp.lt.s32.totalorder %s6796_s24, 3 }
   0x3   : > { %p6741_p2 = scmp.eq.s32.totalorder %s6850_s28, 0  ;;  %s6798_s29 = smov [#allocation2]  }
   0x4   : > { %p202_p3 = pnand %p5802_p0, %p201_p1  ;;  %s220_s30 = sshll.u32 %s6798_s29, 4  ;;  %s221_s30 = int_to_ptr.vmem [resolvable:$true] %s220_s30 }
   0x5   : > { %s6799_s8 = smov 64   ;;  %s6800_s9 = smov 4  }
   0x6   : > { %p6737_p4 = pneg %p202_p3  ;;  %254 = sbr.rel (%p202_p3) target bundleno = 1739 (0x6cb), region = 48 }
   0x8   : > { %p6738_p5 = pnand %p6741_p2, %p6737_p4 }
   0xa   : > { %6740 = dma.hbm_to_vmem [thread:$0]  (!%p6738_p5), %s219_s27, 9216, %s221_s30, [#allocation3], %s6799_s8, %s6799_s8, %s6800_s9  }
   0xb   : > { %6791 = dma.done.wait (%p6741_p2), [#allocation3], 9216  }
   0xc   : > { %6793 = vsyncadd (%p6741_p2), [#allocation3], 4294958080  ;;  %s5807_s10 = sshll.u32 %s6850_s28, 5  ;;  %v364_v0 = vlaneseq  ;;  %vm11559_vm0 = vcmask 1041408   ;;  %vm11565_vm1 = vcmask 31744   ;;  %v12077_v59 = vmov 0 }
   0xd   : > { %p288_p6 = scmp.lt.s32.totalorder %s5807_s10, 63  ;;  %v5811_v13 = vld [vmem:[%s11552_s1 + $0x2] sm:$0x3]  ;;  %v862_v14 = vld [vmem:[%s11552_s1] sm:$0x3]  ;;  %v12081_v62 = vmov 0 }
   0xe   : > { %v6856_v1 = vshrl.u32 %v364_v0, 7  ;;  %v1092_v17 = vsel %vm11559_vm0, %v5811_v13, 0  ;;  %v1232_v18 = vsel %vm11559_vm0, %v862_v14, 0  ;;  %v5844_v42 = vld [vmem:[%s11552_s1 + $0x4] sm:$0x3]  ;;  %s5809_s27 = sshll.u32 %s6850_s28, 1 }
   0xf   : > { %s13503_s10 = smov (!%p288_p6, %s5807_s10), 63  ;;  %1101 = vmatpush.bf16.msra.mxu0 %v1092_v17  ;;  %6731 = vmatpush.bf16.msra.mxu2 %v1092_v17  ;;  %v5861_v43 = vld [vmem:[%s11552_s1 + $0x6] sm:$0x3]  ;;  %v1647_v55 = vsel %vm11559_vm0, %v5844_v42, 0  ;;  %p294_p7 = scmp.lt.s32.totalorder %s5809_s27, 3 }
  0x10   : > { %12057 = vst [vmem:[#allocation5_spill] sm:$0xff] %v6856_v1  ;;  %v6859_v2 = vadd.s32 8, %v6856_v1  ;;  %v6862_v3 = vshra.s32 %v6856_v1, 4  ;;  %v6865_v4 = vadd.s32 224, %v6856_v1  ;;  %v6868_v5 = vadd.s32 232, %v6856_v1  ;;  %s5808_s11 = sshll.u32 %s13503_s10, 2  ;;  %1241 = vmatpush.bf16.msra.mxu1 %v1232_v18  ;;  %6732 = vmatpush.bf16.msra.mxu3 %v1092_v17 }
  0x11   : > { %v429_v6 = vand.u32 15, %v6856_v1  ;;  %vm11566_vm2 = vcmp.lt.s32.totalorder %v6856_v1, 1  ;;  %v6873_v7 = vadd.s32 240, %v6856_v1  ;;  %v6876_v8 = vadd.s32 248, %v6856_v1  ;;  %s6881_s14 = scalar_lea.vmem %s11551_s0, %s5808_s11  ;;  %s13505_s27 = smov (!%p294_p7, %s5809_s27), 3 }
  0x12   : > { %12058 = vst [vmem:[#allocation6_spill] sm:$0xff] %v6859_v2  ;;  %v6884_v9 = vshra.s32 %v6859_v2, 4  ;;  %v526_v10 = vadd.s32 4294967295, %v6862_v3  ;;  %v6888_v11 = vshra.s32 %v6865_v4, 4  ;;  %v6891_v12 = vshra.s32 %v6868_v5, 4  ;;  %v6730_v15 = vld [vmem:[%s6881_s14 + $0x78] sm:$0xff]  }
  0x13   : > { %v6900_v16 = vadd.s32 4294967295, %v429_v6  ;;  %v6904_v19 = vunpack.c.l.bf16 %v6730_v15  ;;  %v6906_v20 = vunpack.c.h.bf16 %v6730_v15  ;;  %v6728_v21 = vld [vmem:[%s6881_s14 + $0x68] sm:$0xff]   ;;  %v6729_v22 = vld [vmem:[%s6881_s14 + $0x70] sm:$0xff]   ;;  %v6951_v41 = vshra.s32 %v6873_v7, 4  ;;  %v6648_v48 = vld [vmem:[%s6881_s14] sm:$0xff]   ;;  %1656 = vmatpush.bf16.msrb.mxu2 %v1647_v55  ;;  %s5810_s29 = sshll.u32 %s13505_s27, 2 }
  0x14   : > { %12059 = vst [vmem:[#allocation7_spill] sm:$0xff] %v6888_v11  ;;  %v527_v23 = vadd.s32 4294967295, %v6884_v9  ;;  %vm558_vm3 = vcmp.ge.s32.totalorder %v526_v10, 0  ;;  %vm590_vm4 = vcmp.lt.s32.totalorder %v526_v10, 16  ;;  %v6911_v24 = vunpack.c.l.bf16 %v6728_v21  ;;  %s297_s9 = scalar_lea.vmem %s11558_s7, %s5810_s29 }
  0x15   : > { %12060 = vst [vmem:[#allocation8_spill] sm:$0xff] %v6891_v12  ;;  %vm6913_vm5 = vmand %vm558_vm3, %vm590_vm4  ;;  %v6917_v26 = vunpack.c.h.bf16 %v6728_v21  ;;  %v554_v27 = vadd.s32 4294967295, %v6888_v11  ;;  %v555_v28 = vadd.s32 4294967295, %v6891_v12  ;;  %v6921_v29 = vunpack.c.h.bf16 %v6729_v22 }
  0x16   : > { %12061 = vst [vmem:[#allocation9_spill] sm:$0xff] %v6904_v19  ;;  %vm559_vm6 = vcmp.ge.s32.totalorder %v527_v23, 0  ;;  %vm591_vm7 = vcmp.lt.s32.totalorder %v527_v23, 16  ;;  %v991_v30 = vsel %vm6913_vm5, %v6904_v19, 0.0  ;;  %v491_v31 = vrot.slane %v6904_v19, 7 }
  0x17   : > { %12062 = vst [vmem:[#allocation10_spill] sm:$0xff] %v6906_v20  ;;  %vm6927_vm8 = vmand %vm559_vm6, %vm591_vm7  ;;  %vm586_vm9 = vcmp.ge.s32.totalorder %v554_v27, 0  ;;  %vm587_vm10 = vcmp.ge.s32.totalorder %v555_v28, 0  ;;  %vm618_vm11 = vcmp.lt.s32.totalorder %v554_v27, 16  ;;  %vm619_vm12 = vcmp.lt.s32.totalorder %v555_v28, 16 }
  0x18   : > { %v992_v33 = vsel %vm6927_vm8, %v6906_v20, 0.0  ;;  %vm6934_vm13 = vmand %vm586_vm9, %vm618_vm11  ;;  %v11569_v35 = vrot.slane %v6921_v29, 7  ;;  %v492_v36 = vrot.slane %v6906_v20, 7  ;;  %vm11564_vm14 = vcmp.ge.s32.totalorder %v6900_v16, 0  ;;  %12071 = vst [vmem:[#allocation11_spill] sm:$0xff] %v6951_v41 }
  0x19   : > { %v1023_v37 = vpack.c.bf16 %v992_v33, %v991_v30  ;;  %vm6941_vm15 = vmand %vm587_vm10, %vm619_vm12  ;;  %v1019_v39 = vsel %vm6934_vm13, %v6911_v24, 0.0  ;;  %v6948_v40 = vunpack.c.l.bf16 %v6729_v22  ;;  %v6979_v47 = vshra.s32 %v6876_v8, 4 }
  0x1a   : > { %v1020_v44 = vsel %vm6941_vm15, %v6917_v26, 0.0  ;;  %v6966_v45 = vsel %vm11566_vm2, %v491_v31, %v492_v36  ;;  %v6972_v46 = vsel %vm11566_vm2, %v11569_v35, %v491_v31  ;;  %vm718_vm3 = vmand %vm6913_vm5, %vm11564_vm14  ;;  %v556_v52 = vadd.s32 4294967295, %v6951_v41 }
  0x1b   : > { %12072 = vst [vmem:[#allocation12_spill] sm:$0xff] %v6966_v45  ;;  %5812 = vmatmul.msk.bf16.vlgmr.msra.gmra.mxu0 %vm11565_vm1, %v1023_v37  ;;  %v1037_v49 = vpack.c.bf16 %v1020_v44, %v1019_v39  ;;  %v814_v50 = vsel %vm718_vm3, %v6972_v46, 0.0  ;;  %v815_v51 = vsel %vm6927_vm8, %v6966_v45, 0.0  ;;  %v557_v54 = vadd.s32 4294967295, %v6979_v47 }
  0x1c   : > { %12073 = vst [vmem:[#allocation13_spill] sm:$0xff] %v6972_v46  ;;  %v846_v53 = vpack.c.bf16 %v815_v51, %v814_v50  ;;  %v2029_v56 = vsel %vm11559_vm0, %v5861_v43, 0  ;;  %vm588_vm4 = vcmp.ge.s32.totalorder %v556_v52, 0  ;;  %vm620_vm6 = vcmp.lt.s32.totalorder %v556_v52, 16 }
  0x1d   : > { %12074 = vst [vmem:[#allocation14_spill] sm:$0xff] %v6979_v47  ;;  %5826 = vmatmul.msk.bf16.vlgmr.msra.gmra.mxu2 %vm11565_vm1, %v1037_v49  ;;  %2038 = vmatpush.bf16.msrb.mxu3 %v2029_v56  ;;  %v6992_v57 = vunpack.c.l.bf16 %v6648_v48  ;;  %v6994_v58 = vunpack.c.h.bf16 %v6648_v48  ;;  %vm589_vm7 = vcmp.ge.s32.totalorder %v557_v54, 0  ;;  %vm621_vm9 = vcmp.lt.s32.totalorder %v557_v54, 16  ;;  %vm6997_vm10 = vmand %vm588_vm4, %vm620_vm6  ;;  %v6716_v48 = vld [vmem:[%s6881_s14 + $0x8] sm:$0xff]  }
  0x1e   : > { %5828 = vmatmul.msk.bf16.vlgmr.msra.gmra.mxu1 %vm11565_vm1, %v846_v53  ;;  %v12078_v59 = vsel %vm6997_vm10, 4294967295, %v12077_v59  ;;  %v7002_v60 = vadd.s32 16, %v6856_v1  ;;  %v7005_v61 = vadd.s32 24, %v6856_v1  ;;  %vm7007_vm11 = vmand %vm589_vm7, %vm621_vm9  ;;  %v1021_v63 = vsel %vm6997_vm10, %v6948_v40, 0.0 }
  0x1f   : > { %12075 = vst [vmem:[#allocation15_spill] sm:$0xff] %v6992_v57  ;;  %v12082_v62 = vsel %vm7007_vm11, 4294967295, %v12081_v62  ;;  %v430_v0 = vand.u32 15, %v6859_v2  ;;  %v1323_v6 = vrot.slane %v6992_v57, 1  ;;  %v11563_v10 = vrot.slane %v6904_v19, 1 }
  0x20   : > { %12076 = vst [vmem:[#allocation16_spill] sm:$0xff] %v6994_v58  ;;  %v1022_v13 = vsel %vm7007_vm11, %v6921_v29, 0.0  ;;  %v7021_v14 = vshra.s32 %v7002_v60, 4  ;;  %v7024_v15 = vshra.s32 %v7005_v61, 4  ;;  %v1354_v17 = vrot.slane %v6906_v20, 1 }
  0x21   : > { %12079 = vst [vmem:[#allocation17_spill] sm:$0xff] %v7002_v60  ;;  %v1038_v18 = vpack.c.bf16 %v1022_v13, %v1021_v63  ;;  %vm11560_vm12 = vcmp.lt.s32.totalorder %v6856_v1, 7  ;;  %v7028_v21 = vadd.s32 1, %v430_v0  ;;  %v431_v22 = vand.u32 15, %v7002_v60 }
  0x22   : > { %12080 = vst [vmem:[#allocation18_spill] sm:$0xff] %v7005_v61  ;;  %v528_v23 = vadd.s32 4294967295, %v7021_v14  ;;  %v529_v27 = vadd.s32 4294967295, %v7024_v15  ;;  %v7037_v28 = vsel %vm11560_vm12, %v11563_v10, %v1354_v17  ;;  %v7043_v30 = vsel %vm11560_vm12, %v1354_v17, %v1323_v6 }
  0x23   : > { %12083 = vst [vmem:[#allocation19_spill] sm:$0xff] %v7021_v14  ;;  %5827 = vmatmul.msk.bf16.vlgmr.msra.gmra.mxu3 %vm11565_vm1, %v1038_v18  ;;  %vm11561_vm3 = vcmp.lt.s32.totalorder %v7028_v21, 16  ;;  %v461_v31 = vrot.slane %v6992_v57, 7  ;;  %v462_v33 = vrot.slane %v6994_v58, 7  ;;  %v1548_v42 = vsel %vm6913_vm5, %v7037_v28, 0.0 }
  0x24   : > { %12084 = vst [vmem:[#allocation20_spill] sm:$0xff] %v7024_v15  ;;  %vm560_vm4 = vcmp.ge.s32.totalorder %v528_v23, 0  ;;  %vm561_vm6 = vcmp.ge.s32.totalorder %v529_v27, 0  ;;  %vm592_vm7 = vcmp.lt.s32.totalorder %v528_v23, 16  ;;  %vm593_vm9 = vcmp.lt.s32.totalorder %v529_v27, 16  ;;  %vm7053_vm0 = vmand %vm6927_vm8, %vm11561_vm3 }
  0x25   : > { %12085 = vst [vmem:[#allocation21_spill] sm:$0xff] %v7037_v28  ;;  %vm7057_vm12 = vmand %vm560_vm4, %vm592_vm7  ;;  %v1549_v43 = vsel %vm7053_vm0, %v7043_v30, 0.0  ;;  %v7071_v32 = vsel %vm11566_vm2, %v461_v31, %v462_v33  ;;  %v7073_v44 = vadd.s32 4294967295, %v431_v22  ;;  %v7087_v50 = vsel %vm11566_vm2, %v492_v36, %v461_v31 }
  0x26   : > { %12086 = vst [vmem:[#allocation22_spill] sm:$0xff] %v7043_v30  ;;  %vm7076_vm8 = vmand %vm561_vm6, %vm593_vm9  ;;  %v993_v25 = vsel %vm7057_vm12, %v6992_v57, 0.0  ;;  %vm1770_vm0 = vcmp.ge.s32.totalorder %v6862_v3, 0  ;;  %vm1771_vm5 = vcmp.ge.s32.totalorder %v6884_v9, 0  ;;  %vm1802_vm6 = vcmp.lt.s32.totalorder %v6862_v3, 16 }
  0x27   : > { %12091 = vst [vmem:[#allocation23_spill] sm:$0xff] %v7071_v32  ;;  %v994_v51 = vsel %vm7076_vm8, %v6994_v58, 0.0  ;;  %vm11562_vm4 = vcmp.ge.s32.totalorder %v7073_v44, 0  ;;  %v817_v52 = vsel %vm7076_vm8, %v7071_v32, 0.0  ;;  %v1580_v54 = vpack.c.bf16 %v1549_v43, %v1548_v42  ;;  %vm7107_vm3 = vmand %vm1770_vm0, %vm1802_vm6 }
  0x28   : > { %12092 = vst [vmem:[#allocation24_spill] sm:$0xff] %v7073_v44  ;;  %v1024_v53 = vpack.c.bf16 %v994_v51, %v993_v25  ;;  %vm720_vm7 = vmand %vm7057_vm12, %vm11562_vm4  ;;  %vm1803_vm9 = vcmp.lt.s32.totalorder %v6884_v9, 16  ;;  %v7104_v36 = vunpack.c.l.bf16 %v6716_v48  ;;  %v7112_v63 = vadd.s32 32, %v6856_v1 }
  0x29   : > { %12095 = vst [vmem:[#allocation25_spill] sm:$0xff] %v7087_v50  ;;  %v816_v55 = vsel %vm720_vm7, %v7087_v50, 0.0  ;;  %v7115_v0 = vadd.s32 40, %v6856_v1  ;;  %v432_v13 = vand.u32 15, %v7005_v61  ;;  %vm7120_vm4 = vmand %vm1771_vm5, %vm1803_vm9  ;;  %v7124_v22 = vunpack.c.h.bf16 %v6716_v48 }
  0x2a   : > { %12098 = vst [vmem:[#allocation26_spill] sm:$0xff] %v7112_v63  ;;  %v847_v17 = vpack.c.bf16 %v817_v52, %v816_v55  ;;  %v1324_v23 = vrot.slane %v6994_v58, 1  ;;  %v11571_v27 = vrot.slane %v7104_v36, 1  ;;  %vm1866_vm0 = vmand %vm7107_vm3, %vm11564_vm14  ;;  %v1931_v31 = vsel %vm7120_vm4, %v7071_v32, 0.0 }
  0x2b   : > { %12099 = vst [vmem:[#allocation27_spill] sm:$0xff] %v7115_v0  ;;  %5813 = vmatmul.msk.bf16.gmra.mxu0 %vm11565_vm1, %v1024_v53  ;;  %v7137_v37 = vshra.s32 %v7112_v63, 4  ;;  %v7140_v42 = vshra.s32 %v7115_v0, 4  ;;  %v7142_v43 = vadd.s32 1, %v432_v13  ;;  %v1930_v48 = vsel %vm1866_vm0, %v7087_v50, 0.0 }
  0x2c   : > { %v463_v25 = vrot.slane %v7104_v36, 7  ;;  %v433_v53 = vand.u32 15, %v7112_v63  ;;  %v1962_v55 = vpack.c.bf16 %v1931_v31, %v1930_v48  ;;  %vm12105_vm6 = vcmp.lt.s32.totalorder %v6856_v1, 7  ;;  %v6717_v63 = vld [vmem:[%s6881_s14 + $0x10] sm:$0xff]  }
  0x2d   : > { %12102 = vst [vmem:[#allocation28_spill] sm:$0xff] %v7137_v37  ;;  %5845 = vmatmul.msk.bf16.vlgmr.msrb.gmra.mxu2 %vm11565_vm1, %v1580_v54  ;;  %v530_v51 = vadd.s32 4294967295, %v7137_v37  ;;  %v531_v52 = vadd.s32 4294967295, %v7140_v42  ;;  %vm11574_vm5 = vcmp.lt.s32.totalorder %v7142_v43, 16  ;;  %v7156_v13 = vsel %vm12105_vm6, %v1324_v23, %v11571_v27  ;;  %vm12107_vm7 = vmmov %vm12105_vm6 }
  0x2e   : > { %12103 = vst [vmem:[#allocation29_spill] sm:$0xff] %v7140_v42  ;;  %5829 = vmatmul.msk.bf16.gmra.mxu1 %vm11565_vm1, %v847_v17  ;;  %v7162_v54 = vsel %vm12107_vm7, %v1323_v6, %v1324_v23  ;;  %v11570_v10 = vrot.slane %v7124_v22, 7  ;;  %vm7169_vm2 = vmand %vm7076_vm8, %vm11574_vm5  ;;  %vm12113_vm7 = vcmp.lt.s32.totalorder %v6856_v1, 1  ;;  %v2725_v39 = vadd.s32 1, %v6884_v9 }
  0x2f   : > { %12104 = vst [vmem:[#allocation30_spill] sm:$0xff] %v7142_v43  ;;  %vm562_vm9 = vcmp.ge.s32.totalorder %v530_v51, 0  ;;  %vm563_vm0 = vcmp.ge.s32.totalorder %v531_v52, 0  ;;  %vm594_vm14 = vcmp.lt.s32.totalorder %v530_v51, 16  ;;  %vm595_vm1 = vcmp.lt.s32.totalorder %v531_v52, 16 }
  0x30   : > { %12106 = vst [vmem:[#allocation31_spill] sm:$0xff] %v7156_v13  ;;  %vm7173_vm6 = vmand %vm562_vm9, %vm594_vm14  ;;  %v7181_v6 = vsel %vm12113_vm7, %v463_v25, %v11570_v10  ;;  %v1550_v48 = vsel %vm7057_vm12, %v7162_v54, 0.0  ;;  %v7193_v51 = vadd.s32 4294967295, %v433_v53  ;;  %v2724_v52 = vadd.s32 1, %v6862_v3 }
  0x31   : > { %12108 = vst [vmem:[#allocation32_spill] sm:$0xff] %v7162_v54  ;;  %vm7183_vm11 = vmand %vm563_vm0, %vm595_vm1  ;;  %v995_v49 = vsel %vm7173_vm6, %v7104_v36, 0.0  ;;  %v1551_v10 = vsel %vm7169_vm2, %v7156_v13, 0.0  ;;  %vm12118_vm14 = vcmask 31744   ;;  %vm2757_vm0 = vcmp.ge.s32.totalorder %v2725_v39, 0 }
  0x32   : > { %12116 = vst [vmem:[#allocation33_spill] sm:$0xff] %v7193_v51  ;;  %v996_v35 = vsel %vm7183_vm11, %v7124_v22, 0.0  ;;  %vm12117_vm1 = vmmov %vm12113_vm7  ;;  %vm11577_vm12 = vcmp.ge.s32.totalorder %v7193_v51, 0  ;;  %v819_v3 = vsel %vm7183_vm11, %v7181_v6, 0.0  ;;  %vm2756_vm8 = vcmp.ge.s32.totalorder %v2724_v52, 0 }
  0x33   : > { %v523_v27 = vsel %vm12117_vm1, %v462_v33, %v463_v25  ;;  %5862 = vmatmul.msk.bf16.vlgmr.msrb.gmra.mxu3 %vm12118_vm14, %v1962_v55  ;;  %vm2788_vm9 = vcmp.lt.s32.totalorder %v2724_v52, 16  ;;  %v1025_v53 = vpack.c.bf16 %v996_v35, %v995_v49  ;;  %vm7217_vm2 = vmand %vm7173_vm6, %vm11577_vm12  ;;  %vm2789_vm7 = vcmp.lt.s32.totalorder %v2725_v39, 16 }
  0x34   : > { %vm1772_vm1 = vcmp.ge.s32.totalorder %v7021_v14, 0  ;;  %v818_v9 = vsel %vm7217_vm2, %v523_v27, 0.0  ;;  %vm7224_vm14 = vmand %vm2756_vm8, %vm2788_vm9  ;;  %vm1773_vm5 = vcmp.ge.s32.totalorder %v7024_v15, 0  ;;  %vm1804_vm10 = vcmp.lt.s32.totalorder %v7021_v14, 16 }
  0x35   : > { %v7230_v35 = vunpack.c.l.bf16 %v6717_v63  ;;  %vm7232_vm12 = vmand %vm2757_vm0, %vm2789_vm7  ;;  %v3202_v17 = vsel %vm7224_vm14, %v7104_v36, 0.0  ;;  %vm1805_vm2 = vcmp.lt.s32.totalorder %v7024_v15, 16  ;;  %v7241_v49 = vadd.s32 48, %v6856_v1 }
  0x36   : > { %v7244_v52 = vadd.s32 56, %v6856_v1  ;;  %vm12127_vm8 = vcmp.ge.s32.totalorder %v6900_v16, 0  ;;  %v2917_v39 = vsel %vm7232_vm12, %v7181_v6, 0.0  ;;  %v3203_v33 = vsel %vm7232_vm12, %v7124_v22, 0.0  ;;  %vm7262_vm0 = vmand %vm1772_vm1, %vm1804_vm10 }
  0x37   : > { %12125 = vst [vmem:[#allocation34_spill] sm:$0xff] %v7241_v49  ;;  %vm2852_vm9 = vmand %vm7224_vm14, %vm12127_vm8  ;;  %v434_v61 = vand.u32 15, %v7115_v0  ;;  %v1326_v60 = vrot.slane %v7124_v22, 1  ;;  %v7258_v32 = vpack.c.bf16 %v3203_v33, %v3202_v17  ;;  %v12129_v16 = vmov 0 }
  0x38   : > { %12126 = vst [vmem:[#allocation35_spill] sm:$0xff] %v7244_v52  ;;  %v2916_v2 = vsel %vm2852_vm9, %v523_v27, 0.0  ;;  %v12130_v16 = vsel %vm7262_vm0, 4294967295, %v12129_v16  ;;  %v7267_v50 = vshra.s32 %v7241_v49, 4  ;;  %v7270_v30 = vshra.s32 %v7244_v52, 4  ;;  %vm7278_vm7 = vmand %vm1773_vm5, %vm1805_vm2 }
  0x39   : > { %12128 = vst [vmem:[#allocation36_spill] sm:$0xff] %v7258_v32  ;;  %v1581_v28 = vpack.c.bf16 %v1551_v10, %v1550_v48  ;;  %v7272_v20 = vpack.c.bf16 %v2917_v39, %v2916_v2  ;;  %v12134_v17 = vmov 0  ;;  %v848_v0 = vpack.c.bf16 %v819_v3, %v818_v9 }
  0x3a   : > { %12131 = vst [vmem:[#allocation37_spill] sm:$0xff] %v7267_v50  ;;  %v12135_v17 = vsel %vm7278_vm7, 4294967295, %v12134_v17  ;;  %vm12136_vm10 = vcmp.ge.s32.totalorder %v7073_v44, 0  ;;  %v532_v2 = vadd.s32 4294967295, %v7267_v50  ;;  %v533_v10 = vadd.s32 4294967295, %v7270_v30 }
  0x3b   : > { %12132 = vst [vmem:[#allocation38_spill] sm:$0xff] %v7270_v30  ;;  %vm7287_vm1 = vmand %vm7262_vm0, %vm12136_vm10  ;;  %v12139_v48 = vrot.slane %v7104_v36, 1  ;;  %vm12140_vm5 = vcmp.lt.s32.totalorder %v6856_v1, 7  ;;  %vm12142_vm2 = vcmask 31744   ;;  %v7300_v3 = vunpack.c.h.bf16 %v6717_v63 }
  0x3c   : > { %12133 = vst [vmem:[#allocation39_spill] sm:$0xff] %v7272_v20  ;;  %5814 = vmatmul.msk.bf16.gmra.mxu0 %vm12142_vm2, %v1025_v53  ;;  %vm12144_vm8 = vcmp.lt.s32.totalorder %v7028_v21, 16  ;;  %v1932_v33 = vsel %vm7287_vm1, %v523_v27, 0.0  ;;  %v12145_v53 = vrot.slane %v7230_v35, 1  ;;  %vm12146_vm10 = vmmov %vm12140_vm5  ;;  %v7320_v44 = vadd.s32 1, %v434_v61 }
  0x3d   : > { %v7297_v39 = vsel %vm12140_vm5, %v12139_v48, %v1326_v60  ;;  %12143 = vst [vmem:[#allocation41_spill] sm:$0xff] %v7300_v3  ;;  %vm3457_vm9 = vmand %vm7232_vm12, %vm12144_vm8  ;;  %v1933_v48 = vsel %vm7278_vm7, %v7181_v6, 0.0  ;;  %vm564_vm5 = vcmp.ge.s32.totalorder %v532_v2, 0  ;;  %v435_v32 = vand.u32 15, %v7241_v49 }
  0x3e   : > { %12141 = vst [vmem:[#allocation40_spill] sm:$0xff] %v7297_v39  ;;  %v3488_v9 = vsel %vm7224_vm14, %v7297_v39, 0.0  ;;  %v7318_v63 = vsel %vm12146_vm10, %v1326_v60, %v12145_v53  ;;  %vm12149_vm12 = vmmov %vm12142_vm2  ;;  %vm596_vm2 = vcmp.lt.s32.totalorder %v532_v2, 16  ;;  %vm565_vm1 = vcmp.ge.s32.totalorder %v533_v10, 0 }
  0x3f   : > { %12147 = vst [vmem:[#allocation42_spill] sm:$0xff] %v7318_v63  ;;  %5846 = vmatmul.msk.bf16.gmra.mxu2 %vm12149_vm12, %v1581_v28  ;;  %v3489_v25 = vsel %vm3457_vm9, %v7318_v63, 0.0  ;;  %vm12150_vm14 = vmmov %vm12149_vm12  ;;  %vm597_vm8 = vcmp.lt.s32.totalorder %v533_v10, 16  ;;  %v1963_v6 = vpack.c.bf16 %v1933_v48, %v1932_v33  ;;  %v7328_v55 = vadd.s32 4294967295, %v435_v32  ;;  %v6718_v10 = vld [vmem:[%s6881_s14 + $0x18] sm:$0xff]  }
  0x40   : > { %12148 = vst [vmem:[#allocation43_spill] sm:$0xff] %v7320_v44  ;;  %5830 = vmatmul.msk.bf16.gmra.mxu1 %vm12150_vm14, %v848_v0  ;;  %v7326_v27 = vpack.c.bf16 %v3489_v25, %v3488_v9  ;;  %vm7330_vm10 = vmand %vm564_vm5, %vm596_vm2  ;;  %vm11595_vm12 = vcmp.lt.s32.totalorder %v7320_v44, 16  ;;  %v465_v61 = vrot.slane %v7230_v35, 7  ;;  %v11600_v28 = vrot.slane %v7300_v3, 7 }
  0x41   : > { %12152 = vst [vmem:[#allocation45_spill] sm:$0xff] %v7328_v55  ;;  %vm7337_vm9 = vmand %vm565_vm1, %vm597_vm8  ;;  %vm11613_vm14 = vcmp.ge.s32.totalorder %v7328_v55, 0  ;;  %v373_v0 = vadd.s32 64, %v6856_v1  ;;  %v7344_v33 = vadd.s32 72, %v6856_v1  ;;  %vm12157_vm5 = vcmask 31744  }
  0x42   : > { %12151 = vst [vmem:[#allocation44_spill] sm:$0xff] %v7326_v27  ;;  %vm7351_vm2 = vmand %vm7183_vm11, %vm11595_vm12  ;;  %vm1774_vm1 = vcmp.ge.s32.totalorder %v7137_v37, 0  ;;  %vm1806_vm8 = vcmp.lt.s32.totalorder %v7137_v37, 16  ;;  %v997_v9 = vsel %vm7330_vm10, %v7230_v35, 0.0  ;;  %v998_v48 = vsel %vm7337_vm9, %v7300_v3, 0.0 }
  0x43   : > { %5863 = vmatmul.msk.bf16.gmra.mxu3 %vm12157_vm5, %v1963_v6  ;;  %vm12160_vm11 = vcmp.lt.s32.totalorder %v6856_v1, 1  ;;  %v12162_v53 = vrot.slane %v7124_v22, 7  ;;  %vm7379_vm12 = vmand %vm7330_vm10, %vm11613_vm14  ;;  %vm1775_vm7 = vcmp.ge.s32.totalorder %v7140_v42, 0  ;;  %vm1807_vm0 = vcmp.lt.s32.totalorder %v7140_v42, 16 }
  0x44   : > { %v7367_v23 = vsel %vm12160_vm11, %v465_v61, %v11600_v28  ;;  %vm12163_vm5 = vmmov %vm12160_vm11  ;;  %v7385_v6 = vshra.s32 %v373_v0, 4  ;;  %v1552_v28 = vsel %vm7173_vm6, %v7297_v39, 0.0  ;;  %v7398_v49 = vshra.s32 %v7344_v33, 4 }
  0x45   : > { %12161 = vst [vmem:[#allocation46_spill] sm:$0xff] %v7367_v23  ;;  %v7373_v25 = vsel %vm12163_vm5, %v12162_v53, %v465_v61  ;;  %v1553_v61 = vsel %vm7351_vm2, %v7318_v63, 0.0  ;;  %vm7393_vm11 = vmand %vm1774_vm1, %vm1806_vm8  ;;  %v12168_v53 = vmov 0  ;;  %v1026_v27 = vpack.c.bf16 %v998_v48, %v997_v9 }
  0x46   : > { %12164 = vst [vmem:[#allocation47_spill] sm:$0xff] %v7373_v25  ;;  %v12169_v53 = vsel %vm7393_vm11, 4294967295, %v12168_v53  ;;  %v820_v42 = vsel %vm7379_vm12, %v7373_v25, 0.0  ;;  %v821_v31 = vsel %vm7337_vm9, %v7367_v23, 0.0  ;;  %vm7406_vm6 = vmand %vm1775_vm7, %vm1807_vm0  ;;  %v12172_v37 = vmov 0 }
  0x47   : > { %12167 = vst [vmem:[#allocation48_spill] sm:$0xff] %v7385_v6  ;;  %v12173_v37 = vsel %vm7406_vm6, 4294967295, %v12172_v37  ;;  %v436_v44 = vand.u32 15, %v7244_v52  ;;  %v1582_v20 = vpack.c.bf16 %v1553_v61, %v1552_v28  ;;  %vm12175_vm2 = vcmp.ge.s32.totalorder %v7193_v51, 0 }
  0x48   : > { %12170 = vst [vmem:[#allocation49_spill] sm:$0xff] %v12169_v53  ;;  %vm7416_vm1 = vmand %vm7393_vm11, %vm12175_vm2  ;;  %v534_v48 = vadd.s32 4294967295, %v7385_v6  ;;  %v437_v32 = vand.u32 15, %v373_v0  ;;  %v849_v15 = vpack.c.bf16 %v821_v31, %v820_v42  ;;  %v535_v14 = vadd.s32 4294967295, %v7398_v49 }
  0x49   : > { %12171 = vst [vmem:[#allocation50_spill] sm:$0xff] %v7398_v49  ;;  %vm12178_vm0 = vcmask 31744   ;;  %v7423_v63 = vunpack.c.l.bf16 %v6718_v10  ;;  %v1934_v28 = vsel %vm7416_vm1, %v7373_v25, 0.0  ;;  %v1935_v61 = vsel %vm7406_vm6, %v7367_v23, 0.0 }
  0x4a   : > { %12174 = vst [vmem:[#allocation51_spill] sm:$0xff] %v12173_v37  ;;  %v7431_v52 = vunpack.c.h.bf16 %v6718_v10  ;;  %v7433_v51 = vadd.s32 1, %v436_v44  ;;  %vm12182_vm7 = vmmov %vm12178_vm0  ;;  %vm566_vm12 = vcmp.ge.s32.totalorder %v534_v48, 0  ;;  %vm598_vm8 = vcmp.lt.s32.totalorder %v534_v48, 16 }
  0x4b   : > { %12179 = vst [vmem:[#allocation52_spill] sm:$0xff] %v7423_v63  ;;  %v7436_v42 = vadd.s32 4294967295, %v437_v32  ;;  %vm12184_vm5 = vmmov %vm12178_vm0  ;;  %vm567_vm2 = vcmp.ge.s32.totalorder %v535_v14, 0  ;;  %v1328_v0 = vrot.slane %v7300_v3, 1  ;;  %v11614_v31 = vrot.slane %v7423_v63, 1 }
  0x4c   : > { %5815 = vmatmul.msk.bf16.gmra.mxu0 %vm12178_vm0, %v1026_v27  ;;  %12180 = vst [vmem:[#allocation53_spill] sm:$0xff] %v7431_v52  ;;  %vm599_vm0 = vcmp.lt.s32.totalorder %v535_v14, 16  ;;  %v1964_v27 = vpack.c.bf16 %v1935_v61, %v1934_v28  ;;  %vm7441_vm1 = vmand %vm566_vm12, %vm598_vm8  ;;  %vm11615_vm14 = vcmp.lt.s32.totalorder %v7433_v51, 16  ;;  %v11621_v44 = vrot.slane %v7431_v52, 7  ;;  %v6719_v61 = vld [vmem:[%s6881_s14 + $0x20] sm:$0xff]  }
  0x4d   : > { %12181 = vst [vmem:[#allocation54_spill] sm:$0xff] %v7433_v51  ;;  %v375_v14 = vadd.s32 80, %v6856_v1  ;;  %vm12189_vm12 = vmmov %vm12184_vm5  ;;  %vm12190_vm8 = vcmp.lt.s32.totalorder %v6856_v1, 7  ;;  %v12192_v32 = vrot.slane %v7230_v35, 1  ;;  %vm1777_vm6 = vcmp.ge.s32.totalorder %v7270_v30, 0 }
  0x4e   : > { %12183 = vst [vmem:[#allocation55_spill] sm:$0xff] %v7436_v42  ;;  %v7462_v48 = vsel %vm12190_vm8, %v1328_v0, %v11614_v31  ;;  %vm1809_vm11 = vcmp.lt.s32.totalorder %v7270_v30, 16  ;;  %v7546_v46 = vunpack.c.l.bf16 %v6719_v61  ;;  %v12600_v38 = vrot.slane %v6921_v29, 7 }
  0x4f   : > { %5847 = vmatmul.msk.bf16.gmra.mxu2 %vm12182_vm7, %v1582_v20  ;;  %v467_v20 = vrot.slane %v7423_v63, 7  ;;  %vm7448_vm7 = vmand %vm567_vm2, %vm599_vm0  ;;  %12191 = vst [vmem:[#allocation56_spill] sm:$0xff] %v7462_v48  ;;  %v12649_v56 = vmov 0 }
  0x50   : > { %5831 = vmatmul.msk.bf16.gmra.mxu1 %vm12184_vm5, %v849_v15  ;;  %v7455_v15 = vadd.s32 88, %v6856_v1  ;;  %vm12193_vm2 = vmmov %vm12190_vm8  ;;  %vm1808_vm5 = vcmp.lt.s32.totalorder %v7267_v50, 16  ;;  %12217 = vst [vmem:[#allocation64_spill] sm:$0xff] %v7546_v46 }
  0x51   : > { %v7468_v28 = vsel %vm12193_vm2, %v12192_v32, %v1328_v0  ;;  %vm7474_vm0 = vmand %vm7337_vm9, %vm11615_vm14  ;;  %v1000_v0 = vsel %vm7448_vm7, %v7431_v52, 0.0  ;;  %vm12197_vm9 = vcmp.lt.s32.totalorder %v6856_v1, 1  ;;  %v12199_v32 = vrot.slane %v7300_v3, 7 }
  0x52   : > { %12194 = vst [vmem:[#allocation57_spill] sm:$0xff] %v7468_v28  ;;  %v7490_v2 = vsel %vm12197_vm9, %v467_v20, %v11621_v44  ;;  %vm12200_vm8 = vmmov %vm12197_vm9  ;;  %vm12202_vm2 = vcmp.ge.s32.totalorder %v7436_v42, 0  ;;  %v7508_v44 = vshra.s32 %v375_v14, 4  ;;  %v1554_v51 = vsel %vm7330_vm10, %v7468_v28, 0.0 }
  0x53   : > { %5864 = vmatmul.msk.bf16.gmra.mxu3 %vm12189_vm12, %v1964_v27  ;;  %vm1776_vm12 = vcmp.ge.s32.totalorder %v7267_v50, 0  ;;  %v999_v27 = vsel %vm7441_vm1, %v7423_v63, 0.0  ;;  %12198 = vst [vmem:[#allocation58_spill] sm:$0xff] %v7490_v2  ;;  %v7496_v31 = vsel %vm12200_vm8, %v12199_v32, %v467_v20  ;;  %vm7502_vm14 = vmand %vm7441_vm1, %vm12202_vm2  ;;  %v1555_v20 = vsel %vm7474_vm0, %v7462_v48, 0.0 }
  0x54   : > { %12201 = vst [vmem:[#allocation59_spill] sm:$0xff] %v7496_v31  ;;  %vm7516_vm9 = vmand %vm1776_vm12, %vm1808_vm5  ;;  %v12206_v32 = vmov 0  ;;  %v7521_v23 = vshra.s32 %v7455_v15, 4  ;;  %v1027_v25 = vpack.c.bf16 %v1000_v0, %v999_v27  ;;  %v822_v30 = vsel %vm7502_vm14, %v7496_v31, 0.0 }
  0x55   : > { %12205 = vst [vmem:[#allocation60_spill] sm:$0xff] %v7508_v44  ;;  %v12207_v32 = vsel %vm7516_vm9, 4294967295, %v12206_v32  ;;  %v823_v60 = vsel %vm7448_vm7, %v7490_v2, 0.0  ;;  %vm7529_vm10 = vmand %vm1777_vm6, %vm1809_vm11  ;;  %v12210_v28 = vmov 0  ;;  %v438_v48 = vand.u32 15, %v7344_v33 }
  0x56   : > { %12208 = vst [vmem:[#allocation61_spill] sm:$0xff] %v12207_v32  ;;  %v12211_v28 = vsel %vm7529_vm10, 4294967295, %v12210_v28  ;;  %v1583_v39 = vpack.c.bf16 %v1555_v20, %v1554_v51  ;;  %vm12213_vm5 = vcmp.ge.s32.totalorder %v7328_v55, 0  ;;  %v536_v50 = vadd.s32 4294967295, %v7508_v44 }
  0x57   : > { %12209 = vst [vmem:[#allocation62_spill] sm:$0xff] %v7521_v23  ;;  %vm7539_vm0 = vmand %vm7516_vm9, %vm12213_vm5  ;;  %v439_v0 = vand.u32 15, %v375_v14  ;;  %v850_v43 = vpack.c.bf16 %v823_v60, %v822_v30  ;;  %v537_v45 = vadd.s32 4294967295, %v7521_v23  ;;  %vm12216_vm14 = vcmask 31744  }
  0x58   : > { %12212 = vst [vmem:[#allocation63_spill] sm:$0xff] %v12211_v28  ;;  %v1936_v51 = vsel %vm7539_vm0, %v7496_v31, 0.0  ;;  %v1937_v33 = vsel %vm7529_vm10, %v7490_v2, 0.0  ;;  %v7554_v20 = vunpack.c.h.bf16 %v6719_v61  ;;  %v7556_v55 = vadd.s32 1, %v438_v48  ;;  %vm12220_vm11 = vmmov %vm12216_vm14 }
  0x59   : > { %vm568_vm6 = vcmp.ge.s32.totalorder %v536_v50, 0  ;;  %vm600_vm12 = vcmp.lt.s32.totalorder %v536_v50, 16  ;;  %v7559_v30 = vadd.s32 4294967295, %v439_v0  ;;  %vm12222_vm8 = vmmov %vm12220_vm11  ;;  %vm569_vm2 = vcmp.ge.s32.totalorder %v537_v45, 0 }
  0x5a   : > { %12218 = vst [vmem:[#allocation65_spill] sm:$0xff] %v7554_v20  ;;  %vm601_vm5 = vcmp.lt.s32.totalorder %v537_v45, 16  ;;  %v1330_v14 = vrot.slane %v7431_v52, 1  ;;  %v11639_v60 = vrot.slane %v7546_v46, 1  ;;  %vm7564_vm0 = vmand %vm568_vm6, %vm600_vm12  ;;  %v11646_v48 = vrot.slane %v7554_v20, 7 }
  0x5b   : > { %12219 = vst [vmem:[#allocation66_spill] sm:$0xff] %v7556_v55  ;;  %v377_v45 = vadd.s32 96, %v6856_v1  ;;  %vm12227_vm6 = vmmov %vm12222_vm8  ;;  %vm12228_vm12 = vcmp.lt.s32.totalorder %v6856_v1, 7  ;;  %v12230_v0 = vrot.slane %v7423_v63, 1  ;;  %vm1779_vm10 = vcmp.ge.s32.totalorder %v7398_v49, 0 }
  0x5c   : > { %5816 = vmatmul.msk.bf16.gmra.mxu0 %vm12216_vm14, %v1027_v25  ;;  %12221 = vst [vmem:[#allocation67_spill] sm:$0xff] %v7559_v30  ;;  %v1965_v25 = vpack.c.bf16 %v1937_v33, %v1936_v51  ;;  %vm11640_vm14 = vcmp.lt.s32.totalorder %v7556_v55, 16  ;;  %v7585_v50 = vsel %vm12228_vm12, %v1330_v14, %v11639_v60  ;;  %vm1811_vm9 = vcmp.lt.s32.totalorder %v7398_v49, 16  ;;  %v6720_v33 = vld [vmem:[%s6881_s14 + $0x28] sm:$0xff]  }
  0x5d   : > { %12229 = vst [vmem:[#allocation68_spill] sm:$0xff] %v7585_v50  ;;  %v7669_v63 = vunpack.c.l.bf16 %v6720_v33 }
  0x5f   : > { %5848 = vmatmul.msk.bf16.gmra.mxu2 %vm12220_vm11, %v1583_v39  ;;  %v469_v39 = vrot.slane %v7546_v46, 7  ;;  %vm7571_vm11 = vmand %vm569_vm2, %vm601_vm5  ;;  %12255 = vst [vmem:[#allocation76_spill] sm:$0xff] %v7669_v63 }
  0x60   : > { %5832 = vmatmul.msk.bf16.gmra.mxu1 %vm12222_vm8, %v850_v43  ;;  %v7578_v43 = vadd.s32 104, %v6856_v1  ;;  %vm12231_vm2 = vmmov %vm12228_vm12  ;;  %vm1810_vm8 = vcmp.lt.s32.totalorder %v7385_v6, 16 }
  0x61   : > { %v7591_v51 = vsel %vm12231_vm2, %v12230_v0, %v1330_v14  ;;  %vm7597_vm5 = vmand %vm7448_vm7, %vm11640_vm14  ;;  %v1002_v14 = vsel %vm7571_vm11, %v7554_v20, 0.0  ;;  %vm12235_vm7 = vcmp.lt.s32.totalorder %v6856_v1, 1  ;;  %v12237_v0 = vrot.slane %v7431_v52, 7 }
  0x62   : > { %12232 = vst [vmem:[#allocation69_spill] sm:$0xff] %v7591_v51  ;;  %v7613_v9 = vsel %vm12235_vm7, %v469_v39, %v11646_v48  ;;  %vm12238_vm12 = vmmov %vm12235_vm7  ;;  %vm12240_vm2 = vcmp.ge.s32.totalorder %v7559_v30, 0  ;;  %v7631_v48 = vshra.s32 %v377_v45, 4  ;;  %v1556_v55 = vsel %vm7441_vm1, %v7591_v51, 0.0 }
  0x63   : > { %5865 = vmatmul.msk.bf16.gmra.mxu3 %vm12227_vm6, %v1965_v25  ;;  %vm1778_vm6 = vcmp.ge.s32.totalorder %v7385_v6, 0  ;;  %v1001_v25 = vsel %vm7564_vm0, %v7546_v46, 0.0  ;;  %12236 = vst [vmem:[#allocation70_spill] sm:$0xff] %v7613_v9  ;;  %v7619_v60 = vsel %vm12238_vm12, %v12237_v0, %v469_v39  ;;  %vm7625_vm14 = vmand %vm7564_vm0, %vm12240_vm2  ;;  %v1557_v39 = vsel %vm7597_vm5, %v7585_v50, 0.0 }
  0x64   : > { %12239 = vst [vmem:[#allocation71_spill] sm:$0xff] %v7619_v60  ;;  %vm7639_vm7 = vmand %vm1778_vm6, %vm1810_vm8  ;;  %v12244_v0 = vmov 0  ;;  %v7644_v2 = vshra.s32 %v7578_v43, 4  ;;  %v1028_v31 = vpack.c.bf16 %v1002_v14, %v1001_v25  ;;  %v824_v49 = vsel %vm7625_vm14, %v7619_v60, 0.0 }
  0x65   : > { %12243 = vst [vmem:[#allocation72_spill] sm:$0xff] %v7631_v48  ;;  %v12245_v0 = vsel %vm7639_vm7, 4294967295, %v12244_v0  ;;  %v825_v10 = vsel %vm7571_vm11, %v7613_v9, 0.0  ;;  %vm7652_vm1 = vmand %vm1779_vm10, %vm1811_vm9  ;;  %v12248_v51 = vmov 0  ;;  %v440_v50 = vand.u32 15, %v7455_v15 }
  0x66   : > { %12246 = vst [vmem:[#allocation73_spill] sm:$0xff] %v12245_v0  ;;  %v12249_v51 = vsel %vm7652_vm1, 4294967295, %v12248_v51  ;;  %v1584_v28 = vpack.c.bf16 %v1557_v39, %v1556_v55  ;;  %vm12251_vm8 = vcmp.ge.s32.totalorder %v7436_v42, 0  ;;  %v538_v6 = vadd.s32 4294967295, %v7631_v48 }
  0x67   : > { %12247 = vst [vmem:[#allocation74_spill] sm:$0xff] %v7644_v2  ;;  %vm7662_vm5 = vmand %vm7639_vm7, %vm12251_vm8  ;;  %v441_v14 = vand.u32 15, %v377_v45  ;;  %v851_v52 = vpack.c.bf16 %v825_v10, %v824_v49  ;;  %v539_v32 = vadd.s32 4294967295, %v7644_v2  ;;  %vm12254_vm9 = vcmask 31744  }
  0x68   : > { %12250 = vst [vmem:[#allocation75_spill] sm:$0xff] %v12249_v51  ;;  %v1938_v55 = vsel %vm7662_vm5, %v7619_v60, 0.0  ;;  %v1939_v15 = vsel %vm7652_vm1, %v7613_v9, 0.0  ;;  %v7677_v39 = vunpack.c.h.bf16 %v6720_v33  ;;  %v7679_v42 = vadd.s32 1, %v440_v50  ;;  %vm12258_vm10 = vmmov %vm12254_vm9 }
  0x69   : > { %vm570_vm14 = vcmp.ge.s32.totalorder %v538_v6, 0  ;;  %vm602_vm6 = vcmp.lt.s32.totalorder %v538_v6, 16  ;;  %v7682_v49 = vadd.s32 4294967295, %v441_v14  ;;  %vm12260_vm12 = vmmov %vm12254_vm9  ;;  %vm571_vm2 = vcmp.ge.s32.totalorder %v539_v32, 0 }
  0x6a   : > { %12256 = vst [vmem:[#allocation77_spill] sm:$0xff] %v7677_v39  ;;  %vm603_vm8 = vcmp.lt.s32.totalorder %v539_v32, 16  ;;  %v1332_v45 = vrot.slane %v7554_v20, 1  ;;  %v11665_v10 = vrot.slane %v7669_v63, 1  ;;  %vm7687_vm5 = vmand %vm570_vm14, %vm602_vm6  ;;  %v11672_v50 = vrot.slane %v7677_v39, 7 }
  0x6b   : > { %12257 = vst [vmem:[#allocation78_spill] sm:$0xff] %v7679_v42  ;;  %v7701_v32 = vadd.s32 120, %v6856_v1  ;;  %vm12265_vm14 = vmmov %vm12260_vm12  ;;  %vm12266_vm6 = vcmp.lt.s32.totalorder %v6856_v1, 7  ;;  %v12268_v14 = vrot.slane %v7546_v46, 1  ;;  %vm1781_vm1 = vcmp.ge.s32.totalorder %v7521_v23, 0 }
  0x6c   : > { %5817 = vmatmul.msk.bf16.gmra.mxu0 %vm12254_vm9, %v1028_v31  ;;  %12259 = vst [vmem:[#allocation79_spill] sm:$0xff] %v7682_v49  ;;  %v1966_v31 = vpack.c.bf16 %v1939_v15, %v1938_v55  ;;  %vm11666_vm9 = vcmp.lt.s32.totalorder %v7679_v42, 16  ;;  %v7708_v6 = vsel %vm12266_vm6, %v1332_v45, %v11665_v10  ;;  %vm1813_vm7 = vcmp.lt.s32.totalorder %v7521_v23, 16  ;;  %v6721_v15 = vld [vmem:[%s6881_s14 + $0x30] sm:$0xff]  }
  0x6d   : > { %12267 = vst [vmem:[#allocation80_spill] sm:$0xff] %v7708_v6  ;;  %v7767_v9 = vshra.s32 %v7701_v32, 4  ;;  %v7792_v46 = vunpack.c.l.bf16 %v6721_v15 }
  0x6f   : > { %5849 = vmatmul.msk.bf16.gmra.mxu2 %vm12258_vm10, %v1584_v28  ;;  %v471_v28 = vrot.slane %v7669_v63, 7  ;;  %vm7694_vm10 = vmand %vm571_vm2, %vm603_vm8  ;;  %12285 = vst [vmem:[#allocation86_spill] sm:$0xff] %v7767_v9  ;;  %v541_v0 = vadd.s32 4294967295, %v7767_v9 }
  0x70   : > { %5833 = vmatmul.msk.bf16.gmra.mxu1 %vm12260_vm12, %v851_v52  ;;  %v379_v52 = vadd.s32 112, %v6856_v1  ;;  %vm12269_vm2 = vmmov %vm12266_vm6  ;;  %vm1812_vm12 = vcmp.lt.s32.totalorder %v7508_v44, 16  ;;  %12293 = vst [vmem:[#allocation88_spill] sm:$0xff] %v7792_v46 }
  0x71   : > { %v7714_v55 = vsel %vm12269_vm2, %v12268_v14, %v1332_v45  ;;  %vm7720_vm8 = vmand %vm7571_vm11, %vm11666_vm9  ;;  %v1004_v45 = vsel %vm7694_vm10, %v7677_v39, 0.0  ;;  %vm12273_vm11 = vcmp.lt.s32.totalorder %v6856_v1, 1  ;;  %v12275_v14 = vrot.slane %v7554_v20, 7 }
  0x72   : > { %12270 = vst [vmem:[#allocation81_spill] sm:$0xff] %v7714_v55  ;;  %v7736_v27 = vsel %vm12273_vm11, %v471_v28, %v11672_v50  ;;  %vm12276_vm6 = vmmov %vm12273_vm11  ;;  %vm12278_vm2 = vcmp.ge.s32.totalorder %v7682_v49, 0  ;;  %v7754_v50 = vshra.s32 %v379_v52, 4  ;;  %v1558_v42 = vsel %vm7564_vm0, %v7714_v55, 0.0 }
  0x73   : > { %5866 = vmatmul.msk.bf16.gmra.mxu3 %vm12265_vm14, %v1966_v31  ;;  %vm1780_vm14 = vcmp.ge.s32.totalorder %v7508_v44, 0  ;;  %v1003_v31 = vsel %vm7687_vm5, %v7669_v63, 0.0  ;;  %12274 = vst [vmem:[#allocation82_spill] sm:$0xff] %v7736_v27  ;;  %v7742_v10 = vsel %vm12276_vm6, %v12275_v14, %v471_v28  ;;  %vm7748_vm9 = vmand %vm7687_vm5, %vm12278_vm2  ;;  %v1559_v28 = vsel %vm7720_vm8, %v7708_v6, 0.0 }
  0x74   : > { %12277 = vst [vmem:[#allocation83_spill] sm:$0xff] %v7742_v10  ;;  %vm7762_vm11 = vmand %vm1780_vm14, %vm1812_vm12  ;;  %v12282_v14 = vmov 0  ;;  %v1029_v60 = vpack.c.bf16 %v1004_v45, %v1003_v31  ;;  %v826_v23 = vsel %vm7748_vm9, %v7742_v10, 0.0  ;;  %v827_v61 = vsel %vm7694_vm10, %v7736_v27, 0.0 }
  0x75   : > { %12281 = vst [vmem:[#allocation84_spill] sm:$0xff] %v7754_v50  ;;  %v12283_v14 = vsel %vm7762_vm11, 4294967295, %v12282_v14  ;;  %vm7775_vm0 = vmand %vm1781_vm1, %vm1813_vm7  ;;  %v12286_v55 = vmov 0  ;;  %v442_v6 = vand.u32 15, %v7578_v43  ;;  %v1585_v51 = vpack.c.bf16 %v1559_v28, %v1558_v42 }
  0x76   : > { %12284 = vst [vmem:[#allocation85_spill] sm:$0xff] %v12283_v14  ;;  %v12287_v55 = vsel %vm7775_vm0, 4294967295, %v12286_v55  ;;  %vm12289_vm12 = vcmp.ge.s32.totalorder %v7559_v30, 0  ;;  %v540_v44 = vadd.s32 4294967295, %v7754_v50  ;;  %v443_v45 = vand.u32 15, %v379_v52 }
  0x77   : > { %12288 = vst [vmem:[#allocation87_spill] sm:$0xff] %v12287_v55  ;;  %vm7785_vm8 = vmand %vm7762_vm11, %vm12289_vm12  ;;  %v852_v20 = vpack.c.bf16 %v827_v61, %v826_v23  ;;  %vm12292_vm7 = vcmask 31744   ;;  %v1941_v43 = vsel %vm7775_vm0, %v7736_v27, 0.0  ;;  %v7800_v28 = vunpack.c.h.bf16 %v6721_v15 }
  0x78   : > { %v1940_v42 = vsel %vm7785_vm8, %v7742_v10, 0.0  ;;  %v7802_v30 = vadd.s32 1, %v442_v6  ;;  %vm12296_vm1 = vmmov %vm12292_vm7  ;;  %vm572_vm9 = vcmp.ge.s32.totalorder %v540_v44, 0  ;;  %vm604_vm14 = vcmp.lt.s32.totalorder %v540_v44, 16 }
  0x79   : > { %12294 = vst [vmem:[#allocation89_spill] sm:$0xff] %v7800_v28  ;;  %v7805_v23 = vadd.s32 4294967295, %v443_v45  ;;  %vm12298_vm6 = vmmov %vm12296_vm1  ;;  %vm573_vm2 = vcmp.ge.s32.totalorder %v541_v0, 0  ;;  %vm605_vm12 = vcmp.lt.s32.totalorder %v541_v0, 16  ;;  %v1334_v52 = vrot.slane %v7677_v39, 1 }
  0x7a   : > { %12295 = vst [vmem:[#allocation90_spill] sm:$0xff] %v7802_v30  ;;  %v11691_v61 = vrot.slane %v7792_v46, 1  ;;  %vm7810_vm8 = vmand %vm572_vm9, %vm604_vm14  ;;  %v11698_v6 = vrot.slane %v7800_v28, 7  ;;  %v7824_v0 = vadd.s32 136, %v6856_v1  ;;  %vm12304_vm14 = vcmp.lt.s32.totalorder %v6856_v1, 7 }
  0x7b   : > { %12297 = vst [vmem:[#allocation91_spill] sm:$0xff] %v7805_v23  ;;  %vm12303_vm9 = vmmov %vm12298_vm6  ;;  %v12306_v45 = vrot.slane %v7669_v63, 1  ;;  %vm1783_vm0 = vcmp.ge.s32.totalorder %v7644_v2, 0  ;;  %vm1815_vm11 = vcmp.lt.s32.totalorder %v7644_v2, 16 }
  0x7c   : > { %5818 = vmatmul.msk.bf16.gmra.mxu0 %vm12292_vm7, %v1029_v60  ;;  %v1967_v60 = vpack.c.bf16 %v1941_v43, %v1940_v42  ;;  %vm11692_vm7 = vcmp.lt.s32.totalorder %v7802_v30, 16  ;;  %v7831_v44 = vsel %vm12304_vm14, %v1334_v52, %v11691_v61  ;;  %v7890_v27 = vshra.s32 %v7824_v0, 4  ;;  %v6722_v43 = vld [vmem:[%s6881_s14 + $0x38] sm:$0xff]  }
  0x7d   : > { %12305 = vst [vmem:[#allocation92_spill] sm:$0xff] %v7831_v44  ;;  %v7915_v63 = vunpack.c.l.bf16 %v6722_v43 }
  0x7e   : > { %12323 = vst [vmem:[#allocation98_spill] sm:$0xff] %v7890_v27  ;;  %v543_v14 = vadd.s32 4294967295, %v7890_v27 }
  0x7f   : > { %5850 = vmatmul.msk.bf16.gmra.mxu2 %vm12296_vm1, %v1585_v51  ;;  %v473_v51 = vrot.slane %v7792_v46, 7  ;;  %vm7817_vm1 = vmand %vm573_vm2, %vm605_vm12  ;;  %12331 = vst [vmem:[#allocation100_spill] sm:$0xff] %v7915_v63 }
  0x80   : > { %5834 = vmatmul.msk.bf16.gmra.mxu1 %vm12298_vm6, %v852_v20  ;;  %v381_v20 = vadd.s32 128, %v6856_v1  ;;  %vm12307_vm2 = vmmov %vm12304_vm14  ;;  %vm1814_vm6 = vcmp.lt.s32.totalorder %v7631_v48, 16 }
  0x81   : > { %v7837_v42 = vsel %vm12307_vm2, %v12306_v45, %v1334_v52  ;;  %vm7843_vm12 = vmand %vm7694_vm10, %vm11692_vm7  ;;  %v1006_v52 = vsel %vm7817_vm1, %v7800_v28, 0.0  ;;  %vm12311_vm10 = vcmp.lt.s32.totalorder %v6856_v1, 1  ;;  %v12313_v45 = vrot.slane %v7677_v39, 7 }
  0x82   : > { %12308 = vst [vmem:[#allocation93_spill] sm:$0xff] %v7837_v42  ;;  %v7859_v25 = vsel %vm12311_vm10, %v473_v51, %v11698_v6  ;;  %vm12314_vm14 = vmmov %vm12311_vm10  ;;  %vm12316_vm2 = vcmp.ge.s32.totalorder %v7805_v23, 0  ;;  %v7877_v6 = vshra.s32 %v381_v20, 4  ;;  %v1560_v30 = vsel %vm7687_vm5, %v7837_v42, 0.0 }
  0x83   : > { %5867 = vmatmul.msk.bf16.gmra.mxu3 %vm12303_vm9, %v1967_v60  ;;  %vm1782_vm9 = vcmp.ge.s32.totalorder %v7631_v48, 0  ;;  %v1005_v60 = vsel %vm7810_vm8, %v7792_v46, 0.0  ;;  %12312 = vst [vmem:[#allocation94_spill] sm:$0xff] %v7859_v25  ;;  %v7865_v61 = vsel %vm12314_vm14, %v12313_v45, %v473_v51  ;;  %vm7871_vm7 = vmand %vm7810_vm8, %vm12316_vm2  ;;  %v1561_v51 = vsel %vm7843_vm12, %v7831_v44, 0.0 }
  0x84   : > { %12315 = vst [vmem:[#allocation95_spill] sm:$0xff] %v7865_v61  ;;  %vm7885_vm10 = vmand %vm1782_vm9, %vm1814_vm6  ;;  %v12320_v45 = vmov 0  ;;  %v1030_v10 = vpack.c.bf16 %v1006_v52, %v1005_v60  ;;  %v828_v2 = vsel %vm7871_vm7, %v7865_v61, 0.0  ;;  %v829_v33 = vsel %vm7817_vm1, %v7859_v25, 0.0 }
  0x85   : > { %12319 = vst [vmem:[#allocation96_spill] sm:$0xff] %v7877_v6  ;;  %v12321_v45 = vsel %vm7885_vm10, 4294967295, %v12320_v45  ;;  %vm7898_vm5 = vmand %vm1783_vm0, %vm1815_vm11  ;;  %v12324_v42 = vmov 0  ;;  %v444_v44 = vand.u32 15, %v7701_v32  ;;  %v1586_v55 = vpack.c.bf16 %v1561_v51, %v1560_v30 }
  0x86   : > { %12322 = vst [vmem:[#allocation97_spill] sm:$0xff] %v12321_v45  ;;  %v12325_v42 = vsel %vm7898_vm5, 4294967295, %v12324_v42  ;;  %vm12327_vm6 = vcmp.ge.s32.totalorder %v7682_v49, 0  ;;  %v542_v48 = vadd.s32 4294967295, %v7877_v6  ;;  %v445_v52 = vand.u32 15, %v381_v20 }
  0x87   : > { %12326 = vst [vmem:[#allocation99_spill] sm:$0xff] %v12325_v42  ;;  %vm7908_vm12 = vmand %vm7885_vm10, %vm12327_vm6  ;;  %v853_v39 = vpack.c.bf16 %v829_v33, %v828_v2  ;;  %vm12330_vm11 = vcmask 31744   ;;  %v1943_v32 = vsel %vm7898_vm5, %v7859_v25, 0.0  ;;  %v7923_v51 = vunpack.c.h.bf16 %v6722_v43 }
  0x88   : > { %v1942_v30 = vsel %vm7908_vm12, %v7865_v61, 0.0  ;;  %v7925_v49 = vadd.s32 1, %v444_v44  ;;  %vm12334_vm0 = vmmov %vm12330_vm11  ;;  %vm574_vm7 = vcmp.ge.s32.totalorder %v542_v48, 0  ;;  %vm606_vm9 = vcmp.lt.s32.totalorder %v542_v48, 16 }
  0x89   : > { %12332 = vst [vmem:[#allocation101_spill] sm:$0xff] %v7923_v51  ;;  %v7928_v2 = vadd.s32 4294967295, %v445_v52  ;;  %vm12336_vm14 = vmmov %vm12334_vm0  ;;  %vm575_vm2 = vcmp.ge.s32.totalorder %v543_v14, 0  ;;  %vm607_vm6 = vcmp.lt.s32.totalorder %v543_v14, 16  ;;  %v1336_v20 = vrot.slane %v7800_v28, 1 }
  0x8a   : > { %12333 = vst [vmem:[#allocation102_spill] sm:$0xff] %v7925_v49  ;;  %v11717_v33 = vrot.slane %v7915_v63, 1  ;;  %vm7933_vm12 = vmand %vm574_vm7, %vm606_vm9  ;;  %v11724_v44 = vrot.slane %v7923_v51, 7  ;;  %v7947_v14 = vadd.s32 152, %v6856_v1  ;;  %vm12342_vm9 = vcmp.lt.s32.totalorder %v6856_v1, 7 }
  0x8b   : > { %12335 = vst [vmem:[#allocation103_spill] sm:$0xff] %v7928_v2  ;;  %vm12341_vm7 = vmmov %vm12336_vm14  ;;  %v12344_v52 = vrot.slane %v7792_v46, 1  ;;  %vm1785_vm5 = vcmp.ge.s32.totalorder %v7767_v9, 0  ;;  %vm1817_vm10 = vcmp.lt.s32.totalorder %v7767_v9, 16 }
  0x8c   : > { %5819 = vmatmul.msk.bf16.gmra.mxu0 %vm12330_vm11, %v1030_v10  ;;  %v1968_v10 = vpack.c.bf16 %v1943_v32, %v1942_v30  ;;  %vm11718_vm11 = vcmp.lt.s32.totalorder %v7925_v49, 16  ;;  %v7954_v48 = vsel %vm12342_vm9, %v1336_v20, %v11717_v33  ;;  %v8013_v25 = vshra.s32 %v7947_v14, 4 }
  0x8d   : > { %12343 = vst [vmem:[#allocation104_spill] sm:$0xff] %v7954_v48  ;;  %v12362_v32 = vmov 0 }
  0x8e   : > { %12361 = vst [vmem:[#allocation110_spill] sm:$0xff] %v8013_v25  ;;  %v545_v13 = vadd.s32 4294967295, %v8013_v25 }
  0x8f   : > { %5851 = vmatmul.msk.bf16.gmra.mxu2 %vm12334_vm0, %v1586_v55  ;;  %v475_v55 = vrot.slane %v7915_v63, 7  ;;  %vm7940_vm0 = vmand %vm575_vm2, %vm607_vm6 }
  0x90   : > { %5835 = vmatmul.msk.bf16.gmra.mxu1 %vm12336_vm14, %v853_v39  ;;  %v383_v39 = vadd.s32 144, %v6856_v1  ;;  %vm12345_vm2 = vmmov %vm12342_vm9  ;;  %vm1816_vm14 = vcmp.lt.s32.totalorder %v7754_v50, 16 }
  0x91   : > { %v7960_v30 = vsel %vm12345_vm2, %v12344_v52, %v1336_v20  ;;  %vm7966_vm6 = vmand %vm7817_vm1, %vm11718_vm11  ;;  %v1008_v20 = vsel %vm7940_vm0, %v7923_v51, 0.0  ;;  %vm12349_vm1 = vcmp.lt.s32.totalorder %v6856_v1, 1  ;;  %v12351_v52 = vrot.slane %v7800_v28, 7 }
  0x92   : > { %12346 = vst [vmem:[#allocation105_spill] sm:$0xff] %v7960_v30  ;;  %v7982_v31 = vsel %vm12349_vm1, %v475_v55, %v11724_v44  ;;  %vm12352_vm9 = vmmov %vm12349_vm1  ;;  %vm12354_vm2 = vcmp.ge.s32.totalorder %v7928_v2, 0  ;;  %v8000_v44 = vshra.s32 %v383_v39, 4  ;;  %v1562_v49 = vsel %vm7810_vm8, %v7960_v30, 0.0  ;;  %v6723_v30 = vld [vmem:[%s6881_s14 + $0x40] sm:$0xff]  }
  0x93   : > { %5868 = vmatmul.msk.bf16.gmra.mxu3 %vm12341_vm7, %v1968_v10  ;;  %vm1784_vm7 = vcmp.ge.s32.totalorder %v7754_v50, 0  ;;  %v1007_v10 = vsel %vm7933_vm12, %v7915_v63, 0.0  ;;  %12350 = vst [vmem:[#allocation106_spill] sm:$0xff] %v7982_v31  ;;  %v7988_v33 = vsel %vm12352_vm9, %v12351_v52, %v475_v55  ;;  %vm7994_vm11 = vmand %vm7933_vm12, %vm12354_vm2  ;;  %v1563_v55 = vsel %vm7966_vm6, %v7954_v48, 0.0 }
  0x94   : > { %12353 = vst [vmem:[#allocation107_spill] sm:$0xff] %v7988_v33  ;;  %vm8008_vm1 = vmand %vm1784_vm7, %vm1816_vm14  ;;  %v12358_v52 = vmov 0  ;;  %v1031_v61 = vpack.c.bf16 %v1008_v20, %v1007_v10  ;;  %v830_v9 = vsel %vm7994_vm11, %v7988_v33, 0.0  ;;  %v831_v15 = vsel %vm7940_vm0, %v7982_v31, 0.0 }
  0x95   : > { %12357 = vst [vmem:[#allocation108_spill] sm:$0xff] %v8000_v44  ;;  %v12359_v52 = vsel %vm8008_vm1, 4294967295, %v12358_v52  ;;  %vm8022_vm8 = vmand %vm1785_vm5, %vm1817_vm10  ;;  %v446_v48 = vand.u32 15, %v7824_v0  ;;  %v1587_v28 = vpack.c.bf16 %v1563_v55, %v1562_v49  ;;  %vm12365_vm14 = vcmp.ge.s32.totalorder %v7805_v23, 0 }
  0x96   : > { %12360 = vst [vmem:[#allocation109_spill] sm:$0xff] %v12359_v52  ;;  %v12363_v32 = vsel %vm8022_vm8, 4294967295, %v12362_v32  ;;  %vm8031_vm6 = vmand %vm8008_vm1, %vm12365_vm14  ;;  %v544_v10 = vadd.s32 4294967295, %v8000_v44  ;;  %v447_v20 = vand.u32 15, %v383_v39  ;;  %v854_v45 = vpack.c.bf16 %v831_v15, %v830_v9 }
  0x97   : > { %12364 = vst [vmem:[#allocation111_spill] sm:$0xff] %v12363_v32  ;;  %v8036_v46 = vunpack.c.l.bf16 %v6723_v30  ;;  %vm12369_vm10 = vcmask 31744   ;;  %v1945_v49 = vsel %vm8022_vm8, %v7982_v31, 0.0  ;;  %v1944_v55 = vsel %vm8031_vm6, %v7988_v33, 0.0 }
  0x98   : > { %v1103_v42 = vpop.f32.mrf.mxu0  ;;  %v8048_v23 = vunpack.c.h.bf16 %v6723_v30  ;;  %v8050_v9 = vadd.s32 1, %v446_v48  ;;  %vm12372_vm5 = vmmov %vm12369_vm10  ;;  %vm576_vm11 = vcmp.ge.s32.totalorder %v544_v10, 0  ;;  %vm608_vm7 = vcmp.lt.s32.totalorder %v544_v10, 16 }
  0x99   : > { %12368 = vst [vmem:[#allocation112_spill] sm:$0xff] %v8036_v46  ;;  %v8053_v39 = vadd.s32 4294967295, %v447_v20  ;;  %vm12374_vm9 = vmmov %vm12372_vm5  ;;  %vm577_vm2 = vcmp.ge.s32.totalorder %v545_v13, 0  ;;  %vm609_vm14 = vcmp.lt.s32.totalorder %v545_v13, 16  ;;  %v385_v50 = vadd.s32 160, %v6856_v1 }
  0x9a   : > { %12370 = vst [vmem:[#allocation113_spill] sm:$0xff] %v8048_v23  ;;  %vm8060_vm6 = vmand %vm576_vm11, %vm608_vm7  ;;  %vm12380_vm11 = vcmp.lt.s32.totalorder %v6856_v1, 7  ;;  %v8080_v20 = vadd.s32 168, %v6856_v1  ;;  %vm12382_vm7 = vcmask 31744   ;;  %vm1787_vm8 = vcmp.ge.s32.totalorder %v7890_v27, 0 }
  0x9b   : > { %v1243_v54 = vpop.f32.mrf.mxu1  ;;  %12371 = vst [vmem:[#allocation114_spill] sm:$0xff] %v8050_v9  ;;  %vm1819_vm1 = vcmp.lt.s32.totalorder %v7890_v27, 16 }
  0x9c   : > { %5820 = vmatmul.msk.bf16.gmra.mxu0 %vm12369_vm10, %v1031_v61  ;;  %v8043_v0 = vadd.f32 %v1243_v54, %v1103_v42  ;;  %12373 = vst [vmem:[#allocation115_spill] sm:$0xff] %v8053_v39  ;;  %v1338_v54 = vrot.slane %v7923_v51, 1  ;;  %v11747_v61 = vrot.slane %v8036_v46, 1  ;;  %v1969_v42 = vpack.c.bf16 %v1945_v49, %v1944_v55 }
  0x9d   : > { %vm11751_vm10 = vcmp.lt.s32.totalorder %v8050_v9, 16  ;;  %v1009_v55 = vsel %vm8060_vm6, %v8036_v46, 0.0  ;;  %v12391_v9 = vrot.slane %v7923_v51, 7  ;;  %v8144_v33 = vshra.s32 %v8080_v20, 4 }
  0x9e   : > { %v8077_v10 = vsel %vm12380_vm11, %v1338_v54, %v11747_v61  ;;  %v448_v51 = vand.u32 15, %v7947_v14 }
  0x9f   : > { %5852 = vmatmul.msk.bf16.gmra.mxu2 %vm12372_vm5, %v1587_v28  ;;  %v477_v28 = vrot.slane %v8036_v46, 7  ;;  %vm8067_vm5 = vmand %vm577_vm2, %vm609_vm14  ;;  %12381 = vst [vmem:[#allocation117_spill] sm:$0xff] %v8077_v10  ;;  %v547_v47 = vadd.s32 4294967295, %v8144_v33 }
  0xa0   : > { %5836 = vmatmul.msk.bf16.gmra.mxu1 %vm12374_vm9, %v854_v45  ;;  %v8058_v15 = vpop.f32.mrf.mxu2  ;;  %v1105_v30 = vpop.f32.mrf.mxu0  ;;  %vm11776_vm9 = vcmp.ge.s32.totalorder %v8053_v39, 0  ;;  %v12383_v45 = vrot.slane %v7915_v63, 1  ;;  %vm12384_vm2 = vmmov %vm12380_vm11  ;;  %vm1786_vm11 = vcmp.ge.s32.totalorder %v7877_v6, 0  ;;  %12401 = vst [vmem:[#allocation124_spill] sm:$0xff] %v8144_v33 }
  0xa1   : > { %12375 = vst [vmem:[#allocation116_spill] sm:$0xff] %v8058_v15  ;;  %vm8096_vm14 = vmand %vm7940_vm0, %vm11751_vm10 }
  0xa2   : > { %v8090_v15 = vsel %vm12384_vm2, %v12383_v45, %v1338_v54  ;;  %v1010_v54 = vsel %vm8067_vm5, %v8048_v23, 0.0  ;;  %v12388_v45 = vrot.slane %v8048_v23, 7  ;;  %vm12389_vm2 = vcmp.lt.s32.totalorder %v6856_v1, 1  ;;  %vm8123_vm10 = vmand %vm8060_vm6, %vm11776_vm9 }
  0xa3   : > { %5869 = vmatmul.msk.bf16.gmra.mxu3 %vm12382_vm7, %v1969_v42  ;;  %v1245_v49 = vpop.f32.mrf.mxu1  ;;  %12385 = vst [vmem:[#allocation118_spill] sm:$0xff] %v8090_v15  ;;  %vm1818_vm7 = vcmp.lt.s32.totalorder %v7877_v6, 16  ;;  %vm12392_vm0 = vmmov %vm12389_vm2  ;;  %v12398_v6 = vmov 0  ;;  %v1032_v27 = vpack.c.bf16 %v1010_v54, %v1009_v55 }
  0xa4   : > { %v8102_v42 = vadd.f32 %v1245_v49, %v1105_v30  ;;  %v8111_v60 = vsel %vm12389_vm2, %v477_v28, %v12388_v45  ;;  %v8117_v31 = vsel %vm12392_vm0, %v12391_v9, %v477_v28  ;;  %v8129_v49 = vshra.s32 %v385_v50, 4  ;;  %vm8139_vm2 = vmand %vm1786_vm11, %vm1818_vm7 }
  0xa5   : > { %12390 = vst [vmem:[#allocation119_spill] sm:$0xff] %v8111_v60  ;;  %v1564_v9 = vsel %vm7933_vm12, %v8090_v15, 0.0  ;;  %v1565_v28 = vsel %vm8096_vm14, %v8077_v10, 0.0  ;;  %v12399_v6 = vsel %vm8139_vm2, 4294967295, %v12398_v6  ;;  %v833_v43 = vsel %vm8067_vm5, %v8111_v60, 0.0  ;;  %v6724_v15 = vld [vmem:[%s6881_s14 + $0x48] sm:$0xff]   ;;  %vm8155_vm12 = vmand %vm1787_vm8, %vm1819_vm1 }
  0xa6   : > { %12393 = vst [vmem:[#allocation120_spill] sm:$0xff] %v8117_v31  ;;  %v8131_v45 = vpop.f32.mrf.mxu3  ;;  %v12403_v10 = vmov 0  ;;  %v1588_v52 = vpack.c.bf16 %v1565_v28, %v1564_v9  ;;  %vm12406_vm14 = vcmp.ge.s32.totalorder %v7928_v2, 0  ;;  %v546_v54 = vadd.s32 4294967295, %v8129_v49 }
  0xa7   : > { %12396 = vst [vmem:[#allocation121_spill] sm:$0xff] %v8129_v49  ;;  %v12404_v10 = vsel %vm8155_vm12, 4294967295, %v12403_v10  ;;  %v449_v30 = vand.u32 15, %v385_v50  ;;  %v8169_v63 = vunpack.c.l.bf16 %v6724_v15  ;;  %vm12410_vm1 = vcmask 31744  }
  0xa8   : > { %12397 = vst [vmem:[#allocation122_spill] sm:$0xff] %v8131_v45  ;;  %v832_v45 = vsel %vm8123_vm10, %v8117_v31, 0.0  ;;  %v8153_v32 = vpop.f32.mrf.mxu2  ;;  %v1108_v61 = vpop.f32.mrf.mxu0  ;;  %vm8164_vm10 = vmand %vm8139_vm2, %vm12406_vm14  ;;  %v1947_v14 = vsel %vm8155_vm12, %v8111_v60, 0.0  ;;  %v8181_v2 = vunpack.c.h.bf16 %v6724_v15  ;;  %v8183_v50 = vadd.s32 1, %v448_v51 }
  0xa9   : > { %12400 = vst [vmem:[#allocation123_spill] sm:$0xff] %v12399_v6  ;;  %v1946_v28 = vsel %vm8164_vm10, %v8117_v31, 0.0  ;;  %vm12413_vm8 = vmmov %vm12410_vm1  ;;  %vm578_vm11 = vcmp.ge.s32.totalorder %v546_v54, 0  ;;  %vm610_vm7 = vcmp.lt.s32.totalorder %v546_v54, 16  ;;  %vm579_vm14 = vcmp.ge.s32.totalorder %v547_v47, 0 }
  0xaa   : > { %12402 = vst [vmem:[#allocation125_spill] sm:$0xff] %v8153_v32  ;;  %v855_v32 = vpack.c.bf16 %v833_v43, %v832_v45  ;;  %v8186_v45 = vadd.s32 4294967295, %v449_v30  ;;  %vm12416_vm0 = vmmov %vm12410_vm1  ;;  %v11777_v43 = vrot.slane %v8169_v63, 1  ;;  %v1970_v15 = vpack.c.bf16 %v1947_v14, %v1946_v28 }
  0xab   : > { %12405 = vst [vmem:[#allocation126_spill] sm:$0xff] %v12404_v10  ;;  %v1248_v37 = vpop.f32.mrf.mxu1  ;;  %vm8193_vm10 = vmand %vm578_vm11, %vm610_vm7  ;;  %v387_v30 = vadd.s32 176, %v6856_v1  ;;  %vm12421_vm11 = vcmp.lt.s32.totalorder %v6856_v1, 7  ;;  %v8214_v28 = vadd.s32 184, %v6856_v1  ;;  %vm12423_vm7 = vcmask 31744  }
  0xac   : > { %12409 = vst [vmem:[#allocation127_spill] sm:$0xff] %v8169_v63  ;;  %5821 = vmatmul.msk.bf16.gmra.mxu0 %vm12410_vm1, %v1032_v27  ;;  %v8176_v9 = vadd.f32 %v1248_v37, %v1108_v61  ;;  %vm611_vm1 = vcmp.lt.s32.totalorder %v547_v47, 16  ;;  %v1340_v37 = vrot.slane %v8048_v23, 1  ;;  %vm11805_vm9 = vcmp.ge.s32.totalorder %v8186_v45, 0 }
  0xad   : > { %12411 = vst [vmem:[#allocation128_spill] sm:$0xff] %v8181_v2  ;;  %v12424_v54 = vrot.slane %v8036_v46, 1  ;;  %vm1789_vm12 = vcmp.ge.s32.totalorder %v8013_v25, 0  ;;  %vm1821_vm2 = vcmp.lt.s32.totalorder %v8013_v25, 16  ;;  %v8276_v31 = vshra.s32 %v8214_v28, 4 }
  0xae   : > { %12412 = vst [vmem:[#allocation129_spill] sm:$0xff] %v8183_v50  ;;  %v8188_v27 = vpop.f32.mrf.mxu3  ;;  %v8211_v14 = vsel %vm12421_vm11, %v1340_v37, %v11777_v43  ;;  %v6725_v43 = vld [vmem:[%s6881_s14 + $0x50] sm:$0xff]   ;;  %v12443_v46 = vmov 0  ;;  %v451_v25 = vand.u32 15, %v387_v30 }
  0xaf   : > { %5853 = vmatmul.msk.bf16.gmra.mxu2 %vm12413_vm8, %v1588_v52  ;;  %12414 = vst [vmem:[#allocation130_spill] sm:$0xff] %v8186_v45  ;;  %vm11781_vm8 = vcmp.lt.s32.totalorder %v8183_v50, 16  ;;  %v479_v52 = vrot.slane %v8169_v63, 7  ;;  %v8304_v3 = vunpack.c.l.bf16 %v6725_v43  ;;  %v549_v53 = vadd.s32 4294967295, %v8276_v31 }
  0xb0   : > { %12415 = vst [vmem:[#allocation131_spill] sm:$0xff] %v8188_v27  ;;  %5837 = vmatmul.msk.bf16.gmra.mxu1 %vm12416_vm0, %v855_v32  ;;  %v1658_v61 = vpop.f32.mrf.mxu2  ;;  %v1110_v51 = vpop.f32.mrf.mxu0  ;;  %vm8201_vm0 = vmand %vm579_vm14, %vm611_vm1 }
  0xb1   : > { %v1738_v32 = vadd.f32 %v1658_v61, %v8043_v0  ;;  %12422 = vst [vmem:[#allocation132_spill] sm:$0xff] %v8211_v14  ;;  %v1011_v61 = vsel %vm8193_vm10, %v8169_v63, 0.0  ;;  %vm12425_vm14 = vmmov %vm12421_vm11  ;;  %vm1788_vm11 = vcmp.ge.s32.totalorder %v8000_v44, 0  ;;  %v1012_v60 = vsel %vm8201_vm0, %v8181_v2, 0.0 }
  0xb2   : > { %v8224_v27 = vsel %vm12425_vm14, %v12424_v54, %v1340_v37  ;;  %vm8230_vm1 = vmand %vm8067_vm5, %vm11781_vm8  ;;  %v12429_v37 = vrot.slane %v8181_v2, 7  ;;  %vm12430_vm14 = vcmp.lt.s32.totalorder %v6856_v1, 1  ;;  %v12432_v54 = vrot.slane %v8048_v23, 7  ;;  %12441 = vst [vmem:[#allocation138_spill] sm:$0xff] %v8276_v31 }
  0xb3   : > { %5870 = vmatmul.msk.bf16.gmra.mxu3 %vm12423_vm7, %v1970_v15  ;;  %v1250_v0 = vpop.f32.mrf.mxu1  ;;  %12426 = vst [vmem:[#allocation133_spill] sm:$0xff] %v8224_v27  ;;  %vm1820_vm7 = vcmp.lt.s32.totalorder %v8000_v44, 16  ;;  %vm12433_vm5 = vmmov %vm12430_vm14  ;;  %v12438_v44 = vmov 0  ;;  %v1033_v23 = vpack.c.bf16 %v1012_v60, %v1011_v61 }
  0xb4   : > { %v8236_v15 = vadd.f32 %v1250_v0, %v1110_v51  ;;  %v8245_v13 = vsel %vm12430_vm14, %v479_v52, %v12429_v37  ;;  %v8251_v50 = vsel %vm12433_vm5, %v12432_v54, %v479_v52  ;;  %vm8257_vm8 = vmand %vm8193_vm10, %vm11805_vm9  ;;  %v8263_v0 = vshra.s32 %v387_v30, 4  ;;  %12449 = vst [vmem:[#allocation141_spill] sm:$0xff] %v8304_v3 }
  0xb5   : > { %12431 = vst [vmem:[#allocation134_spill] sm:$0xff] %v8245_v13  ;;  %v1566_v52 = vsel %vm8060_vm6, %v8224_v27, 0.0  ;;  %v1567_v54 = vsel %vm8230_vm1, %v8211_v14, 0.0  ;;  %vm8271_vm14 = vmand %vm1788_vm11, %vm1820_vm7  ;;  %v834_v6 = vsel %vm8257_vm8, %v8251_v50, 0.0  ;;  %v835_v48 = vsel %vm8201_vm0, %v8245_v13, 0.0 }
  0xb6   : > { %12434 = vst [vmem:[#allocation135_spill] sm:$0xff] %v8251_v50  ;;  %v2040_v37 = vpop.f32.mrf.mxu3  ;;  %v12439_v44 = vsel %vm8271_vm14, 4294967295, %v12438_v44  ;;  %vm8289_vm6 = vmand %vm1789_vm12, %vm1821_vm2  ;;  %v1589_v61 = vpack.c.bf16 %v1567_v54, %v1566_v52  ;;  %vm12446_vm8 = vcmp.ge.s32.totalorder %v8053_v39, 0  ;;  %vm12450_vm2 = vcmask 31744  }
  0xb7   : > { %12437 = vst [vmem:[#allocation136_spill] sm:$0xff] %v8263_v0  ;;  %v8278_v10 = vadd.f32 %v2040_v37, %v1738_v32  ;;  %v12444_v46 = vsel %vm8289_vm6, 4294967295, %v12443_v46  ;;  %v450_v32 = vand.u32 15, %v8080_v20  ;;  %vm8299_vm1 = vmand %vm8271_vm14, %vm12446_vm8  ;;  %v548_v37 = vadd.s32 4294967295, %v8263_v0 }
  0xb8   : > { %12440 = vst [vmem:[#allocation137_spill] sm:$0xff] %v12439_v44  ;;  %v1660_v14 = vpop.f32.mrf.mxu2  ;;  %v1948_v52 = vsel %vm8299_vm1, %v8251_v50, 0.0  ;;  %v8316_v54 = vunpack.c.h.bf16 %v6725_v43  ;;  %vm12453_vm12 = vmmov %vm12450_vm2  ;;  %v8321_v30 = vadd.s32 4294967295, %v451_v25  ;;  %vm581_vm8 = vcmp.ge.s32.totalorder %v549_v53, 0 }
  0xb9   : > { %12442 = vst [vmem:[#allocation139_spill] sm:$0xff] %v8278_v10  ;;  %v1113_v27 = vpop.f32.mrf.mxu0  ;;  %v1739_v60 = vadd.f32 %v1660_v14, %v8102_v42  ;;  %v856_v10 = vpack.c.bf16 %v835_v48, %v834_v6  ;;  %v1949_v42 = vsel %vm8289_vm6, %v8245_v13, 0.0  ;;  %v8318_v6 = vadd.s32 1, %v450_v32  ;;  %vm12455_vm5 = vmmov %vm12450_vm2 }
  0xba   : > { %12445 = vst [vmem:[#allocation140_spill] sm:$0xff] %v12444_v46  ;;  %vm580_vm11 = vcmp.ge.s32.totalorder %v548_v37, 0  ;;  %vm612_vm7 = vcmp.lt.s32.totalorder %v548_v37, 16  ;;  %v11806_v48 = vrot.slane %v8304_v3, 1  ;;  %v1971_v43 = vpack.c.bf16 %v1949_v42, %v1948_v52 }
  0xbb   : > { %12451 = vst [vmem:[#allocation142_spill] sm:$0xff] %v8316_v54  ;;  %vm8328_vm1 = vmand %vm580_vm11, %vm612_vm7  ;;  %v481_v25 = vrot.slane %v8304_v3, 7  ;;  %vm11831_vm9 = vcmp.ge.s32.totalorder %v8321_v30, 0  ;;  %vm12461_vm11 = vcmp.lt.s32.totalorder %v6856_v1, 7  ;;  %v8349_v52 = vadd.s32 200, %v6856_v1 }
  0xbc   : > { %5822 = vmatmul.msk.bf16.gmra.mxu0 %vm12450_vm2, %v1033_v23  ;;  %12452 = vst [vmem:[#allocation143_spill] sm:$0xff] %v8318_v6  ;;  %vm613_vm2 = vcmp.lt.s32.totalorder %v549_v53, 16  ;;  %vm12463_vm7 = vcmask 31744   ;;  %vm1791_vm6 = vcmp.ge.s32.totalorder %v8144_v33, 0  ;;  %vm1823_vm14 = vcmp.lt.s32.totalorder %v8144_v33, 16 }
  0xbd   : > { %v1253_v20 = vpop.f32.mrf.mxu1  ;;  %12454 = vst [vmem:[#allocation144_spill] sm:$0xff] %v8321_v30  ;;  %v8411_v13 = vshra.s32 %v8349_v52, 4  ;;  %v12483_v44 = vmov 0 }
  0xbe   : > { %v8311_v14 = vadd.f32 %v1253_v20, %v1113_v27  ;;  %v2042_v23 = vpop.f32.mrf.mxu3  ;;  %v1342_v27 = vrot.slane %v8181_v2, 1 }
  0xbf   : > { %5854 = vmatmul.msk.bf16.gmra.mxu2 %vm12453_vm12, %v1589_v61  ;;  %v8326_v51 = vadd.f32 %v2042_v23, %v1739_v60  ;;  %vm11810_vm12 = vcmp.lt.s32.totalorder %v8318_v6, 16  ;;  %v389_v60 = vadd.s32 192, %v6856_v1  ;;  %v1013_v23 = vsel %vm8328_vm1, %v8304_v3, 0.0  ;;  %12481 = vst [vmem:[#allocation152_spill] sm:$0xff] %v8411_v13 }
  0xc0   : > { %5838 = vmatmul.msk.bf16.gmra.mxu1 %vm12455_vm5, %v856_v10  ;;  %vm8336_vm5 = vmand %vm581_vm8, %vm613_vm2  ;;  %v8346_v42 = vsel %vm12461_vm11, %v1342_v27, %v11806_v48  ;;  %v6726_v48 = vld [vmem:[%s6881_s14 + $0x58] sm:$0xff]  }
  0xc1   : > { %12456 = vst [vmem:[#allocation145_spill] sm:$0xff] %v8326_v51  ;;  %v1115_v20 = vpop.f32.mrf.mxu0  ;;  %vm12465_vm8 = vmmov %vm12461_vm11  ;;  %vm1790_vm11 = vcmp.ge.s32.totalorder %v8129_v49, 0  ;;  %v1014_v39 = vsel %vm8336_vm5, %v8316_v54, 0.0  ;;  %v453_v33 = vand.u32 15, %v389_v60  ;;  %v551_v51 = vadd.s32 4294967295, %v8411_v13 }
  0xc2   : > { %v1663_v32 = vpop.f32.mrf.mxu2  ;;  %12462 = vst [vmem:[#allocation146_spill] sm:$0xff] %v8346_v42  ;;  %vm8365_vm2 = vmand %vm8201_vm0, %vm11810_vm12  ;;  %v1034_v46 = vpack.c.bf16 %v1014_v39, %v1013_v23 }
  0xc3   : > { %v1740_v53 = vadd.f32 %v1663_v32, %v8176_v9  ;;  %5871 = vmatmul.msk.bf16.gmra.mxu3 %vm12463_vm7, %v1971_v43  ;;  %v12464_v32 = vrot.slane %v8169_v63, 1  ;;  %vm1822_vm7 = vcmp.lt.s32.totalorder %v8129_v49, 16  ;;  %vm8392_vm12 = vmand %vm8328_vm1, %vm11831_vm9  ;;  %v12478_v49 = vmov 0 }
  0xc4   : > { %v8439_v63 = vunpack.c.l.bf16 %v6726_v48 }
  0xc5   : > { %v1255_v9 = vpop.f32.mrf.mxu1  ;;  %v8359_v10 = vsel %vm12465_vm8, %v12464_v32, %v1342_v27  ;;  %v12469_v27 = vrot.slane %v8316_v54, 7  ;;  %vm12470_vm8 = vcmp.lt.s32.totalorder %v6856_v1, 1  ;;  %v12472_v32 = vrot.slane %v8181_v2, 7 }
  0xc6   : > { %12466 = vst [vmem:[#allocation147_spill] sm:$0xff] %v8359_v10  ;;  %v8371_v43 = vadd.f32 %v1255_v9, %v1115_v20  ;;  %vm12473_vm0 = vmmov %vm12470_vm8  ;;  %v8398_v9 = vshra.s32 %v389_v60, 4  ;;  %v8456_v60 = vadd.s32 4294967295, %v453_v33  ;;  %v483_v33 = vrot.slane %v8439_v63, 7 }
  0xc7   : > { %v8380_v47 = vsel %vm12470_vm8, %v481_v25, %v12469_v27  ;;  %v8386_v6 = vsel %vm12473_vm0, %v12472_v32, %v481_v25  ;;  %v2045_v27 = vpop.f32.mrf.mxu3  ;;  %v1568_v25 = vsel %vm8193_vm10, %v8359_v10, 0.0  ;;  %v1569_v32 = vsel %vm8365_vm2, %v8346_v42, 0.0  ;;  %vm8406_vm8 = vmand %vm1790_vm11, %vm1822_vm7 }
  0xc8   : > { %12471 = vst [vmem:[#allocation148_spill] sm:$0xff] %v8380_v47  ;;  %v12479_v49 = vsel %vm8406_vm8, 4294967295, %v12478_v49  ;;  %v8413_v50 = vadd.f32 %v2045_v27, %v1740_v53  ;;  %v836_v2 = vsel %vm8392_vm12, %v8386_v6, 0.0  ;;  %v837_v55 = vsel %vm8336_vm5, %v8380_v47, 0.0  ;;  %vm8424_vm10 = vmand %vm1791_vm6, %vm1823_vm14 }
  0xc9   : > { %12474 = vst [vmem:[#allocation149_spill] sm:$0xff] %v8386_v6  ;;  %v1118_v10 = vpop.f32.mrf.mxu0  ;;  %v12484_v44 = vsel %vm8424_vm10, 4294967295, %v12483_v44  ;;  %v452_v53 = vand.u32 15, %v8214_v28  ;;  %v1590_v23 = vpack.c.bf16 %v1569_v32, %v1568_v25  ;;  %vm12486_vm12 = vcmp.ge.s32.totalorder %v8186_v45, 0 }
  0xca   : > { %12477 = vst [vmem:[#allocation150_spill] sm:$0xff] %v8398_v9  ;;  %v1665_v42 = vpop.f32.mrf.mxu2  ;;  %vm8434_vm2 = vmand %vm8406_vm8, %vm12486_vm12  ;;  %v550_v27 = vadd.s32 4294967295, %v8398_v9  ;;  %vm12489_vm14 = vcmask 31744   ;;  %v8451_v32 = vunpack.c.h.bf16 %v6726_v48  ;;  %vm583_vm12 = vcmp.ge.s32.totalorder %v551_v51, 0 }
  0xcb   : > { %12480 = vst [vmem:[#allocation151_spill] sm:$0xff] %v12479_v49  ;;  %v1741_v39 = vadd.f32 %v1665_v42, %v8236_v15  ;;  %v1951_v15 = vsel %vm8424_vm10, %v8380_v47, 0.0  ;;  %v1950_v25 = vsel %vm8434_vm2, %v8386_v6, 0.0  ;;  %vm12491_vm6 = vmmov %vm12489_vm14  ;;  %vm11858_vm9 = vcmp.ge.s32.totalorder %v8456_v60, 0 }
  0xcc   : > { %12482 = vst [vmem:[#allocation153_spill] sm:$0xff] %v8413_v50  ;;  %v857_v50 = vpack.c.bf16 %v837_v55, %v836_v2  ;;  %5823 = vmatmul.msk.bf16.gmra.mxu0 %vm12489_vm14, %v1034_v46  ;;  %v8453_v2 = vadd.s32 1, %v452_v53  ;;  %vm582_vm11 = vcmp.ge.s32.totalorder %v550_v27, 0  ;;  %vm614_vm7 = vcmp.lt.s32.totalorder %v550_v27, 16  ;;  %vm12493_vm0 = vmmov %vm12491_vm6 }
  0xcd   : > { %12485 = vst [vmem:[#allocation154_spill] sm:$0xff] %v12484_v44  ;;  %v1258_v28 = vpop.f32.mrf.mxu1  ;;  %vm615_vm14 = vcmp.lt.s32.totalorder %v551_v51, 16  ;;  %v11832_v55 = vrot.slane %v8439_v63, 1  ;;  %v1972_v48 = vpack.c.bf16 %v1951_v15, %v1950_v25  ;;  %vm8463_vm2 = vmand %vm582_vm11, %vm614_vm7  ;;  %vm12499_vm11 = vcmp.lt.s32.totalorder %v6856_v1, 7 }
  0xce   : > { %v8446_v42 = vadd.f32 %v1258_v28, %v1118_v10  ;;  %12490 = vst [vmem:[#allocation155_spill] sm:$0xff] %v8453_v2  ;;  %v1344_v10 = vrot.slane %v8316_v54, 1  ;;  %v8484_v25 = vadd.s32 216, %v6856_v1  ;;  %vm12501_vm7 = vcmask 31744  }
  0xcf   : > { %5855 = vmatmul.msk.bf16.gmra.mxu2 %vm12491_vm6, %v1590_v23  ;;  %12492 = vst [vmem:[#allocation156_spill] sm:$0xff] %v8456_v60  ;;  %v2047_v46 = vpop.f32.mrf.mxu3  ;;  %vm11836_vm6 = vcmp.lt.s32.totalorder %v8453_v2, 16  ;;  %vm1793_vm10 = vcmp.ge.s32.totalorder %v8276_v31, 0  ;;  %vm1825_vm8 = vcmp.lt.s32.totalorder %v8276_v31, 16  ;;  %v12520_v49 = vmov 0 }
  0xd0   : > { %5839 = vmatmul.msk.bf16.gmra.mxu1 %vm12493_vm0, %v857_v50  ;;  %v8461_v20 = vadd.f32 %v2047_v46, %v1741_v39  ;;  %vm8471_vm0 = vmand %vm583_vm12, %vm615_vm14  ;;  %v391_v39 = vadd.s32 208, %v6856_v1  ;;  %v8481_v15 = vsel %vm12499_vm11, %v1344_v10, %v11832_v55  ;;  %v1015_v46 = vsel %vm8463_vm2, %v8439_v63, 0.0  ;;  %v6727_v55 = vld [vmem:[%s6881_s14 + $0x60] sm:$0xff]  }
  0xd1   : > { %v1120_v28 = vpop.f32.mrf.mxu0  ;;  %12500 = vst [vmem:[#allocation158_spill] sm:$0xff] %v8481_v15  ;;  %vm12503_vm12 = vmmov %vm12499_vm11  ;;  %vm1792_vm11 = vcmp.ge.s32.totalorder %v8263_v0, 0  ;;  %v1016_v45 = vsel %vm8471_vm0, %v8451_v32, 0.0  ;;  %v8546_v47 = vshra.s32 %v8484_v25, 4  ;;  %v12545_v27 = vrot.slane %v8451_v32, 7 }
  0xd2   : > { %12494 = vst [vmem:[#allocation157_spill] sm:$0xff] %v8461_v20  ;;  %v1668_v53 = vpop.f32.mrf.mxu2  ;;  %vm8500_vm14 = vmand %vm8336_vm5, %vm11836_vm6  ;;  %v1035_v44 = vpack.c.bf16 %v1016_v45, %v1015_v46  ;;  %v455_v31 = vand.u32 15, %v391_v39 }
  0xd3   : > { %v1742_v51 = vadd.f32 %v1668_v53, %v8311_v14  ;;  %5872 = vmatmul.msk.bf16.gmra.mxu3 %vm12501_vm7, %v1972_v48  ;;  %v12502_v53 = vrot.slane %v8304_v3, 1  ;;  %vm1824_vm7 = vcmp.lt.s32.totalorder %v8263_v0, 16  ;;  %vm8527_vm6 = vmand %vm8463_vm2, %vm11858_vm9  ;;  %v12516_v0 = vmov 0  ;;  %12518 = vst [vmem:[#allocation163_spill] sm:$0xff] %v8546_v47 }
  0xd4   : > { %v8574_v3 = vunpack.c.l.bf16 %v6727_v55  ;;  %v553_v20 = vadd.s32 4294967295, %v8546_v47 }
  0xd5   : > { %v1260_v14 = vpop.f32.mrf.mxu1  ;;  %v8494_v50 = vsel %vm12503_vm12, %v12502_v53, %v1344_v10  ;;  %v12507_v10 = vrot.slane %v8451_v32, 7  ;;  %vm12508_vm12 = vcmp.lt.s32.totalorder %v6856_v1, 1  ;;  %v12510_v53 = vrot.slane %v8316_v54, 7 }
  0xd6   : > { %12504 = vst [vmem:[#allocation159_spill] sm:$0xff] %v8494_v50  ;;  %v8506_v48 = vadd.f32 %v1260_v14, %v1120_v28  ;;  %vm12511_vm5 = vmmov %vm12508_vm12  ;;  %v8533_v14 = vshra.s32 %v391_v39, 4  ;;  %v5878_v39 = vld [vmem:[%s11552_s1 + $0x8] sm:$0x3] }
  0xd7   : > { %v8515_v37 = vsel %vm12508_vm12, %v483_v33, %v12507_v10  ;;  %v8521_v2 = vsel %vm12511_vm5, %v12510_v53, %v483_v33  ;;  %v2050_v10 = vpop.f32.mrf.mxu3  ;;  %v1570_v33 = vsel %vm8328_vm1, %v8494_v50, 0.0  ;;  %v1571_v53 = vsel %vm8500_vm14, %v8481_v15, 0.0  ;;  %vm8541_vm12 = vmand %vm1792_vm11, %vm1824_vm7 }
  0xd8   : > { %12509 = vst [vmem:[#allocation160_spill] sm:$0xff] %v8515_v37  ;;  %v12517_v0 = vsel %vm8541_vm12, 4294967295, %v12516_v0  ;;  %v8548_v6 = vadd.f32 %v2050_v10, %v1742_v51  ;;  %v838_v54 = vsel %vm8527_vm6, %v8521_v2, 0.0  ;;  %v839_v61 = vsel %vm8471_vm0, %v8515_v37, 0.0  ;;  %vm8559_vm1 = vmand %vm1793_vm10, %vm1825_vm8 }
  0xd9   : > { %12512 = vst [vmem:[#allocation161_spill] sm:$0xff] %v8521_v2  ;;  %v1123_v50 = vpop.f32.mrf.mxu0  ;;  %v12521_v49 = vsel %vm8559_vm1, 4294967295, %v12520_v49  ;;  %v454_v51 = vand.u32 15, %v8349_v52  ;;  %v1591_v46 = vpack.c.bf16 %v1571_v53, %v1570_v33  ;;  %vm12522_vm6 = vcmp.ge.s32.totalorder %v8321_v30, 0 }
  0xda   : > { %12515 = vst [vmem:[#allocation162_spill] sm:$0xff] %v8533_v14  ;;  %v1670_v15 = vpop.f32.mrf.mxu2  ;;  %vm8569_vm14 = vmand %vm8541_vm12, %vm12522_vm6  ;;  %v552_v10 = vadd.s32 4294967295, %v8533_v14  ;;  %vm12525_vm8 = vcmask 31744   ;;  %v8586_v53 = vunpack.c.h.bf16 %v6727_v55  ;;  %vm12529_vm5 = vcmask 1041408  }
  0xdb   : > { %12519 = vst [vmem:[#allocation164_spill] sm:$0xff] %v8548_v6  ;;  %v1743_v45 = vadd.f32 %v1670_v15, %v8371_v43  ;;  %v858_v6 = vpack.c.bf16 %v839_v61, %v838_v54  ;;  %v1953_v43 = vsel %vm8559_vm1, %v8515_v37, 0.0  ;;  %v1952_v33 = vsel %vm8569_vm14, %v8521_v2, 0.0  ;;  %vm12527_vm10 = vmmov %vm12525_vm8 }
  0xdc   : > { %5824 = vmatmul.msk.bf16.gmra.mxu0 %vm12525_vm8, %v1035_v44  ;;  %v8588_v54 = vadd.s32 1, %v454_v51  ;;  %vm584_vm11 = vcmp.ge.s32.totalorder %v552_v10, 0  ;;  %vm616_vm7 = vcmp.lt.s32.totalorder %v552_v10, 16  ;;  %v8594_v44 = vadd.s32 4294967295, %v455_v31  ;;  %vm12530_vm6 = vmmov %vm12525_vm8 }
  0xdd   : > { %v1263_v52 = vpop.f32.mrf.mxu1  ;;  %vm585_vm14 = vcmp.ge.s32.totalorder %v553_v20, 0  ;;  %vm617_vm8 = vcmp.lt.s32.totalorder %v553_v20, 16  ;;  %v1346_v55 = vrot.slane %v8451_v32, 1  ;;  %v11865_v51 = vrot.slane %v8574_v3, 1 }
  0xde   : > { %v8581_v15 = vadd.f32 %v1263_v52, %v1123_v50  ;;  %12526 = vst [vmem:[#allocation165_spill] sm:$0xff] %v8588_v54  ;;  %v2315_v50 = vsel %vm12529_vm5, %v5878_v39, 0  ;;  %v1973_v52 = vpack.c.bf16 %v1953_v43, %v1952_v33  ;;  %vm11859_vm5 = vcmp.lt.s32.totalorder %v8588_v54, 16 }
  0xdf   : > { %5856 = vmatmul.msk.bf16.gmra.mxu2 %vm12527_vm10, %v1591_v46  ;;  %12528 = vst [vmem:[#allocation166_spill] sm:$0xff] %v8594_v44  ;;  %v2052_v61 = vpop.f32.mrf.mxu3  ;;  %2324 = vmatpush.bf16.msrb.mxu0 %v2315_v50  ;;  %vm8603_vm10 = vmand %vm584_vm11, %vm616_vm7  ;;  %v11864_v20 = vrot.slane %v8586_v53, 7  ;;  %vm11877_vm9 = vcmp.ge.s32.totalorder %v8594_v44, 0  ;;  %vm12535_vm11 = vcmp.lt.s32.totalorder %v6856_v1, 7  ;;  %vm12537_vm7 = vcmask 31744  }
  0xe0   : > { %5840 = vmatmul.msk.bf16.gmra.mxu1 %vm12530_vm6, %v858_v6  ;;  %v8600_v28 = vadd.f32 %v2052_v61, %v1743_v45  ;;  %v485_v6 = vrot.slane %v8574_v3, 7  ;;  %vm8611_vm6 = vmand %vm585_vm14, %vm617_vm8  ;;  %v8620_v45 = vsel %vm12535_vm11, %v1346_v55, %v11865_v51  ;;  %v1017_v43 = vsel %vm8603_vm10, %v8574_v3, 0.0 }
  0xe1   : > { %v1125_v30 = vpop.f32.mrf.mxu0  ;;  %12536 = vst [vmem:[#allocation167_spill] sm:$0xff] %v8620_v45  ;;  %vm12539_vm14 = vmmov %vm12535_vm11  ;;  %vm1794_vm11 = vcmp.ge.s32.totalorder %v8398_v9, 0  ;;  %vm1795_vm1 = vcmp.ge.s32.totalorder %v8411_v13, 0  ;;  %vm1827_vm12 = vcmp.lt.s32.totalorder %v8411_v13, 16  ;;  %v12552_v61 = vmov 0 }
  0xe2   : > { %v1673_v46 = vpop.f32.mrf.mxu2  ;;  %vm8636_vm8 = vmand %vm8471_vm0, %vm11859_vm5 }
  0xe3   : > { %v1744_v39 = vadd.f32 %v1673_v46, %v8446_v42  ;;  %5873 = vmatmul.msk.bf16.gmra.mxu3 %vm12537_vm7, %v1973_v52  ;;  %v12538_v42 = vrot.slane %v8439_v63, 1  ;;  %vm1826_vm7 = vcmp.lt.s32.totalorder %v8398_v9, 16  ;;  %v1018_v46 = vsel %vm8611_vm6, %v8586_v53, 0.0  ;;  %vm8663_vm5 = vmand %vm8603_vm10, %vm11877_vm9 }
  0xe4   : > { %v1036_v9 = vpack.c.bf16 %v1018_v46, %v1017_v43  ;;  %v457_v46 = vand.u32 15, %v6865_v4  ;;  %vm1829_vm9 = vcmp.lt.s32.totalorder %v8546_v47, 16 }
  0xe5   : > { %v1265_v10 = vpop.f32.mrf.mxu1  ;;  %v8630_v33 = vsel %vm12539_vm14, %v12538_v42, %v1346_v55  ;;  %vm12543_vm14 = vcmp.lt.s32.totalorder %v6856_v1, 1 }
  0xe6   : > { %12540 = vst [vmem:[#allocation168_spill] sm:$0xff] %v8630_v33  ;;  %v8642_v52 = vadd.f32 %v1265_v10, %v1125_v30  ;;  %v8651_v55 = vsel %vm12543_vm14, %v485_v6, %v11864_v20  ;;  %vm12546_vm0 = vmmov %vm12543_vm14  ;;  %v1572_v20 = vsel %vm8463_vm2, %v8630_v33, 0.0 }
  0xe7   : > { %12544 = vst [vmem:[#allocation169_spill] sm:$0xff] %v8651_v55  ;;  %v8657_v42 = vsel %vm12546_vm0, %v12545_v27, %v485_v6  ;;  %v2055_v10 = vpop.f32.mrf.mxu3  ;;  %v1573_v6 = vsel %vm8636_vm8, %v8620_v45, 0.0  ;;  %vm8675_vm14 = vmand %vm1794_vm11, %vm1826_vm7  ;;  %v841_v23 = vsel %vm8611_vm6, %v8651_v55, 0.0  ;;  %v456_v45 = vand.u32 15, %v8484_v25 }
  0xe8   : > { %12547 = vst [vmem:[#allocation170_spill] sm:$0xff] %v8657_v42  ;;  %v8679_v51 = vadd.f32 %v2055_v10, %v1744_v39  ;;  %v840_v13 = vsel %vm8663_vm5, %v8657_v42, 0.0  ;;  %vm8687_vm2 = vmand %vm1795_vm1, %vm1827_vm12  ;;  %v1592_v10 = vpack.c.bf16 %v1573_v6, %v1572_v20  ;;  %vm12554_vm8 = vcmp.ge.s32.totalorder %v8456_v60, 0 }
  0xe9   : > { %v1128_v33 = vpop.f32.mrf.mxu0  ;;  %v12553_v61 = vsel %vm8687_vm2, 4294967295, %v12552_v61  ;;  %vm8697_vm5 = vmand %vm8675_vm14, %vm12554_vm8  ;;  %v859_v30 = vpack.c.bf16 %v841_v23, %v840_v13  ;;  %vm12557_vm12 = vcmask 31744   ;;  %v8714_v20 = vadd.s32 4294967295, %v457_v46 }
  0xea   : > { %v1675_v54 = vpop.f32.mrf.mxu2  ;;  %v1954_v25 = vsel %vm8697_vm5, %v8657_v42, 0.0  ;;  %vm12559_vm1 = vmmov %vm12557_vm12  ;;  %v1348_v13 = vrot.slane %v8586_v53, 1  ;;  %vm12562_vm8 = vcmp.lt.s32.totalorder %v6856_v1, 7 }
  0xeb   : > { %v1745_v39 = vadd.f32 %v1675_v54, %v8506_v48  ;;  %v1955_v48 = vsel %vm8687_vm2, %v8651_v55, 0.0  ;;  %v8711_v54 = vadd.s32 1, %v456_v45  ;;  %12560 = vst [vmem:[#allocation172_spill] sm:$0xff] %v8714_v20  ;;  %vm12561_vm11 = vmmov %vm12559_vm1  ;;  %v487_v45 = vrot.slane %v6911_v24, 7 }
  0xec   : > { %5825 = vmatmul.msk.bf16.gmra.mxu0 %vm12557_vm12, %v1036_v9  ;;  %v11879_v9 = vrot.slane %v6911_v24, 1  ;;  %vm11888_vm0 = vcmp.ge.s32.totalorder %v8714_v20, 0  ;;  %vm12564_vm5 = vmmov %vm12559_vm1  ;;  %vm1831_vm2 = vcmp.lt.s32.totalorder %v6891_v12, 16 }
  0xed   : > { %v1268_v37 = vpop.f32.mrf.mxu1  ;;  %12558 = vst [vmem:[#allocation171_spill] sm:$0xff] %v8711_v54  ;;  %vm11876_vm7 = vcmp.lt.s32.totalorder %v8711_v54, 16  ;;  %vm12566_vm12 = vmmov %vm12562_vm8 }
  0xee   : > { %v8703_v2 = vadd.f32 %v1268_v37, %v1128_v33  ;;  %v1974_v33 = vpack.c.bf16 %v1955_v48, %v1954_v25  ;;  %v8730_v46 = vsel %vm12562_vm8, %v1348_v13, %v11879_v9  ;;  %v2216_v48 = vsel %vm7107_vm3, %v6992_v57, 0.0 }
  0xef   : > { %5857 = vmatmul.msk.bf16.gmra.mxu2 %vm12559_vm1, %v1592_v10  ;;  %v2057_v4 = vpop.f32.mrf.mxu3  ;;  %v11878_v10 = vrot.slane %v6917_v26, 7  ;;  %12563 = vst [vmem:[#allocation173_spill] sm:$0xff] %v8730_v46  ;;  %vm8743_vm1 = vmand %vm8611_vm6, %vm11876_vm7  ;;  %vm1828_vm8 = vcmp.lt.s32.totalorder %v8533_v14, 16  ;;  %vm12570_vm6 = vcmp.lt.s32.totalorder %v6856_v1, 1  ;;  %vm1797_vm7 = vcmp.ge.s32.totalorder %v8546_v47, 0 }
  0xf0   : > { %5841 = vmatmul.msk.bf16.gmra.mxu1 %vm12561_vm11, %v859_v30  ;;  %v8719_v37 = vadd.f32 %v2057_v4, %v1745_v39  ;;  %v12565_v30 = vrot.slane %v8574_v3, 1  ;;  %vm1796_vm11 = vcmp.ge.s32.totalorder %v8533_v14, 0  ;;  %v458_v14 = vand.u32 15, %v6868_v5 }
  0xf1   : > { %v1130_v23 = vpop.f32.mrf.mxu0  ;;  %v8761_v50 = vsel %vm12570_vm6, %v487_v45, %v11878_v10 }
  0xf2   : > { %v1678_v6 = vpop.f32.mrf.mxu2  ;;  %v8737_v25 = vsel %vm12566_vm12, %v12565_v30, %v1348_v13  ;;  %v2217_v13 = vsel %vm7120_vm4, %v6994_v58, 0.0  ;;  %12571 = vst [vmem:[#allocation175_spill] sm:$0xff] %v8761_v50  ;;  %vm8773_vm12 = vmand %vm6934_vm13, %vm11888_vm0  ;;  %v843_v31 = vsel %vm6941_vm15, %v8761_v50, 0.0  ;;  %vm12606_vm0 = vnez %v12078_v59 }
  0xf3   : > { %v1746_v43 = vadd.f32 %v1678_v6, %v8581_v15  ;;  %5874 = vmatmul.msk.bf16.gmra.mxu3 %vm12564_vm5, %v1974_v33  ;;  %12567 = vst [vmem:[#allocation174_spill] sm:$0xff] %v8737_v25  ;;  %v12572_v33 = vrot.slane %v8586_v53, 7  ;;  %vm12573_vm5 = vmmov %vm12570_vm6  ;;  %v1574_v30 = vsel %vm8603_vm10, %v8737_v25, 0.0  ;;  %v2248_v9 = vpack.c.bf16 %v2217_v13, %v2216_v48 }
  0xf4   : > { %vm8785_vm6 = vmand %vm1796_vm11, %vm1828_vm8  ;;  %v12579_v15 = vmov 0  ;;  %v459_v13 = vand.u32 15, %v6873_v7  ;;  %v5895_v7 = vld [vmem:[%s11552_s1 + $0xa] sm:$0x3]  ;;  %v489_v48 = vrot.slane %v6948_v40, 7 }
  0xf5   : > { %v1270_v39 = vpop.f32.mrf.mxu1  ;;  %v8767_v6 = vsel %vm12573_vm5, %v12572_v33, %v487_v45  ;;  %v1575_v45 = vsel %vm8743_vm1, %v8730_v46, 0.0  ;;  %v12577_v33 = vmov 0  ;;  %vm8797_vm10 = vmand %vm1797_vm7, %vm1829_vm9  ;;  %vm12581_vm1 = vcmp.ge.s32.totalorder %v8594_v44, 0  ;;  %v12670_v44 = vld [vmem:[#allocation19_spill] sm:$0xff] }
  0xf6   : > { %v8752_v4 = vadd.f32 %v1270_v39, %v1130_v23  ;;  %12574 = vst [vmem:[#allocation176_spill] sm:$0xff] %v8767_v6  ;;  %v12578_v33 = vsel %vm8785_vm6, 4294967295, %v12577_v33  ;;  %v842_v58 = vsel %vm8773_vm12, %v8767_v6, 0.0  ;;  %v12580_v15 = vsel %vm8797_vm10, 4294967295, %v12579_v15  ;;  %vm8807_vm11 = vmand %vm8785_vm6, %vm12581_vm1 }
  0xf7   : > { %v2060_v39 = vpop.f32.mrf.mxu3  ;;  %v860_v23 = vpack.c.bf16 %v843_v31, %v842_v58  ;;  %vm12584_vm9 = vcmask 31744   ;;  %v1956_v5 = vsel %vm8807_vm11, %v8767_v6, 0.0  ;;  %vm12589_vm5 = vcmask 1041408  }
  0xf8   : > { %v8789_v10 = vadd.f32 %v2060_v39, %v1746_v43  ;;  %v1593_v39 = vpack.c.bf16 %v1575_v45, %v1574_v30  ;;  %vm12586_vm7 = vmmov %vm12584_vm9  ;;  %v8824_v30 = vadd.s32 4294967295, %v459_v13  ;;  %vm12590_vm11 = vcmp.lt.s32.totalorder %v6856_v1, 7 }
  0xf9   : > { %v1133_v47 = vpop.f32.mrf.mxu0  ;;  %vm12588_vm8 = vmmov %vm12586_vm7  ;;  %vm1799_vm6 = vcmp.ge.s32.totalorder %v6891_v12, 0 }
  0xfa   : > { %v1680_v57 = vpop.f32.mrf.mxu2  ;;  %12587 = vst [vmem:[#allocation178_spill] sm:$0xff] %v8824_v30  ;;  %vm11901_vm1 = vcmp.ge.s32.totalorder %v8824_v30, 0 }
  0xfb   : > { %v1747_v43 = vadd.f32 %v1680_v57, %v8642_v52  ;;  %v1957_v57 = vsel %vm8797_vm10, %v8761_v50, 0.0  ;;  %v8821_v52 = vadd.s32 1, %v458_v14  ;;  %vm8886_vm10 = vmand %vm12606_vm0, %vm11901_vm1 }
  0xfc   : > { %5879 = vmatmul.msk.bf16.vlgmr.msrb.gmra.mxu0 %vm12584_vm9, %v2248_v9  ;;  %v2601_v9 = vsel %vm12589_vm5, %v5895_v7, 0  ;;  %v1975_v14 = vpack.c.bf16 %v1957_v57, %v1956_v5  ;;  %vm12592_vm9 = vmmov %vm12586_vm7  ;;  %v12593_v5 = vrot.slane %v6911_v24, 1  ;;  %vm12598_vm5 = vnez %v12130_v16 }
  0xfd   : > { %v1273_v54 = vpop.f32.mrf.mxu1  ;;  %12585 = vst [vmem:[#allocation177_spill] sm:$0xff] %v8821_v52  ;;  %2610 = vmatpush.bf16.msrb.mxu1 %v2601_v9  ;;  %vm11887_vm12 = vcmp.lt.s32.totalorder %v8821_v52, 16  ;;  %v2218_v7 = vsel %vm12598_vm5, %v7104_v36, 0.0 }
  0xfe   : > { %v8813_v60 = vadd.f32 %v1273_v54, %v1133_v47  ;;  %v1350_v47 = vrot.slane %v6917_v26, 1  ;;  %v11895_v54 = vrot.slane %v6948_v40, 1 }
  0xff   : > { %5858 = vmatmul.msk.bf16.gmra.mxu2 %vm12586_vm7, %v1593_v39  ;;  %v2062_v58 = vpop.f32.mrf.mxu3  ;;  %vm12594_vm7 = vmmov %vm12590_vm11 }
 0x100   : > { %5842 = vmatmul.msk.bf16.gmra.mxu1 %vm12588_vm8, %v860_v23  ;;  %v8833_v45 = vadd.f32 %v2062_v58, %v1747_v43  ;;  %v8843_v23 = vsel %vm12590_vm11, %v1350_v47, %v11895_v54  ;;  %v8850_v57 = vsel %vm12594_vm7, %v12593_v5, %v1350_v47  ;;  %vm8856_vm8 = vmand %vm6941_vm15, %vm11887_vm12  ;;  %vm1798_vm11 = vcmp.ge.s32.totalorder %v6888_v11, 0 }
 0x101   : > { %v1135_v39 = vpop.f32.mrf.mxu0  ;;  %12591 = vst [vmem:[#allocation179_spill] sm:$0xff] %v8843_v23  ;;  %vm12599_vm7 = vnez %v12135_v17  ;;  %vm12601_vm15 = vcmp.lt.s32.totalorder %v6856_v1, 1  ;;  %v12671_v17 = vld [vmem:[#allocation20_spill] sm:$0xff] }
 0x102   : > { %v1683_v31 = vpop.f32.mrf.mxu2  ;;  %12595 = vst [vmem:[#allocation180_spill] sm:$0xff] %v8850_v57  ;;  %v2219_v47 = vsel %vm12599_vm7, %v7124_v22, 0.0  ;;  %v8874_v9 = vsel %vm12601_vm15, %v489_v48, %v12600_v38  ;;  %vm12604_vm12 = vmmov %vm12601_vm15  ;;  %vm12611_vm15 = vnez %v12082_v62  ;;  %v2727_v50 = vadd.s32 1, %v12671_v17 }
 0x103   : > { %v1748_v13 = vadd.f32 %v1683_v31, %v8703_v2  ;;  %5875 = vmatmul.msk.bf16.gmra.mxu3 %vm12592_vm9, %v1975_v14  ;;  %vm1830_vm9 = vcmp.lt.s32.totalorder %v6888_v11, 16  ;;  %12602 = vst [vmem:[#allocation181_spill] sm:$0xff] %v8874_v9  ;;  %v12603_v14 = vrot.slane %v6917_v26, 7  ;;  %v2249_v38 = vpack.c.bf16 %v2219_v47, %v2218_v7 }
 0x104   : > { %v845_v34 = vsel %vm12611_vm15, %v8874_v9, 0.0  ;;  %v12612_v2 = vmov 0  ;;  %v460_v11 = vand.u32 15, %v6876_v8 }
 0x105   : > { %v1275_v43 = vpop.f32.mrf.mxu1  ;;  %v8880_v36 = vsel %vm12604_vm12, %v12603_v14, %v489_v48  ;;  %v1577_v48 = vsel %vm8856_vm8, %v8843_v23, 0.0  ;;  %vm8898_vm12 = vmand %vm1798_vm11, %vm1830_vm9  ;;  %vm12615_vm8 = vcmp.ge.s32.totalorder %v8714_v20, 0  ;;  %vm12618_vm11 = vcmask 31744  }
 0x106   : > { %v8865_v58 = vadd.f32 %v1275_v43, %v1135_v39  ;;  %12605 = vst [vmem:[#allocation182_spill] sm:$0xff] %v8880_v36  ;;  %v1576_v39 = vsel %vm6934_vm13, %v8850_v57, 0.0  ;;  %v844_v14 = vsel %vm8886_vm10, %v8880_v36, 0.0  ;;  %vm8910_vm13 = vmand %vm1799_vm6, %vm1831_vm2  ;;  %vm12621_vm6 = vcmask 1041408  }
 0x107   : > { %v2065_v22 = vpop.f32.mrf.mxu3  ;;  %v12613_v2 = vsel %vm8910_vm13, 4294967295, %v12612_v2  ;;  %vm8920_vm10 = vmand %vm8898_vm12, %vm12615_vm8  ;;  %v861_v47 = vpack.c.bf16 %v845_v34, %v844_v14  ;;  %v1352_v34 = vrot.slane %v6921_v29, 1  ;;  %v2726_v23 = vadd.s32 1, %v12670_v44 }
 0x108   : > { %v8902_v5 = vadd.f32 %v2065_v22, %v1748_v13  ;;  %12614 = vst [vmem:[#allocation183_spill] sm:$0xff] %v12613_v2  ;;  %v1594_v22 = vpack.c.bf16 %v1577_v48, %v1576_v39  ;;  %v1958_v8 = vsel %vm8920_vm10, %v8880_v36, 0.0  ;;  %v5912_v39 = vld [vmem:[%s11552_s1 + $0xc] sm:$0x3]  ;;  %vm12620_vm2 = vmmov %vm12618_vm11 }
 0x109   : > { %v1138_v12 = vpop.f32.mrf.mxu0  ;;  %v3015_v48 = vsel %vm12621_vm6, %v5912_v39, 0  ;;  %vm12622_vm9 = vmmov %vm12620_vm2  ;;  %v12665_v36 = vld [vmem:[#allocation30_spill] sm:$0xff] }
 0x10a   : > { %v1685_v54 = vpop.f32.mrf.mxu2  ;;  %3024 = vmatpush.bf16.msra.mxu2 %v3015_v48  ;;  %vm12623_vm8 = vmmov %vm12621_vm6 }
 0x10b   : > { %v1749_v13 = vadd.f32 %v1685_v54, %v8752_v4  ;;  %v1959_v4 = vsel %vm8910_vm13, %v8874_v9, 0.0  ;;  %v8931_v54 = vadd.s32 1, %v460_v11  ;;  %vm12624_vm6 = vmmov %vm12622_vm9 }
 0x10c   : > { %5880 = vmatmul.msk.bf16.gmra.mxu0 %vm12618_vm11, %v2249_v38  ;;  %v1976_v11 = vpack.c.bf16 %v1959_v4, %v1958_v8  ;;  %vm1800_vm11 = vcmp.ge.s32.totalorder %v6951_v41, 0  ;;  %v12628_v4 = vrot.slane %v6948_v40, 1 }
 0x10d   : > { %v1278_v31 = vpop.f32.mrf.mxu1  ;;  %12619 = vst [vmem:[#allocation184_spill] sm:$0xff] %v8931_v54  ;;  %vm11923_vm10 = vcmp.lt.s32.totalorder %v8931_v54, 16 }
 0x10e   : > { %v1279_v52 = vadd.f32 %v1278_v31, %v1138_v12  ;;  %v5929_v12 = vld [vmem:[%s11552_s1 + $0xe] sm:$0x3]  ;;  %vm8967_vm1 = vmand %vm12611_vm15, %vm11923_vm10 }
 0x10f   : > { %5859 = vmatmul.msk.bf16.gmra.mxu2 %vm12620_vm2, %v1594_v22  ;;  %v2067_v38 = vpop.f32.mrf.mxu3  ;;  %v3301_v7 = vsel %vm12623_vm8, %v5929_v12, 0  ;;  %vm1832_vm2 = vcmp.lt.s32.totalorder %v6951_v41, 16  ;;  %v12636_v12 = vld [vmem:[#allocation49_spill] sm:$0xff] }
 0x110   : > { %5843 = vmatmul.msk.bf16.gmra.mxu1 %vm12622_vm9, %v861_v47  ;;  %v8942_v14 = vadd.f32 %v2067_v38, %v1749_v13  ;;  %3310 = vmatpush.bf16.msra.mxu3 %v3301_v7  ;;  %v12625_v47 = vrot.slane %v6904_v19, 1  ;;  %vm12626_vm9 = vcmp.lt.s32.totalorder %v6856_v1, 7  ;;  %v12639_v7 = vld [vmem:[#allocation51_spill] sm:$0xff]  ;;  %vm8985_vm15 = vmand %vm1800_vm11, %vm1832_vm2  ;;  %v12699_v19 = vld [vmem:[#allocation28_spill] sm:$0xff] }
 0x111   : > { %v1140_v20 = vpop.f32.mrf.mxu0  ;;  %vm12629_vm8 = vmmov %vm12626_vm9  ;;  %vm12640_vm13 = vnez %v12639_v7  ;;  %v12646_v1 = vld [vmem:[#allocation31_spill] sm:$0xff] }
 0x112   : > { %v1688_v31 = vpop.f32.mrf.mxu2  ;;  %v8955_v8 = vsel %vm12626_vm9, %v1352_v34, %v12625_v47  ;;  %v8961_v39 = vsel %vm12629_vm8, %v12628_v4, %v1352_v34  ;;  %vm12637_vm8 = vnez %v12636_v12  ;;  %v12638_v34 = vld [vmem:[#allocation41_spill] sm:$0xff]  ;;  %v12645_v47 = vld [vmem:[#allocation32_spill] sm:$0xff] }
 0x113   : > { %v1750_v22 = vadd.f32 %v1688_v31, %v8813_v60  ;;  %5876 = vmatmul.msk.bf16.gmra.mxu3 %vm12624_vm6, %v1976_v11  ;;  %12627 = vst [vmem:[#allocation185_spill] sm:$0xff] %v8955_v8  ;;  %vm12633_vm6 = vcmp.lt.s32.totalorder %v7028_v21, 16  ;;  %v2220_v11 = vsel %vm12637_vm8, %v7230_v35, 0.0  ;;  %v2221_v62 = vsel %vm12640_vm13, %v12638_v34, 0.0 }
 0x114   : > { %12630 = vst [vmem:[#allocation186_spill] sm:$0xff] %v8961_v39  ;;  %vm8975_vm9 = vmand %vm7120_vm4, %vm12633_vm6  ;;  %v12641_v31 = vmov 0  ;;  %v1578_v18 = vsel %vm12606_vm0, %v8961_v39, 0.0  ;;  %v2502_v4 = vsel %vm7107_vm3, %v12645_v47, 0.0  ;;  %v2250_v59 = vpack.c.bf16 %v2221_v62, %v2220_v11  ;;  %v12653_v11 = vld [vmem:[#allocation13_spill] sm:$0xff] }
 0x115   : > { %v1280_v13 = vpop.f32.mrf.mxu1  ;;  %v12642_v31 = vsel %vm8985_vm15, 4294967295, %v12641_v31  ;;  %v2503_v41 = vsel %vm8975_vm9, %v12646_v1, 0.0  ;;  %vm12648_vm0 = vcmp.ge.s32.totalorder %v8824_v30, 0  ;;  %vm12652_vm3 = vcmask 31744  }
 0x116   : > { %v1281_v38 = vadd.f32 %v1280_v13, %v1140_v20  ;;  %12643 = vst [vmem:[#allocation49_spill] sm:$0xff] %v12642_v31  ;;  %v1579_v20 = vsel %vm8967_vm1, %v8955_v8, 0.0  ;;  %v12644_v13 = vld [vmem:[#allocation14_spill] sm:$0xff]  ;;  %vm1896_vm1 = vmand %vm8985_vm15, %vm12648_vm0  ;;  %v2534_v47 = vpack.c.bf16 %v2503_v41, %v2502_v4  ;;  %v12663_v8 = vld [vmem:[#allocation63_spill] sm:$0xff] }
 0x117   : > { %v2070_v21 = vpop.f32.mrf.mxu3  ;;  %vm1801_vm4 = vcmp.ge.s32.totalorder %v12644_v13, 0  ;;  %vm1833_vm6 = vcmp.lt.s32.totalorder %v12644_v13, 16  ;;  %v1595_v13 = vpack.c.bf16 %v1579_v20, %v1578_v18  ;;  %v1960_v62 = vsel %vm1896_vm1, %v12653_v11, 0.0  ;;  %vm12655_vm2 = vmmov %vm12652_vm3 }
 0x118   : > { %v9003_v54 = vadd.f32 %v2070_v21, %v1750_v22  ;;  %vm9010_vm11 = vmand %vm1801_vm4, %vm1833_vm6  ;;  %v12654_v21 = vld [vmem:[#allocation12_spill] sm:$0xff]  ;;  %vm12664_vm0 = vnez %v12663_v8  ;;  %vm12666_vm1 = vcmp.lt.s32.totalorder %v12665_v36, 16 }
 0x119   : > { %v1143_v9 = vpop.f32.mrf.mxu0  ;;  %v12650_v56 = vsel %vm9010_vm11, 4294967295, %v12649_v56  ;;  %v1961_v1 = vsel %vm9010_vm11, %v12654_v21, 0.0  ;;  %vm12656_vm9 = vmmov %vm12655_vm2  ;;  %v12662_v21 = vld [vmem:[#allocation53_spill] sm:$0xff] }
 0x11a   : > { %12647 = vst [vmem:[#allocation41_spill] sm:$0xff] %v9003_v54  ;;  %v1690_v39 = vpop.f32.mrf.mxu2  ;;  %vm12658_vm4 = vmmov %vm12655_vm2 }
 0x11b   : > { %v1751_v60 = vadd.f32 %v1690_v39, %v8865_v58  ;;  %12651 = vst [vmem:[#allocation51_spill] sm:$0xff] %v12650_v56  ;;  %v1977_v39 = vpack.c.bf16 %v1961_v1, %v1960_v62  ;;  %v12669_v62 = vld [vmem:[#allocation42_spill] sm:$0xff] }
 0x11c   : > { %5881 = vmatmul.msk.bf16.gmra.mxu0 %vm12652_vm3, %v2250_v59  ;;  %v12659_v59 = vld [vmem:[#allocation52_spill] sm:$0xff]  ;;  %vm2473_vm3 = vmand %vm12599_vm7, %vm12666_vm1  ;;  %vm2759_vm1 = vcmp.ge.s32.totalorder %v2727_v50, 0 }
 0x11d   : > { %v1283_v48 = vpop.f32.mrf.mxu1  ;;  %vm12673_vm7 = vmmov %vm12655_vm2 }
 0x11e   : > { %v1284_v22 = vadd.f32 %v1283_v48, %v1143_v9  ;;  %v12660_v48 = vld [vmem:[#allocation61_spill] sm:$0xff] }
 0x11f   : > { %5860 = vmatmul.msk.bf16.gmra.mxu2 %vm12655_vm2, %v1595_v13  ;;  %v2072_v30 = vpop.f32.mrf.mxu3  ;;  %vm12661_vm6 = vnez %v12660_v48  ;;  %v2223_v13 = vsel %vm12664_vm0, %v12662_v21, 0.0 }
 0x120   : > { %5896 = vmatmul.msk.bf16.vlgmr.msrb.gmra.mxu1 %vm12656_vm9, %v2534_v47  ;;  %v9021_v58 = vadd.f32 %v2072_v30, %v1751_v60  ;;  %v2222_v11 = vsel %vm12661_vm6, %v12659_v59, 0.0  ;;  %v12668_v47 = vld [vmem:[#allocation40_spill] sm:$0xff]  ;;  %vm2758_vm9 = vcmp.ge.s32.totalorder %v2726_v23, 0 }
 0x121   : > { %v1145_v41 = vpop.f32.mrf.mxu0  ;;  %v2504_v60 = vsel %vm12598_vm5, %v12668_v47, 0.0  ;;  %vm12674_vm5 = vmmov %vm12655_vm2  ;;  %v12682_v47 = vld [vmem:[#allocation36_spill] sm:$0xff] }
 0x122   : > { %12657 = vst [vmem:[#allocation187_spill] sm:$0xff] %v9021_v58  ;;  %v1693_v18 = vpop.f32.mrf.mxu2  ;;  %v2728_v58 = vadd.s32 1, %v12699_v19 }
 0x123   : > { %v1752_v20 = vadd.f32 %v1693_v18, %v1279_v52  ;;  %5877 = vmatmul.msk.bf16.gmra.mxu3 %vm12658_vm4, %v1977_v39  ;;  %v2251_v52 = vpack.c.bf16 %v2223_v13, %v2222_v11  ;;  %v2505_v39 = vsel %vm2473_vm3, %v12669_v62, 0.0  ;;  %vm2790_vm4 = vcmp.lt.s32.totalorder %v2726_v23, 16  ;;  %v12687_v62 = vld [vmem:[#allocation73_spill] sm:$0xff] }
 0x124   : > { %v2535_v57 = vpack.c.bf16 %v2505_v39, %v2504_v60  ;;  %vm2791_vm3 = vcmp.lt.s32.totalorder %v2727_v50, 16  ;;  %vm9048_vm10 = vmand %vm2758_vm9, %vm2790_vm4  ;;  %v12676_v13 = vmov 0  ;;  %v12686_v60 = vld [vmem:[#allocation64_spill] sm:$0xff]  ;;  %vm12688_vm9 = vnez %v12687_v62 }
 0x125   : > { %v1285_v9 = vpop.f32.mrf.mxu1  ;;  %v12677_v13 = vsel %vm9048_vm10, 4294967295, %v12676_v13  ;;  %v2224_v39 = vsel %vm12688_vm9, %v12686_v60, 0.0  ;;  %v3204_v12 = vsel %vm9048_vm10, %v7230_v35, 0.0  ;;  %v12705_v35 = vmov 0 }
 0x126   : > { %v1286_v4 = vadd.f32 %v1285_v9, %v1145_v41  ;;  %12678 = vst [vmem:[#allocation53_spill] sm:$0xff] %v12677_v13 }
 0x127   : > { %v2075_v1 = vpop.f32.mrf.mxu3 }
 0x128   : > { %v9034_v30 = vadd.f32 %v2075_v1, %v1752_v20  ;;  %v12672_v1 = vld [vmem:[#allocation39_spill] sm:$0xff] }
 0x129   : > { %v1148_v41 = vpop.f32.mrf.mxu0 }
 0x12a   : > { %12667 = vst [vmem:[#allocation52_spill] sm:$0xff] %v9034_v30  ;;  %v1695_v18 = vpop.f32.mrf.mxu2  ;;  %v12698_v30 = vld [vmem:[#allocation56_spill] sm:$0xff] }
 0x12b   : > { %v1753_v9 = vadd.f32 %v1695_v18, %v1281_v38  ;;  %v12689_v18 = vld [vmem:[#allocation65_spill] sm:$0xff] }
 0x12c   : > { %5882 = vmatmul.msk.bf16.gmra.mxu0 %vm12655_vm2, %v2251_v52  ;;  %vm9052_vm2 = vmand %vm2759_vm1, %vm2791_vm3 }
 0x12d   : > { %v1288_v36 = vpop.f32.mrf.mxu1 }
 0x12e   : > { %v1289_v20 = vadd.f32 %v1288_v36, %v1148_v41  ;;  %v12679_v36 = vmov 0 }
 0x12f   : > { %5913 = vmatmul.msk.bf16.vlgmr.msra.gmra.mxu2 %vm12673_vm7, %v12672_v1  ;;  %v2077_v16 = vpop.f32.mrf.mxu3  ;;  %v12680_v36 = vsel %vm9052_vm2, 4294967295, %v12679_v36  ;;  %vm12683_vm7 = vmmov %vm12674_vm5  ;;  %v12694_v1 = vld [vmem:[#allocation47_spill] sm:$0xff] }
 0x130   : > { %5897 = vmatmul.msk.bf16.gmra.mxu1 %vm12674_vm5, %v2535_v57  ;;  %v9046_v11 = vadd.f32 %v2077_v16, %v1753_v9  ;;  %12681 = vst [vmem:[#allocation63_spill] sm:$0xff] %v12680_v36  ;;  %v12684_v57 = vld [vmem:[#allocation24_spill] sm:$0xff]  ;;  %v12692_v9 = vld [vmem:[#allocation43_spill] sm:$0xff]  ;;  %v12727_v36 = vld [vmem:[#allocation37_spill] sm:$0xff] }
 0x131   : > { %v1150_v38 = vpop.f32.mrf.mxu0  ;;  %vm12685_vm5 = vcmp.ge.s32.totalorder %v12684_v57, 0  ;;  %vm12693_vm1 = vcmp.lt.s32.totalorder %v12692_v9, 16  ;;  %v12697_v57 = vld [vmem:[#allocation57_spill] sm:$0xff] }
 0x132   : > { %12675 = vst [vmem:[#allocation61_spill] sm:$0xff] %v9046_v11  ;;  %v1698_v44 = vpop.f32.mrf.mxu2  ;;  %vm2854_vm11 = vmand %vm9048_vm10, %vm12685_vm5  ;;  %v2506_v11 = vsel %vm12637_vm8, %v12697_v57, 0.0 }
 0x133   : > { %v1754_v52 = vadd.f32 %v1698_v44, %v1284_v22  ;;  %5930 = vmatmul.msk.bf16.vlgmr.msra.gmra.mxu3 %vm12683_vm7, %v12682_v47  ;;  %v12690_v22 = vld [vmem:[#allocation75_spill] sm:$0xff]  ;;  %vm2475_vm3 = vmand %vm12640_vm13, %vm12693_vm1  ;;  %v2918_v16 = vsel %vm2854_vm11, %v12694_v1, 0.0  ;;  %v12695_v44 = vld [vmem:[#allocation46_spill] sm:$0xff]  ;;  %vm2760_vm11 = vcmp.ge.s32.totalorder %v2728_v58, 0 }
 0x134   : > { %vm12691_vm4 = vnez %v12690_v22  ;;  %v2507_v6 = vsel %vm2475_vm3, %v12698_v30, 0.0  ;;  %vm12700_vm13 = vmmov %vm12683_vm7 }
 0x135   : > { %v1290_v23 = vpop.f32.mrf.mxu1  ;;  %v2225_v41 = vsel %vm12691_vm4, %v12689_v18, 0.0  ;;  %v2536_v1 = vpack.c.bf16 %v2507_v6, %v2506_v11  ;;  %vm12702_vm8 = vmmov %vm12683_vm7  ;;  %vm2792_vm7 = vcmp.lt.s32.totalorder %v2728_v58, 16  ;;  %v12712_v58 = vld [vmem:[#allocation33_spill] sm:$0xff] }
 0x136   : > { %v1291_v50 = vadd.f32 %v1290_v23, %v1150_v38  ;;  %v2919_v38 = vsel %vm9052_vm2, %v12695_v44, 0.0  ;;  %v2252_v23 = vpack.c.bf16 %v2225_v41, %v2224_v39  ;;  %v12701_v44 = vld [vmem:[#allocation29_spill] sm:$0xff]  ;;  %v3205_v39 = vsel %vm9052_vm2, %v12638_v34, 0.0  ;;  %vm12703_vm5 = vmmov %vm12702_vm8 }
 0x137   : > { %v2080_v17 = vpop.f32.mrf.mxu3  ;;  %v2949_v31 = vpack.c.bf16 %v2919_v38, %v2918_v16  ;;  %v12708_v34 = vmov 0  ;;  %v12715_v16 = vld [vmem:[#allocation85_spill] sm:$0xff] }
 0x138   : > { %v9076_v47 = vadd.f32 %v2080_v17, %v1754_v52  ;;  %v2729_v52 = vadd.s32 1, %v12701_v44 }
 0x139   : > { %v1153_v56 = vpop.f32.mrf.mxu0 }
 0x13a   : > { %12696 = vst [vmem:[#allocation40_spill] sm:$0xff] %v9076_v47  ;;  %v1700_v9 = vpop.f32.mrf.mxu2  ;;  %vm2761_vm1 = vcmp.ge.s32.totalorder %v2729_v52, 0  ;;  %vm2793_vm3 = vcmp.lt.s32.totalorder %v2729_v52, 16  ;;  %v12722_v52 = vld [vmem:[#allocation59_spill] sm:$0xff] }
 0x13b   : > { %v1755_v7 = vadd.f32 %v1700_v9, %v1286_v4  ;;  %v3235_v4 = vpack.c.bf16 %v3205_v39, %v3204_v12  ;;  %vm9099_vm10 = vmand %vm2761_vm1, %vm2793_vm3  ;;  %v12714_v9 = vld [vmem:[#allocation76_spill] sm:$0xff]  ;;  %v12723_v39 = vld [vmem:[#allocation58_spill] sm:$0xff] }
 0x13c   : > { %5883 = vmatmul.msk.bf16.gmra.mxu0 %vm12700_vm13, %v2252_v23  ;;  %vm9095_vm13 = vmand %vm2760_vm11, %vm2792_vm7  ;;  %v12709_v34 = vsel %vm9099_vm10, 4294967295, %v12708_v34  ;;  %vm12716_vm11 = vnez %v12715_v16  ;;  %v12717_v23 = vld [vmem:[#allocation77_spill] sm:$0xff] }
 0x13d   : > { %v1293_v54 = vpop.f32.mrf.mxu1  ;;  %v12706_v35 = vsel %vm9095_vm13, 4294967295, %v12705_v35  ;;  %12710 = vst [vmem:[#allocation20_spill] sm:$0xff] %v12709_v34  ;;  %v2226_v38 = vsel %vm12716_vm11, %v12714_v9, 0.0  ;;  %v3206_v48 = vsel %vm9095_vm13, %v12659_v59, 0.0  ;;  %v12733_v59 = vmov 0  ;;  %v12755_v34 = vld [vmem:[#allocation48_spill] sm:$0xff] }
 0x13e   : > { %v1294_v17 = vadd.f32 %v1293_v54, %v1153_v56  ;;  %12707 = vst [vmem:[#allocation19_spill] sm:$0xff] %v12706_v35 }
 0x13f   : > { %5914 = vmatmul.msk.bf16.gmra.mxu2 %vm12702_vm8, %v2949_v31  ;;  %v2082_v19 = vpop.f32.mrf.mxu3  ;;  %vm12711_vm8 = vmmov %vm12703_vm5 }
 0x140   : > { %5898 = vmatmul.msk.bf16.gmra.mxu1 %vm12703_vm5, %v2536_v1  ;;  %v9093_v6 = vadd.f32 %v2082_v19, %v1755_v7  ;;  %vm12713_vm5 = vcmp.ge.s32.totalorder %v12712_v58, 0  ;;  %v12718_v7 = vld [vmem:[#allocation87_spill] sm:$0xff]  ;;  %v12720_v1 = vld [vmem:[#allocation54_spill] sm:$0xff]  ;;  %v2921_v19 = vsel %vm9099_vm10, %v12723_v39, 0.0  ;;  %v12726_v58 = vld [vmem:[#allocation68_spill] sm:$0xff] }
 0x141   : > { %v1155_v56 = vpop.f32.mrf.mxu0  ;;  %vm2856_vm2 = vmand %vm9095_vm13, %vm12713_vm5  ;;  %vm12719_vm7 = vnez %v12718_v7  ;;  %vm12721_vm1 = vcmp.lt.s32.totalorder %v12720_v1, 16  ;;  %v12729_v39 = vld [vmem:[#allocation38_spill] sm:$0xff] }
 0x142   : > { %12704 = vst [vmem:[#allocation42_spill] sm:$0xff] %v9093_v6  ;;  %v1703_v54 = vpop.f32.mrf.mxu2  ;;  %vm2477_vm3 = vmand %vm12664_vm0, %vm12721_vm1  ;;  %v2920_v12 = vsel %vm2856_vm2, %v12722_v52, 0.0  ;;  %v2730_v6 = vadd.s32 1, %v12727_v36 }
 0x143   : > { %v1756_v11 = vadd.f32 %v1703_v54, %v1289_v20  ;;  %5931 = vmatmul.msk.bf16.gmra.mxu3 %vm12711_vm8, %v3235_v4  ;;  %v2227_v20 = vsel %vm12719_vm7, %v12717_v23, 0.0  ;;  %v2509_v30 = vsel %vm2477_vm3, %v12726_v58, 0.0  ;;  %v2950_v57 = vpack.c.bf16 %v2921_v19, %v2920_v12  ;;  %vm12728_vm0 = vmmov %vm12711_vm8  ;;  %v12742_v12 = vld [vmem:[#allocation88_spill] sm:$0xff]  ;;  %v12743_v19 = vld [vmem:[#allocation97_spill] sm:$0xff] }
 0x144   : > { %v2253_v54 = vpack.c.bf16 %v2227_v20, %v2226_v38  ;;  %v3207_v38 = vsel %vm9099_vm10, %v12662_v21, 0.0  ;;  %vm2762_vm2 = vcmp.ge.s32.totalorder %v2730_v6, 0  ;;  %vm2794_vm8 = vcmp.lt.s32.totalorder %v2730_v6, 16  ;;  %vm12731_vm5 = vmmov %vm12728_vm0  ;;  %v12740_v6 = vld [vmem:[#allocation45_spill] sm:$0xff] }
 0x145   : > { %v1295_v31 = vpop.f32.mrf.mxu1  ;;  %v12736_v21 = vmov 0 }
 0x146   : > { %v1296_v41 = vadd.f32 %v1295_v31, %v1155_v56  ;;  %v12725_v56 = vld [vmem:[#allocation69_spill] sm:$0xff] }
 0x147   : > { %v2085_v44 = vpop.f32.mrf.mxu3  ;;  %v2508_v31 = vsel %vm12661_vm6, %v12725_v56, 0.0  ;;  %vm12730_vm6 = vmmov %vm12728_vm0 }
 0x148   : > { %v9122_v4 = vadd.f32 %v2085_v44, %v1756_v11  ;;  %v2537_v52 = vpack.c.bf16 %v2509_v30, %v2508_v31  ;;  %v2731_v11 = vadd.s32 1, %v12729_v39  ;;  %v12745_v31 = vld [vmem:[#allocation89_spill] sm:$0xff] }
 0x149   : > { %v1158_v13 = vpop.f32.mrf.mxu0 }
 0x14a   : > { %12724 = vst [vmem:[#allocation39_spill] sm:$0xff] %v9122_v4  ;;  %v1705_v1 = vpop.f32.mrf.mxu2  ;;  %vm2763_vm1 = vcmp.ge.s32.totalorder %v2731_v11, 0  ;;  %vm2795_vm3 = vcmp.lt.s32.totalorder %v2731_v11, 16  ;;  %v12750_v11 = vld [vmem:[#allocation71_spill] sm:$0xff] }
 0x14b   : > { %v1757_v8 = vadd.f32 %v1705_v1, %v1291_v50  ;;  %v3236_v50 = vpack.c.bf16 %v3207_v38, %v3206_v48  ;;  %vm9145_vm13 = vmand %vm2763_vm1, %vm2795_vm3  ;;  %v12751_v38 = vld [vmem:[#allocation70_spill] sm:$0xff] }
 0x14c   : > { %5884 = vmatmul.msk.bf16.gmra.mxu0 %vm12728_vm0, %v2253_v54  ;;  %vm9141_vm0 = vmand %vm2762_vm2, %vm2794_vm8  ;;  %v12737_v21 = vsel %vm9145_vm13, 4294967295, %v12736_v21  ;;  %vm12744_vm2 = vnez %v12743_v19 }
 0x14d   : > { %v1298_v47 = vpop.f32.mrf.mxu1  ;;  %v12734_v59 = vsel %vm9141_vm0, 4294967295, %v12733_v59  ;;  %12738 = vst [vmem:[#allocation64_spill] sm:$0xff] %v12737_v21  ;;  %v2228_v54 = vsel %vm12744_vm2, %v12742_v12, 0.0  ;;  %v3208_v62 = vsel %vm9141_vm0, %v12686_v60, 0.0  ;;  %v12761_v60 = vmov 0  ;;  %v12783_v21 = vld [vmem:[#allocation60_spill] sm:$0xff] }
 0x14e   : > { %v1299_v44 = vadd.f32 %v1298_v47, %v1158_v13  ;;  %12735 = vst [vmem:[#allocation24_spill] sm:$0xff] %v12734_v59 }
 0x14f   : > { %5915 = vmatmul.msk.bf16.gmra.mxu2 %vm12730_vm6, %v2950_v57  ;;  %v2087_v36 = vpop.f32.mrf.mxu3  ;;  %vm12739_vm6 = vmmov %vm12731_vm5 }
 0x150   : > { %5899 = vmatmul.msk.bf16.gmra.mxu1 %vm12731_vm5, %v2537_v52  ;;  %v9139_v30 = vadd.f32 %v2087_v36, %v1757_v8  ;;  %vm12741_vm5 = vcmp.ge.s32.totalorder %v12740_v6, 0  ;;  %v12746_v8 = vld [vmem:[#allocation99_spill] sm:$0xff]  ;;  %v12748_v52 = vld [vmem:[#allocation66_spill] sm:$0xff]  ;;  %v2923_v36 = vsel %vm9145_vm13, %v12751_v38, 0.0  ;;  %v12754_v6 = vld [vmem:[#allocation80_spill] sm:$0xff] }
 0x151   : > { %v1160_v47 = vpop.f32.mrf.mxu0  ;;  %vm2858_vm10 = vmand %vm9141_vm0, %vm12741_vm5  ;;  %vm12747_vm8 = vnez %v12746_v8  ;;  %vm12749_vm1 = vcmp.lt.s32.totalorder %v12748_v52, 16  ;;  %v12757_v38 = vld [vmem:[#allocation50_spill] sm:$0xff] }
 0x152   : > { %12732 = vst [vmem:[#allocation36_spill] sm:$0xff] %v9139_v30  ;;  %v1708_v13 = vpop.f32.mrf.mxu2  ;;  %vm2479_vm3 = vmand %vm12691_vm4, %vm12749_vm1  ;;  %v2922_v48 = vsel %vm2858_vm10, %v12750_v11, 0.0  ;;  %v2732_v30 = vadd.s32 1, %v12755_v34 }
 0x153   : > { %v1758_v20 = vadd.f32 %v1708_v13, %v1294_v17  ;;  %5932 = vmatmul.msk.bf16.gmra.mxu3 %vm12739_vm6, %v3236_v50  ;;  %v2229_v17 = vsel %vm12747_vm8, %v12745_v31, 0.0  ;;  %v2511_v58 = vsel %vm2479_vm3, %v12754_v6, 0.0  ;;  %v2951_v56 = vpack.c.bf16 %v2923_v36, %v2922_v48  ;;  %vm12756_vm10 = vmmov %vm12739_vm6  ;;  %v12770_v48 = vld [vmem:[#allocation100_spill] sm:$0xff]  ;;  %v12771_v36 = vld [vmem:[#allocation109_spill] sm:$0xff] }
 0x154   : > { %v2254_v13 = vpack.c.bf16 %v2229_v17, %v2228_v54  ;;  %v3209_v54 = vsel %vm9145_vm13, %v12689_v18, 0.0  ;;  %vm2764_vm4 = vcmp.ge.s32.totalorder %v2732_v30, 0  ;;  %v12764_v18 = vmov 0 }
 0x155   : > { %v1300_v57 = vpop.f32.mrf.mxu1 }
 0x156   : > { %v1301_v1 = vadd.f32 %v1300_v57, %v1160_v47  ;;  %v12753_v47 = vld [vmem:[#allocation81_spill] sm:$0xff] }
 0x157   : > { %v2090_v39 = vpop.f32.mrf.mxu3  ;;  %v2510_v57 = vsel %vm12688_vm9, %v12753_v47, 0.0  ;;  %vm12758_vm9 = vmmov %vm12739_vm6  ;;  %vm2796_vm6 = vcmp.lt.s32.totalorder %v2732_v30, 16  ;;  %v12768_v30 = vld [vmem:[#allocation55_spill] sm:$0xff] }
 0x158   : > { %v9168_v50 = vadd.f32 %v2090_v39, %v1758_v20  ;;  %v2538_v11 = vpack.c.bf16 %v2511_v58, %v2510_v57  ;;  %v2733_v20 = vadd.s32 1, %v12757_v38  ;;  %vm12759_vm5 = vmmov %vm12758_vm9  ;;  %v3237_v58 = vpack.c.bf16 %v3209_v54, %v3208_v62  ;;  %v12773_v57 = vld [vmem:[#allocation101_spill] sm:$0xff]  ;;  %v12779_v54 = vld [vmem:[#allocation82_spill] sm:$0xff] }
 0x159   : > { %v1163_v35 = vpop.f32.mrf.mxu0 }
 0x15a   : > { %12752 = vst [vmem:[#allocation73_spill] sm:$0xff] %v9168_v50  ;;  %v1710_v52 = vpop.f32.mrf.mxu2  ;;  %vm2765_vm1 = vcmp.ge.s32.totalorder %v2733_v20, 0  ;;  %vm2797_vm3 = vcmp.lt.s32.totalorder %v2733_v20, 16  ;;  %v12778_v20 = vld [vmem:[#allocation83_spill] sm:$0xff] }
 0x15b   : > { %v1759_v22 = vadd.f32 %v1710_v52, %v1296_v41  ;;  %vm9191_vm0 = vmand %vm2765_vm1, %vm2797_vm3 }
 0x15c   : > { %5885 = vmatmul.msk.bf16.gmra.mxu0 %vm12756_vm10, %v2254_v13  ;;  %vm9187_vm10 = vmand %vm2764_vm4, %vm2796_vm6  ;;  %v12765_v18 = vsel %vm9191_vm0, 4294967295, %v12764_v18  ;;  %vm12772_vm4 = vnez %v12771_v36 }
 0x15d   : > { %v1303_v4 = vpop.f32.mrf.mxu1  ;;  %v12762_v60 = vsel %vm9187_vm10, 4294967295, %v12761_v60  ;;  %12766 = vst [vmem:[#allocation47_spill] sm:$0xff] %v12765_v18  ;;  %v2230_v13 = vsel %vm12772_vm4, %v12770_v48, 0.0  ;;  %v3210_v16 = vsel %vm9187_vm10, %v12714_v9, 0.0  ;;  %v12789_v9 = vmov 0  ;;  %v12813_v18 = vld [vmem:[#allocation139_spill] sm:$0xff] }
 0x15e   : > { %v1304_v39 = vadd.f32 %v1303_v4, %v1163_v35  ;;  %12763 = vst [vmem:[#allocation75_spill] sm:$0xff] %v12762_v60 }
 0x15f   : > { %5916 = vmatmul.msk.bf16.gmra.mxu2 %vm12758_vm9, %v2951_v56  ;;  %v2092_v34 = vpop.f32.mrf.mxu3  ;;  %vm12767_vm9 = vmmov %vm12759_vm5 }
 0x160   : > { %5900 = vmatmul.msk.bf16.gmra.mxu1 %vm12759_vm5, %v2538_v11  ;;  %v9185_v41 = vadd.f32 %v2092_v34, %v1759_v22  ;;  %vm12769_vm5 = vcmp.ge.s32.totalorder %v12768_v30, 0  ;;  %v12774_v22 = vld [vmem:[#allocation111_spill] sm:$0xff]  ;;  %v12776_v11 = vld [vmem:[#allocation78_spill] sm:$0xff]  ;;  %v2925_v34 = vsel %vm9191_vm0, %v12779_v54, 0.0  ;;  %v12782_v30 = vld [vmem:[#allocation92_spill] sm:$0xff] }
 0x161   : > { %v1165_v4 = vpop.f32.mrf.mxu0  ;;  %vm2860_vm13 = vmand %vm9187_vm10, %vm12769_vm5  ;;  %vm12775_vm6 = vnez %v12774_v22  ;;  %vm12777_vm1 = vcmp.lt.s32.totalorder %v12776_v11, 16  ;;  %v12785_v54 = vld [vmem:[#allocation62_spill] sm:$0xff] }
 0x162   : > { %12760 = vst [vmem:[#allocation65_spill] sm:$0xff] %v9185_v41  ;;  %v1713_v35 = vpop.f32.mrf.mxu2  ;;  %vm2481_vm3 = vmand %vm12719_vm7, %vm12777_vm1  ;;  %v2924_v62 = vsel %vm2860_vm13, %v12778_v20, 0.0  ;;  %v2734_v41 = vadd.s32 1, %v12783_v21 }
 0x163   : > { %v1760_v17 = vadd.f32 %v1713_v35, %v1299_v44  ;;  %5933 = vmatmul.msk.bf16.gmra.mxu3 %vm12767_vm9, %v3237_v58  ;;  %v2231_v44 = vsel %vm12775_vm6, %v12773_v57, 0.0  ;;  %v2513_v6 = vsel %vm2481_vm3, %v12782_v30, 0.0  ;;  %v2952_v47 = vpack.c.bf16 %v2925_v34, %v2924_v62  ;;  %vm12784_vm13 = vmmov %vm12767_vm9  ;;  %v12800_v34 = vld [vmem:[#allocation112_spill] sm:$0xff] }
 0x164   : > { %v2255_v35 = vpack.c.bf16 %v2231_v44, %v2230_v13  ;;  %v3211_v13 = vsel %vm9191_vm0, %v12717_v23, 0.0  ;;  %vm2766_vm7 = vcmp.ge.s32.totalorder %v2734_v41, 0  ;;  %v12792_v23 = vmov 0 }
 0x165   : > { %v1305_v56 = vpop.f32.mrf.mxu1 }
 0x166   : > { %v1306_v52 = vadd.f32 %v1305_v56, %v1165_v4  ;;  %v12781_v4 = vld [vmem:[#allocation93_spill] sm:$0xff] }
 0x167   : > { %v2095_v38 = vpop.f32.mrf.mxu3  ;;  %v2512_v56 = vsel %vm12716_vm11, %v12781_v4, 0.0  ;;  %vm12786_vm11 = vmmov %vm12767_vm9  ;;  %vm2798_vm9 = vcmp.lt.s32.totalorder %v2734_v41, 16  ;;  %v12796_v41 = vld [vmem:[#allocation67_spill] sm:$0xff] }
 0x168   : > { %v9214_v58 = vadd.f32 %v2095_v38, %v1760_v17  ;;  %v2539_v20 = vpack.c.bf16 %v2513_v6, %v2512_v56  ;;  %v2735_v17 = vadd.s32 1, %v12785_v54  ;;  %vm12787_vm5 = vmmov %vm12786_vm11  ;;  %v3238_v6 = vpack.c.bf16 %v3211_v13, %v3210_v16  ;;  %v12803_v56 = vld [vmem:[#allocation113_spill] sm:$0xff]  ;;  %v12806_v54 = vld [vmem:[#allocation90_spill] sm:$0xff] }
 0x169   : > { %v1168_v59 = vpop.f32.mrf.mxu0  ;;  %v12808_v16 = vld [vmem:[#allocation95_spill] sm:$0xff] }
 0x16a   : > { %12780 = vst [vmem:[#allocation46_spill] sm:$0xff] %v9214_v58  ;;  %v1715_v11 = vpop.f32.mrf.mxu2  ;;  %vm2767_vm1 = vcmp.ge.s32.totalorder %v2735_v17, 0  ;;  %vm2799_vm3 = vcmp.lt.s32.totalorder %v2735_v17, 16 }
 0x16b   : > { %v1761_v7 = vadd.f32 %v1715_v11, %v1301_v1  ;;  %vm9237_vm10 = vmand %vm2767_vm1, %vm2799_vm3  ;;  %vm12807_vm1 = vcmp.lt.s32.totalorder %v12806_v54, 16  ;;  %v12812_v54 = vld [vmem:[#allocation104_spill] sm:$0xff] }
 0x16c   : > { %5886 = vmatmul.msk.bf16.gmra.mxu0 %vm12784_vm13, %v2255_v35  ;;  %vm9233_vm13 = vmand %vm2766_vm7, %vm2798_vm9  ;;  %v12793_v23 = vsel %vm9237_vm10, 4294967295, %v12792_v23  ;;  %v12801_v35 = vld [vmem:[#allocation123_spill] sm:$0xff] }
 0x16d   : > { %v1308_v50 = vpop.f32.mrf.mxu1  ;;  %v12790_v9 = vsel %vm9233_vm13, 4294967295, %v12789_v9  ;;  %12794 = vst [vmem:[#allocation33_spill] sm:$0xff] %v12793_v23  ;;  %vm12802_vm7 = vnez %v12801_v35  ;;  %vm2483_vm3 = vmand %vm12747_vm8, %vm12807_vm1  ;;  %v3212_v19 = vsel %vm9233_vm13, %v12742_v12, 0.0  ;;  %v12820_v12 = vmov 0  ;;  %v12842_v23 = vld [vmem:[#allocation153_spill] sm:$0xff] }
 0x16e   : > { %v1309_v38 = vadd.f32 %v1308_v50, %v1168_v59  ;;  %12791 = vst [vmem:[#allocation29_spill] sm:$0xff] %v12790_v9  ;;  %v2515_v30 = vsel %vm2483_vm3, %v12812_v54, 0.0  ;;  %v12841_v54 = vld [vmem:[#allocation117_spill] sm:$0xff] }
 0x16f   : > { %5917 = vmatmul.msk.bf16.gmra.mxu2 %vm12786_vm11, %v2952_v47  ;;  %v2097_v21 = vpop.f32.mrf.mxu3  ;;  %vm12795_vm11 = vmmov %vm12787_vm5 }
 0x170   : > { %5901 = vmatmul.msk.bf16.gmra.mxu1 %vm12787_vm5, %v2539_v20  ;;  %v9231_v1 = vadd.f32 %v2097_v21, %v1761_v7  ;;  %vm12797_vm5 = vcmp.ge.s32.totalorder %v12796_v41, 0  ;;  %v12804_v7 = vld [vmem:[#allocation126_spill] sm:$0xff] }
 0x171   : > { %v1170_v50 = vpop.f32.mrf.mxu0  ;;  %vm9246_vm0 = vmand %vm9233_vm13, %vm12797_vm5  ;;  %vm12805_vm9 = vnez %v12804_v7  ;;  %v12809_v21 = vld [vmem:[#allocation94_spill] sm:$0xff] }
 0x172   : > { %12788 = vst [vmem:[#allocation28_spill] sm:$0xff] %v9231_v1  ;;  %v1718_v59 = vpop.f32.mrf.mxu2  ;;  %v2233_v20 = vsel %vm12805_vm9, %v12803_v56, 0.0  ;;  %v2926_v13 = vsel %vm9246_vm0, %v12808_v16, 0.0  ;;  %v12814_v16 = vld [vmem:[#allocation72_spill] sm:$0xff]  ;;  %vm12815_vm0 = vmmov %vm12795_vm11 }
 0x173   : > { %v1762_v44 = vadd.f32 %v1718_v59, %v1304_v39  ;;  %5934 = vmatmul.msk.bf16.gmra.mxu3 %vm12795_vm11, %v3238_v6  ;;  %v2232_v39 = vsel %vm12802_vm7, %v12800_v34, 0.0  ;;  %v2927_v6 = vsel %vm9237_vm10, %v12809_v21, 0.0  ;;  %v2736_v58 = vadd.s32 1, %v12814_v16  ;;  %vm12818_vm5 = vmmov %vm12815_vm0 }
 0x174   : > { %v2953_v11 = vpack.c.bf16 %v2927_v6, %v2926_v13 }
 0x175   : > { %v1310_v47 = vpop.f32.mrf.mxu1  ;;  %vm2768_vm8 = vcmp.ge.s32.totalorder %v2736_v58, 0  ;;  %vm2800_vm11 = vcmp.lt.s32.totalorder %v2736_v58, 16  ;;  %v12824_v58 = vmov 0 }
 0x176   : > { %v1311_v62 = vadd.f32 %v1310_v47, %v1170_v50  ;;  %v2256_v50 = vpack.c.bf16 %v2233_v20, %v2232_v39  ;;  %v12811_v47 = vld [vmem:[#allocation105_spill] sm:$0xff] }
 0x177   : > { %v2100_v17 = vpop.f32.mrf.mxu3  ;;  %v2514_v41 = vsel %vm12744_vm2, %v12811_v47, 0.0  ;;  %vm12817_vm2 = vmmov %vm12815_vm0 }
 0x178   : > { %v9266_v59 = vadd.f32 %v2100_v17, %v1762_v44  ;;  %v2540_v46 = vpack.c.bf16 %v2515_v30, %v2514_v41  ;;  %v12816_v44 = vld [vmem:[#allocation74_spill] sm:$0xff]  ;;  %v12830_v41 = vld [vmem:[#allocation137_spill] sm:$0xff] }
 0x179   : > { %v2326_v60 = vpop.f32.mrf.mxu0  ;;  %v2737_v39 = vadd.s32 1, %v12816_v44  ;;  %v12835_v44 = vld [vmem:[#allocation102_spill] sm:$0xff] }
 0x17a   : > { %12810 = vst [vmem:[#allocation76_spill] sm:$0xff] %v9266_v59  ;;  %v1720_v8 = vpop.f32.mrf.mxu2  ;;  %v9273_v1 = vadd.f32 %v2326_v60, %v12813_v18  ;;  %v12843_v59 = vld [vmem:[#allocation84_spill] sm:$0xff] }
 0x17b   : > { %v1763_v4 = vadd.f32 %v1720_v8, %v1306_v52  ;;  %v3213_v52 = vsel %vm9237_vm10, %v12745_v31, 0.0  ;;  %vm2769_vm1 = vcmp.ge.s32.totalorder %v2737_v39, 0  ;;  %vm2801_vm3 = vcmp.lt.s32.totalorder %v2737_v39, 16  ;;  %v12823_v31 = vld [vmem:[#allocation145_spill] sm:$0xff] }
 0x17c   : > { %5887 = vmatmul.msk.bf16.gmra.mxu0 %vm12815_vm0, %v2256_v50  ;;  %v3239_v30 = vpack.c.bf16 %v3213_v52, %v3212_v19  ;;  %vm9288_vm0 = vmand %vm2768_vm8, %vm2800_vm11  ;;  %v12829_v50 = vld [vmem:[#allocation127_spill] sm:$0xff]  ;;  %vm12831_vm8 = vnez %v12830_v41  ;;  %v2738_v25 = vadd.s32 1, %v12843_v59  ;;  %v12848_v59 = vld [vmem:[#allocation116_spill] sm:$0xff] }
 0x17d   : > { %v1313_v21 = vpop.f32.mrf.mxu1  ;;  %v12821_v12 = vsel %vm9288_vm0, 4294967295, %v12820_v12  ;;  %v2234_v8 = vsel %vm12831_vm8, %v12829_v50, 0.0  ;;  %v12837_v19 = vld [vmem:[#allocation107_spill] sm:$0xff]  ;;  %v3214_v36 = vsel %vm9288_vm0, %v12770_v48, 0.0 }
 0x17e   : > { %12822 = vst [vmem:[#allocation77_spill] sm:$0xff] %v12821_v12 }
 0x17f   : > { %5918 = vmatmul.msk.bf16.gmra.mxu2 %vm12817_vm2, %v2953_v11  ;;  %v2102_v60 = vpop.f32.mrf.mxu3  ;;  %vm9295_vm2 = vmand %vm2769_vm1, %vm2801_vm3  ;;  %v12833_v11 = vld [vmem:[#allocation140_spill] sm:$0xff]  ;;  %vm12836_vm1 = vcmp.lt.s32.totalorder %v12835_v44, 16 }
 0x180   : > { %5902 = vmatmul.msk.bf16.gmra.mxu1 %vm12818_vm5, %v2540_v46  ;;  %v9286_v18 = vadd.f32 %v2102_v60, %v1763_v4  ;;  %v12825_v58 = vsel %vm9295_vm2, 4294967295, %v12824_v58  ;;  %v12827_v4 = vld [vmem:[#allocation79_spill] sm:$0xff]  ;;  %vm12834_vm11 = vnez %v12833_v11  ;;  %vm2485_vm3 = vmand %vm12775_vm6, %vm12836_vm1  ;;  %v12838_v60 = vld [vmem:[#allocation106_spill] sm:$0xff]  ;;  %vm2770_vm6 = vcmp.ge.s32.totalorder %v2738_v25, 0 }
 0x181   : > { %v2328_v17 = vpop.f32.mrf.mxu0  ;;  %12826 = vst [vmem:[#allocation87_spill] sm:$0xff] %v12825_v58  ;;  %vm12828_vm13 = vcmp.ge.s32.totalorder %v12827_v4, 0  ;;  %v2517_v9 = vsel %vm2485_vm3, %v12841_v54, 0.0 }
 0x182   : > { %12819 = vst [vmem:[#allocation85_spill] sm:$0xff] %v9286_v18  ;;  %v1723_v20 = vpop.f32.mrf.mxu2  ;;  %v9293_v6 = vadd.f32 %v2328_v17, %v12823_v31  ;;  %vm2864_vm10 = vmand %vm9288_vm0, %vm12828_vm13  ;;  %v12840_v31 = vld [vmem:[#allocation118_spill] sm:$0xff]  ;;  %vm2802_vm13 = vcmp.lt.s32.totalorder %v2738_v25, 16  ;;  %v12853_v25 = vmov 0 }
 0x183   : > { %v1764_v13 = vadd.f32 %v1723_v20, %v1309_v38  ;;  %5935 = vmatmul.msk.bf16.gmra.mxu3 %vm12818_vm5, %v3239_v30  ;;  %v12832_v38 = vld [vmem:[#allocation128_spill] sm:$0xff]  ;;  %v2928_v52 = vsel %vm2864_vm10, %v12837_v19, 0.0  ;;  %v2929_v30 = vsel %vm9295_vm2, %v12838_v60, 0.0  ;;  %v2516_v4 = vsel %vm12772_vm4, %v12840_v31, 0.0  ;;  %vm12844_vm10 = vmmov %vm12818_vm5 }
 0x184   : > { %v2235_v16 = vsel %vm12834_vm11, %v12832_v38, 0.0  ;;  %v2954_v19 = vpack.c.bf16 %v2929_v30, %v2928_v52  ;;  %v2541_v55 = vpack.c.bf16 %v2517_v9, %v2516_v4  ;;  %vm12846_vm4 = vmmov %vm12818_vm5  ;;  %v12852_v52 = vld [vmem:[#allocation157_spill] sm:$0xff] }
 0x185   : > { %v1315_v46 = vpop.f32.mrf.mxu1  ;;  %v2257_v17 = vpack.c.bf16 %v2235_v16, %v2234_v8  ;;  %v12845_v8 = vld [vmem:[#allocation86_spill] sm:$0xff]  ;;  %vm12847_vm5 = vmmov %vm12846_vm4 }
 0x187   : > { %v2105_v39 = vpop.f32.mrf.mxu3 }
 0x188   : > { %v9318_v20 = vadd.f32 %v2105_v39, %v1764_v13  ;;  %v3215_v13 = vsel %vm9295_vm2, %v12773_v57, 0.0  ;;  %v12850_v57 = vmov 0 }
 0x189   : > { %v2331_v47 = vpop.f32.mrf.mxu0  ;;  %v3240_v9 = vpack.c.bf16 %v3215_v13, %v3214_v36  ;;  %v12861_v13 = vld [vmem:[#allocation91_spill] sm:$0xff] }
 0x18a   : > { %12839 = vst [vmem:[#allocation59_spill] sm:$0xff] %v9318_v20  ;;  %v1725_v44 = vpop.f32.mrf.mxu2  ;;  %v9325_v18 = vadd.f32 %v2331_v47, %v12842_v23  ;;  %v1314_v47 = vadd.f32 %v1313_v21, %v12848_v59  ;;  %v12855_v21 = vld [vmem:[#allocation141_spill] sm:$0xff]  ;;  %v12871_v20 = vld [vmem:[#allocation96_spill] sm:$0xff] }
 0x18b   : > { %v1765_v22 = vadd.f32 %v1725_v44, %v1311_v62  ;;  %v2739_v62 = vadd.s32 1, %v12845_v8  ;;  %v12863_v8 = vld [vmem:[#allocation114_spill] sm:$0xff]  ;;  %v2740_v42 = vadd.s32 1, %v12871_v20 }
 0x18c   : > { %5888 = vmatmul.msk.bf16.gmra.mxu0 %vm12844_vm10, %v2257_v17  ;;  %vm9341_vm10 = vmand %vm2770_vm6, %vm2802_vm13  ;;  %v12856_v17 = vld [vmem:[#allocation151_spill] sm:$0xff]  ;;  %vm12862_vm13 = vcmp.ge.s32.totalorder %v12861_v13, 0  ;;  %v12868_v13 = vld [vmem:[#allocation133_spill] sm:$0xff] }
 0x18d   : > { %v1318_v60 = vpop.f32.mrf.mxu1  ;;  %vm2771_vm1 = vcmp.ge.s32.totalorder %v2739_v62, 0  ;;  %vm2803_vm3 = vcmp.lt.s32.totalorder %v2739_v62, 16  ;;  %v12851_v57 = vsel %vm9341_vm10, 4294967295, %v12850_v57  ;;  %vm12857_vm0 = vnez %v12856_v17  ;;  %vm2866_vm2 = vmand %vm9341_vm10, %vm12862_vm13 }
 0x18e   : > { %v2236_v4 = vsel %vm12857_vm0, %v12855_v21, 0.0  ;;  %v2518_v12 = vsel %vm12802_vm7, %v12868_v13, 0.0  ;;  %v3216_v35 = vsel %vm9341_vm10, %v12800_v34, 0.0  ;;  %vm12874_vm7 = vmmov %vm12847_vm5  ;;  %vm12881_vm10 = vnez %v12517_v0 }
 0x18f   : > { %5919 = vmatmul.msk.bf16.gmra.mxu2 %vm12846_vm4, %v2954_v19  ;;  %v2107_v23 = vpop.f32.mrf.mxu3  ;;  %vm9348_vm4 = vmand %vm2771_vm1, %vm2803_vm3  ;;  %v12859_v19 = vld [vmem:[#allocation154_spill] sm:$0xff]  ;;  %vm12864_vm1 = vcmp.lt.s32.totalorder %v12863_v8, 16  ;;  %v12869_v8 = vld [vmem:[#allocation132_spill] sm:$0xff] }
 0x190   : > { %5903 = vmatmul.msk.bf16.gmra.mxu1 %vm12847_vm5, %v2541_v55  ;;  %v9339_v16 = vadd.f32 %v2107_v23, %v1765_v22  ;;  %v12854_v25 = vsel %vm9348_vm4, 4294967295, %v12853_v25  ;;  %v12858_v22 = vld [vmem:[#allocation142_spill] sm:$0xff]  ;;  %vm12860_vm6 = vnez %v12859_v19  ;;  %vm2487_vm3 = vmand %vm12805_vm9, %vm12864_vm1 }
 0x191   : > { %v2333_v44 = vpop.f32.mrf.mxu0  ;;  %v2237_v36 = vsel %vm12860_vm6, %v12858_v22, 0.0  ;;  %v2519_v31 = vsel %vm2487_vm3, %v12869_v8, 0.0  ;;  %vm12872_vm9 = vmmov %vm12847_vm5 }
 0x192   : > { %12849 = vst [vmem:[#allocation58_spill] sm:$0xff] %v9339_v16  ;;  %v1728_v48 = vpop.f32.mrf.mxu2  ;;  %v9346_v30 = vadd.f32 %v2333_v44, %v12852_v52  ;;  %v2258_v23 = vpack.c.bf16 %v2237_v36, %v2236_v4  ;;  %v12867_v44 = vld [vmem:[#allocation125_spill] sm:$0xff]  ;;  %v12870_v4 = vld [vmem:[#allocation164_spill] sm:$0xff]  ;;  %vm12875_vm13 = vmmov %vm12874_vm7 }
 0x193   : > { %v1766_v39 = vadd.f32 %v1728_v48, %v1314_v47  ;;  %5936 = vmatmul.msk.bf16.gmra.mxu3 %vm12847_vm5, %v3240_v9  ;;  %v12865_v9 = vld [vmem:[#allocation120_spill] sm:$0xff]  ;;  %v12866_v47 = vld [vmem:[#allocation119_spill] sm:$0xff]  ;;  %v1316_v52 = vadd.f32 %v1315_v46, %v12867_v44  ;;  %v3217_v46 = vsel %vm9348_vm4, %v12803_v56, 0.0  ;;  %vm2804_vm5 = vcmp.lt.s32.totalorder %v2740_v42, 16 }
 0x194   : > { %v2930_v59 = vsel %vm2866_vm2, %v12865_v9, 0.0  ;;  %v2931_v48 = vsel %vm9348_vm4, %v12866_v47, 0.0  ;;  %v2542_v47 = vpack.c.bf16 %v2519_v31, %v2518_v12  ;;  %vm2772_vm2 = vcmp.ge.s32.totalorder %v2740_v42, 0  ;;  %v12876_v31 = vld [vmem:[#allocation122_spill] sm:$0xff] }
 0x195   : > { %v1320_v55 = vpop.f32.mrf.mxu1  ;;  %v2955_v9 = vpack.c.bf16 %v2931_v48, %v2930_v59  ;;  %v3241_v20 = vpack.c.bf16 %v3217_v46, %v3216_v35  ;;  %v12877_v48 = vmov 0  ;;  %v12879_v42 = vmov 0  ;;  %v12888_v46 = vld [vmem:[#allocation134_spill] sm:$0xff] }
 0x197   : > { %v2110_v62 = vpop.f32.mrf.mxu3 }
 0x198   : > { %v9372_v54 = vadd.f32 %v2110_v62, %v1766_v39  ;;  %v12873_v39 = vld [vmem:[#allocation98_spill] sm:$0xff] }
 0x199   : > { %v2336_v58 = vpop.f32.mrf.mxu0  ;;  %v2741_v62 = vadd.s32 1, %v12873_v39 }
 0x19a   : > { %v1730_v7 = vpop.f32.mrf.mxu2  ;;  %v9379_v36 = vadd.f32 %v2336_v58, %v12870_v4 }
 0x19b   : > { %v1767_v16 = vadd.f32 %v1730_v7, %v1316_v52  ;;  %vm2773_vm1 = vcmp.ge.s32.totalorder %v2741_v62, 0  ;;  %vm2805_vm3 = vcmp.lt.s32.totalorder %v2741_v62, 16  ;;  %v12883_v52 = vld [vmem:[#allocation103_spill] sm:$0xff]  ;;  %v12885_v7 = vld [vmem:[#allocation129_spill] sm:$0xff] }
 0x19c   : > { %5889 = vmatmul.msk.bf16.gmra.mxu0 %vm12872_vm9, %v2258_v23  ;;  %v1319_v23 = vadd.f32 %v1318_v60, %v12876_v31  ;;  %vm9396_vm9 = vmand %vm2772_vm2, %vm2804_vm5  ;;  %vm12882_vm2 = vnez %v12521_v49  ;;  %vm12884_vm5 = vcmp.ge.s32.totalorder %v12883_v52, 0  ;;  %v12889_v62 = vld [vmem:[#allocation131_spill] sm:$0xff]  ;;  %v12892_v52 = vld [vmem:[#allocation108_spill] sm:$0xff] }
 0x19d   : > { %v2612_v2 = vpop.f32.mrf.mxu1  ;;  %v12878_v48 = vsel %vm9396_vm9, 4294967295, %v12877_v48  ;;  %v2239_v44 = vsel %vm12882_vm2, %v8451_v32, 0.0  ;;  %vm2868_vm4 = vmand %vm9396_vm9, %vm12884_vm5  ;;  %v12890_v31 = vld [vmem:[#allocation147_spill] sm:$0xff] }
 0x19e   : > { %v2692_v58 = vadd.f32 %v2612_v2, %v9273_v1 }
 0x19f   : > { %5920 = vmatmul.msk.bf16.gmra.mxu2 %vm12874_vm7, %v2955_v9  ;;  %v2112_v12 = vpop.f32.mrf.mxu3  ;;  %vm9403_vm7 = vmand %vm2773_vm1, %vm2805_vm3  ;;  %vm12886_vm1 = vcmp.lt.s32.totalorder %v12885_v7, 16 }
 0x1a0   : > { %5904 = vmatmul.msk.bf16.gmra.mxu1 %vm12875_vm13, %v2542_v47  ;;  %v9394_v59 = vadd.f32 %v2112_v12, %v1767_v16  ;;  %v12880_v42 = vsel %vm9403_vm7, 4294967295, %v12879_v42  ;;  %v2238_v16 = vsel %vm12881_vm10, %v8439_v63, 0.0  ;;  %vm2489_vm3 = vmand %vm12834_vm11, %vm12886_vm1  ;;  %v12887_v47 = vld [vmem:[#allocation135_spill] sm:$0xff]  ;;  %v2933_v39 = vsel %vm9403_vm7, %v12888_v46, 0.0 }
 0x1a1   : > { %v2338_v56 = vpop.f32.mrf.mxu0  ;;  %v2259_v9 = vpack.c.bf16 %v2239_v44, %v2238_v16  ;;  %v2932_v35 = vsel %vm2868_vm4, %v12887_v47, 0.0  ;;  %v1321_v12 = vadd.f32 %v1320_v55, %v12889_v62  ;;  %v2742_v47 = vadd.s32 1, %v12892_v52  ;;  %vm12893_vm11 = vmmov %vm12875_vm13  ;;  %v12894_v55 = vld [vmem:[#allocation110_spill] sm:$0xff]  ;;  %v12908_v52 = vld [vmem:[#allocation149_spill] sm:$0xff] }
 0x1a2   : > { %v1733_v34 = vpop.f32.mrf.mxu2  ;;  %v9401_v1 = vadd.f32 %v2338_v56, %v8600_v28  ;;  %v2956_v44 = vpack.c.bf16 %v2933_v39, %v2932_v35 }
 0x1a3   : > { %v1768_v2 = vadd.f32 %v1733_v34, %v1319_v23  ;;  %5937 = vmatmul.msk.bf16.gmra.mxu3 %vm12875_vm13, %v3241_v20  ;;  %v12891_v23 = vld [vmem:[#allocation146_spill] sm:$0xff]  ;;  %vm2774_vm4 = vcmp.ge.s32.totalorder %v2742_v47, 0  ;;  %vm2806_vm13 = vcmp.lt.s32.totalorder %v2742_v47, 16 }
 0x1a4   : > { %v2521_v34 = vsel %vm2489_vm3, %v12891_v23, 0.0 }
 0x1a5   : > { %v2614_v60 = vpop.f32.mrf.mxu1 }
 0x1a6   : > { %v2693_v28 = vadd.f32 %v2614_v60, %v9293_v6  ;;  %v2520_v6 = vsel %vm12831_vm8, %v12890_v31, 0.0  ;;  %vm12895_vm8 = vmmov %vm12893_vm11 }
 0x1a7   : > { %v2115_v4 = vpop.f32.mrf.mxu3  ;;  %v2543_v46 = vpack.c.bf16 %v2521_v34, %v2520_v6  ;;  %vm12896_vm5 = vmmov %vm12895_vm8  ;;  %v12901_v34 = vld [vmem:[#allocation115_spill] sm:$0xff] }
 0x1a8   : > { %v9428_v20 = vadd.f32 %v2115_v4, %v1768_v2  ;;  %v2743_v2 = vadd.s32 1, %v12894_v55  ;;  %v3218_v4 = vsel %vm9396_vm9, %v12829_v50, 0.0  ;;  %v12897_v50 = vmov 0 }
 0x1a9   : > { %v2341_v56 = vpop.f32.mrf.mxu0  ;;  %vm12902_vm9 = vcmp.ge.s32.totalorder %v12901_v34, 0 }
 0x1aa   : > { %v1735_v11 = vpop.f32.mrf.mxu2  ;;  %v9435_v16 = vadd.f32 %v2341_v56, %v8679_v51  ;;  %v3219_v51 = vsel %vm9403_vm7, %v12832_v38, 0.0  ;;  %vm2775_vm1 = vcmp.ge.s32.totalorder %v2743_v2, 0  ;;  %vm2807_vm3 = vcmp.lt.s32.totalorder %v2743_v2, 16 }
 0x1ab   : > { %v1769_v60 = vadd.f32 %v1735_v11, %v1321_v12  ;;  %v3242_v39 = vpack.c.bf16 %v3219_v51, %v3218_v4  ;;  %v12910_v4 = vld [vmem:[#allocation159_spill] sm:$0xff]  ;;  %v12912_v11 = vld [vmem:[#allocation121_spill] sm:$0xff] }
 0x1ac   : > { %5890 = vmatmul.msk.bf16.gmra.mxu0 %vm12893_vm11, %v2259_v9  ;;  %vm9451_vm11 = vmand %vm2774_vm4, %vm2806_vm13  ;;  %vm12905_vm4 = vnez %v12553_v61  ;;  %v2522_v51 = vsel %vm12857_vm0, %v12910_v4, 0.0 }
 0x1ad   : > { %v2617_v7 = vpop.f32.mrf.mxu1  ;;  %v12898_v50 = vsel %vm9451_vm11, 4294967295, %v12897_v50  ;;  %vm9467_vm7 = vmand %vm9451_vm11, %vm12902_vm9  ;;  %v2241_v56 = vsel %vm12905_vm4, %v8586_v53, 0.0 }
 0x1ae   : > { %v2694_v41 = vadd.f32 %v2617_v7, %v9325_v18  ;;  %v2934_v47 = vsel %vm9467_vm7, %v12908_v52, 0.0  ;;  %v2744_v52 = vadd.s32 1, %v12912_v11  ;;  %vm12915_vm0 = vmmov %vm12896_vm5  ;;  %v12929_v11 = vld [vmem:[#allocation155_spill] sm:$0xff] }
 0x1af   : > { %5921 = vmatmul.msk.bf16.gmra.mxu2 %vm12895_vm8, %v2956_v44  ;;  %v2117_v35 = vpop.f32.mrf.mxu3  ;;  %vm9458_vm8 = vmand %vm2775_vm1, %vm2807_vm3 }
 0x1b0   : > { %5905 = vmatmul.msk.bf16.gmra.mxu1 %vm12896_vm5, %v2543_v46  ;;  %v9449_v9 = vadd.f32 %v2117_v35, %v1769_v60  ;;  %v12906_v60 = vld [vmem:[#allocation143_spill] sm:$0xff]  ;;  %v12909_v46 = vld [vmem:[#allocation148_spill] sm:$0xff]  ;;  %v12911_v35 = vld [vmem:[#allocation158_spill] sm:$0xff]  ;;  %vm2776_vm9 = vcmp.ge.s32.totalorder %v2744_v52, 0  ;;  %vm2808_vm7 = vcmp.lt.s32.totalorder %v2744_v52, 16 }
 0x1b1   : > { %v2343_v7 = vpop.f32.mrf.mxu0  ;;  %vm12907_vm13 = vcmp.lt.s32.totalorder %v12906_v60, 16  ;;  %vm12916_vm3 = vmmov %vm12915_vm0 }
 0x1b2   : > { %v3026_v18 = vpop.f32.mrf.mxu2  ;;  %v9456_v38 = vadd.f32 %v2343_v7, %v8719_v37  ;;  %v2240_v37 = vsel %vm8675_vm14, %v8574_v3, 0.0  ;;  %vm2491_vm1 = vmand %vm12860_vm6, %vm12907_vm13 }
 0x1b3   : > { %v3106_v62 = vadd.f32 %v3026_v18, %v2692_v58  ;;  %5938 = vmatmul.msk.bf16.gmra.mxu3 %vm12896_vm5, %v3242_v39  ;;  %v2260_v2 = vpack.c.bf16 %v2241_v56, %v2240_v37  ;;  %v2523_v39 = vsel %vm2491_vm1, %v12911_v35, 0.0  ;;  %vm12913_vm6 = vmmov %vm12896_vm5  ;;  %v3220_v56 = vsel %vm9451_vm11, %v12855_v21, 0.0  ;;  %v5946_v21 = vld [vmem:[%s11552_s1 + $0x10] sm:$0x3] }
 0x1b4   : > { %v2544_v60 = vpack.c.bf16 %v2523_v39, %v2522_v51  ;;  %vm9514_vm1 = vmand %vm2776_vm9, %vm2808_vm7  ;;  %v12921_v39 = vmov 0  ;;  %vm12927_vm7 = vnez %v12578_v33 }
 0x1b5   : > { %v2619_v6 = vpop.f32.mrf.mxu1 }
 0x1b6   : > { %v2695_v58 = vadd.f32 %v2619_v6, %v9346_v30  ;;  %v2935_v30 = vsel %vm9458_vm8, %v12909_v46, 0.0 }
 0x1b7   : > { %v3312_v44 = vpop.f32.mrf.mxu3  ;;  %v2957_v34 = vpack.c.bf16 %v2935_v30, %v2934_v47 }
 0x1b8   : > { %v9488_v55 = vadd.f32 %v3312_v44, %v3106_v62  ;;  %v12914_v62 = vld [vmem:[#allocation124_spill] sm:$0xff] }
 0x1b9   : > { %v2346_v18 = vpop.f32.mrf.mxu0  ;;  %v2745_v37 = vadd.s32 1, %v12914_v62 }
 0x1ba   : > { %v3028_v19 = vpop.f32.mrf.mxu2  ;;  %v9495_v6 = vadd.f32 %v2346_v18, %v8789_v10  ;;  %v3221_v10 = vsel %vm9458_vm8, %v12858_v22, 0.0  ;;  %v12917_v22 = vmov 0  ;;  %v12923_v18 = vld [vmem:[#allocation130_spill] sm:$0xff] }
 0x1bb   : > { %v3107_v7 = vadd.f32 %v3028_v19, %v2693_v28  ;;  %v3243_v47 = vpack.c.bf16 %v3221_v10, %v3220_v56  ;;  %vm2777_vm5 = vcmp.ge.s32.totalorder %v2745_v37, 0  ;;  %vm2809_vm13 = vcmp.lt.s32.totalorder %v2745_v37, 16  ;;  %v12932_v37 = vld [vmem:[#allocation160_spill] sm:$0xff] }
 0x1bc   : > { %5891 = vmatmul.msk.bf16.gmra.mxu0 %vm12913_vm6, %v2260_v2  ;;  %v12918_v22 = vsel %vm9514_vm1, 4294967295, %v12917_v22  ;;  %vm12919_vm6 = vcmask 1041408   ;;  %vm12924_vm11 = vcmp.ge.s32.totalorder %v12923_v18, 0 }
 0x1bd   : > { %v2622_v46 = vpop.f32.mrf.mxu1  ;;  %v3587_v2 = vsel %vm12919_vm6, %v5946_v21, 0  ;;  %vm9531_vm9 = vmand %vm9514_vm1, %vm12924_vm11  ;;  %v12934_v21 = vld [vmem:[#allocation167_spill] sm:$0xff] }
 0x1be   : > { %v2696_v17 = vadd.f32 %v2622_v46, %v9379_v36  ;;  %3596 = vmatpush.bf16.msra.mxu0 %v3587_v2  ;;  %v12931_v46 = vld [vmem:[#allocation161_spill] sm:$0xff] }
 0x1bf   : > { %5922 = vmatmul.msk.bf16.gmra.mxu2 %vm12915_vm0, %v2957_v34  ;;  %v3314_v28 = vpop.f32.mrf.mxu3  ;;  %vm9522_vm0 = vmand %vm2777_vm5, %vm2809_vm13  ;;  %vm12928_vm5 = vnez %v12580_v15  ;;  %vm12930_vm13 = vcmp.lt.s32.totalorder %v12929_v11, 16  ;;  %v2936_v62 = vsel %vm9531_vm9, %v12931_v46, 0.0 }
 0x1c0   : > { %5906 = vmatmul.msk.bf16.gmra.mxu1 %vm12916_vm3, %v2544_v60  ;;  %v9509_v44 = vadd.f32 %v3314_v28, %v3107_v7  ;;  %v12922_v39 = vsel %vm9522_vm0, 4294967295, %v12921_v39  ;;  %v2243_v34 = vsel %vm12928_vm5, %v6917_v26, 0.0  ;;  %vm2493_vm6 = vmand %vm12882_vm2, %vm12930_vm13  ;;  %v12933_v28 = vld [vmem:[#allocation168_spill] sm:$0xff] }
 0x1c1   : > { %v2348_v30 = vpop.f32.mrf.mxu0  ;;  %v12936_v7 = vld [vmem:[#allocation136_spill] sm:$0xff]  ;;  %vm12937_vm2 = vmmov %vm12916_vm3 }
 0x1c2   : > { %v3031_v36 = vpop.f32.mrf.mxu2  ;;  %v9520_v60 = vadd.f32 %v2348_v30, %v8833_v45  ;;  %v2242_v45 = vsel %vm12927_vm7, %v6911_v24, 0.0  ;;  %v2746_v46 = vadd.s32 1, %v12936_v7  ;;  %vm12940_vm9 = vmmov %vm12937_vm2 }
 0x1c3   : > { %v3108_v51 = vadd.f32 %v3031_v36, %v2694_v41  ;;  %5939 = vmatmul.msk.bf16.gmra.mxu3 %vm12916_vm3, %v3243_v47  ;;  %v2261_v10 = vpack.c.bf16 %v2243_v34, %v2242_v45  ;;  %v2524_v47 = vsel %vm12881_vm10, %v12933_v28, 0.0  ;;  %v2525_v36 = vsel %vm2493_vm6, %v12934_v21, 0.0  ;;  %vm12939_vm10 = vmmov %vm12937_vm2 }
 0x1c4   : > { %12920 = vst [vmem:[#allocation37_spill] sm:$0xff] %v9520_v60  ;;  %v2545_v60 = vpack.c.bf16 %v2525_v36, %v2524_v47  ;;  %v3222_v34 = vsel %vm9514_vm1, %v8439_v63, 0.0  ;;  %vm2778_vm11 = vcmp.ge.s32.totalorder %v2746_v46, 0  ;;  %vm2810_vm3 = vcmp.lt.s32.totalorder %v2746_v46, 16  ;;  %v12948_v36 = vld [vmem:[#allocation144_spill] sm:$0xff]  ;;  %v12956_v46 = vld [vmem:[#allocation170_spill] sm:$0xff] }
 0x1c5   : > { %v2624_v19 = vpop.f32.mrf.mxu1  ;;  %v12941_v63 = vmov 0  ;;  %v12945_v47 = vmov 0  ;;  %vm12949_vm1 = vcmp.ge.s32.totalorder %v12948_v36, 0  ;;  %v12960_v36 = vld [vmem:[#allocation41_spill] sm:$0xff] }
 0x1c6   : > { %v2697_v41 = vadd.f32 %v2624_v19, %v9401_v1  ;;  %v2937_v1 = vsel %vm9522_vm0, %v12932_v37, 0.0 }
 0x1c7   : > { %v3317_v52 = vpop.f32.mrf.mxu3  ;;  %v2958_v18 = vpack.c.bf16 %v2937_v1, %v2936_v62 }
 0x1c8   : > { %v9552_v56 = vadd.f32 %v3317_v52, %v3108_v51  ;;  %v12938_v51 = vld [vmem:[#allocation138_spill] sm:$0xff] }
 0x1c9   : > { %v2351_v30 = vpop.f32.mrf.mxu0  ;;  %v2747_v45 = vadd.s32 1, %v12938_v51  ;;  %v12957_v51 = vld [vmem:[#allocation169_spill] sm:$0xff] }
 0x1ca   : > { %v3033_v49 = vpop.f32.mrf.mxu2  ;;  %v9559_v19 = vadd.f32 %v2351_v30, %v8902_v5  ;;  %v3223_v5 = vsel %vm9522_vm0, %v8451_v32, 0.0  ;;  %v12952_v30 = vld [vmem:[#allocation183_spill] sm:$0xff] }
 0x1cb   : > { %v3109_v2 = vadd.f32 %v3033_v49, %v2695_v58  ;;  %v3244_v62 = vpack.c.bf16 %v3223_v5, %v3222_v34  ;;  %vm2779_vm13 = vcmp.ge.s32.totalorder %v2747_v45, 0  ;;  %vm2811_vm6 = vcmp.lt.s32.totalorder %v2747_v45, 16  ;;  %v12958_v5 = vld [vmem:[#allocation174_spill] sm:$0xff] }
 0x1cc   : > { %12935 = vst [vmem:[#allocation38_spill] sm:$0xff] %v9559_v19  ;;  %5892 = vmatmul.msk.bf16.gmra.mxu0 %vm12937_vm2, %v2261_v10  ;;  %vm9575_vm2 = vmand %vm2778_vm11, %vm2810_vm3  ;;  %vm12953_vm11 = vnez %v12952_v30  ;;  %v13011_v30 = vld [vmem:[#allocation40_spill] sm:$0xff] }
 0x1cd   : > { %v2627_v37 = vpop.f32.mrf.mxu1  ;;  %v12942_v63 = vsel %vm9575_vm2, 4294967295, %v12941_v63  ;;  %vm9591_vm0 = vmand %vm9575_vm2, %vm12949_vm1 }
 0x1ce   : > { %v2698_v0 = vadd.f32 %v2627_v37, %v9435_v16  ;;  %12943 = vst [vmem:[#allocation45_spill] sm:$0xff] %v12942_v63  ;;  %v2938_v37 = vsel %vm9591_vm0, %v12956_v46, 0.0  ;;  %v12962_v46 = vld [vmem:[#allocation150_spill] sm:$0xff] }
 0x1cf   : > { %5923 = vmatmul.msk.bf16.gmra.mxu2 %vm12939_vm10, %v2958_v18  ;;  %v3319_v58 = vpop.f32.mrf.mxu3  ;;  %vm9582_vm10 = vmand %vm2779_vm13, %vm2811_vm6  ;;  %v12954_v18 = vld [vmem:[#allocation165_spill] sm:$0xff]  ;;  %v2748_v19 = vadd.s32 1, %v12962_v46  ;;  %v12990_v63 = vld [vmem:[#allocation162_spill] sm:$0xff] }
 0x1d0   : > { %5907 = vmatmul.msk.bf16.gmra.mxu1 %vm12940_vm9, %v2545_v60  ;;  %v9573_v52 = vadd.f32 %v3319_v58, %v3109_v2  ;;  %v12946_v47 = vsel %vm9582_vm10, 4294967295, %v12945_v47  ;;  %v2245_v2 = vsel %vm12953_vm11, %v6921_v29, 0.0  ;;  %vm12955_vm3 = vcmp.lt.s32.totalorder %v12954_v18, 16 }
 0x1d1   : > { %v2353_v1 = vpop.f32.mrf.mxu0  ;;  %12947 = vst [vmem:[#allocation97_spill] sm:$0xff] %v12946_v47  ;;  %vm2495_vm13 = vmand %vm12905_vm4, %vm12955_vm3  ;;  %v2526_v58 = vsel %vm8675_vm14, %v12958_v5, 0.0  ;;  %vm2780_vm1 = vcmp.ge.s32.totalorder %v2748_v19, 0  ;;  %vm2812_vm0 = vcmp.lt.s32.totalorder %v2748_v19, 16  ;;  %v12971_v19 = vmov 0 }
 0x1d2   : > { %v3036_v16 = vpop.f32.mrf.mxu2  ;;  %v9580_v32 = vadd.f32 %v2353_v1, %v8942_v14  ;;  %v2244_v14 = vsel %vm8898_vm12, %v6948_v40, 0.0  ;;  %vm12963_vm4 = vmmov %vm12940_vm9  ;;  %v2750_v5 = vadd.s32 1, %v12990_v63 }
 0x1d3   : > { %v3110_v10 = vadd.f32 %v3036_v16, %v2696_v17  ;;  %5940 = vmatmul.msk.bf16.gmra.mxu3 %vm12940_vm9, %v3244_v62  ;;  %v2262_v34 = vpack.c.bf16 %v2245_v2, %v2244_v14  ;;  %v12959_v62 = vld [vmem:[#allocation173_spill] sm:$0xff]  ;;  %v3224_v2 = vsel %vm9575_vm2, %v8574_v3, 0.0  ;;  %vm12965_vm14 = vmmov %vm12963_vm4  ;;  %v12967_v3 = vmov 0 }
 0x1d4   : > { %12944 = vst [vmem:[#allocation88_spill] sm:$0xff] %v9580_v32  ;;  %v2527_v16 = vsel %vm2495_vm13, %v12959_v62, 0.0  ;;  %vm12966_vm6 = vmmov %vm12963_vm4 }
 0x1d5   : > { %v2629_v60 = vpop.f32.mrf.mxu1  ;;  %v2546_v18 = vpack.c.bf16 %v2527_v16, %v2526_v58  ;;  %vm9635_vm13 = vmand %vm2780_vm1, %vm2812_vm0 }
 0x1d6   : > { %v2699_v17 = vadd.f32 %v2629_v60, %v9456_v38  ;;  %v2939_v38 = vsel %vm9582_vm10, %v12957_v51, 0.0  ;;  %v12968_v3 = vsel %vm9635_vm13, 4294967295, %v12967_v3  ;;  %v3226_v33 = vsel %vm9635_vm13, %v6911_v24, 0.0 }
 0x1d7   : > { %v3322_v7 = vpop.f32.mrf.mxu3  ;;  %v2959_v49 = vpack.c.bf16 %v2939_v38, %v2938_v37  ;;  %v12996_v24 = vmov 0 }
 0x1d8   : > { %v9612_v45 = vadd.f32 %v3322_v7, %v3110_v10  ;;  %v12964_v10 = vld [vmem:[#allocation152_spill] sm:$0xff] }
 0x1d9   : > { %v2356_v1 = vpop.f32.mrf.mxu0  ;;  %v2749_v14 = vadd.s32 1, %v12964_v10 }
 0x1da   : > { %v3038_v61 = vpop.f32.mrf.mxu2  ;;  %v9619_v32 = vadd.f32 %v2356_v1, %v12960_v36  ;;  %v12977_v1 = vld [vmem:[#allocation9_spill] sm:$0xff]  ;;  %v12979_v36 = vld [vmem:[#allocation10_spill] sm:$0xff] }
 0x1db   : > { %v3111_v60 = vadd.f32 %v3038_v61, %v2697_v41  ;;  %v3225_v41 = vsel %vm9582_vm10, %v8586_v53, 0.0  ;;  %vm2781_vm9 = vcmp.ge.s32.totalorder %v2749_v14, 0  ;;  %vm2813_vm3 = vcmp.lt.s32.totalorder %v2749_v14, 16  ;;  %v12969_v53 = vld [vmem:[#allocation187_spill] sm:$0xff]  ;;  %v12975_v61 = vld [vmem:[#allocation156_spill] sm:$0xff] }
 0x1dc   : > { %12961 = vst [vmem:[#allocation89_spill] sm:$0xff] %v9619_v32  ;;  %5893 = vmatmul.msk.bf16.gmra.mxu0 %vm12963_vm4, %v2262_v34  ;;  %v3245_v38 = vpack.c.bf16 %v3225_v41, %v3224_v2  ;;  %vm9642_vm4 = vmand %vm2781_vm9, %vm2813_vm3  ;;  %v12984_v14 = vld [vmem:[#allocation176_spill] sm:$0xff]  ;;  %v12985_v41 = vld [vmem:[#allocation175_spill] sm:$0xff] }
 0x1dd   : > { %v2632_v51 = vpop.f32.mrf.mxu1  ;;  %v12972_v19 = vsel %vm9642_vm4, 4294967295, %v12971_v19 }
 0x1de   : > { %v2700_v27 = vadd.f32 %v2632_v51, %v9495_v6  ;;  %v12982_v51 = vld [vmem:[#allocation171_spill] sm:$0xff] }
 0x1df   : > { %5924 = vmatmul.msk.bf16.gmra.mxu2 %vm12965_vm14, %v2959_v49  ;;  %v3324_v7 = vpop.f32.mrf.mxu3  ;;  %vm12973_vm14 = vmmov %vm12966_vm6  ;;  %v12980_v49 = vld [vmem:[#allocation51_spill] sm:$0xff]  ;;  %vm12983_vm9 = vcmp.lt.s32.totalorder %v12982_v51, 16 }
 0x1e0   : > { %5908 = vmatmul.msk.bf16.gmra.mxu1 %vm12966_vm6, %v2546_v18  ;;  %v9633_v37 = vadd.f32 %v3324_v7, %v3111_v60  ;;  %vm12976_vm6 = vcmp.ge.s32.totalorder %v12975_v61, 0  ;;  %vm12981_vm0 = vnez %v12980_v49  ;;  %vm2497_vm3 = vmand %vm12928_vm5, %vm12983_vm9  ;;  %v2941_v7 = vsel %vm9642_vm4, %v12985_v41, 0.0  ;;  %v12987_v61 = vld [vmem:[#allocation179_spill] sm:$0xff] }
 0x1e1   : > { %v2358_v34 = vpop.f32.mrf.mxu0  ;;  %vm2876_vm1 = vmand %vm9635_vm13, %vm12976_vm6  ;;  %v2247_v46 = vsel %vm12981_vm0, %v12979_v36, 0.0  ;;  %vm2814_vm6 = vcmp.lt.s32.totalorder %v2750_v5, 16  ;;  %v13045_v49 = vld [vmem:[#allocation39_spill] sm:$0xff] }
 0x1e2   : > { %v3041_v6 = vpop.f32.mrf.mxu2  ;;  %v9640_v16 = vadd.f32 %v2358_v34, %v12969_v53  ;;  %v2940_v2 = vsel %vm2876_vm1, %v12984_v14, 0.0  ;;  %v12986_v34 = vld [vmem:[#allocation180_spill] sm:$0xff]  ;;  %vm12992_vm5 = vmmov %vm12973_vm14 }
 0x1e3   : > { %v3112_v58 = vadd.f32 %v3041_v6, %v2698_v0  ;;  %5941 = vmatmul.msk.bf16.gmra.mxu3 %vm12973_vm14, %v3245_v38  ;;  %v2246_v0 = vsel %vm8985_vm15, %v12977_v1, 0.0  ;;  %v2528_v53 = vsel %vm12927_vm7, %v12986_v34, 0.0  ;;  %v2960_v14 = vpack.c.bf16 %v2941_v7, %v2940_v2  ;;  %vm12994_vm7 = vmmov %vm12992_vm5  ;;  %v13003_v2 = vld [vmem:[#allocation166_spill] sm:$0xff]  ;;  %v13005_v7 = vld [vmem:[#allocation177_spill] sm:$0xff] }
 0x1e4   : > { %12970 = vst [vmem:[#allocation99_spill] sm:$0xff] %v9640_v16  ;;  %v2263_v6 = vpack.c.bf16 %v2247_v46, %v2246_v0  ;;  %v2529_v16 = vsel %vm2497_vm3, %v12987_v61, 0.0  ;;  %vm2782_vm14 = vcmp.ge.s32.totalorder %v2750_v5, 0  ;;  %vm12995_vm1 = vmmov %vm12992_vm5  ;;  %v13000_v5 = vmov 0 }
 0x1e5   : > { %v9647_v18 = vpop.f32.mrf.mxu1  ;;  %v2547_v47 = vpack.c.bf16 %v2529_v16, %v2528_v53  ;;  %vm13004_vm13 = vcmp.ge.s32.totalorder %v13003_v2, 0  ;;  %v13012_v2 = vld [vmem:[#allocation7_spill] sm:$0xff] }
 0x1e6   : > { %12974 = vst [vmem:[#allocation71_spill] sm:$0xff] %v9647_v18  ;;  %v12988_v18 = vld [vmem:[#allocation52_spill] sm:$0xff] }
 0x1e7   : > { %v3327_v10 = vpop.f32.mrf.mxu3 }
 0x1e8   : > { %v9667_v38 = vadd.f32 %v3327_v10, %v3112_v58  ;;  %v12993_v58 = vld [vmem:[#allocation163_spill] sm:$0xff] }
 0x1e9   : > { %v2361_v51 = vpop.f32.mrf.mxu0  ;;  %v2751_v0 = vadd.s32 1, %v12993_v58 }
 0x1ea   : > { %v3043_v32 = vpop.f32.mrf.mxu2  ;;  %v9674_v62 = vadd.f32 %v2361_v51, %v12988_v18 }
 0x1eb   : > { %v3113_v15 = vadd.f32 %v3043_v32, %v2699_v17  ;;  %v3227_v32 = vsel %vm9642_vm4, %v6917_v26, 0.0  ;;  %vm2783_vm9 = vcmp.ge.s32.totalorder %v2751_v0, 0  ;;  %vm2815_vm3 = vcmp.lt.s32.totalorder %v2751_v0, 16  ;;  %v12998_v26 = vld [vmem:[#allocation61_spill] sm:$0xff]  ;;  %v13009_v0 = vld [vmem:[#allocation186_spill] sm:$0xff] }
 0x1ec   : > { %12989 = vst [vmem:[#allocation70_spill] sm:$0xff] %v9674_v62  ;;  %5894 = vmatmul.msk.bf16.gmra.mxu0 %vm12992_vm5, %v2263_v6  ;;  %v3246_v16 = vpack.c.bf16 %v3227_v32, %v3226_v33  ;;  %vm9691_vm5 = vmand %vm2782_vm14, %vm2814_vm6  ;;  %vm13006_vm6 = vcmp.lt.s32.totalorder %v13005_v7, 16  ;;  %v13007_v6 = vld [vmem:[#allocation182_spill] sm:$0xff]  ;;  %v2530_v33 = vsel %vm8898_vm12, %v13009_v0, 0.0  ;;  %v13010_v32 = vld [vmem:[#allocation185_spill] sm:$0xff] }
 0x1ed   : > { %v9677_v41 = vpop.f32.mrf.mxu1  ;;  %v12997_v24 = vsel %vm9691_vm5, 4294967295, %v12996_v24  ;;  %vm2878_vm14 = vmand %vm9691_vm5, %vm13004_vm13 }
 0x1ee   : > { %12991 = vst [vmem:[#allocation48_spill] sm:$0xff] %v9677_v41  ;;  %vm2499_vm4 = vmand %vm12953_vm11, %vm13006_vm6  ;;  %v2942_v53 = vsel %vm2878_vm14, %v13007_v6, 0.0  ;;  %v2752_v6 = vadd.s32 1, %v13012_v2  ;;  %v13027_v2 = vld [vmem:[#allocation63_spill] sm:$0xff] }
 0x1ef   : > { %5925 = vmatmul.msk.bf16.gmra.mxu2 %vm12994_vm7, %v2960_v14  ;;  %v3329_v63 = vpop.f32.mrf.mxu3  ;;  %vm9698_vm7 = vmand %vm2783_vm9, %vm2815_vm3 }
 0x1f0   : > { %5909 = vmatmul.msk.bf16.gmra.mxu1 %vm12995_vm1, %v2547_v47  ;;  %v9689_v17 = vadd.f32 %v3329_v63, %v3113_v15  ;;  %v13001_v5 = vsel %vm9698_vm7, 4294967295, %v13000_v5  ;;  %v13008_v15 = vld [vmem:[#allocation181_spill] sm:$0xff]  ;;  %v2531_v63 = vsel %vm2499_vm4, %v13010_v32, 0.0  ;;  %vm13015_vm11 = vmmov %vm12995_vm1  ;;  %vm2784_vm13 = vcmp.ge.s32.totalorder %v2752_v6, 0 }
 0x1f1   : > { %v2363_v46 = vpop.f32.mrf.mxu0  ;;  %v2943_v14 = vsel %vm9698_vm7, %v13008_v15, 0.0  ;;  %v3228_v15 = vsel %vm9691_vm5, %v6948_v40, 0.0  ;;  %vm13017_vm12 = vmmov %vm12995_vm1  ;;  %vm2816_vm4 = vcmp.lt.s32.totalorder %v2752_v6, 16  ;;  %v13020_v40 = vmov 0 }
 0x1f2   : > { %v3046_v18 = vpop.f32.mrf.mxu2  ;;  %v9696_v10 = vadd.f32 %v2363_v46, %v12998_v26  ;;  %v2961_v26 = vpack.c.bf16 %v2943_v14, %v2942_v53  ;;  %vm13018_vm9 = vmmov %vm12995_vm1 }
 0x1f3   : > { %v3114_v51 = vadd.f32 %v3046_v18, %v2700_v27  ;;  %5942 = vmatmul.msk.bf16.gmra.mxu3 %vm12995_vm1, %v3246_v16  ;;  %vm9746_vm14 = vmand %vm2784_vm13, %vm2816_vm4 }
 0x1f4   : > { %12999 = vst [vmem:[#allocation50_spill] sm:$0xff] %v9696_v10  ;;  %v2548_v10 = vpack.c.bf16 %v2531_v63, %v2530_v33  ;;  %v13021_v40 = vsel %vm9746_vm14, 4294967295, %v13020_v40  ;;  %v3230_v60 = vsel %vm9746_vm14, %v12977_v1, 0.0  ;;  %v13053_v1 = vmov 0 }
 0x1f5   : > { %v9703_v47 = vpop.f32.mrf.mxu1  ;;  %13022 = vst [vmem:[#allocation101_spill] sm:$0xff] %v13021_v40 }
 0x1f6   : > { %13002 = vst [vmem:[#allocation55_spill] sm:$0xff] %v9703_v47 }
 0x1f7   : > { %v3332_v27 = vpop.f32.mrf.mxu3 }
 0x1f8   : > { %v9717_v58 = vadd.f32 %v3332_v27, %v3114_v51  ;;  %v13014_v51 = vld [vmem:[#allocation44_spill] sm:$0xff] }
 0x1f9   : > { %v2366_v18 = vpop.f32.mrf.mxu0  ;;  %v13016_v27 = vld [vmem:[#allocation8_spill] sm:$0xff] }
 0x1fa   : > { %v9723_v16 = vpop.f32.mrf.mxu2  ;;  %v9726_v46 = vadd.f32 %v2366_v18, %v13011_v30  ;;  %v2753_v43 = vadd.s32 1, %v13016_v27  ;;  %v3229_v18 = vsel %vm9698_vm7, %v6921_v29, 0.0  ;;  %v13023_v30 = vld [vmem:[#allocation42_spill] sm:$0xff]  ;;  %v13034_v27 = vld [vmem:[#allocation57_spill] sm:$0xff] }
 0x1fb   : > { %v3247_v14 = vpack.c.bf16 %v3229_v18, %v3228_v15  ;;  %v13037_v18 = vld [vmem:[#allocation56_spill] sm:$0xff] }
 0x1fc   : > { %5947 = vmatmul.msk.bf16.vlgmr.msra.gmra.mxu0 %vm13015_vm11, %v13014_v51  ;;  %vm2785_vm3 = vcmp.ge.s32.totalorder %v2753_v43, 0  ;;  %vm2817_vm1 = vcmp.lt.s32.totalorder %v2753_v43, 16  ;;  %vm13028_vm11 = vnez %v13027_v2  ;;  %v13032_v51 = vld [vmem:[#allocation172_spill] sm:$0xff]  ;;  %v13035_v43 = vld [vmem:[#allocation53_spill] sm:$0xff] }
 0x1fd   : > { %v9729_v62 = vpop.f32.mrf.mxu1  ;;  %vm9757_vm5 = vmand %vm2785_vm3, %vm2817_vm1  ;;  %vm13033_vm13 = vcmp.ge.s32.totalorder %v13032_v51, 0  ;;  %vm13036_vm7 = vnez %v13035_v43  ;;  %v13044_v43 = vld [vmem:[#allocation22_spill] sm:$0xff] }
 0x1fe   : > { %13013 = vst [vmem:[#allocation100_spill] sm:$0xff] %v9729_v62  ;;  %vm2880_vm4 = vmand %vm9746_vm14, %vm13033_vm13  ;;  %v3490_v15 = vsel %vm13036_vm7, %v13034_v27, 0.0  ;;  %v13043_v62 = vld [vmem:[#allocation21_spill] sm:$0xff] }
 0x1ff   : > { %5926 = vmatmul.msk.bf16.gmra.mxu2 %vm13017_vm12, %v2961_v26  ;;  %v9741_v53 = vpop.f32.mrf.mxu3  ;;  %v13025_v26 = vld [vmem:[#allocation30_spill] sm:$0xff]  ;;  %v2532_v27 = vsel %vm8985_vm15, %v13043_v62, 0.0 }
 0x200   : > { %5910 = vmatmul.msk.bf16.gmra.mxu1 %vm13018_vm9, %v2548_v10  ;;  %vm13026_vm6 = vcmp.lt.s32.totalorder %v13025_v26, 16 }
 0x201   : > { %v2368_v63 = vpop.f32.mrf.mxu0  ;;  %vm3459_vm12 = vmand %vm13028_vm11, %vm13026_vm6 }
 0x202   : > { %v9744_v33 = vpop.f32.mrf.mxu2  ;;  %v9751_v29 = vadd.f32 %v2368_v63, %v13023_v30  ;;  %v3491_v63 = vsel %vm3459_vm12, %v13037_v18, 0.0  ;;  %v13038_v30 = vld [vmem:[#allocation184_spill] sm:$0xff] }
 0x203   : > { %13019 = vst [vmem:[#allocation109_spill] sm:$0xff] %v9744_v33  ;;  %5943 = vmatmul.msk.bf16.gmra.mxu3 %vm13018_vm9, %v3247_v14  ;;  %vm13039_vm3 = vcmp.lt.s32.totalorder %v13038_v30, 16  ;;  %v13041_v14 = vld [vmem:[#allocation13_spill] sm:$0xff] }
 0x204   : > { %13024 = vst [vmem:[#allocation111_spill] sm:$0xff] %v9751_v29  ;;  %vm2501_vm1 = vmand %vm12981_vm0, %vm13039_vm3  ;;  %v2944_v2 = vsel %vm2880_vm4, %v13041_v14, 0.0  ;;  %v13042_v29 = vld [vmem:[#allocation12_spill] sm:$0xff] }
 0x205   : > { %v9762_v6 = vpop.f32.mrf.mxu1  ;;  %v2945_v51 = vsel %vm9757_vm5, %v13042_v29, 0.0  ;;  %v2533_v18 = vsel %vm2501_vm1, %v13044_v43, 0.0  ;;  %vm13048_vm0 = vmmov %vm13018_vm9  ;;  %v13049_v29 = vld [vmem:[#allocation14_spill] sm:$0xff] }
 0x206   : > { %13031 = vst [vmem:[#allocation83_spill] sm:$0xff] %v9762_v6  ;;  %v3521_v6 = vpack.c.bf16 %v3491_v63, %v3490_v15  ;;  %v2962_v33 = vpack.c.bf16 %v2945_v51, %v2944_v2  ;;  %v2549_v14 = vpack.c.bf16 %v2533_v18, %v2532_v27  ;;  %v2755_v15 = vadd.s32 1, %v13049_v29  ;;  %vm13050_vm15 = vmmov %vm13048_vm0  ;;  %v13056_v51 = vld [vmem:[#allocation36_spill] sm:$0xff]  ;;  %v13070_v29 = vld [vmem:[#allocation19_spill] sm:$0xff] }
 0x207   : > { %v9776_v26 = vpop.f32.mrf.mxu3  ;;  %v3231_v63 = vsel %vm9757_vm5, %v12979_v36, 0.0  ;;  %vm13051_vm11 = vmmov %vm13048_vm0  ;;  %v13062_v27 = vmov 0 }
 0x208   : > { %13040 = vst [vmem:[#allocation82_spill] sm:$0xff] %v9776_v26  ;;  %v13046_v26 = vld [vmem:[#allocation11_spill] sm:$0xff]  ;;  %vm2787_vm12 = vcmp.ge.s32.totalorder %v2755_v15, 0  ;;  %vm2819_vm9 = vcmp.lt.s32.totalorder %v2755_v15, 16 }
 0x209   : > { %v2371_v30 = vpop.f32.mrf.mxu0  ;;  %v2754_v41 = vadd.s32 1, %v13046_v26  ;;  %v3248_v26 = vpack.c.bf16 %v3231_v63, %v3230_v60  ;;  %v13072_v60 = vld [vmem:[#allocation68_spill] sm:$0xff] }
 0x20a   : > { %v9786_v7 = vpop.f32.mrf.mxu2  ;;  %v2424_v47 = vadd.f32 %v2371_v30, %v13045_v49  ;;  %v13067_v49 = vld [vmem:[#allocation178_spill] sm:$0xff] }
 0x20b   : > { %vm2786_vm7 = vcmp.ge.s32.totalorder %v2754_v41, 0  ;;  %vm2818_vm6 = vcmp.lt.s32.totalorder %v2754_v41, 16  ;;  %v13060_v41 = vld [vmem:[#allocation20_spill] sm:$0xff] }
 0x20c   : > { %5948 = vmatmul.msk.bf16.gmra.mxu0 %vm13048_vm0, %v3521_v6  ;;  %vm9806_vm13 = vmand %vm2786_vm7, %vm2818_vm6  ;;  %vm13061_vm3 = vnez %v13060_v41  ;;  %vm13068_vm7 = vcmp.ge.s32.totalorder %v13067_v49, 0  ;;  %v13075_v41 = vld [vmem:[#allocation23_spill] sm:$0xff] }
 0x20d   : > { %v9790_v32 = vpop.f32.mrf.mxu1  ;;  %v13054_v1 = vsel %vm9806_vm13, 4294967295, %v13053_v1  ;;  %vm9817_vm0 = vmand %vm2787_vm12, %vm2819_vm9 }
 0x20e   : > { %13047 = vst [vmem:[#allocation60_spill] sm:$0xff] %v9790_v32  ;;  %v13063_v27 = vsel %vm9817_vm0, 4294967295, %v13062_v27  ;;  %vm2882_vm6 = vmand %vm9806_vm13, %vm13068_vm7  ;;  %v13077_v32 = vld [vmem:[#allocation73_spill] sm:$0xff] }
 0x20f   : > { %5927 = vmatmul.msk.bf16.gmra.mxu2 %vm13050_vm15, %v2962_v33  ;;  %v9801_v30 = vpop.f32.mrf.mxu3  ;;  %13055 = vst [vmem:[#allocation67_spill] sm:$0xff] %v13054_v1  ;;  %v13058_v33 = vld [vmem:[#allocation43_spill] sm:$0xff]  ;;  %vm13065_vm15 = vmmov %vm13051_vm11 }
 0x210   : > { %5911 = vmatmul.msk.bf16.gmra.mxu1 %vm13051_vm11, %v2549_v14  ;;  %vm13059_vm4 = vcmp.lt.s32.totalorder %v13058_v33, 16  ;;  %13064 = vst [vmem:[#allocation123_spill] sm:$0xff] %v13063_v27  ;;  %v13069_v14 = vld [vmem:[#allocation69_spill] sm:$0xff]  ;;  %vm13071_vm11 = vnez %v13070_v29  ;;  %vm13078_vm12 = vmmov %vm13065_vm15  ;;  %v13079_v29 = vld [vmem:[#allocation15_spill] sm:$0xff] }
 0x211   : > { %v2373_v2 = vpop.f32.mrf.mxu0  ;;  %vm3461_vm1 = vmand %vm13061_vm3, %vm13059_vm4  ;;  %v3492_v15 = vsel %vm13071_vm11, %v13069_v14, 0.0 }
 0x212   : > { %v9804_v6 = vpop.f32.mrf.mxu2  ;;  %v9811_v36 = vadd.f32 %v2373_v2, %v13056_v51  ;;  %v3493_v63 = vsel %vm3461_vm1, %v13072_v60, 0.0  ;;  %v13074_v51 = vld [vmem:[#allocation25_spill] sm:$0xff]  ;;  %v3232_v60 = vsel %vm9806_vm13, %v13079_v29, 0.0  ;;  %vm13081_vm9 = vmmov %vm13078_vm12 }
 0x213   : > { %13052 = vst [vmem:[#allocation62_spill] sm:$0xff] %v9804_v6  ;;  %5944 = vmatmul.msk.bf16.gmra.mxu3 %vm13065_vm15, %v3248_v26  ;;  %v2946_v33 = vsel %vm2882_vm6, %v13074_v51, 0.0  ;;  %v2947_v26 = vsel %vm9817_vm0, %v13075_v41, 0.0  ;;  %v13080_v51 = vld [vmem:[#allocation16_spill] sm:$0xff]  ;;  %vm13090_vm15 = vmmov %vm13081_vm9  ;;  %v13092_v29 = vld [vmem:[#allocation81_spill] sm:$0xff] }
 0x214   : > { %13057 = vst [vmem:[#allocation112_spill] sm:$0xff] %v9811_v36  ;;  %v3522_v36 = vpack.c.bf16 %v3493_v63, %v3492_v15  ;;  %v2963_v43 = vpack.c.bf16 %v2947_v26, %v2946_v33  ;;  %v3233_v41 = vsel %vm9817_vm0, %v13080_v51, 0.0  ;;  %v13084_v26 = vld [vmem:[#allocation65_spill] sm:$0xff]  ;;  %vm13099_vm6 = vmmov %vm13081_vm9 }
 0x215   : > { %v9822_v18 = vpop.f32.mrf.mxu1  ;;  %v3249_v63 = vpack.c.bf16 %v3233_v41, %v3232_v60  ;;  %v13095_v60 = vld [vmem:[#allocation80_spill] sm:$0xff] }
 0x216   : > { %13066 = vst [vmem:[#allocation113_spill] sm:$0xff] %v9822_v18 }
 0x217   : > { %v9832_v2 = vpop.f32.mrf.mxu3 }
 0x218   : > { %13073 = vst [vmem:[#allocation126_spill] sm:$0xff] %v9832_v2  ;;  %v13117_v2 = vld [vmem:[#allocation85_spill] sm:$0xff] }
 0x219   : > { %v2376_v49 = vpop.f32.mrf.mxu0 }
 0x21a   : > { %v9838_v18 = vpop.f32.mrf.mxu2  ;;  %v2426_v6 = vadd.f32 %v2376_v49, %v13077_v32 }
 0x21b   : > { %13076 = vst [vmem:[#allocation95_spill] sm:$0xff] %v9838_v18 }
 0x21c   : > { %5949 = vmatmul.msk.bf16.gmra.mxu0 %vm13078_vm12, %v3522_v36 }
 0x21d   : > { %v2652_v40 = vpop.f32.mrf.mxu1 }
 0x21e   : > { %v2708_v14 = vadd.f32 %v2652_v40, %v9726_v46  ;;  %v13086_v46 = vld [vmem:[#allocation54_spill] sm:$0xff]  ;;  %v13088_v40 = vld [vmem:[#allocation64_spill] sm:$0xff] }
 0x21f   : > { %5928 = vmatmul.msk.bf16.gmra.mxu2 %vm13081_vm9, %v2963_v43  ;;  %v9850_v15 = vpop.f32.mrf.mxu3  ;;  %vm13087_vm4 = vcmp.lt.s32.totalorder %v13086_v46, 16  ;;  %vm13089_vm3 = vnez %v13088_v40  ;;  %v13093_v43 = vld [vmem:[#allocation24_spill] sm:$0xff]  ;;  %v13098_v46 = vld [vmem:[#allocation46_spill] sm:$0xff] }
 0x220   : > { %13082 = vst [vmem:[#allocation94_spill] sm:$0xff] %v9850_v15  ;;  %vm3463_vm1 = vmand %vm13089_vm3, %vm13087_vm4  ;;  %vm13094_vm7 = vnez %v13093_v43 }
 0x221   : > { %v2378_v33 = vpop.f32.mrf.mxu0  ;;  %v3494_v51 = vsel %vm13094_vm7, %v13092_v29, 0.0  ;;  %v3495_v41 = vsel %vm3463_vm1, %v13095_v60, 0.0  ;;  %v13101_v29 = vld [vmem:[#allocation28_spill] sm:$0xff]  ;;  %v13103_v60 = vld [vmem:[#allocation66_spill] sm:$0xff]  ;;  %vm13115_vm3 = vmmov %vm13099_vm6 }
 0x222   : > { %v9852_v32 = vpop.f32.mrf.mxu2  ;;  %v9855_v36 = vadd.f32 %v2378_v33, %v13084_v26  ;;  %v3523_v1 = vpack.c.bf16 %v3495_v41, %v3494_v51  ;;  %vm13104_vm11 = vcmp.lt.s32.totalorder %v13103_v60, 16  ;;  %v13105_v51 = vld [vmem:[#allocation47_spill] sm:$0xff] }
 0x223   : > { %13083 = vst [vmem:[#allocation139_spill] sm:$0xff] %v9852_v32  ;;  %5945 = vmatmul.msk.bf16.gmra.mxu3 %vm13090_vm15, %v3249_v63  ;;  %vm13106_vm12 = vnez %v13105_v51 }
 0x224   : > { %13085 = vst [vmem:[#allocation72_spill] sm:$0xff] %v9855_v36  ;;  %vm3465_vm9 = vmand %vm13106_vm12, %vm13104_vm11 }
 0x225   : > { %v9862_v49 = vpop.f32.mrf.mxu1  ;;  %vm13130_vm11 = vmmov %vm13115_vm3 }
 0x226   : > { %13091 = vst [vmem:[#allocation74_spill] sm:$0xff] %v9862_v49 }
 0x227   : > { %v9868_v32 = vpop.f32.mrf.mxu3 }
 0x228   : > { %13096 = vst [vmem:[#allocation145_spill] sm:$0xff] %v9868_v32 }
 0x229   : > { %v2381_v26 = vpop.f32.mrf.mxu0 }
 0x22a   : > { %v9870_v33 = vpop.f32.mrf.mxu2  ;;  %v2428_v36 = vadd.f32 %v2381_v26, %v13098_v46  ;;  %v13108_v26 = vld [vmem:[#allocation93_spill] sm:$0xff]  ;;  %v13109_v46 = vld [vmem:[#allocation75_spill] sm:$0xff] }
 0x22b   : > { %13097 = vst [vmem:[#allocation79_spill] sm:$0xff] %v9870_v33  ;;  %vm13110_vm4 = vnez %v13109_v46 }
 0x22c   : > { %5950 = vmatmul.msk.bf16.gmra.mxu0 %vm13099_vm6, %v3523_v1  ;;  %v3496_v1 = vsel %vm13110_vm4, %v13108_v26, 0.0 }
 0x22d   : > { %v2657_v40 = vpop.f32.mrf.mxu1 }
 0x22e   : > { %v2710_v63 = vadd.f32 %v2657_v40, %v2424_v47  ;;  %v13111_v47 = vld [vmem:[#allocation92_spill] sm:$0xff] }
 0x22f   : > { %v9874_v27 = vpop.f32.mrf.mxu3  ;;  %v3497_v40 = vsel %vm3465_vm9, %v13111_v47, 0.0 }
 0x230   : > { %13100 = vst [vmem:[#allocation127_spill] sm:$0xff] %v9874_v27 }
 0x231   : > { %v2383_v15 = vpop.f32.mrf.mxu0 }
 0x232   : > { %v3066_v49 = vpop.f32.mrf.mxu2  ;;  %v9877_v18 = vadd.f32 %v2383_v15, %v13101_v29  ;;  %v13114_v29 = vld [vmem:[#allocation76_spill] sm:$0xff] }
 0x233   : > { %v3122_v43 = vadd.f32 %v3066_v49, %v2708_v14  ;;  %v3524_v14 = vpack.c.bf16 %v3497_v40, %v3496_v1  ;;  %v13124_v40 = vld [vmem:[#allocation105_spill] sm:$0xff] }
 0x234   : > { %13102 = vst [vmem:[#allocation137_spill] sm:$0xff] %v9877_v18 }
 0x235   : > { %v9883_v41 = vpop.f32.mrf.mxu1 }
 0x236   : > { %13107 = vst [vmem:[#allocation128_spill] sm:$0xff] %v9883_v41 }
 0x237   : > { %v3352_v27 = vpop.f32.mrf.mxu3 }
 0x238   : > { %v9889_v33 = vadd.f32 %v3352_v27, %v3122_v43  ;;  %v13119_v27 = vld [vmem:[#allocation78_spill] sm:$0xff]  ;;  %v13121_v43 = vld [vmem:[#allocation33_spill] sm:$0xff] }
 0x239   : > { %v2386_v15 = vpop.f32.mrf.mxu0  ;;  %vm13120_vm1 = vcmp.lt.s32.totalorder %v13119_v27, 16  ;;  %vm13122_vm15 = vnez %v13121_v43 }
 0x23a   : > { %13112 = vst [vmem:[#allocation140_spill] sm:$0xff] %v9889_v33  ;;  %v9891_v49 = vpop.f32.mrf.mxu2  ;;  %v2430_v60 = vadd.f32 %v2386_v15, %v13114_v29  ;;  %vm3467_vm7 = vmand %vm13122_vm15, %vm13120_vm1  ;;  %v13125_v15 = vld [vmem:[#allocation29_spill] sm:$0xff] }
 0x23b   : > { %13113 = vst [vmem:[#allocation107_spill] sm:$0xff] %v9891_v49  ;;  %vm13126_vm6 = vnez %v13125_v15  ;;  %vm13142_vm1 = vmmov %vm13130_vm11 }
 0x23c   : > { %5951 = vmatmul.msk.bf16.gmra.mxu0 %vm13115_vm3, %v3524_v14  ;;  %v3498_v14 = vsel %vm13126_vm6, %v13124_v40, 0.0 }
 0x23d   : > { %v2662_v18 = vpop.f32.mrf.mxu1 }
 0x23e   : > { %v2712_v51 = vadd.f32 %v2662_v18, %v2426_v6  ;;  %v13127_v6 = vld [vmem:[#allocation104_spill] sm:$0xff] }
 0x23f   : > { %v9895_v41 = vpop.f32.mrf.mxu3  ;;  %v3499_v18 = vsel %vm3467_vm7, %v13127_v6, 0.0  ;;  %v13131_v6 = vld [vmem:[#allocation58_spill] sm:$0xff]  ;;  %vm13145_vm7 = vnez %v12854_v25 }
 0x240   : > { %13116 = vst [vmem:[#allocation106_spill] sm:$0xff] %v9895_v41 }
 0x241   : > { %v2388_v46 = vpop.f32.mrf.mxu0 }
 0x242   : > { %v3071_v32 = vpop.f32.mrf.mxu2  ;;  %v9898_v47 = vadd.f32 %v2388_v46, %v13117_v2  ;;  %v13128_v46 = vld [vmem:[#allocation59_spill] sm:$0xff] }
 0x243   : > { %v3124_v26 = vadd.f32 %v3071_v32, %v2710_v63  ;;  %v3525_v32 = vpack.c.bf16 %v3499_v18, %v3498_v14  ;;  %v13135_v14 = vld [vmem:[#allocation87_spill] sm:$0xff] }
 0x244   : > { %13118 = vst [vmem:[#allocation153_spill] sm:$0xff] %v9898_v47  ;;  %vm13136_vm9 = vnez %v13135_v14 }
 0x245   : > { %v9904_v1 = vpop.f32.mrf.mxu1 }
 0x246   : > { %13123 = vst [vmem:[#allocation84_spill] sm:$0xff] %v9904_v1 }
 0x247   : > { %v3357_v29 = vpop.f32.mrf.mxu3 }
 0x248   : > { %v9910_v41 = vadd.f32 %v3357_v29, %v3124_v26  ;;  %v13133_v26 = vld [vmem:[#allocation90_spill] sm:$0xff] }
 0x249   : > { %v2391_v2 = vpop.f32.mrf.mxu0  ;;  %vm13134_vm12 = vcmp.lt.s32.totalorder %v13133_v26, 16  ;;  %v13138_v29 = vld [vmem:[#allocation118_spill] sm:$0xff] }
 0x24a   : > { %v9912_v63 = vpop.f32.mrf.mxu2  ;;  %v9915_v27 = vadd.f32 %v2391_v2, %v13128_v46  ;;  %vm3469_vm4 = vmand %vm13136_vm9, %vm13134_vm12  ;;  %v13139_v2 = vld [vmem:[#allocation77_spill] sm:$0xff] }
 0x24b   : > { %vm13140_vm3 = vnez %v13139_v2  ;;  %vm13147_vm12 = vmmov %vm13142_vm1 }
 0x24c   : > { %13129 = vst [vmem:[#allocation86_spill] sm:$0xff] %v9915_v27  ;;  %5952 = vmatmul.msk.bf16.gmra.mxu0 %vm13130_vm11, %v3525_v32  ;;  %v3500_v32 = vsel %vm13140_vm3, %v13138_v29, 0.0  ;;  %vm13146_vm11 = vnez %v12851_v57 }
 0x24d   : > { %v2667_v43 = vpop.f32.mrf.mxu1 }
 0x24e   : > { %v2714_v47 = vadd.f32 %v2667_v43, %v2428_v36  ;;  %v13141_v36 = vld [vmem:[#allocation117_spill] sm:$0xff] }
 0x24f   : > { %v9918_v1 = vpop.f32.mrf.mxu3  ;;  %v3501_v46 = vsel %vm3469_vm4, %v13141_v36, 0.0  ;;  %vm13150_vm4 = vnez %v12880_v42  ;;  %v9982_v42 = vld [vmem:[%s11553_s2] ss:$0 sm:$0xff] }
 0x251   : > { %v2393_v40 = vpop.f32.mrf.mxu0 }
 0x252   : > { %v3076_v15 = vpop.f32.mrf.mxu2  ;;  %v9921_v33 = vadd.f32 %v2393_v40, %v13131_v6 }
 0x253   : > { %v3126_v49 = vadd.f32 %v3076_v15, %v2712_v51  ;;  %v3526_v51 = vpack.c.bf16 %v3501_v46, %v3500_v32 }
 0x254   : > { %13132 = vst [vmem:[#allocation116_spill] sm:$0xff] %v9921_v33 }
 0x255   : > { %v9927_v18 = vpop.f32.mrf.mxu1 }
 0x256   : > { %13137 = vst [vmem:[#allocation157_spill] sm:$0xff] %v9927_v18 }
 0x257   : > { %v3362_v43 = vpop.f32.mrf.mxu3 }
 0x258   : > { %v9933_v27 = vadd.f32 %v3362_v43, %v3126_v49  ;;  %v13143_v49 = vld [vmem:[#allocation102_spill] sm:$0xff] }
 0x259   : > { %v2396_v40 = vpop.f32.mrf.mxu0  ;;  %vm13144_vm15 = vcmp.lt.s32.totalorder %v13143_v49, 16 }
 0x25a   : > { %v9935_v15 = vpop.f32.mrf.mxu2  ;;  %v9938_v6 = vadd.f32 %v2396_v40, %v9372_v54  ;;  %vm3471_vm6 = vmand %vm13145_vm7, %vm13144_vm15  ;;  %v3502_v54 = vsel %vm13146_vm11, %v12868_v13, 0.0  ;;  %vm13155_vm11 = vnez %v12898_v50 }
 0x25b   : > { %v3503_v32 = vsel %vm3471_vm6, %v12869_v8, 0.0  ;;  %v13148_v8 = vld [vmem:[#allocation114_spill] sm:$0xff]  ;;  %vm13152_vm15 = vmmov %vm13147_vm12 }
 0x25c   : > { %5953 = vmatmul.msk.bf16.gmra.mxu0 %vm13142_vm1, %v3526_v51  ;;  %v3527_v43 = vpack.c.bf16 %v3503_v32, %v3502_v54  ;;  %vm13149_vm9 = vcmp.lt.s32.totalorder %v13148_v8, 16  ;;  %vm13151_vm1 = vnez %v12878_v48 }
 0x25d   : > { %v2672_v26 = vpop.f32.mrf.mxu1  ;;  %vm3473_vm3 = vmand %vm13150_vm4, %vm13149_vm9  ;;  %vm13158_vm9 = vnez %v12922_v39 }
 0x25e   : > { %v2716_v14 = vadd.f32 %v2672_v26, %v2430_v60 }
 0x25f   : > { %v9941_v33 = vpop.f32.mrf.mxu3 }
 0x261   : > { %v2398_v29 = vpop.f32.mrf.mxu0 }
 0x262   : > { %v3081_v2 = vpop.f32.mrf.mxu2  ;;  %v9944_v36 = vadd.f32 %v2398_v29, %v9394_v59 }
 0x263   : > { %v3128_v18 = vadd.f32 %v3081_v2, %v2714_v47 }
 0x267   : > { %v3367_v60 = vpop.f32.mrf.mxu3 }
 0x268   : > { %v9954_v46 = vadd.f32 %v3367_v60, %v3128_v18  ;;  %v3505_v18 = vsel %vm3473_vm3, %v12891_v23, 0.0  ;;  %v13153_v23 = vld [vmem:[#allocation129_spill] sm:$0xff]  ;;  %vm13159_vm3 = vnez %v12918_v22  ;;  %v13179_v22 = vld [vmem:[#allocation38_spill] sm:$0xff] }
 0x269   : > { %v2401_v47 = vpop.f32.mrf.mxu0  ;;  %vm13154_vm7 = vcmp.lt.s32.totalorder %v13153_v23, 16 }
 0x26a   : > { %v9956_v51 = vpop.f32.mrf.mxu2  ;;  %v9959_v59 = vadd.f32 %v2401_v47, %v9428_v20  ;;  %v3504_v20 = vsel %vm13151_vm1, %v12890_v31, 0.0  ;;  %vm3475_vm6 = vmand %vm9458_vm8, %vm13154_vm7 }
 0x26b   : > { %v3528_v49 = vpack.c.bf16 %v3505_v18, %v3504_v20  ;;  %v3507_v60 = vsel %vm3475_vm6, %v12911_v35, 0.0  ;;  %v13156_v18 = vld [vmem:[#allocation143_spill] sm:$0xff]  ;;  %vm13160_vm1 = vmmov %vm13147_vm12 }
 0x26c   : > { %5954 = vmatmul.msk.bf16.gmra.mxu0 %vm13147_vm12, %v3527_v43  ;;  %vm13157_vm8 = vcmp.lt.s32.totalorder %v13156_v18, 16  ;;  %vm13166_vm6 = vmmov %vm13160_vm1 }
 0x26d   : > { %vm3477_vm4 = vmand %vm13158_vm9, %vm13157_vm8 }
 0x26e   : > { %v3509_v35 = vsel %vm3477_vm4, %v12934_v21, 0.0  ;;  %v13163_v21 = vld [vmem:[#allocation174_spill] sm:$0xff]  ;;  %vm13173_vm8 = vmmov %vm13160_vm1  ;;  %vm13176_vm4 = vnez %v13001_v5 }
 0x26f   : > { %v9962_v25 = vpop.f32.mrf.mxu3  ;;  %v3510_v23 = vsel %vm9575_vm2, %v13163_v21, 0.0  ;;  %vm13169_vm2 = vnez %v12972_v19 }
 0x271   : > { %v2403_v26 = vpop.f32.mrf.mxu0 }
 0x272   : > { %v3086_v40 = vpop.f32.mrf.mxu2  ;;  %v9965_v13 = vadd.f32 %v2403_v26, %v9449_v9 }
 0x273   : > { %v3130_v57 = vadd.f32 %v3086_v40, %v2716_v14 }
 0x277   : > { %v3372_v2 = vpop.f32.mrf.mxu3 }
 0x278   : > { %v9975_v29 = vadd.f32 %v3372_v2, %v3130_v57 }
 0x279   : > { %v3598_v54 = vpop.f32.mrf.mxu0 }
 0x27a   : > { %v3678_v14 = vadd.f32 %v3598_v54, %v9488_v55  ;;  %v3506_v55 = vsel %vm13155_vm11, %v12910_v4, 0.0  ;;  %v3508_v4 = vsel %vm13159_vm3, %v12933_v28, 0.0 }
 0x27b   : > { %v3529_v26 = vpack.c.bf16 %v3507_v60, %v3506_v55  ;;  %v3530_v54 = vpack.c.bf16 %v3509_v35, %v3508_v4 }
 0x27c   : > { %5955 = vmatmul.msk.bf16.gmra.mxu0 %vm13152_vm15, %v3528_v49  ;;  %v3714_v48 = vadd.f32 %v9982_v42, %v3678_v14  ;;  %vm13161_vm15 = vcmp.lt.s32.totalorder %v12929_v11, 16 }
 0x27d   : > { %vm3479_vm7 = vmand %vm9582_vm10, %vm13161_vm15 }
 0x27e   : > { %v3746_v43 = vmax.f32 %v3714_v48, 0.0  ;;  %vm13185_vm15 = vmmov %vm13166_vm6 }
 0x281   : > { %v3600_v9 = vpop.f32.mrf.mxu0 }
 0x282   : > { %v3679_v31 = vadd.f32 %v3600_v9, %v9509_v44 }
 0x284   : > { %v3715_v32 = vadd.f32 %v9982_v42, %v3679_v31 }
 0x286   : > { %v3747_v47 = vmax.f32 %v3715_v32, 0.0  ;;  %v13165_v32 = vld [vmem:[#allocation173_spill] sm:$0xff] }
 0x288   : > { %v9995_v40 = vpack.c.bf16 %v3747_v47, %v3746_v43 }
 0x289   : > { %v3603_v57 = vpop.f32.mrf.mxu0 }
 0x28a   : > { %v3680_v44 = vadd.f32 %v3603_v57, %v9552_v56 }
 0x28c   : > { %5956 = vmatmul.msk.bf16.gmra.mxu0 %vm13147_vm12, %v3529_v26  ;;  %v3716_v8 = vadd.f32 %v9982_v42, %v3680_v44  ;;  %vm13170_vm12 = vnez %v12968_v3 }
 0x28e   : > { %v3748_v56 = vmax.f32 %v3716_v8, 0.0 }
 0x291   : > { %v3605_v12 = vpop.f32.mrf.mxu0 }
 0x292   : > { %v3681_v20 = vadd.f32 %v3605_v12, %v9573_v52  ;;  %v13167_v12 = vld [vmem:[#allocation165_spill] sm:$0xff] }
 0x293   : > { %vm13168_vm10 = vcmp.lt.s32.totalorder %v13167_v12, 16 }
 0x294   : > { %v3717_v50 = vadd.f32 %v9982_v42, %v3681_v20  ;;  %vm3481_vm11 = vmand %vm13169_vm2, %vm13168_vm10  ;;  %v3512_v20 = vsel %vm13170_vm12, %v12986_v34, 0.0 }
 0x296   : > { %v3749_v2 = vmax.f32 %v3717_v50, 0.0 }
 0x298   : > { %v10010_v49 = vpack.c.bf16 %v3749_v2, %v3748_v56  ;;  %v13172_v2 = vld [vmem:[#allocation71_spill] sm:$0xff] }
 0x299   : > { %v3608_v14 = vpop.f32.mrf.mxu0 }
 0x29a   : > { %v3682_v52 = vadd.f32 %v3608_v14, %v9612_v45  ;;  %v3511_v45 = vsel %vm3479_vm7, %v13165_v32, 0.0 }
 0x29b   : > { %v3531_v47 = vpack.c.bf16 %v3511_v45, %v3510_v23  ;;  %v13181_v23 = vld [vmem:[#allocation109_spill] sm:$0xff] }
 0x29c   : > { %5957 = vmatmul.msk.bf16.gmra.mxu0 %vm13160_vm1, %v3530_v54  ;;  %v3718_v9 = vadd.f32 %v9982_v42, %v3682_v52  ;;  %vm13177_vm1 = vnez %v12997_v24 }
 0x29e   : > { %v3750_v55 = vmax.f32 %v3718_v9, 0.0 }
 0x2a1   : > { %v3610_v39 = vpop.f32.mrf.mxu0 }
 0x2a2   : > { %v3683_v48 = vadd.f32 %v3610_v39, %v9633_v37  ;;  %v13174_v39 = vld [vmem:[#allocation171_spill] sm:$0xff] }
 0x2a3   : > { %vm13175_vm9 = vcmp.lt.s32.totalorder %v13174_v39, 16 }
 0x2a4   : > { %v3719_v28 = vadd.f32 %v9982_v42, %v3683_v48  ;;  %vm3483_vm3 = vmand %vm13176_vm4, %vm13175_vm9 }
 0x2a6   : > { %v3751_v60 = vmax.f32 %v3719_v28, 0.0  ;;  %v13180_v28 = vld [vmem:[#allocation48_spill] sm:$0xff] }
 0x2a8   : > { %v10025_v43 = vpack.c.bf16 %v3751_v60, %v3750_v55  ;;  %v13182_v60 = vld [vmem:[#allocation88_spill] sm:$0xff] }
 0x2a9   : > { %v3613_v26 = vpop.f32.mrf.mxu0 }
 0x2aa   : > { %v3684_v37 = vadd.f32 %v3613_v26, %v9667_v38  ;;  %v3513_v38 = vsel %vm3481_vm11, %v12987_v61, 0.0 }
 0x2ab   : > { %v3532_v35 = vpack.c.bf16 %v3513_v38, %v3512_v20  ;;  %v13186_v20 = vld [vmem:[#allocation177_spill] sm:$0xff] }
 0x2ac   : > { %5958 = vmatmul.msk.bf16.gmra.mxu0 %vm13166_vm6, %v3531_v47  ;;  %v3720_v57 = vadd.f32 %v9982_v42, %v3684_v37  ;;  %v13183_v47 = vld [vmem:[#allocation55_spill] sm:$0xff]  ;;  %v13184_v37 = vld [vmem:[#allocation82_spill] sm:$0xff]  ;;  %vm13187_vm7 = vcmp.lt.s32.totalorder %v13186_v20, 16 }
 0x2ad   : > { %v2703_v26 = vadd.f32 %v13183_v47, %v13182_v60  ;;  %vm3485_vm6 = vmand %vm9757_vm5, %vm13187_vm7 }
 0x2ae   : > { %v3752_v18 = vmax.f32 %v3720_v57, 0.0  ;;  %vm13197_vm5 = vmmov %vm13173_vm8 }
 0x2af   : > { %v3117_v24 = vadd.f32 %v9786_v7, %v2703_v26  ;;  %v3516_v7 = vsel %vm9746_vm14, %v13043_v62, 0.0  ;;  %v13204_v26 = vld [vmem:[#allocation31_spill] sm:$0xff] }
 0x2b1   : > { %v3615_v11 = vpop.f32.mrf.mxu0  ;;  %v3403_v57 = vadd.f32 %v9801_v30, %v3117_v24  ;;  %v13206_v24 = vld [vmem:[#allocation60_spill] sm:$0xff] }
 0x2b2   : > { %v3685_v44 = vadd.f32 %v3615_v11, %v9689_v17  ;;  %v13171_v17 = vld [vmem:[#allocation37_spill] sm:$0xff] }
 0x2b3   : > { %v2701_v54 = vadd.f32 %v13172_v2, %v13171_v17  ;;  %v13191_v17 = vld [vmem:[#allocation100_spill] sm:$0xff] }
 0x2b4   : > { %v3721_v8 = vadd.f32 %v9982_v42, %v3685_v44 }
 0x2b5   : > { %v3115_v14 = vadd.f32 %v9723_v16, %v2701_v54  ;;  %v13178_v16 = vld [vmem:[#allocation185_spill] sm:$0xff] }
 0x2b6   : > { %v3753_v50 = vmax.f32 %v3721_v8, 0.0  ;;  %v3515_v48 = vsel %vm3483_vm3, %v13178_v16, 0.0  ;;  %v13196_v16 = vld [vmem:[#allocation95_spill] sm:$0xff] }
 0x2b7   : > { %v3401_v3 = vadd.f32 %v9741_v53, %v3115_v14  ;;  %v2702_v53 = vadd.f32 %v13180_v28, %v13179_v22  ;;  %v13198_v22 = vld [vmem:[#allocation94_spill] sm:$0xff] }
 0x2b8   : > { %v10040_v4 = vpack.c.bf16 %v3753_v50, %v3752_v18  ;;  %v13189_v50 = vld [vmem:[#allocation22_spill] sm:$0xff] }
 0x2b9   : > { %v3618_v56 = vpop.f32.mrf.mxu0  ;;  %v3116_v32 = vadd.f32 %v13181_v23, %v2702_v53  ;;  %v13199_v23 = vld [vmem:[#allocation184_spill] sm:$0xff] }
 0x2ba   : > { %v3686_v19 = vadd.f32 %v3618_v56, %v9717_v58  ;;  %v3514_v58 = vsel %vm13177_vm1, %v13009_v0, 0.0  ;;  %v13190_v56 = vld [vmem:[#allocation89_spill] sm:$0xff]  ;;  %vm13200_vm14 = vcmp.lt.s32.totalorder %v13199_v23, 16  ;;  %v13218_v23 = vld [vmem:[#allocation106_spill] sm:$0xff] }
 0x2bb   : > { %v3533_v55 = vpack.c.bf16 %v3515_v48, %v3514_v58  ;;  %v3402_v11 = vadd.f32 %v13184_v37, %v3116_v32  ;;  %v2704_v30 = vadd.f32 %v13191_v17, %v13190_v56  ;;  %vm3487_vm10 = vmand %vm9817_vm0, %vm13200_vm14  ;;  %v13210_v56 = vld [vmem:[#allocation145_spill] sm:$0xff] }
 0x2bc   : > { %5959 = vmatmul.msk.bf16.gmra.mxu0 %vm13173_vm8, %v3532_v35  ;;  %v3722_v61 = vadd.f32 %v9982_v42, %v3686_v19  ;;  %v3517_v35 = vsel %vm3485_vm6, %v13189_v50, 0.0  ;;  %v13192_v19 = vld [vmem:[#allocation62_spill] sm:$0xff]  ;;  %v3519_v37 = vsel %vm3487_vm10, %v13204_v26, 0.0  ;;  %v13209_v50 = vld [vmem:[#allocation113_spill] sm:$0xff] }
 0x2bd   : > { %v3118_v14 = vadd.f32 %v13192_v19, %v2704_v30  ;;  %v13211_v30 = vld [vmem:[#allocation79_spill] sm:$0xff] }
 0x2be   : > { %v3754_v21 = vmax.f32 %v3722_v61, 0.0  ;;  %v13193_v61 = vld [vmem:[#allocation99_spill] sm:$0xff] }
 0x2bf   : > { %v13213_v19 = vld [vmem:[#allocation127_spill] sm:$0xff] }
 0x2c1   : > { %v3620_v34 = vpop.f32.mrf.mxu0 }
 0x2c2   : > { %v3687_v52 = vadd.f32 %v3620_v34, %v3401_v3  ;;  %v3534_v34 = vpack.c.bf16 %v3517_v35, %v3516_v7  ;;  %v13208_v7 = vld [vmem:[#allocation50_spill] sm:$0xff] }
 0x2c3   : > { %v2707_v35 = vadd.f32 %v13209_v50, %v13208_v7 }
 0x2c4   : > { %v3723_v9 = vadd.f32 %v9982_v42, %v3687_v52  ;;  %v13194_v52 = vld [vmem:[#allocation83_spill] sm:$0xff] }
 0x2c5   : > { %v2705_v39 = vadd.f32 %v13194_v52, %v13193_v61 }
 0x2c6   : > { %v3755_v31 = vmax.f32 %v3723_v9, 0.0  ;;  %v13195_v9 = vld [vmem:[#allocation126_spill] sm:$0xff] }
 0x2c7   : > { %v3404_v58 = vadd.f32 %v13195_v9, %v3118_v14  ;;  %v3119_v62 = vadd.f32 %v13196_v16, %v2705_v39 }
 0x2c8   : > { %v10061_v45 = vpack.c.bf16 %v3755_v31, %v3754_v21 }
 0x2c9   : > { %v3623_v5 = vpop.f32.mrf.mxu0  ;;  %v3405_v28 = vadd.f32 %v13198_v22, %v3119_v62  ;;  %v13214_v62 = vld [vmem:[#allocation111_spill] sm:$0xff] }
 0x2ca   : > { %v3688_v0 = vadd.f32 %v3623_v5, %v3402_v11  ;;  %v13202_v5 = vld [vmem:[#allocation32_spill] sm:$0xff]  ;;  %v13205_v11 = vld [vmem:[#allocation70_spill] sm:$0xff] }
 0x2cb   : > { %v3518_v47 = vsel %vm9806_vm13, %v13202_v5, 0.0  ;;  %vm13212_vm13 = vmmov %vm13197_vm5 }
 0x2cc   : > { %5960 = vmatmul.msk.bf16.gmra.mxu0 %vm13185_vm15, %v3533_v55  ;;  %v3724_v12 = vadd.f32 %v9982_v42, %v3688_v0  ;;  %v2706_v0 = vadd.f32 %v13206_v24, %v13205_v11 }
 0x2ce   : > { %v3756_v2 = vmax.f32 %v3724_v12, 0.0  ;;  %v13207_v12 = vld [vmem:[#allocation139_spill] sm:$0xff] }
 0x2d1   : > { %v3625_v44 = vpop.f32.mrf.mxu0 }
 0x2d2   : > { %v3689_v8 = vadd.f32 %v3625_v44, %v3403_v57 }
 0x2d4   : > { %v3725_v38 = vadd.f32 %v9982_v42, %v3689_v8  ;;  %v3120_v8 = vadd.f32 %v13207_v12, %v2706_v0  ;;  %v13219_v0 = vld [vmem:[#allocation112_spill] sm:$0xff] }
 0x2d6   : > { %v3757_v54 = vmax.f32 %v3725_v38, 0.0  ;;  %v3535_v38 = vpack.c.bf16 %v3519_v37, %v3518_v47  ;;  %v3406_v17 = vadd.f32 %v13210_v56, %v3120_v8 }
 0x2d8   : > { %v10082_v3 = vpack.c.bf16 %v3757_v54, %v3756_v2  ;;  %v3121_v2 = vadd.f32 %v13211_v30, %v2707_v35  ;;  %v13222_v30 = vld [vmem:[#allocation84_spill] sm:$0xff] }
 0x2d9   : > { %v3628_v10 = vpop.f32.mrf.mxu0 }
 0x2da   : > { %v3690_v48 = vadd.f32 %v3628_v10, %v3404_v58  ;;  %v3407_v14 = vadd.f32 %v13213_v19, %v3121_v2 }
 0x2dc   : > { %5961 = vmatmul.msk.bf16.gmra.mxu0 %vm13197_vm5, %v3534_v34  ;;  %v3726_v21 = vadd.f32 %v9982_v42, %v3690_v48  ;;  %v13215_v48 = vld [vmem:[#allocation74_spill] sm:$0xff] }
 0x2dd   : > { %v2709_v22 = vadd.f32 %v13215_v48, %v13214_v62  ;;  %v13223_v48 = vld [vmem:[#allocation137_spill] sm:$0xff] }
 0x2de   : > { %v3758_v57 = vmax.f32 %v3726_v21, 0.0  ;;  %v13217_v21 = vld [vmem:[#allocation107_spill] sm:$0xff] }
 0x2e1   : > { %v3630_v53 = vpop.f32.mrf.mxu0 }
 0x2e2   : > { %v3691_v31 = vadd.f32 %v3630_v53, %v3405_v28  ;;  %v13216_v28 = vld [vmem:[#allocation140_spill] sm:$0xff] }
 0x2e4   : > { %v3727_v55 = vadd.f32 %v9982_v42, %v3691_v31  ;;  %v3123_v31 = vadd.f32 %v13217_v21, %v2709_v22  ;;  %v13224_v22 = vld [vmem:[#allocation157_spill] sm:$0xff] }
 0x2e6   : > { %v3759_v44 = vmax.f32 %v3727_v55, 0.0  ;;  %v3409_v32 = vadd.f32 %v13218_v23, %v3123_v31  ;;  %v3374_v31 = vpop.f32.mrf.mxu3 }
 0x2e8   : > { %v10103_v20 = vpack.c.bf16 %v3759_v44, %v3758_v57  ;;  %v13220_v57 = vld [vmem:[#allocation128_spill] sm:$0xff] }
 0x2e9   : > { %v3633_v18 = vpop.f32.mrf.mxu0  ;;  %v2711_v44 = vadd.f32 %v13220_v57, %v13219_v0  ;;  %v13225_v0 = vld [vmem:[#allocation153_spill] sm:$0xff] }
 0x2ea   : > { %v3692_v54 = vadd.f32 %v3633_v18, %v3406_v17 }
 0x2eb   : > { %v3125_v8 = vadd.f32 %v9912_v63, %v2711_v44 }
 0x2ec   : > { %5962 = vmatmul.msk.bf16.gmra.mxu0 %vm13212_vm13, %v3535_v38  ;;  %v3728_v10 = vadd.f32 %v9982_v42, %v3692_v54 }
 0x2ed   : > { %v3411_v38 = vadd.f32 %v9918_v1, %v3125_v8  ;;  %v13221_v1 = vld [vmem:[#allocation72_spill] sm:$0xff] }
 0x2ee   : > { %v3760_v39 = vmax.f32 %v3728_v10, 0.0  ;;  %v2713_v2 = vadd.f32 %v13222_v30, %v13221_v1  ;;  %v3377_v44 = vpop.f32.mrf.mxu3  ;;  %v13226_v1 = vld [vmem:[#allocation86_spill] sm:$0xff] }
 0x2f0   : > { %v3127_v19 = vadd.f32 %v9935_v15, %v2713_v2 }
 0x2f1   : > { %v3635_v34 = vpop.f32.mrf.mxu0 }
 0x2f2   : > { %v3693_v61 = vadd.f32 %v3635_v34, %v3407_v14  ;;  %v3413_v14 = vadd.f32 %v9941_v33, %v3127_v19  ;;  %v3088_v33 = vpop.f32.mrf.mxu2 }
 0x2f4   : > { %v3729_v52 = vadd.f32 %v9982_v42, %v3693_v61 }
 0x2f6   : > { %v3761_v9 = vmax.f32 %v3729_v52, 0.0 }
 0x2f8   : > { %v10113_v58 = vpack.c.bf16 %v3761_v9, %v3760_v39 }
 0x2f9   : > { %v3638_v16 = vpop.f32.mrf.mxu0 }
 0x2fa   : > { %v3694_v53 = vadd.f32 %v3638_v16, %v13216_v28  ;;  %3842 = vmatpush.bf16.msra.mxu1 %v10113_v58  ;;  %3949 = vmatpush.bf16.msrb.mxu3 %v10113_v58  ;;  %v2715_v28 = vadd.f32 %v13224_v22, %v13223_v48 }
 0x2fc   : > { %v3730_v5 = vadd.f32 %v9982_v42, %v3694_v53  ;;  %v2674_v53 = vpop.f32.mrf.mxu1  ;;  %v3129_v15 = vadd.f32 %v9956_v51, %v2715_v28 }
 0x2fd   : > { %v2717_v57 = vadd.f32 %v2674_v53, %v13225_v0 }
 0x2fe   : > { %3843 = vmatpush.bf16.msra.mxu1 %v10103_v20  ;;  %3950 = vmatpush.bf16.msrb.mxu3 %v10103_v20  ;;  %v3762_v26 = vmax.f32 %v3730_v5, 0.0  ;;  %v3415_v21 = vadd.f32 %v9962_v25, %v3129_v15 }
 0x2ff   : > { %v3131_v25 = vadd.f32 %v3088_v33, %v2717_v57  ;;  %v5973_v33 = vld [vmem:[%s11556_s5 + $0x10] sm:$0xf] }
 0x301   : > { %v3640_v55 = vpop.f32.mrf.mxu0  ;;  %v3417_v8 = vadd.f32 %v3374_v31, %v3131_v25 }
 0x302   : > { %v3695_v60 = vadd.f32 %v3640_v55, %v3409_v32  ;;  %3844 = vmatpush.bf16.msra.mxu1 %v10082_v3  ;;  %3951 = vmatpush.bf16.msrb.mxu3 %v10082_v3 }
 0x304   : > { %v3731_v47 = vadd.f32 %v9982_v42, %v3695_v60  ;;  %v2677_v60 = vpop.f32.mrf.mxu1 }
 0x305   : > { %v2718_v30 = vadd.f32 %v2677_v60, %v13226_v1 }
 0x306   : > { %v3763_v37 = vmax.f32 %v3731_v47, 0.0  ;;  %3845 = vmatpush.bf16.msra.mxu1 %v10061_v45  ;;  %3952 = vmatpush.bf16.msrb.mxu3 %v10061_v45 }
 0x308   : > { %v10130_v11 = vpack.c.bf16 %v3763_v37, %v3762_v26  ;;  %v3091_v37 = vpop.f32.mrf.mxu2 }
 0x309   : > { %v3643_v24 = vpop.f32.mrf.mxu0  ;;  %v3132_v19 = vadd.f32 %v3091_v37, %v2718_v30 }
 0x30a   : > { %v3696_v12 = vadd.f32 %v3643_v24, %v9910_v41  ;;  %3846 = vmatpush.bf16.msra.mxu1 %v10040_v4  ;;  %3953 = vmatpush.bf16.msrb.mxu3 %v10040_v4 }
 0x30c   : > { %v3732_v7 = vadd.f32 %v9982_v42, %v3696_v12  ;;  %v2679_v12 = vpop.f32.mrf.mxu1 }
 0x30e   : > { %3847 = vmatpush.bf16.msra.mxu1 %v10025_v43  ;;  %3954 = vmatpush.bf16.msrb.mxu3 %v10025_v43  ;;  %v3764_v35 = vmax.f32 %v3732_v7, 0.0 }
 0x311   : > { %v3645_v18 = vpop.f32.mrf.mxu0 }
 0x312   : > { %v3697_v50 = vadd.f32 %v3645_v18, %v3411_v38  ;;  %3848 = vmatpush.bf16.msra.mxu1 %v10010_v49  ;;  %3955 = vmatpush.bf16.msrb.mxu3 %v10010_v49  ;;  %v3093_v38 = vpop.f32.mrf.mxu2 }
 0x314   : > { %v3733_v41 = vadd.f32 %v9982_v42, %v3697_v50 }
 0x316   : > { %v3765_v56 = vmax.f32 %v3733_v41, 0.0  ;;  %3849 = vmatpush.bf16.msra.mxu1 %v9995_v40  ;;  %3956 = vmatpush.bf16.msrb.mxu3 %v9995_v40  ;;  %v5965_v41 = vld [vmem:[%s11556_s5] sm:$0xf] }
 0x318   : > { %v10147_v63 = vpack.c.bf16 %v3765_v56, %v3764_v35  ;;  %v6540_v35 = vld [vmem:[%s11556_s5 + $0x4] sm:$0xf0] }
 0x319   : > { %v3648_v17 = vpop.f32.mrf.mxu0  ;;  %v5966_v56 = vor.u32 %v6540_v35, %v5965_v41  ;;  %v6544_v41 = vld [vmem:[%s11556_s5 + $0x24] sm:$0xf0] }
 0x31a   : > { %v3698_v54 = vadd.f32 %v3648_v17, %v9933_v27  ;;  %v3379_v17 = vpop.f32.mrf.mxu3 }
 0x31b   : > { %3850 = vmatmul.bf16.vlgmr.msra.gmra.mxu1 %v5966_v56 }
 0x31c   : > { %v3734_v10 = vadd.f32 %v9982_v42, %v3698_v54 }
 0x31e   : > { %v3766_v39 = vmax.f32 %v3734_v10, 0.0 }
 0x321   : > { %v3650_v34 = vpop.f32.mrf.mxu0 }
 0x322   : > { %v3699_v61 = vadd.f32 %v3650_v34, %v3413_v14  ;;  %v2682_v34 = vpop.f32.mrf.mxu1  ;;  %v3382_v22 = vpop.f32.mrf.mxu3 }
 0x324   : > { %v3735_v52 = vadd.f32 %v9982_v42, %v3699_v61  ;;  %v13227_v61 = vld [vmem:[#allocation116_spill] sm:$0xff] }
 0x326   : > { %v3767_v9 = vmax.f32 %v3735_v52, 0.0  ;;  %v2719_v52 = vadd.f32 %v2679_v12, %v13227_v61 }
 0x328   : > { %v10156_v16 = vpack.c.bf16 %v3767_v9, %v3766_v39  ;;  %v3096_v39 = vpop.f32.mrf.mxu2  ;;  %v3418_v9 = vadd.f32 %v3377_v44, %v3132_v19 }
 0x329   : > { %v3653_v62 = vpop.f32.mrf.mxu0 }
 0x32a   : > { %v3700_v27 = vadd.f32 %v3653_v62, %v9954_v46  ;;  %v3133_v62 = vadd.f32 %v3093_v38, %v2719_v52  ;;  %v2684_v31 = vpop.f32.mrf.mxu1 }
 0x32b   : > { %v2721_v57 = vadd.f32 %v2684_v31, %v9944_v36  ;;  %v6005_v31 = vld [vmem:[%s11556_s5 + $0x40] sm:$0xf] }
 0x32c   : > { %v3736_v32 = vadd.f32 %v9982_v42, %v3700_v27  ;;  %v3419_v28 = vadd.f32 %v3379_v17, %v3133_v62 }
 0x32e   : > { %v3768_v47 = vmax.f32 %v3736_v32, 0.0 }
 0x331   : > { %v3655_v23 = vpop.f32.mrf.mxu0 }
 0x332   : > { %v3701_v55 = vadd.f32 %v3655_v23, %v3415_v21  ;;  %v6542_v21 = vld [vmem:[%s11556_s5 + $0x14] sm:$0xf0]  ;;  %v2687_v25 = vpop.f32.mrf.mxu1 }
 0x333   : > { %v5974_v23 = vor.u32 %v6542_v21, %v5973_v33 }
 0x334   : > { %v3737_v5 = vadd.f32 %v9982_v42, %v3701_v55  ;;  %v3098_v55 = vpop.f32.mrf.mxu2 }
 0x335   : > { %3855 = vmatmul.bf16.gmra.mxu1 %v5974_v23  ;;  %v3135_v44 = vadd.f32 %v3098_v55, %v2721_v57  ;;  %v6548_v23 = vld [vmem:[%s11556_s5 + $0x44] sm:$0xf0]  ;;  %v6550_v55 = vld [vmem:[%s11556_s5 + $0x54] sm:$0xf0] }
 0x336   : > { %v3769_v26 = vmax.f32 %v3737_v5, 0.0  ;;  %v2720_v5 = vadd.f32 %v2682_v34, %v9938_v6  ;;  %v5981_v6 = vld [vmem:[%s11556_s5 + $0x20] sm:$0xf] }
 0x337   : > { %v5982_v36 = vor.u32 %v6544_v41, %v5981_v6  ;;  %v6023_v6 = vld [vmem:[%s11556_s5 + $0x68] sm:$0xf0] }
 0x338   : > { %v10165_v24 = vpack.c.bf16 %v3769_v26, %v3768_v47  ;;  %v3134_v26 = vadd.f32 %v3096_v39, %v2720_v5 }
 0x339   : > { %v3658_v46 = vpop.f32.mrf.mxu0 }
 0x33a   : > { %v3702_v51 = vadd.f32 %v3658_v46, %v9975_v29  ;;  %v3384_v46 = vpop.f32.mrf.mxu3  ;;  %v2689_v30 = vpop.f32.mrf.mxu1 }
 0x33b   : > { %v3421_v38 = vadd.f32 %v3384_v46, %v3135_v44  ;;  %v6007_v46 = vld [vmem:[%s11556_s5 + $0x48] sm:$0xf0]  ;;  %v6552_v44 = vld [vmem:[%s11556_s5 + $0x64] sm:$0xf0] }
 0x33c   : > { %v3738_v7 = vadd.f32 %v9982_v42, %v3702_v51  ;;  %v3420_v51 = vadd.f32 %v3382_v22, %v3134_v26  ;;  %v6547_v26 = vld [vmem:[%s11556_s5 + $0x44] sm:$0xf] }
 0x33d   : > { %v6010_v57 = vor.u32 %v6547_v26, %v6007_v46  ;;  %v6566_v26 = vld [vmem:[%s11556_s5 + $0xd4] sm:$0xf0] }
 0x33e   : > { %v3770_v2 = vmax.f32 %v3738_v7, 0.0 }
 0x341   : > { %v3660_v18 = vpop.f32.mrf.mxu0 }
 0x342   : > { %v3703_v50 = vadd.f32 %v3660_v18, %v3417_v8  ;;  %v3101_v8 = vpop.f32.mrf.mxu2  ;;  %v3387_v35 = vpop.f32.mrf.mxu3 }
 0x344   : > { %v3739_v29 = vadd.f32 %v9982_v42, %v3703_v50 }
 0x345   : > { %3860 = vmatmul.bf16.gmra.mxu1 %v5982_v36  ;;  %v6047_v36 = vld [vmem:[%s11556_s5 + $0x88] sm:$0xf0] }
 0x346   : > { %v3771_v54 = vmax.f32 %v3739_v29, 0.0  ;;  %v2722_v29 = vadd.f32 %v2687_v25, %v9959_v59  ;;  %v5989_v59 = vld [vmem:[%s11556_s5 + $0x30] sm:$0xf] }
 0x348   : > { %v10178_v14 = vpack.c.bf16 %v3771_v54, %v3770_v2  ;;  %v3136_v2 = vadd.f32 %v3101_v8, %v2722_v29  ;;  %v6015_v8 = vld [vmem:[%s11556_s5 + $0x58] sm:$0xf0]  ;;  %v6553_v29 = vld [vmem:[%s11556_s5 + $0x74] sm:$0xf] }
 0x349   : > { %v3663_v10 = vpop.f32.mrf.mxu0 }
 0x34a   : > { %v3704_v48 = vadd.f32 %v3663_v10, %v3418_v9  ;;  %v3103_v19 = vpop.f32.mrf.mxu2  ;;  %v2723_v10 = vadd.f32 %v2689_v30, %v9965_v13  ;;  %v3422_v61 = vadd.f32 %v3387_v35, %v3136_v2  ;;  %v3389_v39 = vpop.f32.mrf.mxu3  ;;  %v6555_v35 = vld [vmem:[%s11556_s5 + $0x84] sm:$0xf]  ;;  %v6557_v2 = vld [vmem:[%s11556_s5 + $0x94] sm:$0xf] }
 0x34c   : > { %v3740_v53 = vadd.f32 %v9982_v42, %v3704_v48  ;;  %v3137_v52 = vadd.f32 %v3103_v19, %v2723_v10 }
 0x34e   : > { %v3772_v60 = vmax.f32 %v3740_v53, 0.0  ;;  %v3423_v62 = vadd.f32 %v3389_v39, %v3137_v52  ;;  %v6053_v39 = vld [vmem:[%s11556_s5 + $0x90] sm:$0xf] }
 0x351   : > { %v3665_v27 = vpop.f32.mrf.mxu0 }
 0x352   : > { %v3705_v15 = vadd.f32 %v3665_v27, %v3419_v28  ;;  %v6546_v27 = vld [vmem:[%s11556_s5 + $0x34] sm:$0xf0] }
 0x353   : > { %v5990_v53 = vor.u32 %v6546_v27, %v5989_v59 }
 0x354   : > { %v3741_v32 = vadd.f32 %v9982_v42, %v3705_v15 }
 0x355   : > { %3865 = vmatmul.bf16.gmra.mxu1 %v5990_v53  ;;  %v6061_v53 = vld [vmem:[%s11556_s5 + $0xa0] sm:$0xf] }
 0x356   : > { %v3773_v47 = vmax.f32 %v3741_v32, 0.0  ;;  %v6013_v32 = vld [vmem:[%s11556_s5 + $0x50] sm:$0xf] }
 0x357   : > { %v6014_v5 = vor.u32 %v6550_v55, %v6013_v32  ;;  %v6562_v32 = vld [vmem:[%s11556_s5 + $0xb4] sm:$0xf0] }
 0x358   : > { %v10190_v37 = vpack.c.bf16 %v3773_v47, %v3772_v60  ;;  %v6539_v60 = vld [vmem:[%s11556_s5 + $0x4] sm:$0xf]  ;;  %v5967_v47 = vld [vmem:[%s11556_s5 + $0x8] sm:$0xf0] }
 0x359   : > { %v3668_v0 = vpop.f32.mrf.mxu0 }
 0x35a   : > { %v3706_v12 = vadd.f32 %v3668_v0, %v3420_v51  ;;  %v5970_v0 = vor.u32 %v6539_v60, %v5967_v47  ;;  %v6021_v51 = vld [vmem:[%s11556_s5 + $0x60] sm:$0xf]  ;;  %v6093_v47 = vld [vmem:[%s11556_s5 + $0xd0] sm:$0xf] }
 0x35b   : > { %v6022_v25 = vor.u32 %v6552_v44, %v6021_v51  ;;  %v6094_v46 = vor.u32 %v6566_v26, %v6093_v47  ;;  %v6563_v51 = vld [vmem:[%s11556_s5 + $0xc4] sm:$0xf]  ;;  %v6087_v44 = vld [vmem:[%s11556_s5 + $0xc8] sm:$0xf0] }
 0x35c   : > { %v3742_v7 = vadd.f32 %v9982_v42, %v3706_v12  ;;  %v6549_v12 = vld [vmem:[%s11556_s5 + $0x54] sm:$0xf] }
 0x35e   : > { %v3774_v17 = vmax.f32 %v3742_v7, 0.0 }
 0x361   : > { %v3670_v18 = vpop.f32.mrf.mxu0 }
 0x362   : > { %v3707_v50 = vadd.f32 %v3670_v18, %v3421_v38  ;;  %v6018_v38 = vor.u32 %v6549_v12, %v6015_v8  ;;  %v6029_v18 = vld [vmem:[%s11556_s5 + $0x70] sm:$0xf]  ;;  %v6101_v8 = vld [vmem:[%s11556_s5 + $0xe0] sm:$0xf] }
 0x364   : > { %v3743_v56 = vadd.f32 %v9982_v42, %v3707_v50  ;;  %v6551_v50 = vld [vmem:[%s11556_s5 + $0x64] sm:$0xf] }
 0x365   : > { %v6026_v41 = vor.u32 %v6551_v50, %v6023_v6  ;;  %v6565_v50 = vld [vmem:[%s11556_s5 + $0xd4] sm:$0xf]  ;;  %v6095_v6 = vld [vmem:[%s11556_s5 + $0xd8] sm:$0xf0] }
 0x366   : > { %v3775_v1 = vmax.f32 %v3743_v56, 0.0  ;;  %v6050_v56 = vor.u32 %v6555_v35, %v6047_v36 }
 0x368   : > { %v10202_v54 = vpack.c.bf16 %v3775_v1, %v3774_v17  ;;  %v6031_v17 = vld [vmem:[%s11556_s5 + $0x78] sm:$0xf0] }
 0x369   : > { %v3673_v34 = vpop.f32.mrf.mxu0  ;;  %v6034_v1 = vor.u32 %v6553_v29, %v6031_v17 }
 0x36a   : > { %v3708_v9 = vadd.f32 %v3673_v34, %v3422_v61  ;;  %v6559_v61 = vld [vmem:[%s11556_s5 + $0xa4] sm:$0xf] }
 0x36c   : > { %v3744_v22 = vadd.f32 %v9982_v42, %v3708_v9  ;;  %v6558_v9 = vld [vmem:[%s11556_s5 + $0x94] sm:$0xf0] }
 0x36e   : > { %v3776_v15 = vmax.f32 %v3744_v22, 0.0  ;;  %v6561_v22 = vld [vmem:[%s11556_s5 + $0xb4] sm:$0xf] }
 0x371   : > { %v3675_v48 = vpop.f32.mrf.mxu0 }
 0x372   : > { %v3709_v28 = vadd.f32 %v3675_v48, %v3423_v62  ;;  %v6054_v48 = vor.u32 %v6558_v9, %v6053_v39 }
 0x374   : > { %v3745_v13 = vadd.f32 %v9982_v42, %v3709_v28  ;;  %v6006_v42 = vor.u32 %v6548_v23, %v6005_v31  ;;  %v6071_v28 = vld [vmem:[%s11556_s5 + $0xb8] sm:$0xf0]  ;;  %v6564_v31 = vld [vmem:[%s11556_s5 + $0xc4] sm:$0xf0] }
 0x375   : > { %v6074_v59 = vor.u32 %v6561_v22, %v6071_v28  ;;  %v6111_v22 = vld [vmem:[%s11556_s5 + $0xf8] sm:$0xf0] }
 0x376   : > { %v3777_v33 = vmax.f32 %v3745_v13, 0.0  ;;  %3957 = vmatmul.bf16.vlgmr.msrb.gmra.mxu3 %v6006_v42  ;;  %v6560_v13 = vld [vmem:[%s11556_s5 + $0xa4] sm:$0xf0]  ;;  %v6069_v42 = vld [vmem:[%s11556_s5 + $0xb0] sm:$0xf] }
 0x377   : > { %v6070_v60 = vor.u32 %v6562_v32, %v6069_v42 }
 0x378   : > { %v10213_v21 = vpack.c.bf16 %v3777_v33, %v3776_v15  ;;  %v6062_v15 = vor.u32 %v6560_v13, %v6061_v53 }
 0x37a   : > { %3871 = vmatpush.bf16.msrb.mxu2 %v10213_v21  ;;  %3978 = vmatpush.bf16.msrb.mxu1 %v10213_v21 }
 0x37b   : > { %4093 = vmatpush.bf16.msra.mxu3 %v10213_v21 }
 0x37e   : > { %3872 = vmatpush.bf16.msrb.mxu2 %v10202_v54  ;;  %3979 = vmatpush.bf16.msrb.mxu1 %v10202_v54 }
 0x37f   : > { %4094 = vmatpush.bf16.msra.mxu3 %v10202_v54 }
 0x382   : > { %3873 = vmatpush.bf16.msrb.mxu2 %v10190_v37  ;;  %3980 = vmatpush.bf16.msrb.mxu1 %v10190_v37 }
 0x383   : > { %4095 = vmatpush.bf16.msra.mxu3 %v10190_v37 }
 0x386   : > { %3874 = vmatpush.bf16.msrb.mxu2 %v10178_v14  ;;  %3981 = vmatpush.bf16.msrb.mxu1 %v10178_v14 }
 0x387   : > { %4096 = vmatpush.bf16.msra.mxu3 %v10178_v14 }
 0x388   : > { %3962 = vmatmul.bf16.gmra.mxu3 %v6014_v5 }
 0x38a   : > { %3875 = vmatpush.bf16.msrb.mxu2 %v10165_v24  ;;  %3982 = vmatpush.bf16.msrb.mxu1 %v10165_v24 }
 0x38b   : > { %4097 = vmatpush.bf16.msra.mxu3 %v10165_v24 }
 0x38e   : > { %3876 = vmatpush.bf16.msrb.mxu2 %v10156_v16  ;;  %3983 = vmatpush.bf16.msrb.mxu1 %v10156_v16 }
 0x38f   : > { %4098 = vmatpush.bf16.msra.mxu3 %v10156_v16 }
 0x392   : > { %3877 = vmatpush.bf16.msrb.mxu2 %v10147_v63  ;;  %3984 = vmatpush.bf16.msrb.mxu1 %v10147_v63 }
 0x393   : > { %4099 = vmatpush.bf16.msra.mxu3 %v10147_v63 }
 0x396   : > { %3878 = vmatpush.bf16.msrb.mxu2 %v10130_v11  ;;  %3985 = vmatpush.bf16.msrb.mxu1 %v10130_v11 }
 0x397   : > { %4100 = vmatpush.bf16.msra.mxu3 %v10130_v11 }
 0x398   : > { %3967 = vmatmul.bf16.gmra.mxu3 %v6022_v25  ;;  %v3851_v30 = vpop.f32.mrf.mxu1 }
 0x399   : > { %3879 = vmatmul.bf16.vlgmr.msrb.gmra.mxu2 %v5970_v0  ;;  %3986 = vmatmul.bf16.vlgmr.msrb.gmra.mxu1 %v6010_v57 }
 0x39a   : > { %4064 = vmatpush.bf16.msra.mxu2 %v10113_v58  ;;  %4179 = vmatpush.bf16.msra.mxu1 %v10113_v58  ;;  %v6541_v58 = vld [vmem:[%s11556_s5 + $0x14] sm:$0xf] }
 0x39e   : > { %4065 = vmatpush.bf16.msra.mxu2 %v10103_v20  ;;  %4180 = vmatpush.bf16.msra.mxu1 %v10103_v20  ;;  %v5975_v20 = vld [vmem:[%s11556_s5 + $0x18] sm:$0xf0] }
 0x3a2   : > { %4066 = vmatpush.bf16.msra.mxu2 %v10082_v3  ;;  %4181 = vmatpush.bf16.msra.mxu1 %v10082_v3  ;;  %v5978_v3 = vor.u32 %v6541_v58, %v5975_v20  ;;  %v6090_v58 = vor.u32 %v6563_v51, %v6087_v44  ;;  %v6610_v44 = vld [vmem:[#allocation2 + $0x138] sm:$0xff] }
 0x3a3   : > { %5009 = vmatpush.bf16.msrb.mxu0 %v6610_v44 }
 0x3a6   : > { %4067 = vmatpush.bf16.msra.mxu2 %v10061_v45  ;;  %4182 = vmatpush.bf16.msra.mxu1 %v10061_v45  ;;  %v6554_v45 = vld [vmem:[%s11556_s5 + $0x74] sm:$0xf0] }
 0x3a7   : > { %v6030_v7 = vor.u32 %v6554_v45, %v6029_v18 }
 0x3a9   : > { %3884 = vmatmul.bf16.gmra.mxu2 %v5978_v3  ;;  %3991 = vmatmul.bf16.gmra.mxu1 %v6018_v38  ;;  %v6568_v3 = vld [vmem:[%s11556_s5 + $0xe4] sm:$0xf0] }
 0x3aa   : > { %4068 = vmatpush.bf16.msra.mxu2 %v10040_v4  ;;  %4183 = vmatpush.bf16.msra.mxu1 %v10040_v4  ;;  %v6543_v4 = vld [vmem:[%s11556_s5 + $0x24] sm:$0xf]  ;;  %v6102_v38 = vor.u32 %v6568_v3, %v6101_v8  ;;  %v6608_v8 = vld [vmem:[#allocation2 + $0x128] sm:$0xff] }
 0x3ab   : > { %3972 = vmatmul.bf16.gmra.mxu3 %v6030_v7  ;;  %v6607_v3 = vld [vmem:[#allocation2 + $0x120] sm:$0xff] }
 0x3ae   : > { %4069 = vmatpush.bf16.msra.mxu2 %v10025_v43  ;;  %4184 = vmatpush.bf16.msra.mxu1 %v10025_v43  ;;  %v5983_v43 = vld [vmem:[%s11556_s5 + $0x28] sm:$0xf0] }
 0x3b2   : > { %4070 = vmatpush.bf16.msra.mxu2 %v10010_v49  ;;  %4185 = vmatpush.bf16.msra.mxu1 %v10010_v49  ;;  %v5986_v49 = vor.u32 %v6543_v4, %v5983_v43 }
 0x3b6   : > { %4071 = vmatpush.bf16.msra.mxu2 %v9995_v40  ;;  %4186 = vmatpush.bf16.msra.mxu1 %v9995_v40  ;;  %v6545_v40 = vld [vmem:[%s11556_s5 + $0x34] sm:$0xf] }
 0x3b9   : > { %3889 = vmatmul.bf16.gmra.mxu2 %v5986_v49  ;;  %3996 = vmatmul.bf16.gmra.mxu1 %v6026_v41  ;;  %v6098_v41 = vor.u32 %v6565_v50, %v6095_v6  ;;  %v6606_v50 = vld [vmem:[#allocation2 + $0x118] sm:$0xff] }
 0x3ba   : > { %4208 = vmatpush.bf16.msrb.mxu2 %v10213_v21  ;;  %v6085_v21 = vld [vmem:[%s11556_s5 + $0xc0] sm:$0xf] }
 0x3bb   : > { %4101 = vmatmul.bf16.vlgmr.msra.gmra.mxu3 %v6050_v56  ;;  %v6086_v23 = vor.u32 %v6564_v31, %v6085_v21 }
 0x3be   : > { %4209 = vmatpush.bf16.msrb.mxu2 %v10202_v54  ;;  %v6055_v54 = vld [vmem:[%s11556_s5 + $0x98] sm:$0xf0] }
 0x3bf   : > { %v6058_v19 = vor.u32 %v6557_v2, %v6055_v54  ;;  %v6567_v54 = vld [vmem:[%s11556_s5 + $0xe4] sm:$0xf] }
 0x3c2   : > { %4210 = vmatpush.bf16.msrb.mxu2 %v10190_v37  ;;  %v5991_v37 = vld [vmem:[%s11556_s5 + $0x38] sm:$0xf0] }
 0x3c6   : > { %4211 = vmatpush.bf16.msrb.mxu2 %v10178_v14  ;;  %v5994_v14 = vor.u32 %v6545_v40, %v5991_v37  ;;  %v6109_v40 = vld [vmem:[%s11556_s5 + $0xf0] sm:$0xf]  ;;  %v6570_v37 = vld [vmem:[%s11556_s5 + $0xf4] sm:$0xf0] }
 0x3c7   : > { %v6110_v29 = vor.u32 %v6570_v37, %v6109_v40  ;;  %v6603_v40 = vld [vmem:[#allocation2 + $0x100] sm:$0xff] }
 0x3c9   : > { %3894 = vmatmul.bf16.gmra.mxu2 %v5994_v14  ;;  %4001 = vmatmul.bf16.gmra.mxu1 %v6034_v1 }
 0x3ca   : > { %4212 = vmatpush.bf16.msrb.mxu2 %v10165_v24  ;;  %v10347_v24 = vpop.f32.mrf.mxu1 }
 0x3cb   : > { %4106 = vmatmul.bf16.gmra.mxu3 %v6058_v19  ;;  %v6103_v19 = vld [vmem:[%s11556_s5 + $0xe8] sm:$0xf0] }
 0x3ce   : > { %4213 = vmatpush.bf16.msrb.mxu2 %v10156_v16  ;;  %v6045_v16 = vld [vmem:[%s11556_s5 + $0x80] sm:$0xf] }
 0x3d2   : > { %4214 = vmatpush.bf16.msrb.mxu2 %v10147_v63  ;;  %v6556_v63 = vld [vmem:[%s11556_s5 + $0x84] sm:$0xf0]  ;;  %v10355_v10 = vpop.f32.mrf.mxu1 }
 0x3d3   : > { %v6046_v34 = vor.u32 %v6556_v63, %v6045_v16  ;;  %v6106_v63 = vor.u32 %v6567_v54, %v6103_v19 }
 0x3d6   : > { %4215 = vmatpush.bf16.msrb.mxu2 %v10130_v11  ;;  %v6063_v11 = vld [vmem:[%s11556_s5 + $0xa8] sm:$0xf0] }
 0x3d7   : > { %v6066_v52 = vor.u32 %v6559_v61, %v6063_v11 }
 0x3d9   : > { %4072 = vmatmul.bf16.vlgmr.msra.gmra.mxu2 %v6046_v34  ;;  %4187 = vmatmul.bf16.vlgmr.msra.gmra.mxu1 %v6086_v23 }
 0x3da   : > { %v10369_v62 = vpop.f32.mrf.mxu1 }
 0x3db   : > { %4111 = vmatmul.bf16.gmra.mxu3 %v6066_v52 }
 0x3e2   : > { %v10377_v27 = vpop.f32.mrf.mxu1 }
 0x3e9   : > { %4077 = vmatmul.bf16.gmra.mxu2 %v6054_v48  ;;  %4192 = vmatmul.bf16.gmra.mxu1 %v6094_v46  ;;  %v6569_v48 = vld [vmem:[%s11556_s5 + $0xf4] sm:$0xf] }
 0x3ea   : > { %v10385_v33 = vpop.f32.mrf.mxu1 }
 0x3eb   : > { %4116 = vmatmul.bf16.gmra.mxu3 %v6074_v59  ;;  %v6114_v59 = vor.u32 %v6569_v48, %v6111_v22  ;;  %v6586_v48 = vld [vmem:[#allocation2 + $0x78] sm:$0xff] }
 0x3ec   : > { %4486 = vmatpush.bf16.msrb.mxu3 %v6586_v48  ;;  %v6642_v48 = vld [vmem:[#allocation2 + $0x238] sm:$0xff] }
 0x3f2   : > { %v10399_v55 = vpop.f32.mrf.mxu1 }
 0x3f9   : > { %4082 = vmatmul.bf16.gmra.mxu2 %v6062_v15  ;;  %v3958_v5 = vpop.f32.mrf.mxu3  ;;  %4197 = vmatmul.bf16.gmra.mxu1 %v6102_v38 }
 0x3fa   : > { %v10409_v57 = vpop.f32.mrf.mxu1 }
 0x401   : > { %v10407_v0 = vpop.f32.mrf.mxu3 }
 0x409   : > { %4087 = vmatmul.bf16.gmra.mxu2 %v6070_v60  ;;  %4202 = vmatmul.bf16.gmra.mxu1 %v6110_v29 }
 0x40b   : > { %v3963_v25 = vpop.f32.mrf.mxu3 }
 0x413   : > { %v10423_v7 = vpop.f32.mrf.mxu3 }
 0x416   : > { %v3987_v20 = vpop.f32.mrf.mxu1 }
 0x417   : > { %v3988_v12 = vadd.f32 %v3987_v20, %v3958_v5  ;;  %v6609_v20 = vld [vmem:[#allocation2 + $0x130] sm:$0xff] }
 0x418   : > { %5010 = vmatpush.bf16.msrb.mxu0 %v6609_v20  ;;  %v6592_v20 = vld [vmem:[#allocation2 + $0xa8] sm:$0xff] }
 0x419   : > { %4216 = vmatmul.bf16.vlgmr.msrb.gmra.mxu2 %v6090_v58 }
 0x41b   : > { %v3968_v56 = vpop.f32.mrf.mxu3 }
 0x41c   : > { %v3880_v18 = vpop.f32.mrf.mxu2  ;;  %5011 = vmatpush.bf16.msrb.mxu0 %v6608_v8  ;;  %v6583_v8 = vld [vmem:[#allocation2 + $0x60] sm:$0xff] }
 0x41d   : > { %v3881_v45 = vadd.f32 %v3880_v18, %v3851_v30 }
 0x41e   : > { %v10425_v4 = vpop.f32.mrf.mxu1 }
 0x41f   : > { %v4007_v43 = vmax.f32 %v3881_v45, %v3988_v12 }
 0x420   : > { %5012 = vmatpush.bf16.msrb.mxu0 %v6607_v3  ;;  %v6575_v3 = vld [vmem:[#allocation2 + $0x20] sm:$0xff] }
 0x423   : > { %v10444_v2 = vpop.f32.mrf.mxu3 }
 0x424   : > { %v10433_v49 = vpop.f32.mrf.mxu2  ;;  %5013 = vmatpush.bf16.msrb.mxu0 %v6606_v50  ;;  %v13235_v50 = vld [vmem:[#allocation17_spill] sm:$0xff] }
 0x426   : > { %v3992_v35 = vpop.f32.mrf.mxu1 }
 0x427   : > { %v3993_v36 = vadd.f32 %v3992_v35, %v3963_v25 }
 0x429   : > { %4221 = vmatmul.bf16.gmra.mxu2 %v6098_v41  ;;  %v6605_v41 = vld [vmem:[#allocation2 + $0x110] sm:$0xff] }
 0x42a   : > { %5014 = vmatpush.bf16.msrb.mxu0 %v6605_v41  ;;  %v10529_v41 = vshra.s32 %v13235_v50, 3 }
 0x42c   : > { %v3885_v17 = vpop.f32.mrf.mxu2  ;;  %vm4764_vm1 = vcmp.ge.s32.totalorder %v10529_v41, 0  ;;  %vm4772_vm15 = vcmp.lt.s32.totalorder %v10529_v41, 8 }
 0x42d   : > { %v3886_v14 = vadd.f32 %v3885_v17, %v10355_v10  ;;  %vm10575_vm13 = vmand %vm4764_vm1, %vm4772_vm15 }
 0x42e   : > { %v10442_v1 = vpop.f32.mrf.mxu1  ;;  %v3973_v10 = vpop.f32.mrf.mxu3 }
 0x42f   : > { %v4009_v30 = vmax.f32 %v3886_v14, %v3993_v36 }
 0x434   : > { %v10452_v16 = vpop.f32.mrf.mxu2 }
 0x436   : > { %v3997_v34 = vpop.f32.mrf.mxu1  ;;  %v10465_v53 = vpop.f32.mrf.mxu3 }
 0x437   : > { %v3998_v61 = vadd.f32 %v3997_v34, %v3968_v56  ;;  %v6604_v56 = vld [vmem:[#allocation2 + $0x108] sm:$0xff]  ;;  %v13228_v34 = vld [vmem:[#allocation5_spill] sm:$0xff] }
 0x438   : > { %5015 = vmatpush.bf16.msrb.mxu0 %v6604_v56  ;;  %vm13234_vm3 = vcmp.lt.s32.totalorder %v13228_v34, 1  ;;  %v6591_v56 = vld [vmem:[#allocation2 + $0xa0] sm:$0xff]  ;;  %vm13238_vm5 = vcmp.lt.s32.totalorder %v13228_v34, 7 }
 0x439   : > { %4226 = vmatmul.bf16.gmra.mxu2 %v6106_v63  ;;  %vm13239_vm14 = vmmov %vm13238_vm5 }
 0x43a   : > { %vm13240_vm10 = vmmov %vm13234_vm3 }
 0x43b   : > { %vm13248_vm15 = vmmov %vm13238_vm5 }
 0x43c   : > { %v3890_v11 = vpop.f32.mrf.mxu2  ;;  %5016 = vmatpush.bf16.msrb.mxu0 %v6603_v40 }
 0x43d   : > { %v3891_v52 = vadd.f32 %v3890_v11, %v10377_v27 }
 0x43e   : > { %v10455_v39 = vpop.f32.mrf.mxu1  ;;  %v4102_v23 = vpop.f32.mrf.mxu3 }
 0x43f   : > { %v4011_v9 = vmax.f32 %v3891_v52, %v3998_v61  ;;  %v10489_v61 = vshra.s32 %v13228_v34, 3  ;;  %v3883_v52 = vadd.f32 %v10433_v49, %v10347_v24 }
 0x440   : > { %5561 = vmatpush.bf16.msra.mxu0 %v6642_v48  ;;  %v6571_v48 = vld [vmem:[#allocation2] sm:$0xff] }
 0x441   : > { %vm4762_vm0 = vcmp.ge.s32.totalorder %v10489_v61, 0  ;;  %vm4770_vm2 = vcmp.lt.s32.totalorder %v10489_v61, 8 }
 0x442   : > { %vm10504_vm8 = vmand %vm4762_vm0, %vm4770_vm2 }
 0x444   : > { %v10463_v28 = vpop.f32.mrf.mxu2 }
 0x446   : > { %v4002_v13 = vpop.f32.mrf.mxu1  ;;  %v4104_v32 = vpop.f32.mrf.mxu3 }
 0x447   : > { %v4003_v15 = vadd.f32 %v4002_v13, %v3973_v10  ;;  %v13229_v10 = vld [vmem:[#allocation6_spill] sm:$0xff]  ;;  %v6578_v13 = vld [vmem:[#allocation2 + $0x38] sm:$0xff] }
 0x448   : > { %v10492_v11 = vshra.s32 %v13229_v10, 3  ;;  %4563 = vmatpush.bf16.msrb.mxu1 %v6578_v13 }
 0x449   : > { %4231 = vmatmul.bf16.gmra.mxu2 %v6114_v59 }
 0x44a   : > { %vm4763_vm11 = vcmp.ge.s32.totalorder %v10492_v11, 0  ;;  %vm4771_vm12 = vcmp.lt.s32.totalorder %v10492_v11, 8 }
 0x44b   : > { %vm10512_vm9 = vmand %vm4763_vm11, %vm4771_vm12 }
 0x44c   : > { %v3895_v27 = vpop.f32.mrf.mxu2  ;;  %vm6323_vm4 = vmpackc.low %vm10512_vm9, %vm10504_vm8 }
 0x44d   : > { %v3896_v21 = vadd.f32 %v3895_v27, %v10399_v55  ;;  %vm13245_vm11 = vmmov %vm13234_vm3 }
 0x44e   : > { %v4107_v26 = vpop.f32.mrf.mxu3  ;;  %v10482_v36 = vpop.f32.mrf.mxu1 }
 0x44f   : > { %v4013_v31 = vmax.f32 %v3896_v21, %v4003_v15  ;;  %v6594_v15 = vld [vmem:[#allocation2 + $0xb8] sm:$0xff]  ;;  %v6585_v21 = vld [vmem:[#allocation2 + $0x70] sm:$0xff] }
 0x450   : > { %4725 = vmatpush.bf16.msra.mxu2 %v6594_v15  ;;  %4487 = vmatpush.bf16.msrb.mxu3 %v6585_v21 }
 0x454   : > { %v10468_v42 = vpop.f32.mrf.mxu2 }
 0x456   : > { %v10470_v58 = vpop.f32.mrf.mxu3  ;;  %v4188_v17 = vpop.f32.mrf.mxu1 }
 0x45c   : > { %v4073_v5 = vpop.f32.mrf.mxu2 }
 0x45d   : > { %v4103_v60 = vadd.f32 %v4102_v23, %v4073_v5 }
 0x45e   : > { %v4112_v38 = vpop.f32.mrf.mxu3  ;;  %v4190_v19 = vpop.f32.mrf.mxu1 }
 0x45f   : > { %v4122_v47 = vmax.f32 %v4007_v43, %v4103_v60  ;;  %v13232_v60 = vmov 0 }
 0x460   : > { %v13233_v60 = vsel %vm10512_vm9, 4294967295, %v13232_v60  ;;  %vm13286_vm9 = vcmp.lt.s32.totalorder %v13228_v34, 7 }
 0x464   : > { %v4075_v46 = vpop.f32.mrf.mxu2 }
 0x465   : > { %v4105_v59 = vadd.f32 %v4104_v32, %v4075_v46  ;;  %v6584_v46 = vld [vmem:[#allocation2 + $0x68] sm:$0xff] }
 0x466   : > { %v10478_v6 = vpop.f32.mrf.mxu3  ;;  %v4193_v27 = vpop.f32.mrf.mxu1  ;;  %4488 = vmatpush.bf16.msrb.mxu3 %v6584_v46  ;;  %v13243_v46 = vmov 0 }
 0x46a   : > { %4489 = vmatpush.bf16.msrb.mxu3 %v6583_v8 }
 0x46c   : > { %v4078_v51 = vpop.f32.mrf.mxu2 }
 0x46d   : > { %v4108_v25 = vadd.f32 %v4107_v26, %v4078_v51 }
 0x46e   : > { %v4117_v37 = vpop.f32.mrf.mxu3 }
 0x46f   : > { %v10472_v12 = vmax.f32 %v4009_v30, %v4108_v25  ;;  %v6576_v25 = vld [vmem:[#allocation2 + $0x28] sm:$0xff] }
 0x474   : > { %v10474_v55 = vpop.f32.mrf.mxu2 }
 0x47c   : > { %v4083_v18 = vpop.f32.mrf.mxu2 }
 0x47d   : > { %v4113_v45 = vadd.f32 %v4112_v38, %v4083_v18 }
 0x47f   : > { %v10476_v43 = vmax.f32 %v4011_v9, %v4113_v45  ;;  %v3990_v9 = vadd.f32 %v10425_v4, %v10407_v0  ;;  %v6577_v0 = vld [vmem:[#allocation2 + $0x30] sm:$0xff]  ;;  %v4195_v45 = vpop.f32.mrf.mxu1 }
 0x480   : > { %v6593_v4 = vld [vmem:[#allocation2 + $0xb0] sm:$0xff]  ;;  %4564 = vmatpush.bf16.msrb.mxu1 %v6577_v0 }
 0x481   : > { %v4008_v24 = vmax.f32 %v3883_v52, %v3990_v9  ;;  %4726 = vmatpush.bf16.msra.mxu2 %v6593_v4  ;;  %v4110_v52 = vadd.f32 %v10470_v58, %v10474_v55  ;;  %v6582_v9 = vld [vmem:[#allocation2 + $0x58] sm:$0xff]  ;;  %v6581_v58 = vld [vmem:[#allocation2 + $0x50] sm:$0xff]  ;;  %v13241_v4 = vmov 0 }
 0x482   : > { %4490 = vmatpush.bf16.msrb.mxu3 %v6582_v9  ;;  %v6641_v55 = vld [vmem:[#allocation2 + $0x230] sm:$0xff]  ;;  %v13242_v4 = vsel %vm10575_vm13, 4294967295, %v13241_v4 }
 0x483   : > { %v4123_v32 = vmax.f32 %v4008_v24, %v4105_v59  ;;  %5562 = vmatpush.bf16.msra.mxu0 %v6641_v55  ;;  %v13247_v55 = vld [vmem:[#allocation27_spill] sm:$0xff] }
 0x484   : > { %v10480_v35 = vpop.f32.mrf.mxu2  ;;  %4565 = vmatpush.bf16.msrb.mxu1 %v6576_v25  ;;  %v6580_v25 = vld [vmem:[#allocation2 + $0x48] sm:$0xff] }
 0x485   : > { %4727 = vmatpush.bf16.msra.mxu2 %v6592_v20  ;;  %v6640_v20 = vld [vmem:[#allocation2 + $0x228] sm:$0xff] }
 0x486   : > { %4491 = vmatpush.bf16.msrb.mxu3 %v6581_v58  ;;  %v4000_v58 = vadd.f32 %v10455_v39, %v10444_v2  ;;  %v6637_v39 = vld [vmem:[#allocation2 + $0x210] sm:$0xff] }
 0x487   : > { %5563 = vmatpush.bf16.msra.mxu0 %v6640_v20 }
 0x488   : > { %4566 = vmatpush.bf16.msrb.mxu1 %v6575_v3 }
 0x489   : > { %4728 = vmatpush.bf16.msra.mxu2 %v6591_v56 }
 0x48a   : > { %4492 = vmatpush.bf16.msrb.mxu3 %v6580_v25 }
 0x48c   : > { %v4088_v29 = vpop.f32.mrf.mxu2 }
 0x48d   : > { %v4118_v14 = vadd.f32 %v4117_v37, %v4088_v29  ;;  %v13236_v37 = vld [vmem:[#allocation18_spill] sm:$0xff] }
 0x48e   : > { %v10532_v29 = vshra.s32 %v13236_v37, 3 }
 0x48f   : > { %v10484_v30 = vmax.f32 %v4013_v31, %v4118_v14  ;;  %v13230_v31 = vmov 0  ;;  %v3995_v14 = vadd.f32 %v10442_v1, %v10423_v7  ;;  %v6574_v1 = vld [vmem:[#allocation2 + $0x18] sm:$0xff] }
 0x490   : > { %v13231_v31 = vsel %vm10504_vm8, 4294967295, %v13230_v31  ;;  %vm4765_vm7 = vcmp.ge.s32.totalorder %v10532_v29, 0  ;;  %vm4773_vm6 = vcmp.lt.s32.totalorder %v10532_v29, 8  ;;  %4567 = vmatpush.bf16.msrb.mxu1 %v6574_v1  ;;  %v6587_v1 = vld [vmem:[#allocation2 + $0x80] sm:$0xff] }
 0x491   : > { %vm10587_vm0 = vmand %vm4765_vm7, %vm4773_vm6 }
 0x492   : > { %v13244_v46 = vsel %vm10587_vm0, 4294967295, %v13243_v46  ;;  %vm6326_vm2 = vmpackc.low %vm10587_vm0, %vm10575_vm13 }
 0x493   : > { %vm13251_vm6 = vmmov %vm13238_vm5 }
 0x494   : > { %v10486_v54 = vpop.f32.mrf.mxu2 }
 0x49c   : > { %v4217_v63 = vpop.f32.mrf.mxu2 }
 0x49d   : > { %v4218_v22 = vadd.f32 %v4217_v63, %v4188_v17  ;;  %v3888_v17 = vadd.f32 %v10452_v16, %v10369_v62 }
 0x49f   : > { %v10508_v23 = vmax.f32 %v4122_v47, %v4218_v22  ;;  %v4010_v59 = vmax.f32 %v3888_v17, %v3995_v14  ;;  %v6579_v17 = vld [vmem:[#allocation2 + $0x40] sm:$0xff] }
 0x4a0   : > { %v6639_v14 = vld [vmem:[#allocation2 + $0x220] sm:$0xff]  ;;  %4493 = vmatpush.bf16.msrb.mxu3 %v6579_v17  ;;  %v4278_v17 = vadd.s32 4294967295, %v10492_v11 }
 0x4a1   : > { %v11993_v47 = vrot.slane %v10508_v23, 7  ;;  %v11986_v62 = vrot.slane %v10508_v23, 1  ;;  %5564 = vmatpush.bf16.msra.mxu0 %v6639_v14 }
 0x4a4   : > { %v4219_v49 = vpop.f32.mrf.mxu2 }
 0x4a5   : > { %v4220_v5 = vadd.f32 %v4219_v49, %v4190_v19  ;;  %v6589_v49 = vld [vmem:[#allocation2 + $0x90] sm:$0xff] }
 0x4a7   : > { %v4238_v26 = vmax.f32 %v4123_v32, %v4220_v5  ;;  %v4125_v5 = vmax.f32 %v4010_v59, %v4110_v52  ;;  %v13246_v52 = vld [vmem:[#allocation26_spill] sm:$0xff]  ;;  %v6638_v59 = vld [vmem:[#allocation2 + $0x218] sm:$0xff] }
 0x4a8   : > { %v10601_v9 = vshra.s32 %v13246_v52, 3  ;;  %5565 = vmatpush.bf16.msra.mxu0 %v6638_v59 }
 0x4a9   : > { %v4262_v51 = vrot.slane %v4238_v26, 7  ;;  %v6324_v44 = vpack.c.bf16 %v4238_v26, %v10508_v23  ;;  %v4593_v19 = vrot.slane %v4238_v26, 1 }
 0x4aa   : > { %vm4766_vm12 = vcmp.ge.s32.totalorder %v10601_v9, 0 }
 0x4ab   : > { %6325 = vmatmul.msk.bf16.vlgmr.msrb.gmra.mxu0 %vm6323_vm4, %v6324_v44  ;;  %v10526_v38 = vsel %vm13234_vm3, %v11993_v47, %v4262_v51  ;;  %v10557_v13 = vsel %vm13238_vm5, %v11986_v62, %v4593_v19  ;;  %vm4774_vm4 = vcmp.lt.s32.totalorder %v10601_v9, 8  ;;  %vm13252_vm5 = vmmov %vm13240_vm10  ;;  %v4256_v47 = vand.u32 7, %v13236_v37 }
 0x4ac   : > { %v4222_v18 = vpop.f32.mrf.mxu2  ;;  %vm10630_vm7 = vmand %vm4766_vm12, %vm4774_vm4  ;;  %5566 = vmatpush.bf16.msra.mxu0 %v6637_v39  ;;  %vm4286_vm12 = vcmp.ge.s32.totalorder %v4278_v17, 0  ;;  %vm4294_vm4 = vcmp.lt.s32.totalorder %v4278_v17, 8 }
 0x4ad   : > { %v4223_v40 = vadd.f32 %v4222_v18, %v4193_v27  ;;  %v6573_v27 = vld [vmem:[#allocation2 + $0x10] sm:$0xff]  ;;  %v6572_v18 = vld [vmem:[#allocation2 + $0x8] sm:$0xff] }
 0x4ae   : > { %4568 = vmatpush.bf16.msrb.mxu1 %v6573_v27 }
 0x4af   : > { %v10539_v63 = vmax.f32 %v10472_v12, %v4223_v40  ;;  %v6590_v12 = vld [vmem:[#allocation2 + $0x98] sm:$0xff] }
 0x4b0   : > { %4729 = vmatpush.bf16.msra.mxu2 %v6590_v12  ;;  %v3893_v12 = vadd.f32 %v10463_v28, %v10385_v33 }
 0x4b1   : > { %v4263_v16 = vrot.slane %v10539_v63, 7  ;;  %v4594_v7 = vrot.slane %v10539_v63, 1  ;;  %v10549_v22 = vpack.c.bf16 %v10539_v63, %v4238_v26 }
 0x4b2   : > { %4569 = vmatpush.bf16.msrb.mxu1 %v6572_v18  ;;  %v4012_v2 = vmax.f32 %v3893_v12, %v4000_v58  ;;  %v13257_v58 = vld [vmem:[#allocation35_spill] sm:$0xff] }
 0x4b3   : > { %13237 = vst [vmem:[#allocation141_spill] sm:$0xff] %v10549_v22  ;;  %v10563_v15 = vsel %vm13239_vm14, %v4593_v19, %v4594_v7  ;;  %v10567_v21 = vsel %vm13240_vm10, %v4262_v51, %v4263_v16  ;;  %v4198_v51 = vpop.f32.mrf.mxu1  ;;  %v10667_v59 = vshra.s32 %v13257_v58, 3  ;;  %v6601_v18 = vld [vmem:[#allocation2 + $0xf0] sm:$0xff] }
 0x4b4   : > { %v4224_v0 = vpop.f32.mrf.mxu2  ;;  %v10581_v32 = vpack.c.bf16 %v10567_v21, %v10526_v38  ;;  %4730 = vmatpush.bf16.msra.mxu2 %v6589_v49  ;;  %v4115_v49 = vadd.f32 %v10478_v6, %v10480_v35 }
 0x4b5   : > { %v4225_v26 = vadd.f32 %v4224_v0, %v4195_v45  ;;  %v6588_v45 = vld [vmem:[#allocation2 + $0x88] sm:$0xff] }
 0x4b6   : > { %4570 = vmatpush.bf16.msrb.mxu1 %v6571_v48  ;;  %v4127_v6 = vmax.f32 %v4012_v2, %v4115_v49  ;;  %v13256_v48 = vld [vmem:[#allocation34_spill] sm:$0xff]  ;;  %v4254_v49 = vand.u32 7, %v13229_v10  ;;  %v4005_v2 = vadd.f32 %v10482_v36, %v10465_v53  ;;  %v4119_v10 = vpop.f32.mrf.mxu3 }
 0x4b7   : > { %v4240_v44 = vmax.f32 %v4125_v5, %v4225_v26 }
 0x4b8   : > { %4731 = vmatpush.bf16.msra.mxu2 %v6588_v45  ;;  %v6636_v45 = vld [vmem:[#allocation2 + $0x208] sm:$0xff]  ;;  %v10689_v36 = vadd.s32 4294967295, %v4254_v49  ;;  %v10713_v17 = vadd.s32 1, %v4254_v49 }
 0x4b9   : > { %v4264_v8 = vrot.slane %v4240_v44, 7  ;;  %v6327_v3 = vpack.c.bf16 %v4240_v44, %v10539_v63  ;;  %v4595_v0 = vrot.slane %v4240_v44, 1  ;;  %5567 = vmatpush.bf16.msra.mxu0 %v6636_v45 }
 0x4bb   : > { %6328 = vmatmul.msk.bf16.gmra.mxu0 %vm6326_vm2, %v6327_v3  ;;  %v10598_v56 = vsel %vm13245_vm11, %v4263_v16, %v4264_v8  ;;  %v10608_v16 = vshra.s32 %v13247_v55, 3  ;;  %v4200_v5 = vpop.f32.mrf.mxu1 }
 0x4bc   : > { %v4227_v40 = vpop.f32.mrf.mxu2  ;;  %4732 = vmatpush.bf16.msra.mxu2 %v6587_v1  ;;  %v10664_v1 = vshra.s32 %v13256_v48, 3 }
 0x4bd   : > { %v4228_v19 = vadd.f32 %v4227_v40, %v4198_v51  ;;  %vm4767_vm3 = vcmp.ge.s32.totalorder %v10608_v16, 0  ;;  %vm4775_vm1 = vcmp.lt.s32.totalorder %v10608_v16, 8  ;;  %v13249_v51 = vmov 0 }
 0x4be   : > { %v13250_v51 = vsel %vm10630_vm7, 4294967295, %v13249_v51  ;;  %vm10644_vm14 = vmand %vm4767_vm3, %vm4775_vm1  ;;  %vm4768_vm1 = vcmp.ge.s32.totalorder %v10664_v1, 0  ;;  %v4282_v45 = vadd.s32 4294967295, %v10608_v16 }
 0x4bf   : > { %v10611_v27 = vmax.f32 %v10476_v43, %v4228_v19  ;;  %v10628_v43 = vsel %vm13248_vm15, %v4594_v7, %v4595_v0  ;;  %v13254_v7 = vmov 0  ;;  %vm6329_vm10 = vmpackc.low %vm10644_vm14, %vm10630_vm7  ;;  %vm4776_vm15 = vcmp.lt.s32.totalorder %v10664_v1, 8 }
 0x4c0   : > { %v13255_v7 = vsel %vm10644_vm14, 4294967295, %v13254_v7  ;;  %vm13258_vm3 = vmmov %vm13252_vm5  ;;  %vm13281_vm14 = vcmp.lt.s32.totalorder %v13228_v34, 1 }
 0x4c1   : > { %v4265_v26 = vrot.slane %v10611_v27, 7  ;;  %v4596_v33 = vrot.slane %v10611_v27, 1  ;;  %v10622_v28 = vpack.c.bf16 %v10611_v27, %v4240_v44  ;;  %vm13284_vm13 = vmmov %vm13281_vm14 }
 0x4c3   : > { %v10638_v25 = vsel %vm13251_vm6, %v4595_v0, %v4596_v33  ;;  %v10642_v44 = vsel %vm13252_vm5, %v4264_v8, %v4265_v26  ;;  %v4277_v8 = vadd.s32 4294967295, %v10489_v61  ;;  %v4203_v12 = vpop.f32.mrf.mxu1  ;;  %v4253_v0 = vand.u32 7, %v13228_v34 }
 0x4c4   : > { %v4229_v35 = vpop.f32.mrf.mxu2  ;;  %13253 = vst [vmem:[#allocation151_spill] sm:$0xff] %v10642_v44  ;;  %v10650_v20 = vpack.c.bf16 %v10642_v44, %v10598_v56  ;;  %vm4769_vm5 = vcmp.ge.s32.totalorder %v10667_v59, 0 }
 0x4c5   : > { %v4230_v63 = vadd.f32 %v4229_v35, %v4200_v5  ;;  %v6635_v5 = vld [vmem:[#allocation2 + $0x200] sm:$0xff]  ;;  %vm4285_vm2 = vcmp.ge.s32.totalorder %v4277_v8, 0  ;;  %vm4293_vm11 = vcmp.lt.s32.totalorder %v4277_v8, 8  ;;  %v3898_v35 = vadd.f32 %v10468_v42, %v10409_v57 }
 0x4c6   : > { %vm10681_vm6 = vmand %vm4285_vm2, %vm4293_vm11  ;;  %v10687_v53 = vadd.s32 4294967295, %v4253_v0  ;;  %5568 = vmatpush.bf16.msra.mxu0 %v6635_v5  ;;  %v13264_v8 = vmov 0 }
 0x4c7   : > { %v4242_v40 = vmax.f32 %v4127_v6, %v4230_v63  ;;  %vm10700_vm2 = vmand %vm4768_vm1, %vm4776_vm15  ;;  %vm13268_vm15 = vcmp.lt.s32.totalorder %v13228_v34, 7 }
 0x4c8   : > { %v13265_v8 = vsel %vm10700_vm2, 4294967295, %v13264_v8 }
 0x4c9   : > { %v4266_v14 = vrot.slane %v4242_v40, 7  ;;  %v6330_v19 = vpack.c.bf16 %v4242_v40, %v10611_v27  ;;  %v4597_v57 = vrot.slane %v4242_v40, 1  ;;  %v4279_v27 = vadd.s32 4294967295, %v10529_v41 }
 0x4cb   : > { %6331 = vmatmul.msk.bf16.gmra.mxu0 %vm6329_vm10, %v6330_v19  ;;  %v10675_v6 = vsel %vm13258_vm3, %v4265_v26, %v4266_v14  ;;  %vm4777_vm10 = vcmp.lt.s32.totalorder %v10667_v59, 8  ;;  %vm10696_vm3 = vmand %vm4286_vm12, %vm4294_vm4  ;;  %v10704_v19 = vadd.s32 1, %v4253_v0  ;;  %vm11981_vm12 = vcmp.ge.s32.totalorder %v10687_v53, 0  ;;  %v6598_v26 = vld [vmem:[#allocation2 + $0xd8] sm:$0xff] }
 0x4cc   : > { %v4232_v39 = vpop.f32.mrf.mxu2  ;;  %13259 = vst [vmem:[#allocation142_spill] sm:$0xff] %v10675_v6  ;;  %vm10709_vm11 = vmand %vm4769_vm5, %vm4777_vm10  ;;  %vm11982_vm4 = vcmp.ge.s32.totalorder %v10689_v36, 0  ;;  %vm13270_vm10 = vcmp.lt.s32.totalorder %v13228_v34, 1  ;;  %vm4295_vm7 = vcmp.lt.s32.totalorder %v4279_v27, 8 }
 0x4cd   : > { %v4233_v63 = vadd.f32 %v4232_v39, %v4203_v12  ;;  %v4120_v39 = vadd.f32 %v4119_v10, %v10486_v54  ;;  %v10728_v54 = vsel %vm13268_vm15, %v4596_v33, %v4597_v57  ;;  %vm13269_vm5 = vmmov %vm13268_vm15  ;;  %vm11988_vm1 = vcmp.lt.s32.totalorder %v10704_v19, 8 }
 0x4ce   : > { %vm10767_vm15 = vmand %vm10696_vm3, %vm11982_vm4 }
 0x4cf   : > { %v10692_v42 = vmax.f32 %v10484_v30, %v4233_v63  ;;  %v13266_v30 = vmov 0  ;;  %v4014_v63 = vmax.f32 %v3898_v35, %v4005_v2  ;;  %v4205_v35 = vpop.f32.mrf.mxu1 }
 0x4d0   : > { %v13267_v30 = vsel %vm10709_vm11, 4294967295, %v13266_v30 }
 0x4d1   : > { %v4267_v12 = vrot.slane %v10692_v42, 7  ;;  %v11985_v5 = vrot.slane %v10692_v42, 1  ;;  %v10718_v0 = vpack.c.bf16 %v10692_v42, %v4242_v40 }
 0x4d3   : > { %v10734_v49 = vsel %vm13269_vm5, %v4597_v57, %v11985_v5  ;;  %v10738_v40 = vsel %vm13270_vm10, %v4266_v14, %v4267_v12  ;;  %v4129_v57 = vmax.f32 %v4014_v63, %v4120_v39  ;;  %vm10758_vm5 = vmand %vm10681_vm6, %vm11981_vm12  ;;  %vm11987_vm10 = vcmp.lt.s32.totalorder %v10713_v17, 8 }
 0x4d4   : > { %13271 = vst [vmem:[#allocation154_spill] sm:$0xff] %v10738_v40  ;;  %v4234_v10 = vpop.f32.mrf.mxu2  ;;  %v10750_v33 = vpack.c.bf16 %v10738_v40, %v10675_v6  ;;  %v4280_v39 = vadd.s32 4294967295, %v10532_v29  ;;  %vm10776_vm12 = vmand %vm10681_vm6, %vm11988_vm1  ;;  %v10862_v14 = vadd.s32 4294967295, %v4256_v47  ;;  %v6239_v40 = vpack.c.bf16 %v10628_v43, %v10563_v15 }
 0x4d5   : > { %v4235_v2 = vadd.f32 %v4234_v10, %v4205_v35  ;;  %v5176_v10 = vadd.s32 1, %v10489_v61  ;;  %vm10785_vm4 = vmand %vm10696_vm3, %vm11987_vm10  ;;  %v6618_v35 = vld [vmem:[#allocation2 + $0x178] sm:$0xff] }
 0x4d6   : > { %vm6191_vm10 = vmpackc.low %vm10767_vm15, %vm10758_vm5  ;;  %vm4296_vm0 = vcmp.lt.s32.totalorder %v4280_v39, 8  ;;  %5139 = vmatpush.bf16.msra.mxu1 %v6618_v35 }
 0x4d7   : > { %v4244_v63 = vmax.f32 %v4129_v57, %v4235_v2  ;;  %v5177_v2 = vadd.s32 1, %v10492_v11  ;;  %v4255_v57 = vand.u32 7, %v13235_v50  ;;  %v13283_v50 = vrot.slane %v10508_v23, 7  ;;  %vm13288_vm1 = vmpackc.low %vm10696_vm3, %vm10681_vm6 }
 0x4d8   : > { %vm5192_vm6 = vcmp.lt.s32.totalorder %v5176_v10, 8  ;;  %vm13291_vm3 = vcmp.ge.s32.totalorder %v4279_v27, 0 }
 0x4d9   : > { %v4268_v24 = vrot.slane %v4244_v63, 7  ;;  %v10792_v5 = vpack.c.bf16 %v10508_v23, %v4244_v63  ;;  %v4599_v62 = vrot.slane %v4244_v63, 1  ;;  %v6333_v61 = vpack.c.bf16 %v4244_v63, %v10692_v42 }
 0x4da   : > { %v13285_v63 = vrot.slane %v10508_v23, 1  ;;  %v6602_v23 = vld [vmem:[#allocation2 + $0xf8] sm:$0xff]  ;;  %v10869_v3 = vadd.s32 1, %v4255_v57 }
 0x4db   : > { %13280 = vst [vmem:[#allocation91_spill] sm:$0xff] %v10792_v5  ;;  %v10802_v11 = vsel %vm13281_vm14, %v4267_v12, %v4268_v24  ;;  %v10808_v44 = vsel %vm13284_vm13, %v4268_v24, %v13283_v50  ;;  %6149 = vmatmul.msk.bf16.vlgmr.msrb.gmra.mxu3 %vm13288_vm1, %v10792_v5  ;;  %vm13289_vm14 = vmpackc.low %vm10709_vm11, %vm10700_vm2  ;;  %v10847_v12 = vadd.s32 4294967295, %v4255_v57  ;;  %v13299_v50 = vmov 0  ;;  %v6599_v5 = vld [vmem:[#allocation2 + $0xe0] sm:$0xff] }
 0x4dc   : > { %13282 = vst [vmem:[#allocation120_spill] sm:$0xff] %v10802_v11  ;;  %v10814_v6 = vsel %vm13286_vm9, %v4599_v62, %v13285_v63  ;;  %6334 = vmatmul.msk.bf16.gmra.mxu0 %vm13289_vm14, %v6333_v61  ;;  %vm6235_vm13 = vmpackc.low %vm10785_vm4, %vm10776_vm12  ;;  %vm5184_vm9 = vcmp.ge.s32.totalorder %v5176_v10, 0  ;;  %v10833_v37 = vpack.c.bf16 %v10808_v44, %v10802_v11  ;;  %vm5185_vm12 = vcmp.ge.s32.totalorder %v5177_v2, 0  ;;  %4879 = vmatpush.bf16.msra.mxu3 %v6602_v23  ;;  %v6617_v63 = vld [vmem:[#allocation2 + $0x170] sm:$0xff]  ;;  %v6600_v10 = vld [vmem:[#allocation2 + $0xe8] sm:$0xff] }
 0x4dd   : > { %13287 = vst [vmem:[#allocation119_spill] sm:$0xff] %v10814_v6  ;;  %v10837_v24 = vpack.c.bf16 %v10557_v13, %v10814_v6  ;;  %vm10843_vm1 = vmand %vm13291_vm3, %vm4295_vm7  ;;  %vm5193_vm4 = vcmp.lt.s32.totalorder %v5177_v2, 8  ;;  %vm13294_vm14 = vcmp.ge.s32.totalorder %v4280_v39, 0  ;;  %v6626_v2 = vld [vmem:[#allocation2 + $0x1b8] sm:$0xff]  ;;  %v13297_v61 = vmov 0  ;;  %v6625_v23 = vld [vmem:[#allocation2 + $0x1b0] sm:$0xff]  ;;  %5140 = vmatpush.bf16.msra.mxu1 %v6617_v63 }
 0x4de   : > { %13290 = vst [vmem:[#allocation125_spill] sm:$0xff] %v10833_v37  ;;  %6193 = vmatmul.msk.bf16.vlgmr.msrb.gmra.mxu1 %vm6191_vm10, %v10833_v37  ;;  %vm10858_vm7 = vmand %vm13294_vm14, %vm4296_vm0  ;;  %v10875_v39 = vadd.s32 1, %v4256_v47  ;;  %5301 = vmatpush.bf16.msrb.mxu2 %v6626_v2  ;;  %vm12001_vm5 = vcmp.ge.s32.totalorder %v10847_v12, 0  ;;  %vm13301_vm10 = vcmp.lt.s32.totalorder %v10704_v19, 8  ;;  %v13304_v57 = vrot.slane %v10692_v42, 1  ;;  %v6624_v2 = vld [vmem:[#allocation2 + $0x1a8] sm:$0xff] }
 0x4df   : > { %6237 = vmatmul.msk.bf16.vlgmr.msra.gmra.mxu2 %vm6235_vm13, %v10837_v24  ;;  %vm10865_vm3 = vmand %vm5184_vm9, %vm5192_vm6  ;;  %vm12002_vm9 = vcmp.ge.s32.totalorder %v10862_v14, 0  ;;  %vm13305_vm6 = vcmp.lt.s32.totalorder %v13228_v34, 7  ;;  %vm12005_vm14 = vcmp.lt.s32.totalorder %v10869_v3, 8  ;;  %v13309_v34 = vmov 0  ;;  %v6621_v63 = vld [vmem:[#allocation2 + $0x190] sm:$0xff] }
 0x4e0   : > { %v13298_v61 = vsel %vm10865_vm3, 4294967295, %v13297_v61  ;;  %vm10871_vm15 = vmand %vm5185_vm12, %vm5193_vm4  ;;  %4880 = vmatpush.bf16.msra.mxu3 %v6601_v18  ;;  %v10895_v35 = vsel %vm13305_vm6, %v13304_v57, %v4599_v62  ;;  %vm13306_vm12 = vcmp.lt.s32.totalorder %v10713_v17, 8  ;;  %vm12009_vm6 = vcmp.lt.s32.totalorder %v10875_v39, 8  ;;  %v6616_v57 = vld [vmem:[#allocation2 + $0x168] sm:$0xff] }
 0x4e1   : > { %v13300_v50 = vsel %vm10871_vm15, 4294967295, %v13299_v50  ;;  %vm10886_vm13 = vmand %vm10865_vm3, %vm13301_vm10  ;;  %v4281_v62 = vadd.s32 4294967295, %v10601_v9  ;;  %v13311_v42 = vmov 0  ;;  %v4257_v6 = vand.u32 7, %v13246_v52  ;;  %5141 = vmatpush.bf16.msra.mxu1 %v6616_v57  ;;  %v6622_v57 = vld [vmem:[#allocation2 + $0x198] sm:$0xff] }
 0x4e2   : > { %vm10903_vm4 = vmand %vm10871_vm15, %vm13306_vm12  ;;  %5302 = vmatpush.bf16.msrb.mxu2 %v6625_v23  ;;  %v5178_v23 = vadd.s32 1, %v10529_v41  ;;  %v4258_v41 = vand.u32 7, %v13247_v55  ;;  %vm4290_vm2 = vcmp.ge.s32.totalorder %v4282_v45, 0  ;;  %vm4298_vm15 = vcmp.lt.s32.totalorder %v4282_v45, 8  ;;  %v6615_v55 = vld [vmem:[#allocation2 + $0x160] sm:$0xff] }
 0x4e3   : > { %vm10914_vm10 = vmand %vm10843_vm1, %vm12001_vm5  ;;  %vm4297_vm11 = vcmp.lt.s32.totalorder %v4281_v62, 8  ;;  %vm13318_vm8 = vcmp.ge.s32.totalorder %v4281_v62, 0  ;;  %v10974_v52 = vadd.s32 4294967295, %v4257_v6  ;;  %v13323_v47 = vmov 0  ;;  %v6614_v62 = vld [vmem:[#allocation2 + $0x158] sm:$0xff]  ;;  %v6619_v45 = vld [vmem:[#allocation2 + $0x180] sm:$0xff] }
 0x4e4   : > { %v13310_v34 = vsel %vm10914_vm10, 4294967295, %v13309_v34  ;;  %vm10924_vm12 = vmand %vm10858_vm7, %vm12002_vm9  ;;  %4881 = vmatpush.bf16.msra.mxu3 %v6600_v10  ;;  %v5179_v10 = vadd.s32 1, %v10532_v29  ;;  %vm5194_vm0 = vcmp.lt.s32.totalorder %v5178_v23, 8  ;;  %v10980_v27 = vadd.s32 4294967295, %v4258_v41 }
 0x4e5   : > { %v13312_v42 = vsel %vm10924_vm12, 4294967295, %v13311_v42  ;;  %vm10933_vm5 = vmand %vm10843_vm1, %vm12005_vm14  ;;  %5142 = vmatpush.bf16.msra.mxu1 %v6615_v55  ;;  %v13329_v18 = vmov 0  ;;  %v13335_v37 = vmov 0  ;;  %v5181_v55 = vadd.s32 1, %v10608_v16 }
 0x4e6   : > { %vm10942_vm9 = vmand %vm10858_vm7, %vm12009_vm6  ;;  %5303 = vmatpush.bf16.msrb.mxu2 %v6624_v2  ;;  %vm5187_vm10 = vcmp.ge.s32.totalorder %v5179_v10, 0  ;;  %vm5195_vm12 = vcmp.lt.s32.totalorder %v5179_v10, 8  ;;  %v10986_v2 = vadd.s32 1, %v4257_v6  ;;  %v11003_v6 = vadd.s32 1, %v4258_v41 }
 0x4e7   : > { %vm6499_vm14 = vmpackc.low %vm10903_vm4, %vm10886_vm13  ;;  %vm5186_vm4 = vcmp.ge.s32.totalorder %v5178_v23, 0  ;;  %v13337_v23 = vmov 0  ;;  %v5180_v10 = vadd.s32 1, %v10601_v9  ;;  %v13341_v9 = vmov 0 }
 0x4e8   : > { %4882 = vmatpush.bf16.msra.mxu3 %v6599_v5  ;;  %vm13317_vm3 = vmpackc.low %vm10858_vm7, %vm10843_vm1  ;;  %v6623_v5 = vld [vmem:[#allocation2 + $0x1a0] sm:$0xff]  ;;  %v13343_v16 = vmov 0  ;;  %v13346_v11 = vmov 0  ;;  %v13474_v29 = vpack.c.bf16 %v10734_v49, %v10728_v54 }
 0x4e9   : > { %vm10970_vm6 = vmand %vm13318_vm8, %vm4297_vm11  ;;  %vm13325_vm8 = vnez %v13312_v42  ;;  %vm13326_vm11 = vnez %v13310_v34  ;;  %v6597_v42 = vld [vmem:[#allocation2 + $0xd0] sm:$0xff]  ;;  %5143 = vmatpush.bf16.msra.mxu1 %v6614_v62  ;;  %v4283_v62 = vadd.s32 4294967295, %v10664_v1 }
 0x4ea   : > { %vm10976_vm13 = vmand %vm4290_vm2, %vm4298_vm15  ;;  %5304 = vmatpush.bf16.msrb.mxu2 %v6623_v5  ;;  %vm12021_vm15 = vcmp.ge.s32.totalorder %v10974_v52, 0  ;;  %v6613_v34 = vld [vmem:[#allocation2 + $0x150] sm:$0xff]  ;;  %v4259_v5 = vand.u32 7, %v13256_v48  ;;  %v4284_v48 = vadd.s32 4294967295, %v10667_v59 }
 0x4eb   : > { %6152 = vmatmul.msk.bf16.gmra.mxu3 %vm13317_vm3, %v10549_v22  ;;  %vm10982_vm1 = vmand %vm5186_vm4, %vm5194_vm0  ;;  %vm12024_vm4 = vcmp.lt.s32.totalorder %v10986_v2, 8  ;;  %v4260_v22 = vand.u32 7, %v13257_v58  ;;  %vm5197_vm0 = vcmp.lt.s32.totalorder %v5181_v55, 8  ;;  %v6242_v58 = vpack.c.bf16 %v10728_v54, %v10638_v25 }
 0x4ec   : > { %6501 = vmatmul.msk.bf16.vlgmr.msra.gmra.mxu0 %vm6499_vm14, %v6239_v40  ;;  %v13324_v47 = vsel %vm10982_vm1, 4294967295, %v13323_v47  ;;  %vm13327_vm2 = vmpackc.low %vm13325_vm8, %vm13326_vm11  ;;  %4883 = vmatpush.bf16.msra.mxu3 %v6598_v26  ;;  %vm12020_vm14 = vcmp.ge.s32.totalorder %v10980_v27, 0  ;;  %vm12023_vm11 = vcmp.lt.s32.totalorder %v11003_v6, 8  ;;  %v6596_v26 = vld [vmem:[#allocation2 + $0xc8] sm:$0xff] }
 0x4ed   : > { %vm13328_vm7 = vmpackc.low %vm10942_vm9, %vm10933_vm5  ;;  %vm13331_vm5 = vcmp.lt.s32.totalorder %v10869_v3, 8  ;;  %5144 = vmatpush.bf16.msra.mxu1 %v6613_v34  ;;  %v11075_v34 = vadd.s32 4294967295, %v4259_v5  ;;  %v4615_v41 = vadd.s32 1, %v4260_v22 }
 0x4ee   : > { %6196 = vmatmul.msk.bf16.gmra.mxu1 %vm13327_vm2, %v10581_v32  ;;  %vm10999_vm3 = vmand %vm5187_vm10, %vm5195_vm12  ;;  %vm13334_vm10 = vcmp.lt.s32.totalorder %v10875_v39, 8  ;;  %5305 = vmatpush.bf16.msrb.mxu2 %v6622_v57  ;;  %v6612_v57 = vld [vmem:[#allocation2 + $0x148] sm:$0xff] }
 0x4ef   : > { %6240 = vmatmul.msk.bf16.gmra.mxu2 %vm13328_vm7, %v6239_v40  ;;  %v13330_v18 = vsel %vm10999_vm3, 4294967295, %v13329_v18  ;;  %vm11014_vm9 = vmand %vm10982_vm1, %vm13331_vm5  ;;  %v13332_v40 = vmov 0  ;;  %vm4292_vm1 = vcmp.ge.s32.totalorder %v4284_v48, 0 }
 0x4f0   : > { %v13333_v40 = vsel %vm11014_vm9, 4294967295, %v13332_v40  ;;  %vm11023_vm12 = vmand %vm10999_vm3, %vm13334_vm10  ;;  %4884 = vmatpush.bf16.msra.mxu3 %v6597_v42  ;;  %v6620_v42 = vld [vmem:[#allocation2 + $0x188] sm:$0xff]  ;;  %vm4291_vm10 = vcmp.ge.s32.totalorder %v4283_v62, 0  ;;  %vm4300_vm9 = vcmp.lt.s32.totalorder %v4284_v48, 8  ;;  %v6611_v48 = vld [vmem:[#allocation2 + $0x140] sm:$0xff] }
 0x4f1   : > { %v13336_v37 = vsel %vm11023_vm12, 4294967295, %v13335_v37  ;;  %vm11032_vm8 = vmand %vm10970_vm6, %vm12021_vm15  ;;  %vm5196_vm15 = vcmp.lt.s32.totalorder %v5180_v10, 8  ;;  %vm13345_vm12 = vcmp.ge.s32.totalorder %v5180_v10, 0  ;;  %5145 = vmatpush.bf16.msra.mxu1 %v6612_v57  ;;  %v13354_v10 = vmov 0 }
 0x4f2   : > { %v13338_v23 = vsel %vm11032_vm8, 4294967295, %v13337_v23  ;;  %vm11042_vm2 = vmand %vm10976_vm13, %vm12020_vm14  ;;  %5306 = vmatpush.bf16.msrb.mxu2 %v6621_v63  ;;  %vm4299_vm14 = vcmp.lt.s32.totalorder %v4283_v62, 8  ;;  %v6595_v63 = vld [vmem:[#allocation2 + $0xc0] sm:$0xff]  ;;  %v11110_v62 = vadd.s32 1, %v4259_v5  ;;  %v6245_v57 = vpack.c.bf16 %v10895_v35, %v10734_v49  ;;  %v13486_v49 = vld [vmem:[#allocation119_spill] sm:$0xff] }
 0x4f3   : > { %vm11052_vm7 = vmand %vm10970_vm6, %vm12024_vm4  ;;  %vm5189_vm4 = vcmp.ge.s32.totalorder %v5181_v55, 0  ;;  %v13348_v55 = vmov 0 }
 0x4f4   : > { %v13342_v9 = vsel %vm11052_vm7, 4294967295, %v13341_v9  ;;  %vm11061_vm5 = vmand %vm10976_vm13, %vm12023_vm11  ;;  %4885 = vmatpush.bf16.msra.mxu3 %v6596_v26  ;;  %v11092_v26 = vadd.s32 4294967295, %v4260_v22 }
 0x4f5   : > { %v13344_v16 = vsel %vm11061_vm5, 4294967295, %v13343_v16  ;;  %vm11084_vm11 = vmand %vm13345_vm12, %vm5196_vm15  ;;  %vm13351_vm15 = vnez %v13336_v37  ;;  %vm13352_vm12 = vnez %v13333_v40  ;;  %5146 = vmatpush.bf16.msra.mxu1 %v6611_v48  ;;  %v13428_v48 = vmov 0 }
 0x4f6   : > { %v13347_v11 = vsel %vm11084_vm11, 4294967295, %v13346_v11  ;;  %5307 = vmatpush.bf16.msrb.mxu2 %v6620_v42  ;;  %vm11088_vm8 = vmand %vm5189_vm4, %vm5197_vm0  ;;  %vm12035_vm0 = vcmp.ge.s32.totalorder %v11075_v34, 0  ;;  %v5182_v42 = vadd.s32 1, %v10664_v1 }
 0x4f7   : > { %v13349_v55 = vsel %vm11088_vm8, 4294967295, %v13348_v55  ;;  %vm13350_vm3 = vmpackc.low %vm10976_vm13, %vm10970_vm6  ;;  %vm13358_vm6 = vcmp.lt.s32.totalorder %v10986_v2, 8 }
 0x4f8   : > { %vm13353_vm7 = vmpackc.low %vm13351_vm15, %vm13352_vm12  ;;  %4886 = vmatpush.bf16.msra.mxu3 %v6595_v63  ;;  %vm12040_vm12 = vcmp.ge.s32.totalorder %v11092_v26, 0  ;;  %v5183_v63 = vadd.s32 1, %v10667_v59  ;;  %v13403_v59 = vmov 0 }
 0x4f9   : > { %vm11105_vm5 = vmand %vm4291_vm10, %vm4299_vm14  ;;  %vm13367_vm10 = vnez %v13342_v9  ;;  %v13377_v9 = vmov 0 }
 0x4fa   : > { %v13355_v10 = vsel %vm11105_vm5, 4294967295, %v13354_v10  ;;  %vm11112_vm4 = vmand %vm4292_vm1, %vm4300_vm9  ;;  %5308 = vmatpush.bf16.msrb.mxu2 %v6619_v45  ;;  %vm13364_vm1 = vnez %v13338_v23  ;;  %v13373_v23 = vmov 0 }
 0x4fb   : > { %6155 = vmatmul.msk.bf16.gmra.mxu3 %vm13350_vm3, %v10622_v28  ;;  %vm11120_vm13 = vmand %vm11084_vm11, %vm13358_vm6  ;;  %vm13361_vm3 = vcmp.lt.s32.totalorder %v11003_v6, 8  ;;  %vm13383_vm11 = vcmp.ge.s32.totalorder %v10687_v53, 0 }
 0x4fc   : > { %6504 = vmatmul.msk.bf16.gmra.mxu0 %vm13353_vm7, %v6242_v58  ;;  %vm11128_vm14 = vmand %vm11088_vm8, %vm13361_vm3  ;;  %vm13366_vm7 = vnez %v13344_v16  ;;  %vm12041_vm3 = vcmp.lt.s32.totalorder %v11110_v62, 8  ;;  %vm12043_vm8 = vcmp.lt.s32.totalorder %v4615_v41, 8  ;;  %v13389_v16 = vmov 0 }
 0x4fd   : > { %vm13365_vm9 = vmpackc.low %vm11042_vm2, %vm13364_vm1  ;;  %vm13371_vm2 = vcmp.lt.s32.totalorder %v10704_v19, 8  ;;  %vm13372_vm1 = vnez %v13231_v31 }
 0x4fe   : > { %6199 = vmatmul.msk.bf16.gmra.mxu1 %vm13365_vm9, %v10650_v20  ;;  %vm13368_vm15 = vmpackc.low %vm13366_vm7, %vm13367_vm10  ;;  %vm13375_vm10 = vcmp.lt.s32.totalorder %v10713_v17, 8  ;;  %v13385_v17 = vmov 0 }
 0x4ff   : > { %6243 = vmatmul.msk.bf16.gmra.mxu2 %vm13368_vm15, %v6242_v58  ;;  %vm11148_vm6 = vmand %vm11105_vm5, %vm12035_vm0  ;;  %vm13376_vm15 = vnez %v13233_v60  ;;  %v13395_v58 = vmov 0 }
 0x500   : > { %vm11157_vm9 = vmand %vm13372_vm1, %vm13371_vm2  ;;  %vm13387_vm1 = vcmp.ge.s32.totalorder %v10689_v36, 0 }
 0x501   : > { %v13374_v23 = vsel %vm11157_vm9, 4294967295, %v13373_v23  ;;  %vm11169_vm0 = vmand %vm13376_vm15, %vm13375_vm10  ;;  %vm13410_vm9 = vnez %v13330_v18 }
 0x502   : > { %v13378_v9 = vsel %vm11169_vm0, 4294967295, %v13377_v9  ;;  %vm11177_vm2 = vmand %vm11112_vm4, %vm12040_vm12  ;;  %vm13384_vm12 = vnez %v13298_v61  ;;  %vm13420_vm0 = vcmp.lt.s32.totalorder %v4615_v41, 8 }
 0x503   : > { %vm11185_vm7 = vmand %vm11105_vm5, %vm12041_vm3  ;;  %vm13388_vm3 = vnez %v13300_v50 }
 0x504   : > { %vm11197_vm15 = vmand %vm13384_vm12, %vm13383_vm11 }
 0x505   : > { %v13386_v17 = vsel %vm11197_vm15, 4294967295, %v13385_v17  ;;  %vm11205_vm5 = vmand %vm13388_vm3, %vm13387_vm1 }
 0x506   : > { %v13390_v16 = vsel %vm11205_vm5, 4294967295, %v13389_v16  ;;  %vm4647_vm11 = vmand %vm11112_vm4, %vm12043_vm8  ;;  %vm13391_vm8 = vnez %v13355_v10  ;;  %vm13409_vm5 = vcmp.ge.s32.totalorder %v10862_v14, 0  ;;  %v13421_v10 = vpack.c.bf16 %v10526_v38, %v10808_v44 }
 0x507   : > { %vm6505_vm12 = vmpackc.low %vm11128_vm14, %vm11120_vm13  ;;  %vm13393_vm13 = vcmp.lt.s32.totalorder %v10869_v3, 8  ;;  %vm13394_vm14 = vnez %v13242_v4  ;;  %v13413_v3 = vmov 0  ;;  %v13430_v38 = vpack.c.bf16 %v10563_v15, %v10557_v13  ;;  %v6633_v15 = vld [vmem:[#allocation2 + $0x1f0] sm:$0xff] }
 0x508   : > { %vm6200_vm1 = vmpackc.low %vm11177_vm2, %vm11148_vm6  ;;  %vm13398_vm2 = vnez %v13231_v31  ;;  %v13439_v44 = vmov 0  ;;  %v13443_v13 = vmov 0 }
 0x509   : > { %vm6244_vm10 = vmpackc.low %vm4647_vm11, %vm11185_vm7  ;;  %vm13397_vm7 = vcmp.ge.s32.totalorder %v10687_v53, 0 }
 0x50a   : > { %vm13392_vm3 = vmpackc.low %vm11112_vm4, %vm13391_vm8  ;;  %vm13401_vm8 = vcmp.lt.s32.totalorder %v10875_v39, 8  ;;  %vm13402_vm4 = vnez %v13244_v46  ;;  %v13415_v39 = vmov 0 }
 0x50b   : > { %6158 = vmatmul.msk.bf16.gmra.mxu3 %vm13392_vm3, %v10718_v0  ;;  %vm11240_vm6 = vmand %vm13394_vm14, %vm13393_vm13  ;;  %vm5190_vm13 = vcmp.ge.s32.totalorder %v5182_v42, 0  ;;  %vm13406_vm14 = vnez %v13324_v47 }
 0x50c   : > { %6507 = vmatmul.msk.bf16.gmra.mxu0 %vm6505_vm12, %v6245_v57  ;;  %v13396_v58 = vsel %vm11240_vm6, 4294967295, %v13395_v58  ;;  %vm11248_vm11 = vmand %vm13398_vm2, %vm13397_vm7  ;;  %vm5198_vm7 = vcmp.lt.s32.totalorder %v5182_v42, 8  ;;  %vm13405_vm2 = vcmp.ge.s32.totalorder %v10847_v12, 0  ;;  %vm13419_vm6 = vcmp.lt.s32.totalorder %v11110_v62, 8 }
 0x50d   : > { %vm11256_vm12 = vmand %vm13402_vm4, %vm13401_vm8  ;;  %vm5191_vm8 = vcmp.ge.s32.totalorder %v5183_v63, 0  ;;  %vm5199_vm4 = vcmp.lt.s32.totalorder %v5183_v63, 8 }
 0x50e   : > { %v13404_v59 = vsel %vm11256_vm12, 4294967295, %v13403_v59  ;;  %6202 = vmatmul.msk.bf16.gmra.mxu1 %vm6200_vm1, %v10750_v33  ;;  %vm11269_vm15 = vmand %vm13406_vm14, %vm13405_vm2  ;;  %vm13417_vm14 = vcmp.ge.s32.totalorder %v10689_v36, 0  ;;  %v13424_v36 = vmov 0 }
 0x50f   : > { %6246 = vmatmul.msk.bf16.gmra.mxu2 %vm6244_vm10, %v6245_v57  ;;  %vm11277_vm3 = vmand %vm13410_vm9, %vm13409_vm5  ;;  %vm13418_vm5 = vnez %v13233_v60  ;;  %v6634_v60 = vld [vmem:[#allocation2 + $0x1f8] sm:$0xff]  ;;  %vm13437_vm10 = vcmp.ge.s32.totalorder %v10974_v52, 0 }
 0x510   : > { %vm11285_vm1 = vmand %vm5190_vm13, %vm5198_vm7  ;;  %5431 = vmatpush.bf16.msrb.mxu3 %v6634_v60  ;;  %v13501_v60 = vld [vmem:[#allocation91_spill] sm:$0xff] }
 0x511   : > { %v13414_v3 = vsel %vm11285_vm1, 4294967295, %v13413_v3  ;;  %vm11289_vm2 = vmand %vm5191_vm8, %vm5199_vm4  ;;  %vm13423_vm8 = vnez %v13250_v51  ;;  %v13483_v51 = vld [vmem:[#allocation120_spill] sm:$0xff] }
 0x512   : > { %v13416_v39 = vsel %vm11289_vm2, 4294967295, %v13415_v39  ;;  %vm4787_vm9 = vmand %vm13418_vm5, %vm13417_vm14  ;;  %vm13422_vm14 = vcmp.lt.s32.totalorder %v10986_v2, 8  ;;  %vm13431_vm5 = vnez %v13378_v9  ;;  %v13449_v2 = vpack.c.bf16 %v10598_v56, %v10567_v21 }
 0x513   : > { %vm5482_vm12 = vmand %vm11285_vm1, %vm13419_vm6  ;;  %v13458_v21 = vpack.c.bf16 %v10638_v25, %v10628_v43  ;;  %v6629_v25 = vld [vmem:[#allocation2 + $0x1d0] sm:$0xff] }
 0x514   : > { %vm5483_vm13 = vmand %vm11289_vm2, %vm13420_vm0  ;;  %vm13426_vm0 = vcmp.lt.s32.totalorder %v11003_v6, 8  ;;  %5432 = vmatpush.bf16.msrb.mxu3 %v6633_v15  ;;  %v6630_v6 = vld [vmem:[#allocation2 + $0x1d8] sm:$0xff] }
 0x515   : > { %vm6279_vm4 = vmpackc.low %vm4787_vm9, %vm11248_vm11  ;;  %vm13427_vm9 = vnez %v13255_v7  ;;  %v13484_v7 = vld [vmem:[#allocation154_spill] sm:$0xff] }
 0x516   : > { %vm6508_vm7 = vmpackc.low %vm5483_vm13, %vm5482_vm12  ;;  %vm13432_vm13 = vnez %v13374_v23  ;;  %vm13438_vm12 = vnez %v13347_v11  ;;  %v13485_v54 = vpack.c.bf16 %v13483_v51, %v13484_v7 }
 0x517   : > { %vm11314_vm6 = vmand %vm13423_vm8, %vm13422_vm14  ;;  %vm13435_vm14 = vnez %v13386_v17 }
 0x518   : > { %v13425_v36 = vsel %vm11314_vm6, 4294967295, %v13424_v36  ;;  %vm11322_vm11 = vmand %vm13427_vm9, %vm13426_vm0 }
 0x519   : > { %v13429_v48 = vsel %vm11322_vm11, 4294967295, %v13428_v48  ;;  %vm11348_vm6 = vmand %vm13438_vm12, %vm13437_vm10  ;;  %vm13441_vm11 = vcmp.ge.s32.totalorder %v10980_v27, 0  ;;  %vm13445_vm10 = vcmp.ge.s32.totalorder %v10847_v12, 0  ;;  %v6627_v12 = vld [vmem:[#allocation2 + $0x1c0] sm:$0xff] }
 0x51a   : > { %v13440_v44 = vsel %vm11348_vm6, 4294967295, %v13439_v44  ;;  %vm13451_vm6 = vnez %v13265_v8  ;;  %v13490_v8 = vld [vmem:[#allocation125_spill] sm:$0xff] }
 0x51b   : > { %6281 = vmatmul.msk.bf16.vlgmr.msra.gmra.mxu3 %vm6279_vm4, %v13421_v10  ;;  %vm13433_vm4 = vmpackc.low %vm13431_vm5, %vm13432_vm13  ;;  %vm13442_vm5 = vnez %v13349_v55 }
 0x51c   : > { %6510 = vmatmul.msk.bf16.gmra.mxu0 %vm6508_vm7, %v10837_v24  ;;  %vm13434_vm7 = vnez %v13390_v16  ;;  %vm11356_vm13 = vmand %vm13442_vm5, %vm13441_vm11  ;;  %vm13448_vm11 = vnez %v13244_v46  ;;  %v6631_v24 = vld [vmem:[#allocation2 + $0x1e0] sm:$0xff] }
 0x51d   : > { %vm13436_vm0 = vmpackc.low %vm13434_vm7, %vm13435_vm14  ;;  %v13444_v13 = vsel %vm11356_vm13, 4294967295, %v13443_v13  ;;  %vm13446_vm7 = vnez %v13242_v4  ;;  %v13452_v4 = vmov 0 }
 0x51e   : > { %6369 = vmatmul.msk.bf16.vlgmr.msra.gmra.mxu1 %vm13433_vm4, %v13430_v38  ;;  %vm4788_vm14 = vmand %vm13446_vm7, %vm13445_vm10  ;;  %vm13450_vm4 = vcmp.lt.s32.totalorder %v11110_v62, 8  ;;  %vm13454_vm10 = vcmp.lt.s32.totalorder %v4615_v41, 8  ;;  %vm13455_vm7 = vnez %v13267_v30  ;;  %v13472_v62 = vld [vmem:[#allocation151_spill] sm:$0xff] }
 0x51f   : > { %6413 = vmatmul.msk.bf16.vlgmr.msrb.gmra.mxu2 %vm13436_vm0, %v10581_v32  ;;  %v6632_v32 = vld [vmem:[#allocation2 + $0x1e8] sm:$0xff]  ;;  %vm13447_vm0 = vcmp.ge.s32.totalorder %v10862_v14, 0  ;;  %vm11379_vm13 = vmand %vm13451_vm6, %vm13450_vm4  ;;  %vm13460_vm4 = vnez %v13396_v58 }
 0x520   : > { %vm4789_vm5 = vmand %vm13448_vm11, %vm13447_vm0  ;;  %5433 = vmatpush.bf16.msrb.mxu3 %v6632_v32  ;;  %v13453_v4 = vsel %vm11379_vm13, 4294967295, %v13452_v4  ;;  %vm13466_vm13 = vcmp.ge.s32.totalorder %v11092_v26, 0  ;;  %v13471_v14 = vld [vmem:[#allocation142_spill] sm:$0xff] }
 0x521   : > { %vm6282_vm12 = vmpackc.low %vm4789_vm5, %vm4788_vm14  ;;  %vm13459_vm5 = vnez %v13404_v59  ;;  %v13473_v45 = vpack.c.bf16 %v13471_v14, %v13472_v62 }
 0x522   : > { %vm11386_vm0 = vmand %vm13455_vm7, %vm13454_vm10  ;;  %vm13463_vm10 = vcmp.ge.s32.totalorder %v11075_v34, 0 }
 0x523   : > { %vm13461_vm14 = vmpackc.low %vm13459_vm5, %vm13460_vm4 }
 0x524   : > { %5434 = vmatpush.bf16.msrb.mxu3 %v6631_v24  ;;  %vm13462_vm11 = vmpackc.low %vm11277_vm3, %vm11269_vm15  ;;  %vm13469_vm3 = vcmp.ge.s32.totalorder %v10974_v52, 0  ;;  %vm13482_vm15 = vcmp.ge.s32.totalorder %v11092_v26, 0  ;;  %v13487_v52 = vpack.c.bf16 %v13486_v49, %v10895_v35 }
 0x525   : > { %vm11420_vm5 = vmand %vm11289_vm2, %vm13466_vm13 }
 0x526   : > { %vm4790_vm4 = vmand %vm13423_vm8, %vm13469_vm3  ;;  %vm13476_vm8 = vnez %v13425_v36 }
 0x527   : > { %vm4793_vm2 = vmand %vm13455_vm7, %vm13482_vm15  ;;  %vm13497_vm15 = vnez %v13347_v11 }
 0x528   : > { %5435 = vmatpush.bf16.msrb.mxu3 %v6630_v6  ;;  %v5018_v1 = vpop.f32.mrf.mxu0 }
 0x52b   : > { %6284 = vmatmul.msk.bf16.gmra.mxu3 %vm6282_vm12, %v13449_v2  ;;  %vm11412_vm12 = vmand %vm11285_vm1, %vm13463_vm10  ;;  %vm13475_vm10 = vnez %v13429_v48 }
 0x52c   : > { %5436 = vmatpush.bf16.msrb.mxu3 %v6629_v25  ;;  %vm13477_vm3 = vmpackc.low %vm13475_vm10, %vm13476_vm8  ;;  %vm13488_vm10 = vnez %v13453_v4 }
 0x52d   : > { %vm13489_vm8 = vmpackc.low %vm11386_vm0, %vm13488_vm10  ;;  %vm13495_vm0 = vnez %v13324_v47 }
 0x52e   : > { %6372 = vmatmul.msk.bf16.gmra.mxu1 %vm13461_vm14, %v13458_v21  ;;  %vm13470_vm14 = vcmp.ge.s32.totalorder %v10980_v27, 0 }
 0x52f   : > { %6416 = vmatmul.msk.bf16.gmra.mxu2 %vm13462_vm11, %v10650_v20  ;;  %v6628_v20 = vld [vmem:[#allocation2 + $0x1c8] sm:$0xff]  ;;  %vm4791_vm13 = vmand %vm13427_vm9, %vm13470_vm14  ;;  %vm13478_vm9 = vnez %v13444_v13 }
 0x530   : > { %5437 = vmatpush.bf16.msrb.mxu3 %v6628_v20  ;;  %vm6285_vm11 = vmpackc.low %vm4791_vm13, %vm4790_vm4  ;;  %vm13479_vm4 = vnez %v13440_v44  ;;  %vm13481_vm13 = vcmp.ge.s32.totalorder %v11075_v34, 0  ;;  %v5020_v36 = vpop.f32.mrf.mxu0 }
 0x531   : > { %vm13480_vm14 = vmpackc.low %vm13478_vm9, %vm13479_vm4  ;;  %vm13499_vm4 = vnez %v13414_v3 }
 0x534   : > { %5438 = vmatpush.bf16.msrb.mxu3 %v6627_v12 }
 0x538   : > { %v5023_v15 = vpop.f32.mrf.mxu0 }
 0x53b   : > { %6287 = vmatmul.msk.bf16.gmra.mxu3 %vm6285_vm11, %v13473_v45  ;;  %vm4792_vm11 = vmand %vm13451_vm6, %vm13481_vm13 }
 0x53c   : > { %vm6288_vm1 = vmpackc.low %vm4793_vm2, %vm4792_vm11  ;;  %vm13492_vm2 = vnez %v13298_v61  ;;  %vm5629_vm11 = vcmask 523264  }
 0x53d   : > { %vm13491_vm6 = vmpackc.low %vm11420_vm5, %vm11412_vm12  ;;  %vm13496_vm12 = vnez %v13330_v18 }
 0x53e   : > { %6375 = vmatmul.msk.bf16.gmra.mxu1 %vm13477_vm3, %v13474_v29  ;;  %vm6458_vm5 = vmpackc.low %vm13496_vm12, %vm13495_vm0  ;;  %vm13498_vm3 = vnez %v13349_v55 }
 0x53f   : > { %6419 = vmatmul.msk.bf16.gmra.mxu2 %vm13480_vm14, %v10750_v33  ;;  %v13494_v33 = vld [vmem:[#allocation141_spill] sm:$0xff]  ;;  %vm6461_vm9 = vmpackc.low %vm13498_vm3, %vm13497_vm15  ;;  %vm13500_vm14 = vnez %v13416_v39 }
 0x540   : > { %vm6464_vm13 = vmpackc.low %vm13500_vm14, %vm13499_vm4  ;;  %v5025_v6 = vpop.f32.mrf.mxu0 }
 0x548   : > { %v5028_v12 = vpop.f32.mrf.mxu0 }
 0x54b   : > { %6290 = vmatmul.msk.bf16.gmra.mxu3 %vm6288_vm1, %v13485_v54  ;;  %vm13493_vm1 = vnez %v13300_v50 }
 0x54c   : > { %vm6455_vm7 = vmpackc.low %vm13493_vm1, %vm13492_vm2 }
 0x54e   : > { %6378 = vmatmul.msk.bf16.gmra.mxu1 %vm13489_vm8, %v13487_v52 }
 0x54f   : > { %6422 = vmatmul.msk.bf16.gmra.mxu2 %vm13491_vm6, %v13490_v8 }
 0x550   : > { %v5030_v45 = vpop.f32.mrf.mxu0 }
 0x559   : > { %v5033_v7 = vpop.f32.mrf.mxu0 }
 0x55b   : > { %v4572_v30 = vpop.f32.mrf.mxu1  ;;  %6457 = vmatmul.msk.bf16.vlgmr.msrb.gmra.mxu3 %vm6455_vm7, %v13494_v33 }
 0x55e   : > { %v4495_v35 = vpop.f32.mrf.mxu3 }
 0x55f   : > { %v4573_v27 = vadd.f32 %v4572_v30, %v4495_v35 }
 0x561   : > { %v11504_v30 = vpop.f32.mrf.mxu0 }
 0x562   : > { %v4734_v34 = vpop.f32.mrf.mxu2 }
 0x563   : > { %v4754_v26 = vadd.f32 %v4734_v34, %v4573_v27  ;;  %v4574_v40 = vpop.f32.mrf.mxu1 }
 0x566   : > { %v4497_v37 = vpop.f32.mrf.mxu3 }
 0x567   : > { %v4575_v5 = vadd.f32 %v4574_v40, %v4497_v37 }
 0x569   : > { %v5570_v34 = vpop.f32.mrf.mxu0 }
 0x56a   : > { %v4736_v23 = vpop.f32.mrf.mxu2 }
 0x56b   : > { %v4755_v61 = vadd.f32 %v4736_v23, %v4575_v5  ;;  %v4577_v41 = vpop.f32.mrf.mxu1  ;;  %6460 = vmatmul.msk.bf16.gmra.mxu3 %vm6458_vm5, %v10622_v28 }
 0x56e   : > { %v4500_v50 = vpop.f32.mrf.mxu3 }
 0x56f   : > { %v4578_v9 = vadd.f32 %v4577_v41, %v4500_v50 }
 0x571   : > { %v5572_v5 = vpop.f32.mrf.mxu0 }
 0x572   : > { %v4739_v19 = vpop.f32.mrf.mxu2 }
 0x573   : > { %v4756_v22 = vadd.f32 %v4739_v19, %v4578_v9  ;;  %v4579_v17 = vpop.f32.mrf.mxu1 }
 0x576   : > { %v4502_v16 = vpop.f32.mrf.mxu3 }
 0x577   : > { %v4580_v57 = vadd.f32 %v4579_v17, %v4502_v16  ;;  %v11511_v16 = vld [vmem:[%s11555_s4] ss:$0 sm:$0xff] }
 0x57a   : > { %v4741_v47 = vpop.f32.mrf.mxu2 }
 0x57b   : > { %v4757_v18 = vadd.f32 %v4741_v47, %v4580_v57  ;;  %v4582_v42 = vpop.f32.mrf.mxu1  ;;  %6463 = vmatmul.msk.bf16.gmra.mxu3 %vm6461_vm9, %v10718_v0  ;;  %v5575_v57 = vpop.f32.mrf.mxu0 }
 0x57e   : > { %v4505_v63 = vpop.f32.mrf.mxu3 }
 0x57f   : > { %v4583_v58 = vadd.f32 %v4582_v42, %v4505_v63 }
 0x582   : > { %v4744_v28 = vpop.f32.mrf.mxu2 }
 0x583   : > { %v4758_v59 = vadd.f32 %v4744_v28, %v4583_v58  ;;  %v4584_v31 = vpop.f32.mrf.mxu1 }
 0x586   : > { %v4507_v53 = vpop.f32.mrf.mxu3 }
 0x587   : > { %v4585_v10 = vadd.f32 %v4584_v31, %v4507_v53 }
 0x58a   : > { %v4746_v11 = vpop.f32.mrf.mxu2 }
 0x58b   : > { %v4759_v55 = vadd.f32 %v4746_v11, %v4585_v10  ;;  %6466 = vmatmul.msk.bf16.gmra.mxu3 %vm6464_vm13, %v13501_v60  ;;  %v4587_v48 = vpop.f32.mrf.mxu1 }
 0x58e   : > { %v4510_v0 = vpop.f32.mrf.mxu3 }
 0x58f   : > { %v4588_v38 = vadd.f32 %v4587_v48, %v4510_v0  ;;  %v5577_v48 = vpop.f32.mrf.mxu0 }
 0x592   : > { %v4749_v44 = vpop.f32.mrf.mxu2 }
 0x593   : > { %v4760_v13 = vadd.f32 %v4749_v44, %v4588_v38  ;;  %v11500_v24 = vpop.f32.mrf.mxu1 }
 0x596   : > { %v11498_v32 = vpop.f32.mrf.mxu3 }
 0x59a   : > { %v11502_v2 = vpop.f32.mrf.mxu2 }
 0x59b   : > { %v5148_v46 = vpop.f32.mrf.mxu1 }
 0x59e   : > { %v4888_v3 = vpop.f32.mrf.mxu3 }
 0x59f   : > { %v4908_v39 = vadd.f32 %v4888_v3, %v4754_v26 }
 0x5a1   : > { %v5038_v4 = vadd.f32 %v5018_v1, %v4908_v39 }
 0x5a2   : > { %v5310_v56 = vpop.f32.mrf.mxu2 }
 0x5a3   : > { %v5168_v21 = vadd.f32 %v5148_v46, %v5038_v4  ;;  %v5150_v26 = vpop.f32.mrf.mxu1 }
 0x5a5   : > { %v5330_v43 = vadd.f32 %v5310_v56, %v5168_v21 }
 0x5a6   : > { %v4890_v25 = vpop.f32.mrf.mxu3 }
 0x5a7   : > { %v4909_v20 = vadd.f32 %v4890_v25, %v4755_v61 }
 0x5a9   : > { %v5039_v23 = vadd.f32 %v5020_v36, %v4909_v20 }
 0x5aa   : > { %v5312_v37 = vpop.f32.mrf.mxu2 }
 0x5ab   : > { %v5153_v61 = vpop.f32.mrf.mxu1  ;;  %v5169_v9 = vadd.f32 %v5150_v26, %v5039_v23 }
 0x5ad   : > { %v5331_v17 = vadd.f32 %v5312_v37, %v5169_v9 }
 0x5ae   : > { %v4893_v14 = vpop.f32.mrf.mxu3 }
 0x5af   : > { %v4910_v62 = vadd.f32 %v4893_v14, %v4756_v22 }
 0x5b2   : > { %v5315_v22 = vpop.f32.mrf.mxu2 }
 0x5b3   : > { %v5155_v63 = vpop.f32.mrf.mxu1 }
 0x5b6   : > { %v4895_v29 = vpop.f32.mrf.mxu3 }
 0x5b7   : > { %v4911_v51 = vadd.f32 %v4895_v29, %v4757_v18  ;;  %v5040_v18 = vadd.f32 %v5023_v15, %v4910_v62 }
 0x5b9   : > { %v5170_v1 = vadd.f32 %v5153_v61, %v5040_v18  ;;  %v5041_v53 = vadd.f32 %v5025_v6, %v4911_v51  ;;  %v5580_v6 = vpop.f32.mrf.mxu0 }
 0x5ba   : > { %v5317_v31 = vpop.f32.mrf.mxu2 }
 0x5bb   : > { %v5332_v60 = vadd.f32 %v5315_v22, %v5170_v1  ;;  %v5171_v0 = vadd.f32 %v5155_v63, %v5041_v53  ;;  %v5158_v44 = vpop.f32.mrf.mxu1 }
 0x5be   : > { %v4898_v54 = vpop.f32.mrf.mxu3 }
 0x5bf   : > { %v4912_v49 = vadd.f32 %v4898_v54, %v4758_v59 }
 0x5c1   : > { %v5042_v4 = vadd.f32 %v5028_v12, %v4912_v49  ;;  %v4590_v12 = vadd.f32 %v11500_v24, %v11498_v32  ;;  %v5582_v49 = vpop.f32.mrf.mxu0 }
 0x5c2   : > { %v5320_v3 = vpop.f32.mrf.mxu2 }
 0x5c3   : > { %v5160_v20 = vpop.f32.mrf.mxu1  ;;  %v4761_v23 = vadd.f32 %v11502_v2, %v4590_v12 }
 0x5c6   : > { %v4900_v52 = vpop.f32.mrf.mxu3 }
 0x5c7   : > { %v4913_v8 = vadd.f32 %v4900_v52, %v4759_v55 }
 0x5c9   : > { %v5043_v14 = vadd.f32 %v5030_v45, %v4913_v8 }
 0x5ca   : > { %v5322_v52 = vpop.f32.mrf.mxu2 }
 0x5cb   : > { %v5163_v37 = vpop.f32.mrf.mxu1 }
 0x5ce   : > { %v4903_v33 = vpop.f32.mrf.mxu3 }
 0x5cf   : > { %v4914_v35 = vadd.f32 %v4903_v33, %v4760_v13  ;;  %v5333_v13 = vadd.f32 %v5317_v31, %v5171_v0  ;;  %v5173_v33 = vadd.f32 %v5160_v20, %v5043_v14  ;;  %v6646_v0 = vld [vmem:[%s11557_s6 + $0x18] sm:$0xff] }
 0x5d1   : > { %v11506_v27 = vadd.f32 %v5033_v7, %v4914_v35 }
 0x5d3   : > { %v5174_v9 = vadd.f32 %v5163_v37, %v11506_v27 }
 0x5d6   : > { %v4905_v40 = vpop.f32.mrf.mxu3 }
 0x5d7   : > { %v4915_v45 = vadd.f32 %v4905_v40, %v4761_v23 }
 0x5d9   : > { %v5045_v22 = vadd.f32 %v11504_v30, %v4915_v45 }
 0x5de   : > { %v5440_v41 = vpop.f32.mrf.mxu3 }
 0x5df   : > { %v5460_v50 = vadd.f32 %v5440_v41, %v5330_v43  ;;  %v5172_v43 = vadd.f32 %v5158_v44, %v5042_v4 }
 0x5e1   : > { %v5590_v19 = vadd.f32 %v5570_v34, %v5460_v50  ;;  %v5334_v7 = vadd.f32 %v5320_v3, %v5172_v43  ;;  %v5335_v34 = vadd.f32 %v5322_v52, %v5173_v33  ;;  %v5325_v50 = vpop.f32.mrf.mxu2 }
 0x5e3   : > { %v5602_v58 = vadd.f32 %v11511_v16, %v5590_v19 }
 0x5e5   : > { %v5610_v10 = vmax.f32 %v5602_v58, 0.0 }
 0x5e6   : > { %v5442_v47 = vpop.f32.mrf.mxu3 }
 0x5e7   : > { %v5461_v42 = vadd.f32 %v5442_v47, %v5331_v17  ;;  %v5585_v17 = vpop.f32.mrf.mxu0  ;;  %v5336_v47 = vadd.f32 %v5325_v50, %v5174_v9 }
 0x5e9   : > { %v5591_v28 = vadd.f32 %v5572_v5, %v5461_v42  ;;  %v5165_v42 = vpop.f32.mrf.mxu1  ;;  %v5327_v40 = vpop.f32.mrf.mxu2 }
 0x5ea   : > { %v5175_v2 = vadd.f32 %v5165_v42, %v5045_v22 }
 0x5eb   : > { %v5603_v59 = vadd.f32 %v11511_v16, %v5591_v28 }
 0x5ec   : > { %v5337_v58 = vadd.f32 %v5327_v40, %v5175_v2 }
 0x5ed   : > { %v5611_v11 = vmax.f32 %v5603_v59, 0.0 }
 0x5ee   : > { %v5445_v55 = vpop.f32.mrf.mxu3 }
 0x5ef   : > { %v11515_v36 = vpack.c.bf16 %v5611_v11, %v5610_v10  ;;  %v5462_v38 = vadd.f32 %v5445_v55, %v5332_v60  ;;  %v5587_v31 = vpop.f32.mrf.mxu0  ;;  %v6643_v60 = vld [vmem:[%s11557_s6] sm:$0xff] }
 0x5f1   : > { %v5592_v15 = vadd.f32 %v5575_v57, %v5462_v38 }
 0x5f3   : > { %v5604_v21 = vadd.f32 %v11511_v16, %v5592_v15 }
 0x5f5   : > { %v5612_v62 = vmax.f32 %v5604_v21, 0.0 }
 0x5f6   : > { %v5447_v39 = vpop.f32.mrf.mxu3 }
 0x5f7   : > { %v5463_v46 = vadd.f32 %v5447_v39, %v5333_v13 }
 0x5f9   : > { %v5593_v56 = vadd.f32 %v5577_v48, %v5463_v46  ;;  %v6645_v48 = vld [vmem:[%s11557_s6 + $0x10] sm:$0xff] }
 0x5fb   : > { %v5605_v25 = vadd.f32 %v11511_v16, %v5593_v56 }
 0x5fd   : > { %v5613_v29 = vmax.f32 %v5605_v25, 0.0 }
 0x5fe   : > { %v5450_v51 = vpop.f32.mrf.mxu3 }
 0x5ff   : > { %v5619_v54 = vpack.c.bf16 %v5613_v29, %v5612_v62  ;;  %v5464_v35 = vadd.f32 %v5450_v51, %v5334_v7 }
 0x601   : > { %v5594_v26 = vadd.f32 %v5580_v6, %v5464_v35 }
 0x603   : > { %v5606_v8 = vadd.f32 %v11511_v16, %v5594_v26 }
 0x605   : > { %v5614_v32 = vmax.f32 %v5606_v8, 0.0 }
 0x606   : > { %v5452_v5 = vpop.f32.mrf.mxu3 }
 0x607   : > { %v5465_v61 = vadd.f32 %v5452_v5, %v5335_v34 }
 0x609   : > { %v5595_v41 = vadd.f32 %v5582_v49, %v5465_v61 }
 0x60b   : > { %v5607_v19 = vadd.f32 %v11511_v16, %v5595_v41 }
 0x60d   : > { %v5615_v24 = vmax.f32 %v5607_v19, 0.0 }
 0x60e   : > { %v5455_v57 = vpop.f32.mrf.mxu3 }
 0x60f   : > { %v5620_v18 = vpack.c.bf16 %v5615_v24, %v5614_v32  ;;  %v5466_v63 = vadd.f32 %v5455_v57, %v5336_v47 }
 0x611   : > { %v5596_v28 = vadd.f32 %v5585_v17, %v5466_v63 }
 0x613   : > { %v5608_v27 = vadd.f32 %v11511_v16, %v5596_v28 }
 0x615   : > { %v5616_v10 = vmax.f32 %v5608_v27, 0.0 }
 0x616   : > { %v5457_v1 = vpop.f32.mrf.mxu3 }
 0x617   : > { %v5467_v59 = vadd.f32 %v5457_v1, %v5337_v58 }
 0x619   : > { %v5597_v53 = vadd.f32 %v5587_v31, %v5467_v59 }
 0x61b   : > { %v5609_v30 = vadd.f32 %v11511_v16, %v5597_v53  ;;  %v6644_v16 = vld [vmem:[%s11557_s6 + $0x8] sm:$0xff] }
 0x61d   : > { %v5617_v11 = vmax.f32 %v5609_v30, 0.0 }
 0x61f   : > { %v5621_v55 = vpack.c.bf16 %v5617_v11, %v5616_v10 }
 0x621   : > { %5637 = vmatpush.bf16.msrb.mxu1 %v5621_v55  ;;  %5662 = vmatpush.bf16.msra.mxu2 %v5621_v55 }
 0x622   : > { %5689 = vmatpush.bf16.msra.mxu3 %v5621_v55 }
 0x625   : > { %5638 = vmatpush.bf16.msrb.mxu1 %v5620_v18  ;;  %5663 = vmatpush.bf16.msra.mxu2 %v5620_v18 }
 0x626   : > { %5690 = vmatpush.bf16.msra.mxu3 %v5620_v18 }
 0x629   : > { %5639 = vmatpush.bf16.msrb.mxu1 %v5619_v54  ;;  %5664 = vmatpush.bf16.msra.mxu2 %v5619_v54 }
 0x62a   : > { %5691 = vmatpush.bf16.msra.mxu3 %v5619_v54 }
 0x62d   : > { %5640 = vmatpush.bf16.msrb.mxu1 %v11515_v36  ;;  %5665 = vmatpush.bf16.msra.mxu2 %v11515_v36 }
 0x62e   : > { %5692 = vmatpush.bf16.msra.mxu3 %v11515_v36 }
 0x630   : > { %6515 = vmatmul.msk.bf16.vlgmr.msrb.gmra.mxu1 %vm5629_vm11, %v6643_v60  ;;  %6522 = vmatmul.msk.bf16.vlgmr.msra.gmra.mxu2 %vm5629_vm11, %v6644_v16 }
 0x631   : > { %5716 = vmatpush.bf16.msra.mxu1 %v5621_v55  ;;  %6529 = vmatmul.msk.bf16.vlgmr.msra.gmra.mxu3 %vm5629_vm11, %v6645_v48 }
 0x635   : > { %5717 = vmatpush.bf16.msra.mxu1 %v5620_v18 }
 0x639   : > { %5718 = vmatpush.bf16.msra.mxu1 %v5619_v54 }
 0x63d   : > { %5719 = vmatpush.bf16.msra.mxu1 %v11515_v36 }
 0x640   : > { %6536 = vmatmul.msk.bf16.vlgmr.msra.gmra.mxu1 %vm5629_vm11, %v6646_v0 }
 0x6ad   : > { %v5642_v38 = vpop.f32.mrf.mxu1 }
 0x6b3   : > { %v5667_v44 = vpop.f32.mrf.mxu2 }
 0x6b4   : > { %v5694_v15 = vpop.f32.mrf.mxu3  ;;  %v5672_v4 = vmax.f32 %v5642_v38, %v5667_v44 }
 0x6b5   : > { %v5644_v13 = vpop.f32.mrf.mxu1 }
 0x6b6   : > { %v5699_v56 = vmax.f32 %v5672_v4, %v5694_v15 }
 0x6bb   : > { %v5669_v39 = vpop.f32.mrf.mxu2 }
 0x6bc   : > { %v5673_v46 = vmax.f32 %v5644_v13, %v5669_v39  ;;  %v5696_v21 = vpop.f32.mrf.mxu3 }
 0x6bd   : > { %v5721_v3 = vpop.f32.mrf.mxu1 }
 0x6be   : > { %v5700_v6 = vmax.f32 %v5673_v46, %v5696_v21  ;;  %v5726_v43 = vmax.f32 %v5699_v56, %v5721_v3 }
 0x6c5   : > { %v5723_v36 = vpop.f32.mrf.mxu1 }
 0x6c6   : > { %v5727_v25 = vmax.f32 %v5700_v6, %v5723_v36 }
 0x6c8   : > { %v6714_v20 = vpack.c.bf16 %v5727_v25, %v5726_v43 }
 0x6ca   : > { %6715 = vst [vmem:[%s297_s9] sm:$0xff] %v6714_v20  }
 0x6cb PF: > { %s18_s24 = sadd.s32 1, %s6796_s24  }
 0x6cc   : > { %p15_p8 = scmp.ge.s32.totalorder %s18_s24, 4  }
 0x6ce   :  { %17 = sbr.rel (!%p15_p8) target bundleno = 1 (0x1), region = 105 }
 0x6d3   :  { %5754 = vsyncpa [#allocation3], 1 }
 0x6d4   :  { %5756 = vsyncpa [#allocation3 + $0x1], 1 }

</bundles_post_ra>
